<compile_context>
chip_gen: v5e
topology: v5e:2x2
jax: 0.10.0
libtpu: 0.0.40
codegen_flags: <defaults>
</compile_context>

<pallas_src>
from functools import partial

import jax
import jax.numpy as jnp
import numpy as np
from jax.experimental import pallas as pl
from jax.experimental.pallas import tpu as pltpu

K_POOLS = (5, 9, 13)
HALO = K_POOLS[-1] // 2          # 6-pixel halo for the largest pool
LPAD = 8                         # left column pad of the slab (sublane aligned)
BN_EPS = 1e-3


def _silu(v, approx):
    # sigmoid = 1/(1+exp(-v)); exp (and the reciprocal) run on the EUP, off
    # the VALU slot that the pooling max chain saturates.
    return v * pl.reciprocal(1.0 + jnp.exp(-v), approx=approx)


def _vpool5(t):
    """Separable 'valid' window-5 max over axes 0 (rows) and 1 (cols) of a
    (R, C, ch) tensor, log-step shift/max tree (3 maxes per axis).
    Output shape: (R - 4, C - 4, ch)."""
    a = jnp.maximum(t[:-1], t[1:])            # row window 2
    a = jnp.maximum(a[:-2], a[2:])            # row window 4
    a = jnp.maximum(a[:-1], t[4:])            # row window 5
    b = jnp.maximum(a[:, :-1], a[:, 1:])      # col window 2
    b = jnp.maximum(b[:, :-2], b[:, 2:])      # col window 4
    b = jnp.maximum(b[:, :-1], a[:, 4:])      # col window 5
    return b


def spp_kernel(x_ref, w1_ref, b1_ref, w2_ref, b2_ref, o_ref, slab_ref, *,
               img_h, tiled, approx_silu):
    # x_ref : (1, H, W, C1)        whole unpadded image   (tiled=False)
    #         (1, H+12, W, C1)     rows-only zero-padded  (tiled=True)
    # w1_ref: (C1, Cm)   cv1 1x1 conv with BN folded      (matmul dtype)
    # b1_ref: (1, Cm)    cv1 folded BN bias               (f32)
    # w2_ref: (4*Cm, C2) cv2 1x1 conv with BN folded      (matmul dtype)
    # b2_ref: (1, C2)    cv2 folded BN bias               (f32)
    # o_ref : (1, TH, W, C2)  one H-tile of the output
    # slab  : (TH+12, LPAD+W+6, Cm) -inf framed pooling slab (pool dtype)
    TH, W, C2 = o_ref.shape[1], o_ref.shape[2], o_ref.shape[3]
    C1 = x_ref.shape[3]
    Cm = w1_ref.shape[1]
    L, WP, _ = slab_ref.shape
    pdt = slab_ref.dtype
    h = pl.program_id(1)

    # ---- cv1 (1x1 conv + folded BN + SiLU) on exactly the rows we need ----
    if tiled:
        xs = x_ref[0, pl.ds(h * TH, L), :, :]          # (L, W, C1) halo'd slab
        rows = L
    else:
        xs = x_ref[0]                                  # (H, W, C1) whole image
        rows = TH
    y = jnp.dot(xs.reshape(rows * W, C1), w1_ref[...],
                preferred_element_type=jnp.float32) + b1_ref[...]
    y = _silu(y, approx_silu).astype(pdt).reshape(rows, W, Cm)

    if tiled:
        # slab rows that fall outside the image -> -inf (MaxPool2d padding),
        # so tile borders reproduce the reference exactly.
        r = jax.lax.broadcasted_iota(jnp.int32, (rows, W), 0) + (h * TH - HALO)
        inside = (r >= 0) & (r < img_h)
        y = jnp.where(inside[:, :, None], y, jnp.asarray(-jnp.inf, dtype=pdt))

    # ---- scatter into the -inf framed slab (halo never touches the MXU) ---
    slab_ref[...] = jnp.full((L, WP, Cm), -jnp.inf, dtype=pdt)
    if tiled:
        slab_ref[:, LPAD:LPAD + W, :] = y
    else:
        slab_ref[HALO:HALO + TH, LPAD:LPAD + W, :] = y
    yp = slab_ref[...]

    # ---- SPPF cascade + interleaved branch accumulation --------------------
    # pool5 applied 1/2/3x == MaxPool 5/9/13 (max is associative); each branch
    # feeds its w2 row-block immediately (sum of matmuls == concat-then-matmul).
    def branch_dot(t, blk):
        f = t.reshape(TH * W, Cm).astype(w2_ref.dtype)
        return jnp.dot(f, w2_ref[blk * Cm:(blk + 1) * Cm, :],
                       preferred_element_type=jnp.float32)

    ident = y[HALO:HALO + TH] if tiled else y                 # identity branch
    z = branch_dot(ident, 0)
    p = _vpool5(yp)                                           # == MaxPool 5x5
    z = z + branch_dot(p[4:4 + TH, LPAD - 2:LPAD - 2 + W], 1)
    p = _vpool5(p)                                            # == MaxPool 9x9
    z = z + branch_dot(p[2:2 + TH, LPAD - 4:LPAD - 4 + W], 2)
    p = _vpool5(p)                                            # == MaxPool 13x13
    z = z + branch_dot(p[0:TH, LPAD - 6:LPAD - 6 + W], 3)

    # ---- cv2 folded BN bias + SiLU, store the tile -------------------------
    z = _silu(z + b2_ref[...], approx_silu)
    o_ref[0] = z.reshape(TH, W, C2).astype(o_ref.dtype)


def _vmem_capacity_bytes():
    try:
        return int(pltpu.get_tpu_info().vmem_capacity_bytes)
    except Exception:
        return 64 * 1024 * 1024          # conservative (v7x per-TC) fallback


def _rnd(v, m):
    return -(-v // m) * m


def _vmem_estimate(tile_h, rows_in, W, C1, Cm, C2, itm, itp):
    """Rough per-grid-step VMEM tally (lane/sublane padded)."""
    L = tile_h + 2 * HALO
    WP = LPAD + W + HALO
    c1p, cmp_, c2p = _rnd(C1, 128), _rnd(Cm, 128), _rnd(C2, 128)
    w8, wp8 = _rnd(W, 8), _rnd(WP, 8)
    x_blk = 2 * rows_in * w8 * c1p * itm                 # double-buffered input
    w_blk = 2 * ((c1p * cmp_ + 4 * Cm * c2p) * itm + (cmp_ + c2p) * 4)
    o_blk = 2 * tile_h * w8 * c2p * 4
    slab = L * wp8 * cmp_ * itp
    live = (L * w8 * max(c1p * itm, cmp_ * itp)          # xs / y
            + 2 * L * wp8 * cmp_ * itp                   # pooled temporaries
            + 2 * tile_h * w8 * c2p * 4)                 # z accumulator + tail
    return x_blk + w_blk + o_blk + slab + live


def _pick_tile_h(H, W, C1, Cm, C2, itm, itp, budget):
    """Prefer tile_h == H (no halo recompute); otherwise the largest divisor
    of H whose working set fits the budget."""
    if _vmem_estimate(H, H, W, C1, Cm, C2, itm, itp) <= budget:
        return H
    for t in sorted((d for d in range(1, H) if H % d == 0), reverse=True):
        if _vmem_estimate(t, H + 2 * HALO, W, C1, Cm, C2, itm, itp) <= budget:
            return t
    return 1


def spp_pallas_nhwc(x, w1, b1, w2, b2, *, tile_h=None, matmul_dtype=None,
                    pool_dtype=None, out_dtype=None, approx_silu=False):
    """SPP forward on NHWC input: x (N, H, W, C1) -> (N, H, W, C2)."""
    N, H, W, C1 = x.shape
    Cm = w1.shape[1]
    C2 = w2.shape[1]
    assert w1.shape[0] == C1 and w2.shape[0] == 4 * Cm

    if matmul_dtype is None:
        # bf16 operands (f32 accumulation) pay off for realistic channel
        # counts; the tiny-channel demo stays in exact f32.
        matmul_dtype = jnp.bfloat16 if min(C1, Cm, C2) >= 64 else jnp.float32
    if pool_dtype is None:
        pool_dtype = matmul_dtype      # pass jnp.float32 on v5e (no bf16 VPU)
    if out_dtype is None:
        out_dtype = x.dtype

    itm = jnp.dtype(matmul_dtype).itemsize
    itp = jnp.dtype(pool_dtype).itemsize
    cap = _vmem_capacity_bytes()
    if tile_h is None:
        # On v7x with N == 1, pass tile_h=H//2 so the second TensorCore gets
        # a grid step (one extra halo recompute vs 2x cores).
        tile_h = _pick_tile_h(H, W, C1, Cm, C2, itm, itp, int(0.72 * cap))
    assert H % tile_h == 0, "tile_h must divide H"
    n_h = H // tile_h
    tiled = n_h > 1

    L = tile_h + 2 * HALO
    WP = LPAD + W + HALO

    # Cast to the matmul dtype once (halves kernel-input HBM bytes for bf16);
    # pad rows only when H-tiling is actually used (the default path never
    # pads, so there is no extra HBM round-trip of x).
    xk = x.astype(matmul_dtype)
    if tiled:
        xk = jnp.pad(xk, ((0, 0), (HALO, HALO), (0, 0), (0, 0)))
    Hx = xk.shape[1]

    need = _vmem_estimate(tile_h, Hx, W, C1, Cm, C2, itm, itp)
    vmem_limit = int(min(int(0.9 * cap), max(32 << 20, 2 * need)))

    kernel = partial(spp_kernel, img_h=H, tiled=tiled, approx_silu=approx_silu)

    out = pl.pallas_call(
        kernel,
        out_shape=jax.ShapeDtypeStruct((N, H, W, C2), out_dtype),
        grid=(N, n_h),
        in_specs=[
            # Whole (row-padded) image per batch element; the block index is
            # constant in h, so it is DMA'd once per image and reused.
            # TODO(synk): single-buffer the constant-index operands
            # (pipeline_mode=pl.Buffered(1)) to shave VMEM on v7x.
            pl.BlockSpec((1, Hx, W, C1), lambda n, h: (n, 0, 0, 0)),
            pl.BlockSpec((C1, Cm), lambda n, h: (0, 0)),
            pl.BlockSpec((1, Cm), lambda n, h: (0, 0)),
            pl.BlockSpec((4 * Cm, C2), lambda n, h: (0, 0)),
            pl.BlockSpec((1, C2), lambda n, h: (0, 0)),
        ],
        out_specs=pl.BlockSpec((1, tile_h, W, C2), lambda n, h: (n, h, 0, 0)),
        scratch_shapes=[pltpu.VMEM((L, WP, Cm), pool_dtype)],
        compiler_params=pltpu.CompilerParams(
            dimension_semantics=("parallel", "parallel"),
            vmem_limit_bytes=vmem_limit,
        ),
    )(xk, w1.astype(matmul_dtype), b1.astype(jnp.float32),
      w2.astype(matmul_dtype), b2.astype(jnp.float32))
    return out


def spp_pallas(x_nchw, w1, b1, w2, b2, **kw):
    """PyTorch-layout entry point: x (N, C1, H, W) -> (N, C2, H, W).
    NHWC networks should call spp_pallas_nhwc directly and skip these two
    full-tensor transposes (they cost extra HBM passes)."""
    x = jnp.transpose(x_nchw, (0, 2, 3, 1))
    out = spp_pallas_nhwc(x, w1, b1, w2, b2, **kw)
    return jnp.transpose(out, (0, 3, 1, 2))


def spp_reference(x_nchw, w1, b1, w2, b2):
    """Pure-JAX reference (eval-mode SPP) for validation."""
    x = jnp.transpose(x_nchw, (0, 2, 3, 1))
    y = jnp.einsum('nhwc,cd->nhwd', x, w1) + b1.reshape(1, 1, 1, -1)
    y = y * jax.nn.sigmoid(y)
    feats = [y]
    for k in K_POOLS:
        feats.append(jax.lax.reduce_window(
            y, -jnp.inf, jax.lax.max, (1, k, k, 1), (1, 1, 1, 1), 'SAME'))
    cat = jnp.concatenate(feats, axis=-1)
    z = jnp.einsum('nhwc,cd->nhwd', cat, w2) + b2.reshape(1, 1, 1, -1)
    z = z * jax.nn.sigmoid(z)
    return jnp.transpose(z, (0, 3, 1, 2))


def _fold_bn(conv_w_oi, gamma, beta, mean, var):
    """Fold eval-mode BatchNorm into a 1x1 conv.  conv_w_oi: (C_out, C_in).
    Returns (W: (C_in, C_out), b: (1, C_out)) for y = x @ W + b."""
    scale = gamma / jnp.sqrt(var + BN_EPS)                  # (C_out,)
    w = (conv_w_oi * scale[:, None]).T                      # (C_in, C_out)
    b = (beta - mean * scale).reshape(1, -1)
    return w.astype(jnp.float32), b.astype(jnp.float32)


if __name__ == "__main__":
    # Small shapes consistent with SPP(c1=4, c2=8): x is NCHW (2, 4, 16, 16).
    N, C1, H, W = 2, 4, 16, 16
    C2 = 8
    Cm = C1 // 2                                            # cv1 out channels
    Cc = Cm * (len(K_POOLS) + 1)                            # cv2 in channels

    key = jax.random.PRNGKey(0)
    keys = jax.random.split(key, 9)

    x = jax.random.normal(keys[0], (N, C1, H, W), jnp.float32)

    # cv1 parameters (conv weight (Cm, C1, 1, 1) -> (Cm, C1); BN stats).
    conv1_w = jax.random.normal(keys[1], (Cm, C1), jnp.float32) * 0.2
    g1 = 1.0 + 0.1 * jax.random.normal(keys[2], (Cm,), jnp.float32)
    be1 = 0.1 * jax.random.normal(keys[3], (Cm,), jnp.float32)
    mu1 = 0.1 * jax.random.normal(keys[4], (Cm,), jnp.float32)
    va1 = jnp.abs(jax.random.normal(keys[5], (Cm,), jnp.float32)) + 0.5

    # cv2 parameters (conv weight (C2, Cc, 1, 1) -> (C2, Cc); BN stats).
    conv2_w = jax.random.normal(keys[6], (C2, Cc), jnp.float32) * 0.2
    g2 = 1.0 + 0.1 * jax.random.normal(keys[7], (C2,), jnp.float32)
    be2 = 0.1 * jax.random.normal(keys[8], (C2,), jnp.float32)
    mu2 = jnp.zeros((C2,), jnp.float32)
    va2 = jnp.ones((C2,), jnp.float32)

    w1, b1 = _fold_bn(conv1_w, g1, be1, mu1, va1)           # (C1, Cm), (1, Cm)
    w2, b2 = _fold_bn(conv2_w, g2, be2, mu2, va2)           # (Cc, C2), (1, C2)

    ref = jax.block_until_ready(spp_reference(x, w1, b1, w2, b2))

    # 1) default path: tile_h == H (one grid step per image), exact f32 math.
    out = jax.block_until_ready(spp_pallas(x, w1, b1, w2, b2))
    assert out.shape == (N, C2, H, W)
    np.testing.assert_allclose(np.asarray(out), np.asarray(ref),
                               rtol=1e-2, atol=1e-2)

    # 2) H-tiled path (rows-only pad + 6-row halo recompute): exercises the
    #    -inf border masking across an interior tile boundary.
    out_t = jax.block_until_ready(spp_pallas(x, w1, b1, w2, b2, tile_h=8))
    np.testing.assert_allclose(np.asarray(out_t), np.asarray(ref),
                               rtol=1e-2, atol=1e-2)

    # 3) bf16 matmul + bf16 pooling path (what realistic channel counts use).
    out_bf = jax.block_until_ready(
        spp_pallas(x, w1, b1, w2, b2, matmul_dtype=jnp.bfloat16))
    np.testing.assert_allclose(np.asarray(out_bf), np.asarray(ref),
                               rtol=6e-2, atol=6e-2)

    print("KERNEL_OK")
</pallas_src>

<mosaic_0001>
module attributes {stable_mosaic.version = 11 : i64} {
  func.func @spp_kernel(%arg0: i32, %arg1: i32, %arg2: memref<1x16x16x4xf32, #tpu.memory_space<vmem>>, %arg3: memref<4x2xf32, #tpu.memory_space<vmem>>, %arg4: memref<1x2xf32, #tpu.memory_space<vmem>>, %arg5: memref<8x8xf32, #tpu.memory_space<vmem>>, %arg6: memref<1x8xf32, #tpu.memory_space<vmem>>, %arg7: memref<1x16x16x8xf32, #tpu.memory_space<vmem>>, %arg8: memref<28x30x2xf32, #tpu.memory_space<vmem>>) attributes {dimension_semantics = [#tpu.dimension_semantics<parallel>, #tpu.dimension_semantics<parallel>], iteration_bounds = array<i64: 2, 1>, scalar_prefetch = 0 : i64, scratch_operands = 1 : i64, tpu.core_type = #tpu.core_type<tc>, window_params = [{transform_indices = @transform_0, window_bounds = array<i64: 1, 16, 16, 4>}, {pipeline_mode = #tpu.pipeline_mode<synchronous>, transform_indices = @transform_1, window_bounds = array<i64: 4, 2>}, {pipeline_mode = #tpu.pipeline_mode<synchronous>, transform_indices = @transform_2, window_bounds = array<i64: 1, 2>}, {pipeline_mode = #tpu.pipeline_mode<synchronous>, transform_indices = @transform_3, window_bounds = array<i64: 8, 8>}, {pipeline_mode = #tpu.pipeline_mode<synchronous>, transform_indices = @transform_4, window_bounds = array<i64: 1, 8>}, {transform_indices = @transform_5, window_bounds = array<i64: 1, 16, 16, 8>}]} {
    %c0 = arith.constant 0 : index
    %c0_0 = arith.constant 0 : index
    %c0_1 = arith.constant 0 : index
    %c0_2 = arith.constant 0 : index
    %0 = vector.load %arg2[%c0, %c0_0, %c0_1, %c0_2] : memref<1x16x16x4xf32, #tpu.memory_space<vmem>>, vector<1x16x16x4xf32>
    %1 = vector.shape_cast %0 : vector<1x16x16x4xf32> to vector<16x16x4xf32>
    %2 = vector.shape_cast %1 : vector<16x16x4xf32> to vector<256x4xf32>
    %c0_3 = arith.constant 0 : index
    %c0_4 = arith.constant 0 : index
    %3 = vector.load %arg3[%c0_3, %c0_4] : memref<4x2xf32, #tpu.memory_space<vmem>>, vector<4x2xf32>
    %cst = arith.constant dense<0.000000e+00> : vector<256x2xf32>
    %4 = tpu.matmul %2, %3, %cst {dimension_numbers = #tpu.dot_dimension_numbers<[1], [0], [0], [1], [0, 0, 1, 1], [], []>} : vector<256x4xf32>, vector<4x2xf32>, vector<256x2xf32> -> vector<256x2xf32>
    %c0_5 = arith.constant 0 : index
    %c0_6 = arith.constant 0 : index
    %5 = vector.load %arg4[%c0_5, %c0_6] : memref<1x2xf32, #tpu.memory_space<vmem>>, vector<1x2xf32>
    %6 = vector.broadcast %5 : vector<1x2xf32> to vector<256x2xf32>
    %7 = arith.addf %4, %6 : vector<256x2xf32>
    %cst_7 = arith.constant 0.000000e+00 : f32
    %8 = vector.broadcast %cst_7 : f32 to vector<256x2xf32>
    %9 = arith.subf %8, %7 : vector<256x2xf32>
    %10 = math.exp %9 : vector<256x2xf32>
    %cst_8 = arith.constant 1.000000e+00 : f32
    %11 = vector.broadcast %cst_8 : f32 to vector<256x2xf32>
    %12 = arith.addf %11, %10 : vector<256x2xf32>
    %13 = tpu.reciprocal %12 : vector<256x2xf32> -> vector<256x2xf32>
    %14 = arith.mulf %7, %13 : vector<256x2xf32>
    %15 = vector.shape_cast %14 : vector<256x2xf32> to vector<16x16x2xf32>
    %cst_9 = arith.constant 0xFF800000 : f32
    %16 = vector.broadcast %cst_9 : f32 to vector<28x30x2xf32>
    %c0_10 = arith.constant 0 : index
    %c0_11 = arith.constant 0 : index
    %c0_12 = arith.constant 0 : index
    %17 = vector.load %arg8[%c0_10, %c0_11, %c0_12] : memref<28x30x2xf32, #tpu.memory_space<vmem>>, vector<28x30x2xf32>
    tpu.vector_store %arg8[%c0_10, %c0_11, %c0_12], %16 {strides = array<i32>} : memref<28x30x2xf32, #tpu.memory_space<vmem>>, vector<28x30x2xf32>,
    %c6 = arith.constant 6 : index
    %c8 = arith.constant 8 : index
    %c0_13 = arith.constant 0 : index
    %18 = vector.load %arg8[%c6, %c8, %c0_13] : memref<28x30x2xf32, #tpu.memory_space<vmem>>, vector<16x16x2xf32>
    tpu.vector_store %arg8[%c6, %c8, %c0_13], %15 {strides = array<i32>} : memref<28x30x2xf32, #tpu.memory_space<vmem>>, vector<16x16x2xf32>,
    %c0_14 = arith.constant 0 : index
    %c0_15 = arith.constant 0 : index
    %c0_16 = arith.constant 0 : index
    %19 = vector.load %arg8[%c0_14, %c0_15, %c0_16] : memref<28x30x2xf32, #tpu.memory_space<vmem>>, vector<28x30x2xf32>
    %20 = vector.shape_cast %15 : vector<16x16x2xf32> to vector<256x2xf32>
    %c0_17 = arith.constant 0 : index
    %c0_18 = arith.constant 0 : index
    %21 = vector.load %arg5[%c0_17, %c0_18] : memref<8x8xf32, #tpu.memory_space<vmem>>, vector<2x8xf32>
    %cst_19 = arith.constant dense<0.000000e+00> : vector<256x8xf32>
    %22 = tpu.matmul %20, %21, %cst_19 {dimension_numbers = #tpu.dot_dimension_numbers<[1], [0], [0], [1], [0, 0, 1, 1], [], []>} : vector<256x2xf32>, vector<2x8xf32>, vector<256x8xf32> -> vector<256x8xf32>
    %23 = vector.extract_strided_slice %19 {offsets = [0, 0, 0], sizes = [27, 30, 2], strides = [1, 1, 1]} : vector<28x30x2xf32> to vector<27x30x2xf32>
    %24 = vector.extract_strided_slice %19 {offsets = [1, 0, 0], sizes = [27, 30, 2], strides = [1, 1, 1]} : vector<28x30x2xf32> to vector<27x30x2xf32>
    %25 = arith.maximumf %23, %24 : vector<27x30x2xf32>
    %26 = vector.extract_strided_slice %25 {offsets = [0, 0, 0], sizes = [25, 30, 2], strides = [1, 1, 1]} : vector<27x30x2xf32> to vector<25x30x2xf32>
    %27 = vector.extract_strided_slice %25 {offsets = [2, 0, 0], sizes = [25, 30, 2], strides = [1, 1, 1]} : vector<27x30x2xf32> to vector<25x30x2xf32>
    %28 = arith.maximumf %26, %27 : vector<25x30x2xf32>
    %29 = vector.extract_strided_slice %28 {offsets = [0, 0, 0], sizes = [24, 30, 2], strides = [1, 1, 1]} : vector<25x30x2xf32> to vector<24x30x2xf32>
    %30 = vector.extract_strided_slice %19 {offsets = [4, 0, 0], sizes = [24, 30, 2], strides = [1, 1, 1]} : vector<28x30x2xf32> to vector<24x30x2xf32>
    %31 = arith.maximumf %29, %30 : vector<24x30x2xf32>
    %32 = vector.extract_strided_slice %31 {offsets = [0, 0, 0], sizes = [24, 29, 2], strides = [1, 1, 1]} : vector<24x30x2xf32> to vector<24x29x2xf32>
    %33 = vector.extract_strided_slice %31 {offsets = [0, 1, 0], sizes = [24, 29, 2], strides = [1, 1, 1]} : vector<24x30x2xf32> to vector<24x29x2xf32>
    %34 = arith.maximumf %32, %33 : vector<24x29x2xf32>
    %35 = vector.extract_strided_slice %34 {offsets = [0, 0, 0], sizes = [24, 27, 2], strides = [1, 1, 1]} : vector<24x29x2xf32> to vector<24x27x2xf32>
    %36 = vector.extract_strided_slice %34 {offsets = [0, 2, 0], sizes = [24, 27, 2], strides = [1, 1, 1]} : vector<24x29x2xf32> to vector<24x27x2xf32>
    %37 = arith.maximumf %35, %36 : vector<24x27x2xf32>
    %38 = vector.extract_strided_slice %37 {offsets = [0, 0, 0], sizes = [24, 26, 2], strides = [1, 1, 1]} : vector<24x27x2xf32> to vector<24x26x2xf32>
    %39 = vector.extract_strided_slice %31 {offsets = [0, 4, 0], sizes = [24, 26, 2], strides = [1, 1, 1]} : vector<24x30x2xf32> to vector<24x26x2xf32>
    %40 = arith.maximumf %38, %39 : vector<24x26x2xf32>
    %41 = vector.extract_strided_slice %40 {offsets = [4, 6, 0], sizes = [16, 16, 2], strides = [1, 1, 1]} : vector<24x26x2xf32> to vector<16x16x2xf32>
    %42 = vector.shape_cast %41 : vector<16x16x2xf32> to vector<256x2xf32>
    %c2 = arith.constant 2 : index
    %c0_20 = arith.constant 0 : index
    %43 = vector.load %arg5[%c2, %c0_20] : memref<8x8xf32, #tpu.memory_space<vmem>>, vector<2x8xf32>
    %cst_21 = arith.constant dense<0.000000e+00> : vector<256x8xf32>
    %44 = tpu.matmul %42, %43, %cst_21 {dimension_numbers = #tpu.dot_dimension_numbers<[1], [0], [0], [1], [0, 0, 1, 1], [], []>} : vector<256x2xf32>, vector<2x8xf32>, vector<256x8xf32> -> vector<256x8xf32>
    %45 = arith.addf %22, %44 : vector<256x8xf32>
    %46 = vector.extract_strided_slice %40 {offsets = [0, 0, 0], sizes = [23, 26, 2], strides = [1, 1, 1]} : vector<24x26x2xf32> to vector<23x26x2xf32>
    %47 = vector.extract_strided_slice %40 {offsets = [1, 0, 0], sizes = [23, 26, 2], strides = [1, 1, 1]} : vector<24x26x2xf32> to vector<23x26x2xf32>
    %48 = arith.maximumf %46, %47 : vector<23x26x2xf32>
    %49 = vector.extract_strided_slice %48 {offsets = [0, 0, 0], sizes = [21, 26, 2], strides = [1, 1, 1]} : vector<23x26x2xf32> to vector<21x26x2xf32>
    %50 = vector.extract_strided_slice %48 {offsets = [2, 0, 0], sizes = [21, 26, 2], strides = [1, 1, 1]} : vector<23x26x2xf32> to vector<21x26x2xf32>
    %51 = arith.maximumf %49, %50 : vector<21x26x2xf32>
    %52 = vector.extract_strided_slice %51 {offsets = [0, 0, 0], sizes = [20, 26, 2], strides = [1, 1, 1]} : vector<21x26x2xf32> to vector<20x26x2xf32>
    %53 = vector.extract_strided_slice %40 {offsets = [4, 0, 0], sizes = [20, 26, 2], strides = [1, 1, 1]} : vector<24x26x2xf32> to vector<20x26x2xf32>
    %54 = arith.maximumf %52, %53 : vector<20x26x2xf32>
    %55 = vector.extract_strided_slice %54 {offsets = [0, 0, 0], sizes = [20, 25, 2], strides = [1, 1, 1]} : vector<20x26x2xf32> to vector<20x25x2xf32>
    %56 = vector.extract_strided_slice %54 {offsets = [0, 1, 0], sizes = [20, 25, 2], strides = [1, 1, 1]} : vector<20x26x2xf32> to vector<20x25x2xf32>
    %57 = arith.maximumf %55, %56 : vector<20x25x2xf32>
    %58 = vector.extract_strided_slice %57 {offsets = [0, 0, 0], sizes = [20, 23, 2], strides = [1, 1, 1]} : vector<20x25x2xf32> to vector<20x23x2xf32>
    %59 = vector.extract_strided_slice %57 {offsets = [0, 2, 0], sizes = [20, 23, 2], strides = [1, 1, 1]} : vector<20x25x2xf32> to vector<20x23x2xf32>
    %60 = arith.maximumf %58, %59 : vector<20x23x2xf32>
    %61 = vector.extract_strided_slice %60 {offsets = [0, 0, 0], sizes = [20, 22, 2], strides = [1, 1, 1]} : vector<20x23x2xf32> to vector<20x22x2xf32>
    %62 = vector.extract_strided_slice %54 {offsets = [0, 4, 0], sizes = [20, 22, 2], strides = [1, 1, 1]} : vector<20x26x2xf32> to vector<20x22x2xf32>
    %63 = arith.maximumf %61, %62 : vector<20x22x2xf32>
    %64 = vector.extract_strided_slice %63 {offsets = [2, 4, 0], sizes = [16, 16, 2], strides = [1, 1, 1]} : vector<20x22x2xf32> to vector<16x16x2xf32>
    %65 = vector.shape_cast %64 : vector<16x16x2xf32> to vector<256x2xf32>
    %c4 = arith.constant 4 : index
    %c0_22 = arith.constant 0 : index
    %66 = vector.load %arg5[%c4, %c0_22] : memref<8x8xf32, #tpu.memory_space<vmem>>, vector<2x8xf32>
    %cst_23 = arith.constant dense<0.000000e+00> : vector<256x8xf32>
    %67 = tpu.matmul %65, %66, %cst_23 {dimension_numbers = #tpu.dot_dimension_numbers<[1], [0], [0], [1], [0, 0, 1, 1], [], []>} : vector<256x2xf32>, vector<2x8xf32>, vector<256x8xf32> -> vector<256x8xf32>
    %68 = arith.addf %45, %67 : vector<256x8xf32>
    %69 = vector.extract_strided_slice %63 {offsets = [0, 0, 0], sizes = [19, 22, 2], strides = [1, 1, 1]} : vector<20x22x2xf32> to vector<19x22x2xf32>
    %70 = vector.extract_strided_slice %63 {offsets = [1, 0, 0], sizes = [19, 22, 2], strides = [1, 1, 1]} : vector<20x22x2xf32> to vector<19x22x2xf32>
    %71 = arith.maximumf %69, %70 : vector<19x22x2xf32>
    %72 = vector.extract_strided_slice %71 {offsets = [0, 0, 0], sizes = [17, 22, 2], strides = [1, 1, 1]} : vector<19x22x2xf32> to vector<17x22x2xf32>
    %73 = vector.extract_strided_slice %71 {offsets = [2, 0, 0], sizes = [17, 22, 2], strides = [1, 1, 1]} : vector<19x22x2xf32> to vector<17x22x2xf32>
    %74 = arith.maximumf %72, %73 : vector<17x22x2xf32>
    %75 = vector.extract_strided_slice %74 {offsets = [0, 0, 0], sizes = [16, 22, 2], strides = [1, 1, 1]} : vector<17x22x2xf32> to vector<16x22x2xf32>
    %76 = vector.extract_strided_slice %63 {offsets = [4, 0, 0], sizes = [16, 22, 2], strides = [1, 1, 1]} : vector<20x22x2xf32> to vector<16x22x2xf32>
    %77 = arith.maximumf %75, %76 : vector<16x22x2xf32>
    %78 = vector.extract_strided_slice %77 {offsets = [0, 0, 0], sizes = [16, 21, 2], strides = [1, 1, 1]} : vector<16x22x2xf32> to vector<16x21x2xf32>
    %79 = vector.extract_strided_slice %77 {offsets = [0, 1, 0], sizes = [16, 21, 2], strides = [1, 1, 1]} : vector<16x22x2xf32> to vector<16x21x2xf32>
    %80 = arith.maximumf %78, %79 : vector<16x21x2xf32>
    %81 = vector.extract_strided_slice %80 {offsets = [0, 0, 0], sizes = [16, 19, 2], strides = [1, 1, 1]} : vector<16x21x2xf32> to vector<16x19x2xf32>
    %82 = vector.extract_strided_slice %80 {offsets = [0, 2, 0], sizes = [16, 19, 2], strides = [1, 1, 1]} : vector<16x21x2xf32> to vector<16x19x2xf32>
    %83 = arith.maximumf %81, %82 : vector<16x19x2xf32>
    %84 = vector.extract_strided_slice %83 {offsets = [0, 0, 0], sizes = [16, 18, 2], strides = [1, 1, 1]} : vector<16x19x2xf32> to vector<16x18x2xf32>
    %85 = vector.extract_strided_slice %77 {offsets = [0, 4, 0], sizes = [16, 18, 2], strides = [1, 1, 1]} : vector<16x22x2xf32> to vector<16x18x2xf32>
    %86 = arith.maximumf %84, %85 : vector<16x18x2xf32>
    %87 = vector.extract_strided_slice %86 {offsets = [0, 2, 0], sizes = [16, 16, 2], strides = [1, 1, 1]} : vector<16x18x2xf32> to vector<16x16x2xf32>
    %88 = vector.shape_cast %87 : vector<16x16x2xf32> to vector<256x2xf32>
    %c6_24 = arith.constant 6 : index
    %c0_25 = arith.constant 0 : index
    %89 = vector.load %arg5[%c6_24, %c0_25] : memref<8x8xf32, #tpu.memory_space<vmem>>, vector<2x8xf32>
    %cst_26 = arith.constant dense<0.000000e+00> : vector<256x8xf32>
    %90 = tpu.matmul %88, %89, %cst_26 {dimension_numbers = #tpu.dot_dimension_numbers<[1], [0], [0], [1], [0, 0, 1, 1], [], []>} : vector<256x2xf32>, vector<2x8xf32>, vector<256x8xf32> -> vector<256x8xf32>
    %91 = arith.addf %68, %90 : vector<256x8xf32>
    %c0_27 = arith.constant 0 : index
    %c0_28 = arith.constant 0 : index
    %92 = vector.load %arg6[%c0_27, %c0_28] : memref<1x8xf32, #tpu.memory_space<vmem>>, vector<1x8xf32>
    %93 = vector.broadcast %92 : vector<1x8xf32> to vector<256x8xf32>
    %94 = arith.addf %91, %93 : vector<256x8xf32>
    %cst_29 = arith.constant 0.000000e+00 : f32
    %95 = vector.broadcast %cst_29 : f32 to vector<256x8xf32>
    %96 = arith.subf %95, %94 : vector<256x8xf32>
    %97 = math.exp %96 : vector<256x8xf32>
    %cst_30 = arith.constant 1.000000e+00 : f32
    %98 = vector.broadcast %cst_30 : f32 to vector<256x8xf32>
    %99 = arith.addf %98, %97 : vector<256x8xf32>
    %100 = tpu.reciprocal %99 : vector<256x8xf32> -> vector<256x8xf32>
    %101 = arith.mulf %94, %100 : vector<256x8xf32>
    %102 = vector.shape_cast %101 : vector<256x8xf32> to vector<16x16x8xf32>
    %c0_31 = arith.constant 0 : index
    %c0_32 = arith.constant 0 : index
    %c0_33 = arith.constant 0 : index
    %c0_34 = arith.constant 0 : index
    %103 = vector.load %arg7[%c0_31, %c0_32, %c0_33, %c0_34] : memref<1x16x16x8xf32, #tpu.memory_space<vmem>>, vector<1x16x16x8xf32>
    %104 = vector.shape_cast %103 : vector<1x16x16x8xf32> to vector<16x16x8xf32>
    %105 = vector.shape_cast %102 : vector<16x16x8xf32> to vector<1x16x16x8xf32>
    tpu.vector_store %arg7[%c0_31, %c0_32, %c0_33, %c0_34], %105 {strides = array<i32>} : memref<1x16x16x8xf32, #tpu.memory_space<vmem>>, vector<1x16x16x8xf32>,
    return
  }
  func.func @transform_0(%arg0: i32, %arg1: i32) -> (i32, i32, i32, i32) {
    %c0_i32 = arith.constant 0 : i32
    %c0_i32_0 = arith.constant 0 : i32
    %c0_i32_1 = arith.constant 0 : i32
    %c0_i32_2 = arith.constant 0 : i32
    return %arg0, %c0_i32, %c0_i32_0, %c0_i32_1 : i32, i32, i32, i32
  }
  func.func @transform_1(%arg0: i32, %arg1: i32) -> (i32, i32) {
    %c0_i32 = arith.constant 0 : i32
    %c0_i32_0 = arith.constant 0 : i32
    %c0_i32_1 = arith.constant 0 : i32
    return %c0_i32, %c0_i32_0 : i32, i32
  }
  func.func @transform_2(%arg0: i32, %arg1: i32) -> (i32, i32) {
    %c0_i32 = arith.constant 0 : i32
    %c0_i32_0 = arith.constant 0 : i32
    %c0_i32_1 = arith.constant 0 : i32
    return %c0_i32, %c0_i32_0 : i32, i32
  }
  func.func @transform_3(%arg0: i32, %arg1: i32) -> (i32, i32) {
    %c0_i32 = arith.constant 0 : i32
    %c0_i32_0 = arith.constant 0 : i32
    %c0_i32_1 = arith.constant 0 : i32
    return %c0_i32, %c0_i32_0 : i32, i32
  }
  func.func @transform_4(%arg0: i32, %arg1: i32) -> (i32, i32) {
    %c0_i32 = arith.constant 0 : i32
    %c0_i32_0 = arith.constant 0 : i32
    %c0_i32_1 = arith.constant 0 : i32
    return %c0_i32, %c0_i32_0 : i32, i32
  }
  func.func @transform_5(%arg0: i32, %arg1: i32) -> (i32, i32, i32, i32) {
    %c0_i32 = arith.constant 0 : i32
    %c0_i32_0 = arith.constant 0 : i32
    %c0_i32_1 = arith.constant 0 : i32
    return %arg0, %arg1, %c0_i32, %c0_i32_0 : i32, i32, i32, i32
  }
}

</mosaic_0001>

<bundles_post_ra>
// kernel: tpu_custom_call.1
= control target key start
LH: loop header
LB: loop body
LE: loop exit
PB: predicated region body
PF: predicated region fallthrough
CT: control target
= control target key end

     0   :  { %s7449_s18 = smov 0   ;;  %s7451_s19 = smov 0   ;;  %s13376_s0 = inlined_call_operand.vmem [shape: f32[2,16,16,4], index: 0, kind: input, shape index: {}]   ;;  %s13377_s1 = inlined_call_operand.vmem [shape: f32[4,2], index: 1, kind: input, shape index: {}]   ;;  %s13378_s2 = inlined_call_operand.vmem [shape: f32[1,2], index: 2, kind: input, shape index: {}]   ;;  %s13379_s3 = inlined_call_operand.vmem [shape: f32[8,8], index: 3, kind: input, shape index: {}]   ;;  %s13380_s4 = inlined_call_operand.vmem [shape: f32[1,8], index: 4, kind: input, shape index: {}]   ;;  %s13381_s5 = inlined_call_operand.vmem [shape: f32[2,16,16,8], index: 5, kind: output, shape index: {}]  }
   0x1   :  { %s7453_s20 = smov 0  }
   0x2 LB: > { %s27_s21 = sadd.s32 1, %s7412_s19  ;;  %p6913_p0 = scmp.ge.s32.totalorder %s7416_s20, 1  ;;  %s7416_s20 = sphi %s7453_s20, %s15_s20   ;;  %s7412_s19 = sphi %s7451_s19, %s14415_s19   ;;  %s7408_s18 = sphi %s7449_s18, %s14414_s18  }
   0x3   : > { %p29_p1 = scmp.ge.s32.totalorder %s27_s21, 2  ;;  %p201_p2 = scmp.lt.s32.totalorder %s7416_s20, 3 }
   0x5   : > { %s14417_s21 = smov (%p29_p1, %s27_s21), 0  ;;  %p202_p3 = pnand %p6913_p0, %p201_p2 }
   0x7   : > { %205 = sbr.rel (%p202_p3) target bundleno = 1304 (0x518), region = 40 }
   0xc   : > { %v282_v0 = vld [vmem:[%s13377_s1] sm:$0xf]  ;;  %vm384_vm0 = vcmask 1043456   ;;  %p234_p4 = scmp.lt.s32.totalorder %s7408_s18, 1  ;;  %vm287_vm1 = vcmask 31744   ;;  %vm1109_vm2 = vcmask 15360  }
   0xd   : > { %6918 = vmatpush.msk.msra.mxu0 %vm384_vm0, %v282_v0  ;;  %7087 = vmatpush.msk.msra.mxu1 %vm384_vm0, %v282_v0  ;;  %v7551_v33 = vld [vmem:[%s13378_s2] ss:$0 sm:$0xff]  ;;  %v13382_v35 = vmov -inf  }
   0xe   : > { %7088 = vmatpush.msk.msra.mxu2 %vm384_vm0, %v282_v0  ;;  %7089 = vmatpush.msk.msra.mxu3 %vm384_vm0, %v282_v0  ;;  %s14419_s18 = smov (!%p234_p4, %s7408_s18), 1  ;;  %1136 = vst.msk [vmem:[#allocation2 + $0xc8] sm:$0xff] %vm1109_vm2, %v13382_v35 }
   0xf   : > { %s7085_s24 = sshll.u32 %s14419_s18, 8  ;;  %1110 = vst.msk [vmem:[#allocation2] sm:$0xff] %vm1109_vm2, %v13382_v35 }
  0x10   : > { %s7482_s27 = scalar_lea.vmem %s13376_s0, %s7085_s24  ;;  %1111 = vst.msk [vmem:[#allocation2 + $0x8] sm:$0xff] %vm1109_vm2, %v13382_v35  ;;  %s11825_s23 = scalar_lea.vmem %s13381_s5, %s7085_s24 }
  0x11   : > { %v250_v1 = vld [vmem:[%s7482_s27] sm:$0xff]  ;;  %v251_v5 = vld [vmem:[%s7482_s27 + $0x8] sm:$0xff]  ;;  %v252_v9 = vld [vmem:[%s7482_s27 + $0x10] sm:$0xff]  ;;  %1112 = vst.msk [vmem:[#allocation2 + $0x10] sm:$0xff] %vm1109_vm2, %v13382_v35 }
  0x12   : > { %v258_v2 = vld [vmem:[%s7482_s27 + $0x40] sm:$0xff]  ;;  %6919 = vmatmul.msk.f32.vlgmr.msra.gmra.mxu0 %vm287_vm1, %v250_v1  ;;  %v259_v6 = vld [vmem:[%s7482_s27 + $0x48] sm:$0xff]  ;;  %v260_v10 = vld [vmem:[%s7482_s27 + $0x50] sm:$0xff]  ;;  %1115 = vst.msk [vmem:[#allocation2 + $0x20] sm:$0xff] %vm1109_vm2, %v13382_v35 }
  0x13   : > { %v266_v3 = vld [vmem:[%s7482_s27 + $0x80] sm:$0xff]  ;;  %6927 = vmatmul.msk.f32.vlgmr.msra.gmra.mxu1 %vm287_vm1, %v258_v2  ;;  %v267_v7 = vld [vmem:[%s7482_s27 + $0x88] sm:$0xff]  ;;  %v268_v11 = vld [vmem:[%s7482_s27 + $0x90] sm:$0xff]  ;;  %1116 = vst.msk [vmem:[#allocation2 + $0x28] sm:$0xff] %vm1109_vm2, %v13382_v35 }
  0x14   : > { %v274_v4 = vld [vmem:[%s7482_s27 + $0xc0] sm:$0xff]  ;;  %6935 = vmatmul.msk.f32.vlgmr.msra.gmra.mxu2 %vm287_vm1, %v266_v3  ;;  %v275_v8 = vld [vmem:[%s7482_s27 + $0xc8] sm:$0xff]  ;;  %v276_v12 = vld [vmem:[%s7482_s27 + $0xd0] sm:$0xff]  ;;  %1117 = vst.msk [vmem:[#allocation2 + $0x30] sm:$0xff] %vm1109_vm2, %v13382_v35 }
  0x15   : > { %6943 = vmatmul.msk.f32.vlgmr.msra.gmra.mxu3 %vm287_vm1, %v274_v4  ;;  %v253_v13 = vld [vmem:[%s7482_s27 + $0x18] sm:$0xff]  ;;  %v254_v17 = vld [vmem:[%s7482_s27 + $0x20] sm:$0xff]  ;;  %v255_v21 = vld [vmem:[%s7482_s27 + $0x28] sm:$0xff]  ;;  %1119 = vst.msk [vmem:[#allocation2 + $0x40] sm:$0xff] %vm1109_vm2, %v13382_v35 }
  0x16   : > { %v261_v14 = vld [vmem:[%s7482_s27 + $0x58] sm:$0xff]  ;;  %v262_v18 = vld [vmem:[%s7482_s27 + $0x60] sm:$0xff]  ;;  %v263_v22 = vld [vmem:[%s7482_s27 + $0x68] sm:$0xff]  ;;  %1120 = vst.msk [vmem:[#allocation2 + $0x48] sm:$0xff] %vm1109_vm2, %v13382_v35 }
  0x17   : > { %v269_v15 = vld [vmem:[%s7482_s27 + $0x98] sm:$0xff]  ;;  %v270_v19 = vld [vmem:[%s7482_s27 + $0xa0] sm:$0xff]  ;;  %v271_v23 = vld [vmem:[%s7482_s27 + $0xa8] sm:$0xff]  ;;  %1121 = vst.msk [vmem:[#allocation2 + $0x50] sm:$0xff] %vm1109_vm2, %v13382_v35 }
  0x18   : > { %v277_v16 = vld [vmem:[%s7482_s27 + $0xd8] sm:$0xff]  ;;  %v278_v20 = vld [vmem:[%s7482_s27 + $0xe0] sm:$0xff]  ;;  %v279_v24 = vld [vmem:[%s7482_s27 + $0xe8] sm:$0xff]  ;;  %1123 = vst.msk [vmem:[#allocation2 + $0x60] sm:$0xff] %vm1109_vm2, %v13382_v35 }
  0x19   : > { %v256_v25 = vld [vmem:[%s7482_s27 + $0x30] sm:$0xff]  ;;  %v257_v29 = vld [vmem:[%s7482_s27 + $0x38] sm:$0xff]  ;;  %1124 = vst.msk [vmem:[#allocation2 + $0x68] sm:$0xff] %vm1109_vm2, %v13382_v35 }
  0x1a   : > { %6920 = vmatmul.msk.f32.gmra.mxu0 %vm287_vm1, %v251_v5  ;;  %v264_v26 = vld [vmem:[%s7482_s27 + $0x70] sm:$0xff]  ;;  %v265_v30 = vld [vmem:[%s7482_s27 + $0x78] sm:$0xff]  ;;  %1125 = vst.msk [vmem:[#allocation2 + $0x70] sm:$0xff] %vm1109_vm2, %v13382_v35 }
  0x1b   : > { %6928 = vmatmul.msk.f32.gmra.mxu1 %vm287_vm1, %v259_v6  ;;  %v272_v27 = vld [vmem:[%s7482_s27 + $0xb0] sm:$0xff]  ;;  %v273_v31 = vld [vmem:[%s7482_s27 + $0xb8] sm:$0xff]  ;;  %1127 = vst.msk [vmem:[#allocation2 + $0x80] sm:$0xff] %vm1109_vm2, %v13382_v35 }
  0x1c   : > { %6936 = vmatmul.msk.f32.gmra.mxu2 %vm287_vm1, %v267_v7  ;;  %v280_v28 = vld [vmem:[%s7482_s27 + $0xf0] sm:$0xff]  ;;  %v281_v32 = vld [vmem:[%s7482_s27 + $0xf8] sm:$0xff]  ;;  %1128 = vst.msk [vmem:[#allocation2 + $0x88] sm:$0xff] %vm1109_vm2, %v13382_v35 }
  0x1d   : > { %6944 = vmatmul.msk.f32.gmra.mxu3 %vm287_vm1, %v275_v8  ;;  %1129 = vst.msk [vmem:[#allocation2 + $0x90] sm:$0xff] %vm1109_vm2, %v13382_v35 }
  0x1e   : > { %1131 = vst.msk [vmem:[#allocation2 + $0xa0] sm:$0xff] %vm1109_vm2, %v13382_v35 }
  0x1f   : > { %1132 = vst.msk [vmem:[#allocation2 + $0xa8] sm:$0xff] %vm1109_vm2, %v13382_v35 }
  0x20   : > { %1133 = vst.msk [vmem:[#allocation2 + $0xb0] sm:$0xff] %vm1109_vm2, %v13382_v35 }
  0x21   : > { %1135 = vst.msk [vmem:[#allocation2 + $0xc0] sm:$0xff] %vm1109_vm2, %v13382_v35 }
  0x22   : > { %6921 = vmatmul.msk.f32.gmra.mxu0 %vm287_vm1, %v252_v9  ;;  %1137 = vst.msk [vmem:[#allocation2 + $0xd0] sm:$0xff] %vm1109_vm2, %v13382_v35 }
  0x23   : > { %6929 = vmatmul.msk.f32.gmra.mxu1 %vm287_vm1, %v260_v10  ;;  %1139 = vst.msk [vmem:[#allocation2 + $0xe0] sm:$0xff] %vm1109_vm2, %v13382_v35 }
  0x24   : > { %6937 = vmatmul.msk.f32.gmra.mxu2 %vm287_vm1, %v268_v11  ;;  %1140 = vst.msk [vmem:[#allocation2 + $0xe8] sm:$0xff] %vm1109_vm2, %v13382_v35 }
  0x25   : > { %6945 = vmatmul.msk.f32.gmra.mxu3 %vm287_vm1, %v276_v12  ;;  %1141 = vst.msk [vmem:[#allocation2 + $0xf0] sm:$0xff] %vm1109_vm2, %v13382_v35 }
  0x26   : > { %1143 = vst.msk [vmem:[#allocation2 + $0x100] sm:$0xff] %vm1109_vm2, %v13382_v35 }
  0x27   : > { %1144 = vst.msk [vmem:[#allocation2 + $0x108] sm:$0xff] %vm1109_vm2, %v13382_v35 }
  0x28   : > { %1145 = vst.msk [vmem:[#allocation2 + $0x110] sm:$0xff] %vm1109_vm2, %v13382_v35 }
  0x29   : > { %1147 = vst.msk [vmem:[#allocation2 + $0x120] sm:$0xff] %vm1109_vm2, %v13382_v35 }
  0x2a   : > { %6922 = vmatmul.msk.f32.gmra.mxu0 %vm287_vm1, %v253_v13  ;;  %1148 = vst.msk [vmem:[#allocation2 + $0x128] sm:$0xff] %vm1109_vm2, %v13382_v35 }
  0x2b   : > { %6930 = vmatmul.msk.f32.gmra.mxu1 %vm287_vm1, %v261_v14  ;;  %1149 = vst.msk [vmem:[#allocation2 + $0x130] sm:$0xff] %vm1109_vm2, %v13382_v35 }
  0x2c   : > { %6938 = vmatmul.msk.f32.gmra.mxu2 %vm287_vm1, %v269_v15  ;;  %1151 = vst.msk [vmem:[#allocation2 + $0x140] sm:$0xff] %vm1109_vm2, %v13382_v35 }
  0x2d   : > { %6946 = vmatmul.msk.f32.gmra.mxu3 %vm287_vm1, %v277_v16  ;;  %1152 = vst.msk [vmem:[#allocation2 + $0x148] sm:$0xff] %vm1109_vm2, %v13382_v35 }
  0x2e   : > { %1153 = vst.msk [vmem:[#allocation2 + $0x150] sm:$0xff] %vm1109_vm2, %v13382_v35 }
  0x2f   : > { %1155 = vst.msk [vmem:[#allocation2 + $0x160] sm:$0xff] %vm1109_vm2, %v13382_v35 }
  0x30   : > { %1156 = vst.msk [vmem:[#allocation2 + $0x168] sm:$0xff] %vm1109_vm2, %v13382_v35 }
  0x31   : > { %1157 = vst.msk [vmem:[#allocation2 + $0x170] sm:$0xff] %vm1109_vm2, %v13382_v35 }
  0x32   : > { %6923 = vmatmul.msk.f32.gmra.mxu0 %vm287_vm1, %v254_v17  ;;  %1159 = vst.msk [vmem:[#allocation2 + $0x180] sm:$0xff] %vm1109_vm2, %v13382_v35 }
  0x33   : > { %6931 = vmatmul.msk.f32.gmra.mxu1 %vm287_vm1, %v262_v18  ;;  %1160 = vst.msk [vmem:[#allocation2 + $0x188] sm:$0xff] %vm1109_vm2, %v13382_v35 }
  0x34   : > { %6939 = vmatmul.msk.f32.gmra.mxu2 %vm287_vm1, %v270_v19  ;;  %1161 = vst.msk [vmem:[#allocation2 + $0x190] sm:$0xff] %vm1109_vm2, %v13382_v35 }
  0x35   : > { %6947 = vmatmul.msk.f32.gmra.mxu3 %vm287_vm1, %v278_v20  ;;  %1163 = vst.msk [vmem:[#allocation2 + $0x1a0] sm:$0xff] %vm1109_vm2, %v13382_v35 }
  0x36   : > { %1164 = vst.msk [vmem:[#allocation2 + $0x1a8] sm:$0xff] %vm1109_vm2, %v13382_v35 }
  0x37   : > { %1165 = vst.msk [vmem:[#allocation2 + $0x1b0] sm:$0xff] %vm1109_vm2, %v13382_v35 }
  0x38   : > { %1167 = vst.msk [vmem:[#allocation2 + $0x1c0] sm:$0xff] %vm1109_vm2, %v13382_v35 }
  0x39   : > { %1168 = vst.msk [vmem:[#allocation2 + $0x1c8] sm:$0xff] %vm1109_vm2, %v13382_v35 }
  0x3a   : > { %6924 = vmatmul.msk.f32.gmra.mxu0 %vm287_vm1, %v255_v21  ;;  %1169 = vst.msk [vmem:[#allocation2 + $0x1d0] sm:$0xff] %vm1109_vm2, %v13382_v35 }
  0x3b   : > { %6932 = vmatmul.msk.f32.gmra.mxu1 %vm287_vm1, %v263_v22  ;;  %1171 = vst.msk [vmem:[#allocation2 + $0x1e0] sm:$0xff] %vm1109_vm2, %v13382_v35 }
  0x3c   : > { %6940 = vmatmul.msk.f32.gmra.mxu2 %vm287_vm1, %v271_v23  ;;  %1172 = vst.msk [vmem:[#allocation2 + $0x1e8] sm:$0xff] %vm1109_vm2, %v13382_v35 }
  0x3d   : > { %6948 = vmatmul.msk.f32.gmra.mxu3 %vm287_vm1, %v279_v24  ;;  %1173 = vst.msk [vmem:[#allocation2 + $0x1f0] sm:$0xff] %vm1109_vm2, %v13382_v35 }
  0x3e   : > { %1175 = vst.msk [vmem:[#allocation2 + $0x200] sm:$0xff] %vm1109_vm2, %v13382_v35 }
  0x3f   : > { %1176 = vst.msk [vmem:[#allocation2 + $0x208] sm:$0xff] %vm1109_vm2, %v13382_v35 }
  0x40   : > { %1177 = vst.msk [vmem:[#allocation2 + $0x210] sm:$0xff] %vm1109_vm2, %v13382_v35 }
  0x41   : > { %1179 = vst.msk [vmem:[#allocation2 + $0x220] sm:$0xff] %vm1109_vm2, %v13382_v35 }
  0x42   : > { %6925 = vmatmul.msk.f32.gmra.mxu0 %vm287_vm1, %v256_v25  ;;  %1180 = vst.msk [vmem:[#allocation2 + $0x228] sm:$0xff] %vm1109_vm2, %v13382_v35 }
  0x43   : > { %6933 = vmatmul.msk.f32.gmra.mxu1 %vm287_vm1, %v264_v26  ;;  %1181 = vst.msk [vmem:[#allocation2 + $0x230] sm:$0xff] %vm1109_vm2, %v13382_v35 }
  0x44   : > { %6941 = vmatmul.msk.f32.gmra.mxu2 %vm287_vm1, %v272_v27  ;;  %1183 = vst.msk [vmem:[#allocation2 + $0x240] sm:$0xff] %vm1109_vm2, %v13382_v35 }
  0x45   : > { %6949 = vmatmul.msk.f32.gmra.mxu3 %vm287_vm1, %v280_v28  ;;  %1184 = vst.msk [vmem:[#allocation2 + $0x248] sm:$0xff] %vm1109_vm2, %v13382_v35 }
  0x46   : > { %1185 = vst.msk [vmem:[#allocation2 + $0x250] sm:$0xff] %vm1109_vm2, %v13382_v35 }
  0x47   : > { %1187 = vst.msk [vmem:[#allocation2 + $0x260] sm:$0xff] %vm1109_vm2, %v13382_v35 }
  0x48   : > { %1188 = vst.msk [vmem:[#allocation2 + $0x268] sm:$0xff] %vm1109_vm2, %v13382_v35 }
  0x49   : > { %1189 = vst.msk [vmem:[#allocation2 + $0x270] sm:$0xff] %vm1109_vm2, %v13382_v35 }
  0x4a   : > { %6926 = vmatmul.msk.f32.gmra.mxu0 %vm287_vm1, %v257_v29  ;;  %1191 = vst.msk [vmem:[#allocation2 + $0x280] sm:$0xff] %vm1109_vm2, %v13382_v35 }
  0x4b   : > { %6934 = vmatmul.msk.f32.gmra.mxu1 %vm287_vm1, %v265_v30  ;;  %1192 = vst.msk [vmem:[#allocation2 + $0x288] sm:$0xff] %vm1109_vm2, %v13382_v35 }
  0x4c   : > { %6942 = vmatmul.msk.f32.gmra.mxu2 %vm287_vm1, %v273_v31  ;;  %1193 = vst.msk [vmem:[#allocation2 + $0x290] sm:$0xff] %vm1109_vm2, %v13382_v35 }
  0x4d   : > { %6950 = vmatmul.msk.f32.gmra.mxu3 %vm287_vm1, %v281_v32  ;;  %1195 = vst.msk [vmem:[#allocation2 + $0x2a0] sm:$0xff] %vm1109_vm2, %v13382_v35 }
  0x4e   : > { %1196 = vst.msk [vmem:[#allocation2 + $0x2a8] sm:$0xff] %vm1109_vm2, %v13382_v35 }
  0x4f   : > { %1197 = vst.msk [vmem:[#allocation2 + $0x2b0] sm:$0xff] %vm1109_vm2, %v13382_v35 }
  0x50   : > { %1199 = vst.msk [vmem:[#allocation2 + $0x2c0] sm:$0xff] %vm1109_vm2, %v13382_v35 }
  0x51   : > { %1200 = vst.msk [vmem:[#allocation2 + $0x2c8] sm:$0xff] %vm1109_vm2, %v13382_v35 }
  0x52   : > { %1201 = vst.msk [vmem:[#allocation2 + $0x2d0] sm:$0xff] %vm1109_vm2, %v13382_v35 }
  0x53   : > { %1203 = vst.msk [vmem:[#allocation2 + $0x2e0] sm:$0xff] %vm1109_vm2, %v13382_v35 }
  0x54   : > { %1204 = vst.msk [vmem:[#allocation2 + $0x2e8] sm:$0xff] %vm1109_vm2, %v13382_v35 }
  0x55   : > { %1205 = vst.msk [vmem:[#allocation2 + $0x2f0] sm:$0xff] %vm1109_vm2, %v13382_v35 }
  0x56   : > { %1207 = vst.msk [vmem:[#allocation2 + $0x300] sm:$0xff] %vm1109_vm2, %v13382_v35 }
  0x57   : > { %1208 = vst.msk [vmem:[#allocation2 + $0x308] sm:$0xff] %vm1109_vm2, %v13382_v35 }
  0x58   : > { %1209 = vst.msk [vmem:[#allocation2 + $0x310] sm:$0xff] %vm1109_vm2, %v13382_v35 }
  0x59   : > { %1211 = vst.msk [vmem:[#allocation2 + $0x320] sm:$0xff] %vm1109_vm2, %v13382_v35 }
  0x5a   : > { %1212 = vst.msk [vmem:[#allocation2 + $0x328] sm:$0xff] %vm1109_vm2, %v13382_v35 }
  0x5b   : > { %1213 = vst.msk [vmem:[#allocation2 + $0x330] sm:$0xff] %vm1109_vm2, %v13382_v35 }
  0x5c   : > { %1215 = vst.msk [vmem:[#allocation2 + $0x340] sm:$0xff] %vm1109_vm2, %v13382_v35 }
  0x5d   : > { %1216 = vst.msk [vmem:[#allocation2 + $0x348] sm:$0xff] %vm1109_vm2, %v13382_v35 }
  0x5e   : > { %1217 = vst.msk [vmem:[#allocation2 + $0x350] sm:$0xff] %vm1109_vm2, %v13382_v35 }
  0x5f   : > { %1219 = vst.msk [vmem:[#allocation2 + $0x360] sm:$0xff] %vm1109_vm2, %v13382_v35 }
  0x60   : > { %1220 = vst.msk [vmem:[#allocation2 + $0x368] sm:$0xff] %vm1109_vm2, %v13382_v35 }
  0x61   : > { %1221 = vst.msk [vmem:[#allocation2 + $0x370] sm:$0xff] %vm1109_vm2, %v13382_v35 }
  0x8f   : > { %v405_v34 = vpop.f32.mrf.mxu0 }
  0x90   : > { %v429_v36 = vpop.f32.mrf.mxu1  ;;  %v7556_v37 = vadd.f32 %v7551_v33, %v405_v34 }
  0x91   : > { %v7561_v38 = vadd.f32 %v7551_v33, %v429_v36 }
  0x92   : > { %v501_v39 = vsub.f32 0.0, %v7556_v37 }
  0x93   : > { %v509_v40 = vsub.f32 0.0, %v7561_v38 }
  0x94   : > { %v533_v41 = vmul.f32 1.442695, %v501_v39 }
  0x95   : > { %v549_v42 = vmul.f32 1.442695, %v509_v40 }
  0x96   : > { %7117 = vpow2.f32 %v533_v41 }
  0x97   : > { %7119 = vpow2.f32 %v549_v42  ;;  %v408_v53 = vpop.f32.mrf.mxu0  ;;  %v453_v30 = vpop.f32.mrf.mxu2 }
  0x98   : > { %v432_v54 = vpop.f32.mrf.mxu1  ;;  %v7623_v56 = vadd.f32 %v7551_v33, %v408_v53 }
  0x99   : > { %v7626_v57 = vadd.f32 %v7551_v33, %v432_v54 }
  0x9a   : > { %v502_v60 = vsub.f32 0.0, %v7623_v56 }
  0x9b   : > { %v510_v61 = vsub.f32 0.0, %v7626_v57 }
  0x9c   : > { %v7118_v43 = vpop.eup %7117  ;;  %v535_v0 = vmul.f32 1.442695, %v502_v60 }
  0x9d   : > { %v7120_v44 = vpop.eup %7119  ;;  %v597_v45 = vadd.f32 1.0, %v7118_v43  ;;  %v551_v1 = vmul.f32 1.442695, %v510_v61 }
  0x9e   : > { %v7593_v46 = vadd.f32 1.0, %v7120_v44 }
  0x9f   : > { %7121 = vrcp.f32 %v597_v45  ;;  %v638_v51 = vand.u32 2147483647, %v597_v45  ;;  %v640_v52 = vand.u32 2147483648, %v597_v45  ;;  %vm634_vm4 = vweird.f32 %v597_v45  ;;  %v411_v5 = vpop.f32.mrf.mxu0 }
  0xa0   : > { %7123 = vrcp.f32 %v7593_v46  ;;  %v435_v6 = vpop.f32.mrf.mxu1  ;;  %v7652_v7 = vadd.f32 %v7551_v33, %v411_v5  ;;  %vm746_vm7 = vweird.f32 %v7593_v46  ;;  %v752_v13 = vand.u32 2147483648, %v7593_v46 }
  0xa1   : > { %v641_v62 = vor.u32 1.1754944e-38, %v640_v52  ;;  %vm639_vm6 = vcmp.eq.f32.partialorder %v638_v51, 8.507059e+37  ;;  %7125 = vpow2.f32 %v535_v0  ;;  %v7655_v8 = vadd.f32 %v7551_v33, %v435_v6  ;;  %v477_v52 = vpop.f32.mrf.mxu3 }
  0xa2   : > { %7127 = vpow2.f32 %v551_v1  ;;  %v503_v10 = vsub.f32 0.0, %v7652_v7  ;;  %v750_v17 = vand.u32 2147483647, %v7593_v46  ;;  %v753_v24 = vor.u32 1.1754944e-38, %v752_v13 }
  0xa3   : > { %v511_v11 = vsub.f32 0.0, %v7655_v8  ;;  %v7757_v60 = vadd.f32 %v7551_v33, %v477_v52 }
  0xa4   : > { %v537_v14 = vmul.f32 1.442695, %v503_v10  ;;  %vm751_vm10 = vcmp.eq.f32.partialorder %v750_v17, 8.507059e+37 }
  0xa5   : > { %v7122_v47 = vpop.eup %7121  ;;  %v553_v19 = vmul.f32 1.442695, %v511_v11 }
  0xa6   : > { %v630_v48 = vmul.f32 %v7122_v47, %v597_v45  ;;  %v7614_v49 = vpop.eup %7123  ;;  %vm635_vm3 = vweird.f32 %v7122_v47  ;;  %7129 = vpow2.f32 %v537_v14 }
  0xa7   : > { %v742_v58 = vmul.f32 %v7614_v49, %v7593_v46  ;;  %vm636_vm5 = vmor %vm634_vm4, %vm635_vm3  ;;  %vm747_vm8 = vweird.f32 %v7614_v49  ;;  %v7126_v12 = vpop.eup %7125  ;;  %v414_v22 = vpop.f32.mrf.mxu0 }
  0xa8   : > { %v631_v50 = vsub.f32 1.0, %v630_v48  ;;  %v7128_v15 = vpop.eup %7127  ;;  %v7675_v18 = vadd.f32 1.0, %v7126_v12  ;;  %vm7679_vm9 = vmor %vm746_vm7, %vm747_vm8  ;;  %v438_v23 = vpop.f32.mrf.mxu1  ;;  %v7692_v25 = vadd.f32 %v7551_v33, %v414_v22 }
  0xa9   : > { %v743_v3 = vsub.f32 1.0, %v742_v58  ;;  %v7683_v21 = vadd.f32 1.0, %v7128_v15  ;;  %v7695_v26 = vadd.f32 %v7551_v33, %v438_v23 }
  0xaa   : > { %v632_v55 = vmul.f32 %v7122_v47, %v631_v50  ;;  %7131 = vrcp.f32 %v7675_v18  ;;  %v504_v28 = vsub.f32 0.0, %v7692_v25  ;;  %vm648_vm11 = vweird.f32 %v7675_v18 }
  0xab   : > { %v744_v9 = vmul.f32 %v7614_v49, %v743_v3  ;;  %7133 = vrcp.f32 %v7683_v21  ;;  %v512_v29 = vsub.f32 0.0, %v7695_v26  ;;  %v766_v54 = vand.u32 2147483648, %v7683_v21 }
  0xac   : > { %v633_v59 = vadd.f32 %v7122_v47, %v632_v55  ;;  %7135 = vpow2.f32 %v553_v19  ;;  %v7130_v31 = vpop.eup %7129  ;;  %v539_v34 = vmul.f32 1.442695, %v504_v28  ;;  %vm760_vm13 = vweird.f32 %v7683_v21 }
  0xad   : > { %v745_v16 = vadd.f32 %v7614_v49, %v744_v9  ;;  %v555_v39 = vmul.f32 1.442695, %v512_v29  ;;  %v764_v1 = vand.u32 2147483647, %v7683_v21  ;;  %v525_v9 = vsub.f32 0.0, %v7757_v60 }
  0xae   : > { %v637_v63 = vsel %vm636_vm5, %v7122_v47, %v633_v59  ;;  %v654_v47 = vand.u32 2147483648, %v7675_v18  ;;  %v767_v15 = vor.u32 1.1754944e-38, %v766_v54 }
  0xaf   : > { %v642_v2 = vsel %vm639_vm6, %v641_v62, %v637_v63  ;;  %v749_v27 = vsel %vm7679_vm9, %v7614_v49, %v745_v16  ;;  %v7742_v49 = vadd.f32 %v7551_v33, %v453_v30  ;;  %v417_v51 = vpop.f32.mrf.mxu0  ;;  %v581_v17 = vmul.f32 1.442695, %v525_v9 }
  0xb0   : > { %v7643_v4 = vmul.f32 %v642_v2, %v7556_v37  ;;  %v754_v32 = vsel %vm751_vm10, %v753_v24, %v749_v27  ;;  %v7710_v36 = vpop.eup %7131  ;;  %v7714_v37 = vadd.f32 1.0, %v7130_v31  ;;  %v456_v2 = vpop.f32.mrf.mxu2  ;;  %v7777_v3 = vadd.f32 %v7551_v33, %v417_v51 }
  0xb1   : > { %v7716_v40 = vpop.eup %7133  ;;  %v644_v41 = vmul.f32 %v7710_v36, %v7675_v18  ;;  %v7725_v43 = vmul.f32 %v754_v32, %v7561_v38  ;;  %v652_v38 = vand.u32 2147483647, %v7675_v18  ;;  %vm649_vm12 = vweird.f32 %v7710_v36 }
  0xb2   : > { %1224 = vst.msk [vmem:[#allocation2 + $0xc8] sm:$0xff] %vm1109_vm2, %v7643_v4  ;;  %v7136_v42 = vpop.eup %7135  ;;  %v756_v44 = vmul.f32 %v7716_v40, %v7683_v21  ;;  %7137 = vrcp.f32 %v7714_v37  ;;  %v666_v55 = vand.u32 2147483647, %v7714_v37  ;;  %v668_v58 = vand.u32 2147483648, %v7714_v37  ;;  %vm7769_vm14 = vmor %vm648_vm11, %vm649_vm12 }
  0xb3   : > { %v645_v45 = vsub.f32 1.0, %v644_v41  ;;  %v7733_v46 = vadd.f32 1.0, %v7136_v42  ;;  %7139 = vpow2.f32 %v539_v34  ;;  %v517_v59 = vsub.f32 0.0, %v7742_v49  ;;  %1232 = vst.msk [vmem:[#allocation2 + $0x148] sm:$0xff] %vm1109_vm2, %v7725_v43 }
  0xb4   : > { %v757_v48 = vsub.f32 1.0, %v756_v44  ;;  %7141 = vpow2.f32 %v555_v39  ;;  %vm761_vm15 = vweird.f32 %v7716_v40  ;;  %vm653_vm3 = vcmp.eq.f32.partialorder %v652_v38, 8.507059e+37 }
  0xb5   : > { %v646_v50 = vmul.f32 %v7710_v36, %v645_v45  ;;  %7143 = vrcp.f32 %v7733_v46  ;;  %v565_v6 = vmul.f32 1.442695, %v517_v59  ;;  %vm7785_vm1 = vmor %vm760_vm13, %vm761_vm15  ;;  %v655_v14 = vor.u32 1.1754944e-38, %v654_v47 }
  0xb6   : > { %v758_v53 = vmul.f32 %v7716_v40, %v757_v48  ;;  %vm662_vm4 = vweird.f32 %v7714_v37  ;;  %vm765_vm5 = vcmp.eq.f32.partialorder %v764_v1, 8.507059e+37  ;;  %vm7809_vm6 = vcmp.eq.f32.partialorder %v666_v55, 8.507059e+37 }
  0xb7   : > { %v647_v61 = vadd.f32 %v7710_v36, %v646_v50  ;;  %7145 = vpow2.f32 %v565_v6  ;;  %v669_v24 = vor.u32 1.1754944e-38, %v668_v58  ;;  %v505_v28 = vsub.f32 0.0, %v7777_v3 }
  0xb8   : > { %v7761_v62 = vpop.eup %7137  ;;  %v759_v0 = vadd.f32 %v7716_v40, %v758_v53  ;;  %7147 = vpow2.f32 %v581_v17  ;;  %vm774_vm8 = vweird.f32 %v7733_v46  ;;  %v780_v34 = vand.u32 2147483648, %v7733_v46  ;;  %v459_v48 = vpop.f32.mrf.mxu2 }
  0xb9   : > { %v7140_v5 = vpop.eup %7139  ;;  %v651_v10 = vsel %vm7769_vm14, %v7710_v36, %v647_v61  ;;  %v658_v12 = vmul.f32 %v7761_v62, %v7714_v37  ;;  %vm663_vm7 = vweird.f32 %v7761_v62  ;;  %v441_v36 = vpop.f32.mrf.mxu1  ;;  %v778_v41 = vand.u32 2147483647, %v7733_v46 }
  0xba   : > { %v7142_v13 = vpop.eup %7141  ;;  %v763_v18 = vsel %vm7785_vm1, %v7716_v40, %v759_v0  ;;  %v656_v19 = vsel %vm653_vm3, %v655_v14, %v651_v10  ;;  %v7805_v22 = vadd.f32 1.0, %v7140_v5  ;;  %v7840_v44 = vadd.f32 %v7551_v33, %v456_v2  ;;  %vm7853_vm10 = vmor %vm662_vm4, %vm663_vm7  ;;  %v480_v61 = vpop.f32.mrf.mxu3 }
  0xbb   : > { %v7794_v16 = vpop.eup %7143  ;;  %v659_v20 = vsub.f32 1.0, %v658_v12  ;;  %v7813_v27 = vadd.f32 1.0, %v7142_v13  ;;  %v768_v29 = vsel %vm765_vm5, %v767_v15, %v763_v18  ;;  %v7823_v32 = vmul.f32 %v656_v19, %v7623_v56 }
  0xbc   : > { %v770_v21 = vmul.f32 %v7794_v16, %v7733_v46  ;;  %7149 = vrcp.f32 %v7805_v22  ;;  %vm775_vm9 = vweird.f32 %v7794_v16  ;;  %v7837_v42 = vmul.f32 %v768_v29, %v7626_v57 }
  0xbd   : > { %v660_v30 = vmul.f32 %v7761_v62, %v659_v20  ;;  %v7146_v56 = vpop.eup %7145  ;;  %7151 = vrcp.f32 %v7813_v27  ;;  %v7843_v45 = vmul.f32 1.442695, %v505_v28  ;;  %v682_v50 = vand.u32 2147483648, %v7805_v22  ;;  %vm7872_vm11 = vmor %vm774_vm8, %vm775_vm9  ;;  %1225 = vst.msk [vmem:[#allocation2 + $0xd0] sm:$0xff] %vm1109_vm2, %v7823_v32 }
  0xbe   : > { %v771_v31 = vsub.f32 1.0, %v770_v21  ;;  %v7847_v38 = vadd.f32 1.0, %v7146_v56  ;;  %v7860_v51 = vadd.f32 %v7551_v33, %v441_v36  ;;  %v7148_v52 = vpop.eup %7147  ;;  %v518_v53 = vsub.f32 0.0, %v7840_v44  ;;  %1233 = vst.msk [vmem:[#allocation2 + $0x150] sm:$0xff] %vm1109_vm2, %v7837_v42 }
  0xbf   : > { %v661_v39 = vadd.f32 %v7761_v62, %v660_v30  ;;  %v781_v55 = vor.u32 1.1754944e-38, %v780_v34  ;;  %v7877_v58 = vadd.f32 %v7551_v33, %v459_v48  ;;  %vm7883_vm12 = vcmp.eq.f32.partialorder %v778_v41, 8.507059e+37 }
  0xc0   : > { %v772_v40 = vmul.f32 %v7794_v16, %v771_v31  ;;  %7153 = vrcp.f32 %v7847_v38  ;;  %v862_v59 = vand.u32 2147483647, %v7847_v38  ;;  %v680_v46 = vand.u32 2147483647, %v7805_v22 }
  0xc1   : > { %v665_v37 = vsel %vm7853_vm10, %v7761_v62, %v661_v39  ;;  %v864_v0 = vand.u32 2147483648, %v7847_v38  ;;  %v7893_v1 = vadd.f32 1.0, %v7148_v52  ;;  %v567_v2 = vmul.f32 1.442695, %v518_v53  ;;  %v462_v52 = vpop.f32.mrf.mxu2 }
  0xc2   : > { %v773_v57 = vadd.f32 %v7794_v16, %v772_v40  ;;  %v7888_v63 = vpop.eup %7149  ;;  %v7896_v5 = vadd.f32 %v7551_v33, %v480_v61  ;;  %v670_v6 = vsel %vm7809_vm6, %v669_v24, %v665_v37  ;;  %v519_v10 = vsub.f32 0.0, %v7877_v58  ;;  %v483_v48 = vpop.f32.mrf.mxu3 }
  0xc3   : > { %v7906_v11 = vor.u32 1.1754944e-38, %v682_v50  ;;  %v7908_v12 = vpop.eup %7151  ;;  %vm858_vm13 = vweird.f32 %v7847_v38  ;;  %7155 = vrcp.f32 %v7893_v1  ;;  %v974_v13 = vand.u32 2147483647, %v7893_v1 }
  0xc4   : > { %v777_v9 = vsel %vm7872_vm11, %v7794_v16, %v773_v57  ;;  %v976_v14 = vand.u32 2147483648, %v7893_v1  ;;  %7157 = vpow2.f32 %v567_v2  ;;  %v526_v15 = vsub.f32 0.0, %v7896_v5 }
  0xc5   : > { %v782_v16 = vsel %vm7883_vm12, %v781_v55, %v777_v9  ;;  %v569_v17 = vmul.f32 1.442695, %v519_v10  ;;  %vm7923_vm14 = vcmp.eq.f32.partialorder %v862_v59, 8.507059e+37  ;;  %v7927_v19 = vor.u32 1.1754944e-38, %v864_v0 }
  0xc6   : > { %v7930_v20 = vmul.f32 %v670_v6, %v7652_v7  ;;  %v672_v21 = vmul.f32 %v7888_v63, %v7805_v22  ;;  %v7934_v23 = vpop.eup %7153  ;;  %vm970_vm15 = vweird.f32 %v7893_v1  ;;  %v583_v24 = vmul.f32 1.442695, %v526_v15 }
  0xc7   : > { %7159 = vpow2.f32 %v569_v17  ;;  %v784_v28 = vmul.f32 %v7908_v12, %v7813_v27  ;;  %v854_v7 = vmul.f32 %v7934_v23, %v7847_v38  ;;  %v7945_v29 = vor.u32 1.1754944e-38, %v976_v14 }
  0xc8   : > { %v7948_v30 = vmul.f32 %v782_v16, %v7655_v8  ;;  %v673_v31 = vsub.f32 1.0, %v672_v21  ;;  %vm676_vm1 = vweird.f32 %v7805_v22  ;;  %vm7953_vm3 = vcmp.eq.f32.partialorder %v974_v13, 8.507059e+37  ;;  %1226 = vst.msk [vmem:[#allocation2 + $0xe8] sm:$0xff] %vm1109_vm2, %v7930_v20 }
  0xc9   : > { %7161 = vpow2.f32 %v583_v24  ;;  %vm677_vm4 = vweird.f32 %v7888_v63  ;;  %v785_v36 = vsub.f32 1.0, %v784_v28  ;;  %v792_v39 = vand.u32 2147483647, %v7813_v27  ;;  %v7959_v40 = vpop.eup %7155 }
  0xca   : > { %v855_v8 = vsub.f32 1.0, %v854_v7  ;;  %vm859_vm5 = vweird.f32 %v7934_v23  ;;  %v674_v41 = vmul.f32 %v7888_v63, %v673_v31  ;;  %v794_v56 = vand.u32 2147483648, %v7813_v27  ;;  %v7158_v47 = vpop.eup %7157  ;;  %1234 = vst.msk [vmem:[#allocation2 + $0x168] sm:$0xff] %vm1109_vm2, %v7948_v30 }
  0xcb   : > { %v966_v57 = vmul.f32 %v7959_v40, %v7893_v1  ;;  %v786_v50 = vmul.f32 %v7908_v12, %v785_v36  ;;  %vm788_vm6 = vweird.f32 %v7813_v27  ;;  %vm789_vm7 = vweird.f32 %v7908_v12  ;;  %vm7990_vm8 = vmor %vm858_vm13, %vm859_vm5 }
  0xcc   : > { %v856_v53 = vmul.f32 %v7934_v23, %v855_v8  ;;  %v7976_v37 = vadd.f32 1.0, %v7158_v47  ;;  %v7979_v54 = vadd.f32 %v7551_v33, %v483_v48  ;;  %v7982_v55 = vadd.f32 %v7551_v33, %v462_v52  ;;  %vm8085_vm5 = vmor %vm788_vm6, %vm789_vm7  ;;  %v486_v48 = vpop.f32.mrf.mxu3 }
  0xcd   : > { %v7160_v59 = vpop.eup %7159  ;;  %v967_v62 = vsub.f32 1.0, %v966_v57  ;;  %vm971_vm9 = vweird.f32 %v7959_v40  ;;  %v675_v0 = vadd.f32 %v7888_v63, %v674_v41  ;;  %vm7998_vm10 = vcmp.eq.f32.partialorder %v680_v46, 8.507059e+37 }
  0xce   : > { %vm8002_vm11 = vcmp.eq.f32.partialorder %v792_v39, 8.507059e+37  ;;  %v857_v38 = vadd.f32 %v7934_v23, %v856_v53  ;;  %7163 = vrcp.f32 %v7976_v37  ;;  %v787_v9 = vadd.f32 %v7908_v12, %v786_v50  ;;  %vm8027_vm12 = vmor %vm970_vm15, %vm971_vm9 }
  0xcf   : > { %v795_v10 = vor.u32 1.1754944e-38, %v794_v56  ;;  %v7162_v13 = vpop.eup %7161  ;;  %v968_v46 = vmul.f32 %v7959_v40, %v967_v62  ;;  %v876_v14 = vand.u32 2147483647, %v7976_v37  ;;  %v878_v15 = vand.u32 2147483648, %v7976_v37  ;;  %vm8047_vm15 = vmor %vm676_vm1, %vm677_vm4 }
  0xd0   : > { %v8016_v16 = vadd.f32 1.0, %v7160_v59  ;;  %v861_v17 = vsel %vm7990_vm8, %v7934_v23, %v857_v38  ;;  %v8031_v24 = vadd.f32 1.0, %v7162_v13  ;;  %v527_v28 = vsub.f32 0.0, %v7979_v54 }
  0xd1   : > { %v520_v7 = vsub.f32 0.0, %v7982_v55  ;;  %v866_v23 = vsel %vm7923_vm14, %v7927_v19, %v861_v17  ;;  %v969_v31 = vadd.f32 %v7959_v40, %v968_v46  ;;  %vm872_vm13 = vweird.f32 %v7976_v37  ;;  %v465_v17 = vpop.f32.mrf.mxu2 }
  0xd2   : > { %7165 = vrcp.f32 %v8016_v16  ;;  %v8054_v18 = vmul.f32 %v866_v23, %v7742_v49  ;;  %v8056_v19 = vor.u32 1.1754944e-38, %v878_v15  ;;  %v679_v36 = vsel %vm8047_vm15, %v7888_v63, %v675_v0 }
  0xd3   : > { %7167 = vrcp.f32 %v8031_v24  ;;  %v973_v22 = vsel %vm8027_vm12, %v7959_v40, %v969_v31  ;;  %vm8067_vm14 = vcmp.eq.f32.partialorder %v876_v14, 8.507059e+37  ;;  %vm984_vm1 = vweird.f32 %v8031_v24 }
  0xd4   : > { %13717 = vst [vmem:[#allocation3_spill] sm:$0xff] %v8054_v18  ;;  %v990_v49 = vand.u32 2147483648, %v8031_v24  ;;  %v890_v8 = vand.u32 2147483647, %v8016_v16  ;;  %v7164_v41 = vpop.eup %7163  ;;  %v978_v63 = vsel %vm7953_vm3, %v7945_v29, %v973_v22  ;;  %v988_v40 = vand.u32 2147483647, %v8031_v24 }
  0xd5   : > { %1240 = vst.msk [vmem:[#allocation2 + $0x1c8] sm:$0xff] %vm1109_vm2, %v8054_v18  ;;  %vm886_vm4 = vweird.f32 %v8016_v16  ;;  %v585_v56 = vmul.f32 1.442695, %v527_v28  ;;  %v8090_v57 = vmul.f32 %v978_v63, %v7757_v60  ;;  %v868_v29 = vmul.f32 %v7164_v41, %v7976_v37 }
  0xd6   : > { %vm873_vm3 = vweird.f32 %v7164_v41  ;;  %v892_v34 = vand.u32 2147483648, %v8016_v16  ;;  %v8096_v50 = vor.u32 1.1754944e-38, %v990_v49  ;;  %vm8100_vm6 = vcmp.eq.f32.partialorder %v890_v8, 8.507059e+37 }
  0xd7   : > { %13722 = vst [vmem:[#allocation4_spill] sm:$0xff] %v8090_v57  ;;  %7169 = vpow2.f32 %v585_v56  ;;  %v684_v60 = vsel %vm7998_vm10, %v7906_v11, %v679_v36  ;;  %v869_v53 = vsub.f32 1.0, %v868_v29  ;;  %v791_v61 = vsel %vm8085_vm5, %v7908_v12, %v787_v9  ;;  %v1368_v9 = vld [vmem:[%s13379_s3] sm:$0x3]  ;;  %vm8135_vm9 = vmor %vm872_vm13, %vm873_vm3 }
  0xd8   : > { %v7166_v52 = vpop.eup %7165  ;;  %1248 = vst.msk [vmem:[#allocation2 + $0x248] sm:$0xff] %vm1109_vm2, %v8090_v57  ;;  %v8110_v59 = vmul.f32 %v684_v60, %v7692_v25  ;;  %v571_v62 = vmul.f32 1.442695, %v520_v7  ;;  %v796_v11 = vsel %vm8002_vm11, %v795_v10, %v791_v61  ;;  %v8121_v38 = vadd.f32 %v7551_v33, %v486_v48  ;;  %v8872_v57 = vld [vmem:[#allocation2 + $0x2c8] sm:$0xff] }
  0xd9   : > { %v7168_v0 = vpop.eup %7167  ;;  %v882_v2 = vmul.f32 %v7166_v52, %v8016_v16  ;;  %vm887_vm7 = vweird.f32 %v7166_v52  ;;  %v870_v25 = vmul.f32 %v7164_v41, %v869_v53  ;;  %v8127_v12 = vmul.f32 %v796_v11, %v7695_v26 }
  0xda   : > { %v980_v13 = vmul.f32 %v7168_v0, %v8031_v24  ;;  %vm985_vm8 = vweird.f32 %v7168_v0  ;;  %1227 = vst.msk [vmem:[#allocation2 + $0xf0] sm:$0xff] %vm1109_vm2, %v8110_v59  ;;  %7171 = vpow2.f32 %v571_v62  ;;  %v528_v46 = vsub.f32 0.0, %v8121_v38  ;;  %vm8153_vm11 = vmor %vm886_vm4, %vm887_vm7 }
  0xdb   : > { %v883_v10 = vsub.f32 1.0, %v882_v2  ;;  %v513_v14 = vsub.f32 0.0, %v7860_v51  ;;  %v871_v15 = vadd.f32 %v7164_v41, %v870_v25  ;;  %1235 = vst.msk [vmem:[#allocation2 + $0x170] sm:$0xff] %vm1109_vm2, %v8127_v12  ;;  %7173 = vpow2.f32 %v7843_v45  ;;  %vm8167_vm12 = vmor %vm984_vm1, %vm985_vm8 }
  0xdc   : > { %v981_v26 = vsub.f32 1.0, %v980_v13  ;;  %vm2987_vm10 = vcmask 1041408   ;;  %v587_v28 = vmul.f32 1.442695, %v528_v46  ;;  %v8146_v23 = vadd.f32 %v7551_v33, %v465_v17 }
  0xdd   : > { %v7170_v37 = vpop.eup %7169  ;;  %v884_v21 = vmul.f32 %v7166_v52, %v883_v10  ;;  %v557_v7 = vmul.f32 1.442695, %v513_v14  ;;  %6984 = vmatpush.msk.msrb.mxu2 %vm2987_vm10, %v1368_v9  ;;  %v875_v31 = vsel %vm8135_vm9, %v7164_v41, %v871_v15  ;;  %v893_v36 = vor.u32 1.1754944e-38, %v892_v34  ;;  %v444_v10 = vpop.f32.mrf.mxu1 }
  0xde   : > { %v982_v1 = vmul.f32 %v7168_v0, %v981_v26  ;;  %v8157_v22 = vadd.f32 1.0, %v7170_v37  ;;  %6985 = vmatmul.msk.f32.vlgmr.msrb.gmra.mxu2 %vm1109_vm2, %v7643_v4  ;;  %v880_v49 = vsel %vm8067_vm14, %v8056_v19, %v875_v31  ;;  %7175 = vpow2.f32 %v587_v28  ;;  %v489_v4 = vpop.f32.mrf.mxu3 }
  0xdf   : > { %v885_v16 = vadd.f32 %v7166_v52, %v884_v21  ;;  %v521_v41 = vsub.f32 0.0, %v8146_v23  ;;  %v8173_v63 = vmul.f32 %v880_v49, %v7840_v44  ;;  %vm989_vm13 = vcmp.eq.f32.partialorder %v988_v40, 8.507059e+37 }
  0xe0   : > { %v983_v56 = vadd.f32 %v7168_v0, %v982_v1  ;;  %7177 = vrcp.f32 %v8157_v22  ;;  %v7172_v19 = vpop.eup %7171  ;;  %v1002_v47 = vand.u32 2147483647, %v8157_v22  ;;  %v8182_v29 = vadd.f32 %v7551_v33, %v489_v4 }
  0xe1   : > { %13731 = vst [vmem:[#allocation5_spill] sm:$0xff] %v8173_v63  ;;  %v889_v39 = vsel %vm8153_vm11, %v7166_v52, %v885_v16  ;;  %7179 = vpow2.f32 %v557_v7  ;;  %v7174_v34 = vpop.eup %7173  ;;  %v8190_v40 = vadd.f32 1.0, %v7172_v19  ;;  %v573_v48 = vmul.f32 1.442695, %v521_v41 }
  0xe2   : > { %1241 = vst.msk [vmem:[#allocation2 + $0x1d0] sm:$0xff] %vm1109_vm2, %v8173_v63  ;;  %v987_v44 = vsel %vm8167_vm12, %v7168_v0, %v983_v56  ;;  %v894_v24 = vsel %vm8100_vm6, %v893_v36, %v889_v39  ;;  %v1004_v53 = vand.u32 2147483648, %v8157_v22  ;;  %v8204_v0 = vadd.f32 1.0, %v7174_v34 }
  0xe3   : > { %v992_v60 = vsel %vm989_vm13, %v8096_v50, %v987_v44  ;;  %v8194_v52 = vmul.f32 %v894_v24, %v7877_v58  ;;  %7181 = vrcp.f32 %v8190_v40  ;;  %v904_v27 = vand.u32 2147483647, %v8190_v40  ;;  %v420_v50 = vpop.f32.mrf.mxu0 }
  0xe4   : > { %v8198_v61 = vmul.f32 %v992_v60, %v7896_v5  ;;  %v7176_v62 = vpop.eup %7175  ;;  %7183 = vpow2.f32 %v573_v48  ;;  %vm998_vm15 = vweird.f32 %v8157_v22  ;;  %vm8209_vm14 = vcmp.eq.f32.partialorder %v1002_v47, 8.507059e+37 }
  0xe5   : > { %13732 = vst [vmem:[#allocation6_spill] sm:$0xff] %v8194_v52  ;;  %v8213_v5 = vadd.f32 1.0, %v7176_v62  ;;  %v529_v11 = vsub.f32 0.0, %v8182_v29  ;;  %v1005_v9 = vor.u32 1.1754944e-38, %v1004_v53  ;;  %v906_v6 = vand.u32 2147483648, %v8190_v40 }
  0xe6   : > { %13733 = vst [vmem:[#allocation7_spill] sm:$0xff] %v8198_v61  ;;  %v7178_v2 = vpop.eup %7177  ;;  %6986 = vmatmul.msk.f32.gmra.mxu2 %vm1109_vm2, %v7823_v32  ;;  %7185 = vrcp.f32 %v8204_v0  ;;  %vm900_vm1 = vweird.f32 %v8190_v40  ;;  %v8225_v14 = vadd.f32 %v7551_v33, %v420_v50  ;;  %vm8227_vm5 = vcmp.eq.f32.partialorder %v904_v27, 8.507059e+37 }
  0xe7   : > { %1242 = vst.msk [vmem:[#allocation2 + $0x1e8] sm:$0xff] %vm1109_vm2, %v8194_v52  ;;  %v7180_v25 = vpop.eup %7179  ;;  %v994_v13 = vmul.f32 %v7178_v2, %v8157_v22  ;;  %7187 = vrcp.f32 %v8213_v5  ;;  %v1018_v46 = vand.u32 2147483648, %v8213_v5  ;;  %vm999_vm4 = vweird.f32 %v7178_v2 }
  0xe8   : > { %1249 = vst.msk [vmem:[#allocation2 + $0x250] sm:$0xff] %vm1109_vm2, %v8198_v61  ;;  %v1016_v26 = vand.u32 2147483647, %v8213_v5  ;;  %v696_v17 = vand.u32 2147483648, %v8204_v0  ;;  %v694_v21 = vand.u32 2147483647, %v8204_v0  ;;  %v8237_v31 = vadd.f32 %v7551_v33, %v444_v10  ;;  %vm8243_vm6 = vmor %vm998_vm15, %vm999_vm4 }
  0xe9   : > { %v995_v15 = vsub.f32 1.0, %v994_v13  ;;  %v7182_v37 = vpop.eup %7181  ;;  %v8234_v28 = vadd.f32 1.0, %v7180_v25  ;;  %v589_v7 = vmul.f32 1.442695, %v529_v11  ;;  %v907_v49 = vor.u32 1.1754944e-38, %v906_v6  ;;  %v468_v6 = vpop.f32.mrf.mxu2 }
  0xea   : > { %v7184_v1 = vpop.eup %7183  ;;  %v896_v36 = vmul.f32 %v7182_v37, %v8190_v40  ;;  %vm1012_vm3 = vweird.f32 %v8213_v5  ;;  %vm901_vm7 = vweird.f32 %v7182_v37  ;;  %v8247_v16 = vor.u32 1.1754944e-38, %v1018_v46 }
  0xeb   : > { %v996_v45 = vmul.f32 %v7178_v2, %v995_v15  ;;  %vm690_vm8 = vweird.f32 %v8204_v0  ;;  %7189 = vrcp.f32 %v8234_v28  ;;  %vm8251_vm9 = vcmp.eq.f32.partialorder %v1016_v26, 8.507059e+37  ;;  %vm8275_vm13 = vmor %vm900_vm1, %vm901_vm7 }
  0xec   : > { %v7186_v33 = vpop.eup %7185  ;;  %v897_v56 = vsub.f32 1.0, %v896_v36  ;;  %v697_v19 = vor.u32 1.1754944e-38, %v696_v17  ;;  %v8255_v22 = vadd.f32 1.0, %v7184_v1  ;;  %vm8258_vm11 = vcmp.eq.f32.partialorder %v694_v21, 8.507059e+37 }
  0xed   : > { %v997_v41 = vadd.f32 %v7178_v2, %v996_v45  ;;  %v7188_v39 = vpop.eup %7187  ;;  %v686_v47 = vmul.f32 %v7186_v33, %v8204_v0  ;;  %v806_v44 = vand.u32 2147483647, %v8234_v28  ;;  %v808_v24 = vand.u32 2147483648, %v8234_v28 }
  0xee   : > { %7191 = vpow2.f32 %v589_v7  ;;  %6987 = vmatmul.msk.f32.gmra.mxu2 %vm1109_vm2, %v7930_v20  ;;  %v898_v60 = vmul.f32 %v7182_v37, %v897_v56  ;;  %v1008_v53 = vmul.f32 %v7188_v39, %v8213_v5  ;;  %vm802_vm12 = vweird.f32 %v8234_v28  ;;  %v8315_v56 = vld [vmem:[%s13378_s2] ss:$0 sm:$0xff] }
  0xef   : > { %v1001_v48 = vsel %vm8243_vm6, %v7178_v2, %v997_v41  ;;  %v687_v50 = vsub.f32 1.0, %v686_v47  ;;  %vm691_vm15 = vweird.f32 %v7186_v33  ;;  %7193 = vrcp.f32 %v8255_v22 }
  0xf0   : > { %v1006_v62 = vsel %vm8209_vm14, %v1005_v9, %v1001_v48  ;;  %v899_v2 = vadd.f32 %v7182_v37, %v898_v60  ;;  %v1009_v11 = vsub.f32 1.0, %v1008_v53  ;;  %vm1013_vm4 = vweird.f32 %v7188_v39  ;;  %vm692_vm7 = vmor %vm690_vm8, %vm691_vm15  ;;  %v423_v53 = vpop.f32.mrf.mxu0 }
  0xf1   : > { %v8281_v20 = vmul.f32 %v1006_v62, %v7979_v54  ;;  %v7190_v25 = vpop.eup %7189  ;;  %v688_v58 = vmul.f32 %v7186_v33, %v687_v50  ;;  %vm8283_vm14 = vcmp.eq.f32.partialorder %v806_v44, 8.507059e+37  ;;  %v809_v40 = vor.u32 1.1754944e-38, %v808_v24  ;;  %vm8298_vm1 = vmor %vm1012_vm3, %vm1013_vm4  ;;  %v447_v62 = vpop.f32.mrf.mxu1 }
  0xf2   : > { %v506_v9 = vsub.f32 0.0, %v8225_v14  ;;  %v903_v54 = vsel %vm8275_vm13, %v7182_v37, %v899_v2  ;;  %v1010_v10 = vmul.f32 %v7188_v39, %v1009_v11  ;;  %v798_v46 = vmul.f32 %v7190_v25, %v8234_v28 }
  0xf3   : > { %13746 = vst [vmem:[#allocation8_spill] sm:$0xff] %v8281_v20  ;;  %v918_v15 = vand.u32 2147483647, %v8255_v22  ;;  %v908_v17 = vsel %vm8227_vm5, %v907_v49, %v903_v54  ;;  %v689_v7 = vadd.f32 %v7186_v33, %v688_v58  ;;  %vm803_vm6 = vweird.f32 %v7190_v25  ;;  %v471_v58 = vpop.f32.mrf.mxu2 }
  0xf4   : > { %1250 = vst.msk [vmem:[#allocation2 + $0x268] sm:$0xff] %vm1109_vm2, %v8281_v20  ;;  %v7192_v26 = vpop.eup %7191  ;;  %v920_v1 = vand.u32 2147483648, %v8255_v22  ;;  %v8304_v37 = vmul.f32 %v908_v17, %v7982_v55  ;;  %v1011_v45 = vadd.f32 %v7188_v39, %v1010_v10  ;;  %v799_v32 = vsub.f32 1.0, %v798_v46  ;;  %vm8336_vm5 = vmor %vm802_vm12, %vm803_vm6 }
  0xf5   : > { %v8309_v36 = vadd.f32 1.0, %v7192_v26  ;;  %v7194_v5 = vpop.eup %7193  ;;  %v693_v49 = vsel %vm692_vm7, %v7186_v33, %v689_v7  ;;  %v543_v8 = vmul.f32 1.442695, %v506_v9  ;;  %v514_v41 = vsub.f32 0.0, %v8237_v31 }
  0xf6   : > { %13751 = vst [vmem:[#allocation9_spill] sm:$0xff] %v8304_v37  ;;  %v8318_v55 = vadd.f32 %v8315_v56, %v468_v6  ;;  %6988 = vmatmul.msk.f32.gmra.mxu2 %vm1109_vm2, %v8110_v59  ;;  %v1015_v0 = vsel %vm8298_vm1, %v7188_v39, %v1011_v45  ;;  %v698_v33 = vsel %vm8258_vm11, %v697_v19, %v693_v49  ;;  %vm914_vm3 = vweird.f32 %v8255_v22 }
  0xf7   : > { %1243 = vst.msk [vmem:[#allocation2 + $0x1f0] sm:$0xff] %vm1109_vm2, %v8304_v37  ;;  %v800_v47 = vmul.f32 %v7190_v25, %v799_v32  ;;  %v910_v44 = vmul.f32 %v7194_v5, %v8255_v22  ;;  %v1020_v24 = vsel %vm8251_vm9, %v8247_v16, %v1015_v0  ;;  %v1081_v48 = vmul.f32 %v698_v33, %v7777_v3  ;;  %v1346_v37 = vld [vmem:[#allocation2 + $0x2d0] sm:$0xff] }
  0xf8   : > { %7195 = vrcp.f32 %v8309_v36  ;;  %v8343_v19 = vmul.f32 %v1020_v24, %v8121_v38  ;;  %vm915_vm8 = vweird.f32 %v7194_v5  ;;  %vm8346_vm9 = vcmp.eq.f32.partialorder %v918_v15, 8.507059e+37  ;;  %v426_v3 = vpop.f32.mrf.mxu0 }
  0xf9   : > { %v801_v39 = vadd.f32 %v7190_v25, %v800_v47  ;;  %v911_v34 = vsub.f32 1.0, %v910_v44  ;;  %1228 = vst.msk [vmem:[#allocation2 + $0x108] sm:$0xff] %vm1109_vm2, %v1081_v48  ;;  %7197 = vpow2.f32 %v543_v8  ;;  %v522_v28 = vsub.f32 0.0, %v8318_v55  ;;  %vm8359_vm11 = vmor %vm914_vm3, %vm915_vm8 }
  0xfa   : > { %13754 = vst [vmem:[#allocation10_spill] sm:$0xff] %v8343_v19  ;;  %v921_v4 = vor.u32 1.1754944e-38, %v920_v1  ;;  %v559_v60 = vmul.f32 1.442695, %v514_v41  ;;  %vm1026_vm12 = vweird.f32 %v8309_v36  ;;  %v1030_v2 = vand.u32 2147483647, %v8309_v36 }
  0xfb   : > { %1251 = vst.msk [vmem:[#allocation2 + $0x270] sm:$0xff] %vm1109_vm2, %v8343_v19  ;;  %v805_v16 = vsel %vm8336_vm5, %v7190_v25, %v801_v39  ;;  %v912_v38 = vmul.f32 %v7194_v5, %v911_v34  ;;  %v575_v11 = vmul.f32 1.442695, %v522_v28  ;;  %v492_v25 = vpop.f32.mrf.mxu3  ;;  %v8373_v54 = vadd.f32 %v8315_v56, %v423_v53 }
  0xfc   : > { %v810_v27 = vsel %vm8283_vm14, %v809_v40, %v805_v16  ;;  %7199 = vpow2.f32 %v559_v60  ;;  %v8369_v13 = vadd.f32 %v8315_v56, %v492_v25  ;;  %v1032_v40 = vand.u32 2147483648, %v8309_v36 }
  0xfd   : > { %v8366_v9 = vmul.f32 %v810_v27, %v7860_v51  ;;  %v913_v6 = vadd.f32 %v7194_v5, %v912_v38  ;;  %7201 = vpow2.f32 %v575_v11  ;;  %v8376_v10 = vadd.f32 %v8315_v56, %v447_v62 }
  0xfe   : > { %v7196_v22 = vpop.eup %7195  ;;  %6989 = vmatmul.msk.f32.gmra.mxu2 %vm1109_vm2, %v1081_v48  ;;  %v530_v15 = vsub.f32 0.0, %v8369_v13  ;;  %v8386_v26 = vadd.f32 %v8315_v56, %v471_v58  ;;  %v507_v7 = vsub.f32 0.0, %v8373_v54  ;;  %vm8399_vm15 = vcmp.eq.f32.partialorder %v1030_v2, 8.507059e+37 }
  0xff   : > { %1236 = vst.msk [vmem:[#allocation2 + $0x188] sm:$0xff] %vm1109_vm2, %v8366_v9  ;;  %v917_v51 = vsel %vm8359_vm11, %v7194_v5, %v913_v6  ;;  %v1022_v46 = vmul.f32 %v7196_v22, %v8309_v36  ;;  %v7198_v17 = vpop.eup %7197  ;;  %vm1027_vm13 = vweird.f32 %v7196_v22  ;;  %v515_v1 = vsub.f32 0.0, %v8376_v10 }
 0x100   : > { %v922_v21 = vsel %vm8346_vm9, %v921_v4, %v917_v51  ;;  %v8395_v5 = vadd.f32 1.0, %v7198_v17  ;;  %v591_v49 = vmul.f32 1.442695, %v530_v15  ;;  %v545_v8 = vmul.f32 1.442695, %v507_v7  ;;  %vm8406_vm4 = vmor %vm1026_vm12, %vm1027_vm13 }
 0x101   : > { %v8393_v45 = vmul.f32 %v922_v21, %v8146_v23  ;;  %v1023_v32 = vsub.f32 1.0, %v1022_v46  ;;  %v1033_v44 = vor.u32 1.1754944e-38, %v1032_v40  ;;  %v523_v48 = vsub.f32 0.0, %v8386_v26  ;;  %v474_v23 = vpop.f32.mrf.mxu2 }
 0x102   : > { %v7200_v41 = vpop.eup %7199  ;;  %7203 = vrcp.f32 %v8395_v5  ;;  %v561_v34 = vmul.f32 1.442695, %v515_v1  ;;  %v708_v28 = vand.u32 2147483647, %v8395_v5  ;;  %v710_v38 = vand.u32 2147483648, %v8395_v5 }
 0x103   : > { %13759 = vst [vmem:[#allocation11_spill] sm:$0xff] %v8393_v45  ;;  %v1024_v0 = vmul.f32 %v7196_v22, %v1023_v32  ;;  %v7202_v47 = vpop.eup %7201  ;;  %v8410_v24 = vadd.f32 1.0, %v7200_v41  ;;  %7205 = vpow2.f32 %v591_v49  ;;  %v495_v36 = vpop.f32.mrf.mxu3  ;;  %v577_v62 = vmul.f32 1.442695, %v523_v48 }
 0x104   : > { %1244 = vst.msk [vmem:[#allocation2 + $0x208] sm:$0xff] %vm1109_vm2, %v8393_v45  ;;  %v8413_v39 = vadd.f32 1.0, %v7202_v47  ;;  %7207 = vpow2.f32 %v545_v8  ;;  %v8422_v4 = vadd.f32 %v8315_v56, %v495_v36  ;;  %v8428_v27 = vadd.f32 %v8315_v56, %v426_v3  ;;  %v450_v47 = vpop.f32.mrf.mxu1 }
 0x105   : > { %v1025_v59 = vadd.f32 %v7196_v22, %v1024_v0  ;;  %7209 = vrcp.f32 %v8410_v24  ;;  %v820_v53 = vand.u32 2147483647, %v8410_v24  ;;  %vm704_vm14 = vweird.f32 %v8395_v5 }
 0x106   : > { %7211 = vrcp.f32 %v8413_v39  ;;  %v822_v11 = vand.u32 2147483648, %v8410_v24  ;;  %vm8436_vm1 = vcmp.eq.f32.partialorder %v708_v28, 8.507059e+37  ;;  %v934_v40 = vand.u32 2147483648, %v8413_v39 }
 0x107   : > { %v1029_v16 = vsel %vm8406_vm4, %v7196_v22, %v1025_v59  ;;  %7213 = vpow2.f32 %v561_v34  ;;  %v932_v22 = vand.u32 2147483647, %v8413_v39  ;;  %vm816_vm6 = vweird.f32 %v8410_v24 }
 0x108   : > { %v1034_v60 = vsel %vm8399_vm15, %v1033_v44, %v1029_v16  ;;  %v7204_v50 = vpop.eup %7203  ;;  %vm928_vm7 = vweird.f32 %v8413_v39  ;;  %vm8448_vm5 = vcmp.eq.f32.partialorder %v820_v53, 8.507059e+37  ;;  %7215 = vpow2.f32 %v577_v62 }
 0x109   : > { %v8431_v2 = vmul.f32 %v1034_v60, %v8182_v29  ;;  %v7206_v25 = vpop.eup %7205  ;;  %v700_v58 = vmul.f32 %v7204_v50, %v8395_v5  ;;  %v711_v29 = vor.u32 1.1754944e-38, %v710_v38  ;;  %vm705_vm3 = vweird.f32 %v7204_v50 }
 0x10a   : > { %v7208_v51 = vpop.eup %7207  ;;  %v8446_v46 = vadd.f32 1.0, %v7206_v25  ;;  %v823_v49 = vor.u32 1.1754944e-38, %v822_v11  ;;  %vm8457_vm8 = vcmp.eq.f32.partialorder %v932_v22, 8.507059e+37  ;;  %v935_v33 = vor.u32 1.1754944e-38, %v934_v40  ;;  %vm706_vm12 = vmor %vm704_vm14, %vm705_vm3 }
 0x10b   : > { %13764 = vst [vmem:[#allocation12_spill] sm:$0xff] %v8431_v2  ;;  %v7210_v15 = vpop.eup %7209  ;;  %v701_v17 = vsub.f32 1.0, %v700_v58  ;;  %v8452_v7 = vadd.f32 1.0, %v7208_v51  ;;  %v531_v59 = vsub.f32 0.0, %v8422_v4  ;;  %v508_v28 = vsub.f32 0.0, %v8428_v27 }
 0x10c   : > { %1252 = vst.msk [vmem:[#allocation2 + $0x288] sm:$0xff] %vm1109_vm2, %v8431_v2  ;;  %v7212_v1 = vpop.eup %7211  ;;  %v812_v32 = vmul.f32 %v7210_v15, %v8410_v24  ;;  %7217 = vrcp.f32 %v8446_v46  ;;  %vm817_vm9 = vweird.f32 %v7210_v15  ;;  %v8470_v38 = vadd.f32 %v8315_v56, %v450_v47 }
 0x10d   : > { %v702_v8 = vmul.f32 %v7204_v50, %v701_v17  ;;  %v924_v41 = vmul.f32 %v7212_v1, %v8413_v39  ;;  %v7214_v44 = vpop.eup %7213  ;;  %7219 = vrcp.f32 %v8452_v7  ;;  %vm929_vm11 = vweird.f32 %v7212_v1  ;;  %vm8477_vm13 = vmor %vm816_vm6, %vm817_vm9 }
 0x10e   : > { %v813_v48 = vsub.f32 1.0, %v812_v32  ;;  %v8467_v16 = vadd.f32 1.0, %v7214_v44  ;;  %v8473_v60 = vadd.f32 %v8315_v56, %v474_v23  ;;  %v7216_v53 = vpop.eup %7215  ;;  %vm1040_vm15 = vweird.f32 %v8446_v46  ;;  %vm8488_vm4 = vmor %vm928_vm7, %vm929_vm11 }
 0x10f   : > { %v703_v34 = vadd.f32 %v7204_v50, %v702_v8  ;;  %v925_v3 = vsub.f32 1.0, %v924_v41  ;;  %v1044_v5 = vand.u32 2147483647, %v8446_v46  ;;  %v1046_v24 = vand.u32 2147483648, %v8446_v46 }
 0x110   : > { %v814_v36 = vmul.f32 %v7210_v15, %v813_v48  ;;  %v722_v51 = vand.u32 2147483647, %v8452_v7  ;;  %v724_v6 = vand.u32 2147483648, %v8452_v7  ;;  %7221 = vrcp.f32 %v8467_v16 }
 0x111   : > { %v707_v62 = vsel %vm706_vm12, %v7204_v50, %v703_v34  ;;  %v926_v25 = vmul.f32 %v7212_v1, %v925_v3  ;;  %v8500_v39 = vadd.f32 1.0, %v7216_v53  ;;  %v834_v34 = vand.u32 2147483647, %v8467_v16 }
 0x112   : > { %v7218_v58 = vpop.eup %7217  ;;  %v712_v22 = vsel %vm8436_vm1, %v711_v29, %v707_v62  ;;  %v815_v40 = vadd.f32 %v7210_v15, %v814_v36  ;;  %vm718_vm1 = vweird.f32 %v8452_v7  ;;  %vm8519_vm6 = vcmp.eq.f32.partialorder %v1044_v5, 8.507059e+37 }
 0x113   : > { %v1082_v17 = vmul.f32 %v712_v22, %v8225_v14  ;;  %v927_v32 = vadd.f32 %v7212_v1, %v926_v25  ;;  %v1036_v8 = vmul.f32 %v7218_v58, %v8446_v46  ;;  %v7220_v29 = vpop.eup %7219  ;;  %vm1041_vm14 = vweird.f32 %v7218_v58 }
 0x114   : > { %v819_v41 = vsel %vm8477_vm13, %v7210_v15, %v815_v40  ;;  %v714_v44 = vmul.f32 %v7220_v29, %v8452_v7  ;;  %vm8528_vm7 = vmor %vm1040_vm15, %vm1041_vm14  ;;  %v1047_v0 = vor.u32 1.1754944e-38, %v1046_v24  ;;  %7223 = vrcp.f32 %v8500_v39 }
 0x115   : > { %1229 = vst.msk [vmem:[#allocation2 + $0x110] sm:$0xff] %vm1109_vm2, %v1082_v17  ;;  %v824_v47 = vsel %vm8448_vm5, %v823_v49, %v819_v41  ;;  %v931_v14 = vsel %vm8488_vm4, %v7212_v1, %v927_v32  ;;  %v1037_v23 = vsub.f32 1.0, %v1036_v8  ;;  %6990 = vmatmul.msk.f32.gmra.mxu2 %vm1109_vm2, %v1082_v17  ;;  %vm8532_vm5 = vcmp.eq.f32.partialorder %v722_v51, 8.507059e+37  ;;  %v498_v51 = vpop.f32.mrf.mxu3 }
 0x116   : > { %v8510_v15 = vmul.f32 %v824_v47, %v8237_v31  ;;  %v936_v48 = vsel %vm8457_vm8, %v935_v33, %v931_v14  ;;  %v715_v3 = vsub.f32 1.0, %v714_v44  ;;  %v725_v33 = vor.u32 1.1754944e-38, %v724_v6  ;;  %v7222_v46 = vpop.eup %7221 }
 0x117   : > { %v8517_v21 = vmul.f32 %v936_v48, %v8318_v55  ;;  %v1038_v49 = vmul.f32 %v7218_v58, %v1037_v23  ;;  %vm719_vm3 = vweird.f32 %v7220_v29  ;;  %v593_v62 = vmul.f32 1.442695, %v531_v59 }
 0x118   : > { %1237 = vst.msk [vmem:[#allocation2 + $0x190] sm:$0xff] %vm1109_vm2, %v8510_v15  ;;  %v716_v53 = vmul.f32 %v7220_v29, %v715_v3  ;;  %vm830_vm8 = vweird.f32 %v8467_v16  ;;  %vm8540_vm9 = vcmp.eq.f32.partialorder %v834_v34, 8.507059e+37  ;;  %v547_v25 = vmul.f32 1.442695, %v508_v28  ;;  %vm720_vm11 = vmor %vm718_vm1, %vm719_vm3 }
 0x119   : > { %13775 = vst [vmem:[#allocation13_spill] sm:$0xff] %v8517_v21  ;;  %v1039_v36 = vadd.f32 %v7218_v58, %v1038_v49  ;;  %v516_v5 = vsub.f32 0.0, %v8470_v38  ;;  %v826_v50 = vmul.f32 %v7222_v46, %v8467_v16  ;;  %v836_v24 = vand.u32 2147483648, %v8467_v16 }
 0x11a   : > { %1245 = vst.msk [vmem:[#allocation2 + $0x210] sm:$0xff] %vm1109_vm2, %v8517_v21  ;;  %v717_v40 = vadd.f32 %v7220_v29, %v716_v53  ;;  %7225 = vpow2.f32 %v593_v62  ;;  %v524_v28 = vsub.f32 0.0, %v8473_v60  ;;  %vm831_vm12 = vweird.f32 %v7222_v46  ;;  %v7224_v6 = vpop.eup %7223  ;;  %v3068_v62 = vld [vmem:[%s13379_s3 + $0x2] sm:$0x3] }
 0x11b   : > { %v1043_v22 = vsel %vm8528_vm7, %v7218_v58, %v1039_v36  ;;  %v563_v17 = vmul.f32 1.442695, %v516_v5  ;;  %v827_v8 = vsub.f32 1.0, %v826_v50  ;;  %7227 = vpow2.f32 %v547_v25  ;;  %vm8569_vm15 = vmor %vm830_vm8, %vm831_vm12  ;;  %6951 = vmatpush.msk.msrb.mxu1 %vm2987_vm10, %v3068_v62  ;;  %v1329_v50 = vld [vmem:[#allocation2 + $0x248] sm:$0xff] }
 0x11c   : > { %v1048_v59 = vsel %vm8519_vm6, %v1047_v0, %v1043_v22  ;;  %v721_v58 = vsel %vm720_vm11, %v7220_v29, %v717_v40  ;;  %v579_v47 = vmul.f32 1.442695, %v524_v28  ;;  %v8560_v14 = vadd.f32 %v8315_v56, %v498_v51  ;;  %v8624_v28 = vld [vmem:[#allocation2 + $0x270] sm:$0xff] }
 0x11d   : > { %v8555_v32 = vmul.f32 %v1048_v59, %v8369_v13  ;;  %v726_v41 = vsel %vm8532_vm5, %v725_v33, %v721_v58  ;;  %v828_v23 = vmul.f32 %v7222_v46, %v827_v8  ;;  %v938_v13 = vmul.f32 %v7224_v6, %v8500_v39  ;;  %v8857_v20 = vld [vmem:[#allocation2 + $0x110] sm:$0xff] }
 0x11e   : > { %v1083_v7 = vmul.f32 %v726_v41, %v8373_v54  ;;  %vm942_vm13 = vweird.f32 %v8500_v39  ;;  %v837_v44 = vor.u32 1.1754944e-38, %v836_v24  ;;  %v948_v56 = vand.u32 2147483648, %v8500_v39  ;;  %v8615_v24 = vld [vmem:[#allocation2 + $0x268] sm:$0xff]  ;;  %13816 = vst [vmem:[#allocation21_spill] sm:$0xff] %v8857_v20 }
 0x11f   : > { %13784 = vst [vmem:[#allocation14_spill] sm:$0xff] %v8555_v32  ;;  %7229 = vpow2.f32 %v563_v17  ;;  %v532_v48 = vsub.f32 0.0, %v8560_v14  ;;  %v829_v54 = vadd.f32 %v7222_v46, %v828_v23  ;;  %v939_v34 = vsub.f32 1.0, %v938_v13  ;;  %v8622_v17 = vld [vmem:[#allocation2 + $0x250] sm:$0xff] }
 0x120   : > { %1253 = vst.msk [vmem:[#allocation2 + $0x290] sm:$0xff] %vm1109_vm2, %v8555_v32  ;;  %vm943_vm4 = vweird.f32 %v7224_v6  ;;  %v946_v49 = vand.u32 2147483647, %v8500_v39  ;;  %6991 = vmatmul.msk.f32.gmra.mxu2 %vm1109_vm2, %v1083_v7  ;;  %v7226_v16 = vpop.eup %7225  ;;  %7231 = vpow2.f32 %v579_v47  ;;  %vm1113_vm14 = vcmask 13312   ;;  %v1318_v32 = vld [vmem:[#allocation2 + $0x1f0] sm:$0xff] }
 0x121   : > { %1230 = vst.msk [vmem:[#allocation2 + $0x128] sm:$0xff] %vm1109_vm2, %v1083_v7  ;;  %v595_v1 = vmul.f32 1.442695, %v532_v48  ;;  %v833_v3 = vsel %vm8569_vm15, %v7222_v46, %v829_v54  ;;  %v940_v31 = vmul.f32 %v7224_v6, %v939_v34  ;;  %v8580_v0 = vadd.f32 1.0, %v7226_v16  ;;  %v7228_v55 = vpop.eup %7227  ;;  %vm8588_vm1 = vmor %vm942_vm13, %vm943_vm4  ;;  %v4817_v34 = vld [vmem:[%s13379_s3 + $0x4] sm:$0x3] }
 0x122   : > { %1114 = vst.msk [vmem:[#allocation2 + $0x18] sm:$0x3f] %vm1113_vm14, %v13382_v35  ;;  %v838_v33 = vsel %vm8540_vm9, %v837_v44, %v833_v3  ;;  %v949_v53 = vor.u32 1.1754944e-38, %v948_v56  ;;  %vm947_vm6 = vcmp.eq.f32.partialorder %v946_v49, 8.507059e+37  ;;  %v8604_v25 = vadd.f32 1.0, %v7228_v55  ;;  %7017 = vmatpush.msk.msrb.mxu3 %vm2987_vm10, %v4817_v34 }
 0x123   : > { %7233 = vpow2.f32 %v595_v1  ;;  %1118 = vst.msk [vmem:[#allocation2 + $0x38] sm:$0x3f] %vm1113_vm14, %v13382_v35  ;;  %v8598_v46 = vmul.f32 %v838_v33, %v8376_v10  ;;  %v941_v11 = vadd.f32 %v7224_v6, %v940_v31  ;;  %v1058_v8 = vand.u32 2147483647, %v8580_v0  ;;  %v5932_v3 = vld [vmem:[%s13379_s3 + $0x6] sm:$0x3] }
 0x124   : > { %7235 = vrcp.f32 %v8580_v0  ;;  %1122 = vst.msk [vmem:[#allocation2 + $0x58] sm:$0x3f] %vm1113_vm14, %v13382_v35  ;;  %v8636_v47 = vmax.f32 %v1329_v50, %v8615_v24  ;;  %v736_v23 = vand.u32 2147483647, %v8604_v25  ;;  %v738_v13 = vand.u32 2147483648, %v8604_v25  ;;  %7050 = vmatpush.msk.msrb.mxu0 %vm2987_vm10, %v5932_v3 }
 0x125   : > { %v7230_v39 = vpop.eup %7229  ;;  %1238 = vst.msk [vmem:[#allocation2 + $0x1a8] sm:$0xff] %vm1109_vm2, %v8598_v46  ;;  %v945_v5 = vsel %vm8588_vm1, %v7224_v6, %v941_v11  ;;  %7237 = vrcp.f32 %v8604_v25  ;;  %v1060_v6 = vand.u32 2147483648, %v8580_v0  ;;  %v8645_v29 = vmax.f32 %v8622_v17, %v8624_v28 }
 0x126   : > { %v8610_v10 = vadd.f32 1.0, %v7230_v39  ;;  %v7232_v22 = vpop.eup %7231  ;;  %v950_v40 = vsel %vm947_vm6, %v949_v53, %v945_v5  ;;  %1126 = vst.msk [vmem:[#allocation2 + $0x78] sm:$0x3f] %vm1113_vm14, %v13382_v35  ;;  %vm1054_vm7 = vweird.f32 %v8580_v0  ;;  %vm8659_vm3 = vcmp.eq.f32.partialorder %v1058_v8, 8.507059e+37 }
 0x127   : > { %v8618_v51 = vmul.f32 %v950_v40, %v8386_v26  ;;  %1130 = vst.msk [vmem:[#allocation2 + $0x98] sm:$0x3f] %vm1113_vm14, %v13382_v35  ;;  %v8631_v26 = vadd.f32 1.0, %v7232_v22  ;;  %v1061_v16 = vor.u32 1.1754944e-38, %v1060_v6  ;;  %vm732_vm8 = vweird.f32 %v8604_v25 }
 0x128   : > { %13790 = vst [vmem:[#allocation16_spill] sm:$0xff] %v8622_v17  ;;  %7239 = vrcp.f32 %v8610_v10  ;;  %v848_v44 = vand.u32 2147483647, %v8610_v10  ;;  %v850_v56 = vand.u32 2147483648, %v8610_v10  ;;  %vm8674_vm9 = vcmp.eq.f32.partialorder %v736_v23, 8.507059e+37 }
 0x129   : > { %13789 = vst [vmem:[#allocation15_spill] sm:$0xff] %v8618_v51  ;;  %v7234_v59 = vpop.eup %7233  ;;  %7241 = vrcp.f32 %v8631_v26  ;;  %v739_v36 = vor.u32 1.1754944e-38, %v738_v13  ;;  %vm844_vm11 = vweird.f32 %v8610_v10  ;;  %vm956_vm4 = vweird.f32 %v8631_v26 }
 0x12a   : > { %v7236_v58 = vpop.eup %7235  ;;  %1246 = vst.msk [vmem:[#allocation2 + $0x228] sm:$0xff] %vm1109_vm2, %v8618_v51  ;;  %v8633_v41 = vadd.f32 1.0, %v7234_v59  ;;  %vm8691_vm13 = vcmp.eq.f32.partialorder %v848_v44, 8.507059e+37  ;;  %v851_v5 = vor.u32 1.1754944e-38, %v850_v56  ;;  %v962_v8 = vand.u32 2147483648, %v8631_v26  ;;  %v8715_v44 = vld [vmem:[#allocation2 + $0x288] sm:$0xff] }
 0x12b   : > { %13791 = vst [vmem:[#allocation17_spill] sm:$0xff] %v8636_v47  ;;  %v1050_v7 = vmul.f32 %v7236_v58, %v8580_v0  ;;  %v8652_v48 = vpop.eup %7237  ;;  %vm1055_vm5 = vweird.f32 %v7236_v58  ;;  %v960_v0 = vand.u32 2147483647, %v8631_v26  ;;  %v1349_v51 = vld [vmem:[#allocation2 + $0x2e8] sm:$0xff] }
 0x12c   : > { %1134 = vst.msk [vmem:[#allocation2 + $0xb8] sm:$0x3f] %vm1113_vm14, %v13382_v35  ;;  %7243 = vrcp.f32 %v8633_v41  ;;  %v728_v1 = vmul.f32 %v8652_v48, %v8604_v25  ;;  %vm8685_vm12 = vmor %vm1054_vm7, %vm1055_vm5  ;;  %vm733_vm15 = vweird.f32 %v8652_v48  ;;  %vm1068_vm6 = vweird.f32 %v8633_v41 }
 0x12d   : > { %13792 = vst [vmem:[#allocation18_spill] sm:$0xff] %v8645_v29  ;;  %v1051_v54 = vsub.f32 1.0, %v1050_v7  ;;  %v1074_v13 = vand.u32 2147483648, %v8633_v41  ;;  %vm8724_vm7 = vmor %vm732_vm8, %vm733_vm15  ;;  %v1072_v3 = vand.u32 2147483647, %v8633_v41  ;;  %vm2218_vm15 = vcmask 1045504  }
 0x12e   : > { %1138 = vst.msk [vmem:[#allocation2 + $0xd8] sm:$0x3f] %vm1113_vm14, %v13382_v35  ;;  %v8672_v31 = vpop.eup %7239  ;;  %v729_v62 = vsub.f32 1.0, %v728_v1  ;;  %v1271_v25 = vld [vmem:[#allocation2 + $0x78] sm:$0x3f] }
 0x12f   : > { %1142 = vst.msk [vmem:[#allocation2 + $0xf8] sm:$0x3f] %vm1113_vm14, %v13382_v35  ;;  %v1052_v55 = vmul.f32 %v7236_v58, %v1051_v54  ;;  %v840_v11 = vmul.f32 %v8672_v31, %v8610_v10  ;;  %v8698_v40 = vpop.eup %7241  ;;  %vm845_vm1 = vweird.f32 %v8672_v31 }
 0x130   : > { %1146 = vst.msk [vmem:[#allocation2 + $0x118] sm:$0x3f] %vm1113_vm14, %v13382_v35  ;;  %v730_v50 = vmul.f32 %v8652_v48, %v729_v62  ;;  %v952_v23 = vmul.f32 %v8698_v40, %v8631_v26  ;;  %vm8740_vm5 = vmor %vm844_vm11, %vm845_vm1  ;;  %v8755_v62 = vld [vmem:[#allocation2 + $0x28] sm:$0xff]  ;;  %vm8770_vm11 = vcmp.eq.f32.partialorder %v960_v0, 8.507059e+37  ;;  %v1075_v0 = vor.u32 1.1754944e-38, %v1074_v13 }
 0x131   : > { %v1053_v22 = vadd.f32 %v7236_v58, %v1052_v55  ;;  %v841_v59 = vsub.f32 1.0, %v840_v11  ;;  %1150 = vst.msk [vmem:[#allocation2 + $0x138] sm:$0x3f] %vm1113_vm14, %v13382_v35  ;;  %v8746_v55 = vld [vmem:[#allocation2 + $0x20] sm:$0xff]  ;;  %v8757_v11 = vld [vmem:[#allocation2 + $0x30] sm:$0xff] }
 0x132   : > { %v8705_v6 = vpop.eup %7243  ;;  %1154 = vst.msk [vmem:[#allocation2 + $0x158] sm:$0x3f] %vm1113_vm14, %v13382_v35  ;;  %v731_v54 = vadd.f32 %v8652_v48, %v730_v50  ;;  %v8761_v50 = vld [vmem:[#allocation2 + $0x50] sm:$0xff] }
 0x133   : > { %v1057_v7 = vsel %vm8685_vm12, %v7236_v58, %v1053_v22  ;;  %v842_v34 = vmul.f32 %v8672_v31, %v841_v59  ;;  %v1064_v1 = vmul.f32 %v8705_v6, %v8633_v41  ;;  %1158 = vst.msk [vmem:[#allocation2 + $0x178] sm:$0x3f] %vm1113_vm14, %v13382_v35  ;;  %vm1069_vm8 = vweird.f32 %v8705_v6  ;;  %v8759_v22 = vld [vmem:[#allocation2 + $0x40] sm:$0xff]  ;;  %v1270_v58 = vld [vmem:[#allocation2 + $0x70] sm:$0xff] }
 0x134   : > { %v1062_v56 = vsel %vm8659_vm3, %v1061_v16, %v1057_v7  ;;  %v953_v16 = vsub.f32 1.0, %v952_v23  ;;  %vm957_vm3 = vweird.f32 %v8698_v40  ;;  %1162 = vst.msk [vmem:[#allocation2 + $0x198] sm:$0x3f] %vm1113_vm14, %v13382_v35  ;;  %v963_v23 = vor.u32 1.1754944e-38, %v962_v8  ;;  %v8791_v8 = vld [vmem:[#allocation2 + $0x58] sm:$0x3f]  ;;  %vm8808_vm12 = vmor %vm1068_vm6, %vm1069_vm8 }
 0x135   : > { %v8734_v49 = vmul.f32 %v1062_v56, %v8422_v4  ;;  %v735_v4 = vsel %vm8724_vm7, %v8652_v48, %v731_v54  ;;  %v843_v10 = vadd.f32 %v8672_v31, %v842_v34  ;;  %v1065_v53 = vsub.f32 1.0, %v1064_v1  ;;  %1166 = vst.msk [vmem:[#allocation2 + $0x1b8] sm:$0x3f] %vm1113_vm14, %v13382_v35  ;;  %v8774_v56 = vld [vmem:[#allocation2 + $0x38] sm:$0x3f]  ;;  %v8776_v54 = vld [vmem:[#allocation2 + $0x48] sm:$0xff] }
 0x136   : > { %v740_v48 = vsel %vm8674_vm9, %v739_v36, %v735_v4  ;;  %v954_v59 = vmul.f32 %v8698_v40, %v953_v16  ;;  %vm8786_vm9 = vmor %vm956_vm4, %vm957_vm3  ;;  %v1268_v16 = vld [vmem:[#allocation2 + $0x60] sm:$0xff]  ;;  %v8793_v4 = vld [vmem:[#allocation2 + $0x90] sm:$0xff]  ;;  %1170 = vst.msk [vmem:[#allocation2 + $0x1d8] sm:$0x3f] %vm1113_vm14, %v13382_v35  ;;  %vm6789_vm6 = vcmask 64512  }
 0x137   : > { %13803 = vst [vmem:[#allocation19_spill] sm:$0xff] %v8734_v49  ;;  %v1084_v34 = vmul.f32 %v740_v48, %v8428_v27  ;;  %v847_v1 = vsel %vm8740_vm5, %v8672_v31, %v843_v10  ;;  %v1066_v36 = vmul.f32 %v8705_v6, %v1065_v53  ;;  %v8799_v27 = vmax.f32 %v8615_v24, %v8715_v44  ;;  %v8812_v10 = vld [vmem:[#allocation2 + $0x98] sm:$0x3f]  ;;  %v1256_v53 = vld [vmem:[#allocation2] sm:$0xff]  ;;  %v1257_v48 = vld [vmem:[#allocation2 + $0x8] sm:$0xff] }
 0x138   : > { %1254 = vst.msk [vmem:[#allocation2 + $0x2a8] sm:$0xff] %vm1109_vm2, %v8734_v49  ;;  %v852_v26 = vsel %vm8691_vm13, %v851_v5, %v847_v1  ;;  %v955_v31 = vadd.f32 %v8698_v40, %v954_v59  ;;  %v1373_v24 = vmax.f32 %v8746_v55, %v8759_v22  ;;  %vm8823_vm13 = vcmp.eq.f32.partialorder %v1072_v3, 8.507059e+37  ;;  %v8828_v59 = vld [vmem:[#allocation2 + $0x80] sm:$0xff]  ;;  %v8975_v17 = vld [vmem:[#allocation2 + $0xf8] sm:$0x3f] }
 0x139   : > { %13810 = vst [vmem:[#allocation20_spill] sm:$0xff] %v8799_v27  ;;  %v8820_v39 = vmul.f32 %v852_v26, %v8470_v38  ;;  %v1067_v41 = vadd.f32 %v8705_v6, %v1066_v36  ;;  %6992 = vmatmul.msk.f32.gmra.mxu2 %vm1109_vm2, %v1084_v34  ;;  %v1374_v1 = vmax.f32 %v8755_v62, %v8776_v54  ;;  %v1258_v26 = vld [vmem:[#allocation2 + $0x10] sm:$0xff]  ;;  %v13815_v49 = vmov -inf  }
 0x13a   : > { %1174 = vst.msk [vmem:[#allocation2 + $0x1f8] sm:$0x3f] %vm1113_vm14, %v13382_v35  ;;  %v959_v38 = vsel %vm8786_vm9, %v8698_v40, %v955_v31  ;;  %v1259_v35 = vld [vmem:[#allocation2 + $0x18] sm:$0x3f]  ;;  %v1375_v3 = vmax.f32 %v8757_v11, %v8761_v50  ;;  %v1376_v36 = vmax.f32 %v8774_v56, %v8791_v8  ;;  %v1269_v31 = vld [vmem:[#allocation2 + $0x68] sm:$0xff]  ;;  %v8852_v2 = vmax.f32 %v1270_v58, %v8793_v4 }
 0x13b   : > { %1231 = vst.msk [vmem:[#allocation2 + $0x130] sm:$0xff] %vm1109_vm2, %v1084_v34  ;;  %v8840_v34 = vmax.f32 %v1268_v16, %v8828_v59  ;;  %v964_v40 = vsel %vm8770_vm11, %v963_v23, %v959_v38  ;;  %v1071_v33 = vsel %vm8808_vm12, %v8705_v6, %v1067_v41  ;;  %v8855_v19 = vmax.f32 %v1271_v25, %v8812_v10  ;;  %v1273_v23 = vld [vmem:[#allocation2 + $0x88] sm:$0xff]  ;;  %v8864_v38 = vld [vmem:[#allocation2 + $0xa0] sm:$0xff]  ;;  %v8870_v41 = vld [vmem:[#allocation2 + $0x210] sm:$0xff] }
 0x13c   : > { %1178 = vst.msk [vmem:[#allocation2 + $0x218] sm:$0x3f] %vm1113_vm14, %v13815_v49  ;;  %v8860_v61 = vmul.f32 %v964_v40, %v8473_v60  ;;  %v1076_v7 = vsel %vm8823_vm13, %v1075_v0, %v1071_v33  ;;  %v1369_v6 = vmax.f32 %v1256_v53, %v8746_v55  ;;  %v1370_v13 = vmax.f32 %v1257_v48, %v8755_v62  ;;  %v8883_v55 = vld [vmem:[#allocation2 + $0xf0] sm:$0xff]  ;;  %v1277_v62 = vld [vmem:[#allocation2 + $0xa8] sm:$0xff] }
 0x13d   : > { %1239 = vst.msk [vmem:[#allocation2 + $0x1b0] sm:$0xff] %vm1109_vm2, %v8820_v39  ;;  %v8875_v60 = vmul.f32 %v1076_v7, %v8560_v14  ;;  %v1371_v0 = vmax.f32 %v1258_v26, %v8757_v11  ;;  %v1372_v5 = vmax.f32 %v1259_v35, %v8774_v56  ;;  %v8879_v40 = vmax.f32 %v1269_v31, %v1273_v23  ;;  %v8899_v56 = vld [vmem:[#allocation2 + $0x290] sm:$0xff]  ;;  %v1279_v26 = vld [vmem:[#allocation2 + $0xb8] sm:$0x3f] }
 0x13e   : > { %13817 = vst [vmem:[#allocation22_spill] sm:$0xff] %v8860_v61  ;;  %v8888_v53 = vmax.f32 %v8759_v22, %v1268_v16  ;;  %v8891_v14 = vmax.f32 %v8776_v54, %v1269_v31  ;;  %v8894_v11 = vmax.f32 %v8761_v50, %v1270_v58  ;;  %v8897_v35 = vmax.f32 %v8791_v8, %v1271_v25  ;;  %v1278_v48 = vld [vmem:[#allocation2 + $0xb0] sm:$0xff]  ;;  %v1281_v25 = vld [vmem:[#allocation2 + $0xc8] sm:$0xff] }
 0x13f   : > { %1182 = vst.msk [vmem:[#allocation2 + $0x238] sm:$0x3f] %vm1113_vm14, %v13815_v49  ;;  %v1477_v33 = vmax.f32 %v1373_v24, %v8840_v34  ;;  %v1478_v22 = vmax.f32 %v1374_v1, %v8879_v40  ;;  %v1479_v54 = vmax.f32 %v1375_v3, %v8852_v2  ;;  %v1480_v16 = vmax.f32 %v1376_v36, %v8855_v19  ;;  %v8917_v31 = vld [vmem:[#allocation2 + $0xd0] sm:$0xff]  ;;  %v8927_v1 = vld [vmem:[#allocation2 + $0xe8] sm:$0xff] }
 0x140   : > { %13818 = vst [vmem:[#allocation23_spill] sm:$0xff] %v8870_v41  ;;  %v8909_v50 = vmax.f32 %v8883_v55, %v8857_v20  ;;  %v8912_v58 = vmax.f32 %v1318_v32, %v8870_v41  ;;  %v8915_v8 = vmax.f32 %v8872_v57, %v1349_v51  ;;  %v8921_v24 = vmax.f32 %v8828_v59, %v8864_v38 }
 0x141   : > { %13819 = vst [vmem:[#allocation24_spill] sm:$0xff] %v8875_v60  ;;  %6993 = vmatmul.msk.f32.gmra.mxu2 %vm1109_vm2, %v7725_v43  ;;  %v1473_v32 = vmax.f32 %v1369_v6, %v8888_v53  ;;  %v1474_v51 = vmax.f32 %v1370_v13, %v8891_v14  ;;  %v1475_v3 = vmax.f32 %v1371_v0, %v8894_v11  ;;  %v8947_v6 = vld [vmem:[#allocation2 + $0xe0] sm:$0xff] }
 0x142   : > { %1186 = vst.msk [vmem:[#allocation2 + $0x258] sm:$0x3f] %vm1113_vm14, %v13815_v49  ;;  %v1476_v36 = vmax.f32 %v1372_v5, %v8897_v35  ;;  %v8935_v7 = vmax.f32 %v8624_v28, %v8899_v56  ;;  %v8937_v21 = vmax.f32 %v1273_v23, %v1277_v62  ;;  %v8940_v43 = vmax.f32 %v8793_v4, %v1278_v48 }
 0x143   : > { %1247 = vst.msk [vmem:[#allocation2 + $0x230] sm:$0xff] %vm1109_vm2, %v8860_v61  ;;  %v1283_v61 = vld [vmem:[#allocation2 + $0xd8] sm:$0x3f]  ;;  %v8943_v45 = vmax.f32 %v8812_v10, %v1279_v26  ;;  %v8952_v28 = vmax.f32 %v1277_v62, %v1281_v25  ;;  %v8955_v0 = vmax.f32 %v1278_v48, %v8917_v31  ;;  %v8969_v41 = vmax.f32 %v8917_v31, %v8883_v55 }
 0x144   : > { %13820 = vst [vmem:[#allocation25_spill] sm:$0xff] %v8899_v56  ;;  %v8957_v5 = vmax.f32 %v1279_v26, %v1283_v61  ;;  %v1481_v63 = vmax.f32 %v8888_v53, %v8921_v24  ;;  %v8980_v18 = vmax.f32 %v1474_v51, %v1273_v23  ;;  %v8983_v27 = vmax.f32 %v1475_v3, %v8793_v4  ;;  %v1350_v4 = vld [vmem:[#allocation2 + $0x2f0] sm:$0xff] }
 0x145   : > { %1255 = vst.msk [vmem:[#allocation2 + $0x2b0] sm:$0xff] %vm1109_vm2, %v8875_v60  ;;  %v1280_v60 = vld [vmem:[#allocation2 + $0xc0] sm:$0xff]  ;;  %v8993_v47 = vmax.f32 %v1283_v61, %v8975_v17  ;;  %v8998_v23 = vmax.f32 %v1477_v33, %v8864_v38 }
 0x146   : > { %13821 = vst [vmem:[#allocation26_spill] sm:$0xff] %v8909_v50  ;;  %v8950_v13 = vmax.f32 %v8864_v38, %v1280_v60  ;;  %v8962_v52 = vmax.f32 %v1280_v60, %v8947_v6  ;;  %v8986_v50 = vmax.f32 %v1476_v36, %v8812_v10  ;;  %v1354_v10 = vld [vmem:[#allocation2 + $0x310] sm:$0xff]  ;;  %v9011_v36 = vmax.f32 %v1479_v54, %v1278_v48 }
 0x147   : > { %13822 = vst [vmem:[#allocation27_spill] sm:$0xff] %v8912_v58  ;;  %v8965_v58 = vmax.f32 %v1281_v25, %v8927_v1  ;;  %v1483_v38 = vmax.f32 %v8894_v11, %v8940_v43  ;;  %v1488_v11 = vmax.f32 %v8855_v19, %v8957_v5  ;;  %v1492_v54 = vmax.f32 %v8943_v45, %v8993_v47  ;;  %v9049_v19 = vld [vmem:[#allocation2 + $0x108] sm:$0xff] }
 0x148   : > { %13823 = vst [vmem:[#allocation28_spill] sm:$0xff] %v8915_v8  ;;  %v8978_v8 = vmax.f32 %v1473_v32, %v8828_v59  ;;  %v1482_v59 = vmax.f32 %v8891_v14, %v8937_v21  ;;  %v9000_v32 = vmax.f32 %v1478_v22, %v1277_v62  ;;  %v9013_v14 = vmax.f32 %v1480_v16, %v1279_v26 }
 0x149   : > { %1190 = vst.msk [vmem:[#allocation2 + $0x278] sm:$0x3f] %vm1113_vm14, %v13815_v49  ;;  %v1484_v62 = vmax.f32 %v8897_v35, %v8943_v45  ;;  %v1485_v33 = vmax.f32 %v8840_v34, %v8950_v13  ;;  %v9023_v22 = vmax.f32 %v1481_v63, %v1280_v60  ;;  %v1489_v35 = vmax.f32 %v8921_v24, %v8962_v52  ;;  %v9041_v60 = vld [vmem:[#allocation2 + $0x100] sm:$0xff]  ;;  %v9051_v24 = vld [vmem:[#allocation2 + $0x118] sm:$0x3f] }
 0x14a   : > { %13824 = vst [vmem:[#allocation29_spill] sm:$0xff] %v8927_v1  ;;  %v9037_v63 = vmax.f32 %v1346_v37, %v1350_v4  ;;  %v9039_v34 = vmax.f32 %v1350_v4, %v1354_v10  ;;  %v9045_v16 = vmax.f32 %v1482_v59, %v1281_v25  ;;  %6994 = vmatmul.msk.f32.gmra.mxu2 %vm1109_vm2, %v7837_v42 }
 0x14b   : > { %13825 = vst [vmem:[#allocation30_spill] sm:$0xff] %v8935_v7  ;;  %v1490_v4 = vmax.f32 %v8937_v21, %v8965_v58  ;;  %v1491_v45 = vmax.f32 %v8940_v43, %v8969_v41  ;;  %v9062_v25 = vmax.f32 %v1483_v38, %v8917_v31  ;;  %v9064_v42 = vmax.f32 %v1484_v62, %v1283_v61 }
 0x14c   : > { %1194 = vst.msk [vmem:[#allocation2 + $0x298] sm:$0x3f] %vm1113_vm14, %v13815_v49  ;;  %v8990_v53 = vld [vmem:[#allocation2 + $0x2b0] sm:$0xff]  ;;  %v9067_v59 = vmax.f32 %v1485_v33, %v8947_v6  ;;  %v9076_v21 = vmax.f32 %v1488_v11, %v8975_v17  ;;  %v9079_v10 = vmax.f32 %v1489_v35, %v9041_v60  ;;  %v9088_v43 = vmax.f32 %v1492_v54, %v9051_v24 }
 0x14d   : > { %13826 = vst [vmem:[#allocation31_spill] sm:$0xff] %v8950_v13  ;;  %v9006_v51 = vmax.f32 %v8899_v56, %v8990_v53  ;;  %v9009_v3 = vmax.f32 %v8990_v53, %v1346_v37  ;;  %v1486_v37 = vmax.f32 %v8879_v40, %v8952_v28  ;;  %v9082_v31 = vmax.f32 %v1490_v4, %v9049_v19 }
 0x14e   : > { %13827 = vst [vmem:[#allocation32_spill] sm:$0xff] %v8952_v28  ;;  %v9085_v61 = vmax.f32 %v1491_v45, %v8857_v20  ;;  %v1762_v38 = vrot.slane %v8978_v8, 1  ;;  %v1765_v62 = vrot.slane %v8983_v27, 1  ;;  %v13413_v33 = vrot.slane %v8986_v50, 1 }
 0x14f   : > { %13828 = vst [vmem:[#allocation33_spill] sm:$0xff] %v8955_v0  ;;  %v9070_v40 = vmax.f32 %v1486_v37, %v8927_v1  ;;  %v1769_v11 = vrot.slane %v8998_v23, 1  ;;  %v1770_v35 = vrot.slane %v9000_v32, 1  ;;  %v1772_v37 = vrot.slane %v9011_v36, 1 }
 0x150   : > { %13829 = vst [vmem:[#allocation34_spill] sm:$0xff] %v8957_v5  ;;  %v1776_v4 = vrot.slane %v9023_v22, 1  ;;  %v1777_v48 = vrot.slane %v9045_v16, 1  ;;  %v13422_v20 = vrot.slane %v9088_v43, 1 }
 0x151   : > { %1198 = vst.msk [vmem:[#allocation2 + $0x2b8] sm:$0x3f] %vm1113_vm14, %v13815_v49 }
 0x152   : > { %13830 = vst [vmem:[#allocation35_spill] sm:$0xff] %v8962_v52  ;;  %6995 = vmatmul.msk.f32.gmra.mxu2 %vm1109_vm2, %v7948_v30 }
 0x153   : > { %13831 = vst [vmem:[#allocation36_spill] sm:$0xff] %v8965_v58  ;;  %v1793_v58 = vrot.slane %v9085_v61, 1 }
 0x154   : > { %13832 = vst [vmem:[#allocation37_spill] sm:$0xff] %v8969_v41  ;;  %v13423_v41 = vrot.slane %v9076_v21, 1 }
 0x155   : > { %1202 = vst.msk [vmem:[#allocation2 + $0x2d8] sm:$0x3f] %vm1113_vm14, %v13815_v49 }
 0x156   : > { %13833 = vst [vmem:[#allocation38_spill] sm:$0xff] %v8975_v17 }
 0x157   : > { %1206 = vst.msk [vmem:[#allocation2 + $0x2f8] sm:$0x3f] %vm1113_vm14, %v13815_v49 }
 0x158   : > { %13834 = vst [vmem:[#allocation39_spill] sm:$0xff] %v8990_v53 }
 0x159   : > { %13835 = vst [vmem:[#allocation40_spill] sm:$0xff] %v8993_v47 }
 0x15a   : > { %1210 = vst.msk [vmem:[#allocation2 + $0x318] sm:$0x3f] %vm1113_vm14, %v13815_v49  ;;  %6996 = vmatmul.msk.f32.gmra.mxu2 %vm1109_vm2, %v8127_v12 }
 0x15b   : > { %13836 = vst [vmem:[#allocation41_spill] sm:$0xff] %v9006_v51  ;;  %v1779_v51 = vrot.slane %v9062_v25, 1 }
 0x15c   : > { %13837 = vst [vmem:[#allocation42_spill] sm:$0xff] %v9009_v3 }
 0x15d   : > { %1214 = vst.msk [vmem:[#allocation2 + $0x338] sm:$0x3f] %vm1113_vm14, %v13815_v49 }
 0x15e   : > { %1218 = vst.msk [vmem:[#allocation2 + $0x358] sm:$0x3f] %vm1113_vm14, %v13815_v49 }
 0x15f   : > { %1222 = vst.msk [vmem:[#allocation2 + $0x378] sm:$0x3f] %vm1113_vm14, %v13815_v49  ;;  %v1487_v49 = vmax.f32 %v8852_v2, %v8955_v0  ;;  %vm1761_vm14 = vcmask 1046528  }
 0x160   : > { %13838 = vst [vmem:[#allocation43_spill] sm:$0xff] %v9037_v63  ;;  %v1768_v26 = vsel %vm1761_vm14, %v1765_v62, %v13413_v33  ;;  %v1773_v63 = vsel %vm1761_vm14, %v1770_v35, %v1772_v37  ;;  %v1784_v33 = vrot.slane %v9070_v40, 1 }
 0x161   : > { %13839 = vst [vmem:[#allocation44_spill] sm:$0xff] %v9039_v34  ;;  %v9073_v2 = vmax.f32 %v1487_v49, %v8883_v55  ;;  %v1763_v55 = vrot.slane %v8980_v18, 1  ;;  %v13415_v49 = vrot.slane %v9013_v14, 1  ;;  %v1771_v34 = vsel %vm1761_vm14, %v1769_v11, %v1770_v35 }
 0x162   : > { %13840 = vst [vmem:[#allocation45_spill] sm:$0xff] %v9051_v24  ;;  %v1780_v11 = vsel %vm1761_vm14, %v1777_v48, %v1779_v51  ;;  %6997 = vmatmul.msk.f32.gmra.mxu2 %vm1109_vm2, %v8366_v9  ;;  %v2587_v9 = vrot.slane %v9000_v32, 4 }
 0x163   : > { %v1764_v54 = vsel %vm1761_vm14, %v1762_v38, %v1763_v55  ;;  %v1766_v45 = vsel %vm1761_vm14, %v1763_v55, %v1765_v62  ;;  %v1775_v3 = vsel %vm1761_vm14, %v1772_v37, %v13415_v49  ;;  %v1778_v38 = vsel %vm1761_vm14, %v1776_v4, %v1777_v48 }
 0x164   : > { %v13421_v55 = vrot.slane %v9064_v42, 1  ;;  %v1783_v62 = vrot.slane %v9067_v59, 1  ;;  %v1786_v35 = vrot.slane %v9073_v2, 1  ;;  %v1790_v37 = vrot.slane %v9079_v10, 1 }
 0x165   : > { %v1791_v49 = vrot.slane %v9082_v31, 1  ;;  %v9133_v53 = vmax.f32 %v8978_v8, %v1764_v54  ;;  %v9150_v54 = vmax.f32 %v9000_v32, %v1773_v63  ;;  %v2600_v32 = vrot.slane %v9067_v59, 4 }
 0x166   : > { %v1782_v30 = vsel %vm1761_vm14, %v1779_v51, %v13421_v55  ;;  %v1785_v4 = vsel %vm1761_vm14, %v1783_v62, %v1784_v33  ;;  %v1787_v52 = vsel %vm1761_vm14, %v1784_v33, %v1786_v35  ;;  %v1789_v48 = vsel %vm1761_vm14, %v1786_v35, %v13423_v41 }
 0x167   : > { %v1792_v56 = vsel %vm1761_vm14, %v1790_v37, %v1791_v49  ;;  %v1794_v51 = vsel %vm1761_vm14, %v1791_v49, %v1793_v58  ;;  %v9138_v62 = vmax.f32 %v8980_v18, %v1766_v45  ;;  %v9141_v55 = vmax.f32 %v8983_v27, %v1768_v26 }
 0x168   : > { %v1796_v33 = vsel %vm1761_vm14, %v1793_v58, %v13422_v20  ;;  %v9147_v35 = vmax.f32 %v8998_v23, %v1771_v34  ;;  %v9153_v37 = vmax.f32 %v9011_v36, %v1775_v3  ;;  %v9156_v49 = vmax.f32 %v9023_v22, %v1778_v38 }
 0x169   : > { %v9159_v45 = vmax.f32 %v9045_v16, %v1780_v11  ;;  %v9162_v26 = vmax.f32 %v9062_v25, %v1782_v30  ;;  %v9165_v58 = vmax.f32 %v9067_v59, %v1785_v4  ;;  %v9168_v34 = vmax.f32 %v9070_v40, %v1787_v52 }
 0x16a   : > { %v9171_v63 = vmax.f32 %v9073_v2, %v1789_v48  ;;  %v9174_v3 = vmax.f32 %v9079_v10, %v1792_v56  ;;  %v9177_v38 = vmax.f32 %v9082_v31, %v1794_v51  ;;  %v9182_v11 = vmax.f32 %v9085_v61, %v1796_v33  ;;  %6998 = vmatmul.msk.f32.gmra.mxu2 %vm1109_vm2, %v8510_v15 }
 0x16b   : > { %v2219_v30 = vrot.slane %v9133_v53, 2  ;;  %v2220_v52 = vrot.slane %v9138_v62, 2  ;;  %v13433_v4 = vrot.slane %v9141_v55, 2  ;;  %v2226_v48 = vrot.slane %v9147_v35, 2 }
 0x16c   : > { %v2227_v56 = vrot.slane %v9150_v54, 2  ;;  %v13434_v51 = vrot.slane %v9153_v37, 2  ;;  %v2233_v12 = vrot.slane %v9156_v49, 2  ;;  %v2234_v33 = vrot.slane %v9159_v45, 2 }
 0x16d   : > { %v2221_v20 = vsel %vm2218_vm15, %v2219_v30, %v2220_v52  ;;  %v13435_v41 = vrot.slane %v9162_v26, 2  ;;  %v2223_v7 = vsel %vm2218_vm15, %v2220_v52, %v13433_v4  ;;  %v2240_v5 = vrot.slane %v9165_v58, 2 }
 0x16e   : > { %v2228_v29 = vsel %vm2218_vm15, %v2226_v48, %v2227_v56  ;;  %v2230_v47 = vsel %vm2218_vm15, %v2227_v56, %v13434_v51  ;;  %v2235_v30 = vsel %vm2218_vm15, %v2233_v12, %v2234_v33  ;;  %v2241_v28 = vrot.slane %v9168_v34, 2 }
 0x16f   : > { %v2237_v0 = vsel %vm2218_vm15, %v2234_v33, %v13435_v41  ;;  %v2243_v13 = vrot.slane %v9171_v63, 2  ;;  %v2247_v52 = vrot.slane %v9174_v3, 2  ;;  %v2248_v48 = vrot.slane %v9177_v38, 2 }
 0x170   : > { %v2250_v4 = vrot.slane %v9182_v11, 2  ;;  %v2483_v56 = vmax.f32 %v9133_v53, %v2221_v20  ;;  %v2242_v51 = vsel %vm2218_vm15, %v2240_v5, %v2241_v28  ;;  %v2484_v33 = vmax.f32 %v9138_v62, %v2223_v7 }
 0x171   : > { %v2244_v12 = vsel %vm2218_vm15, %v2241_v28, %v2243_v13  ;;  %v2487_v41 = vmax.f32 %v9147_v35, %v2228_v29  ;;  %v2249_v17 = vsel %vm2218_vm15, %v2247_v52, %v2248_v48  ;;  %v2488_v1 = vmax.f32 %v9150_v54, %v2230_v47 }
 0x172   : > { %v2251_v24 = vsel %vm2218_vm15, %v2248_v48, %v2250_v4  ;;  %v2491_v20 = vmax.f32 %v9156_v49, %v2235_v30  ;;  %v2492_v5 = vmax.f32 %v9159_v45, %v2237_v0  ;;  %v2495_v28 = vmax.f32 %v9165_v58, %v2242_v51  ;;  %6999 = vmatmul.msk.f32.gmra.mxu2 %vm1109_vm2, %v8598_v46 }
 0x173   : > { %v2496_v7 = vmax.f32 %v9168_v34, %v2244_v12  ;;  %v2499_v29 = vmax.f32 %v9174_v3, %v2249_v17  ;;  %v2500_v53 = vmax.f32 %v9177_v38, %v2251_v24  ;;  %v2579_v62 = vrot.slane %v8978_v8, 4 }
 0x174   : > { %v2580_v35 = vrot.slane %v8980_v18, 4  ;;  %v2582_v47 = vrot.slane %v8983_v27, 4  ;;  %v2586_v54 = vrot.slane %v8998_v23, 4  ;;  %v2589_v0 = vrot.slane %v9011_v36, 4 }
 0x175   : > { %v2593_v49 = vrot.slane %v9023_v22, 4  ;;  %v2594_v8 = vrot.slane %v9045_v16, 4  ;;  %v2596_v18 = vrot.slane %v9062_v25, 4  ;;  %v2601_v22 = vrot.slane %v9070_v40, 4 }
 0x176   : > { %v2581_v45 = vsel %vm384_vm0, %v2579_v62, %v2580_v35  ;;  %v2583_v17 = vsel %vm384_vm0, %v2580_v35, %v2582_v47  ;;  %v2588_v24 = vsel %vm384_vm0, %v2586_v54, %v2587_v9  ;;  %v2590_v23 = vsel %vm384_vm0, %v2587_v9, %v2589_v0 }
 0x177   : > { %v2595_v58 = vsel %vm384_vm0, %v2593_v49, %v2594_v8  ;;  %v2597_v34 = vsel %vm384_vm0, %v2594_v8, %v2596_v18  ;;  %v13442_v16 = vrot.slane %v9073_v2, 4  ;;  %v2607_v3 = vrot.slane %v9079_v10, 4 }
 0x178   : > { %v2602_v38 = vsel %vm384_vm0, %v2600_v32, %v2601_v22  ;;  %v2608_v51 = vrot.slane %v9082_v31, 4  ;;  %v13441_v30 = vrot.slane %v9085_v61, 4  ;;  %v2843_v52 = vmax.f32 %v2483_v56, %v2581_v45 }
 0x179   : > { %v2604_v59 = vsel %vm384_vm0, %v2601_v22, %v13442_v16  ;;  %v2844_v40 = vmax.f32 %v2484_v33, %v2583_v17  ;;  %v9262_v48 = vmax.f32 %v2487_v41, %v2588_v24  ;;  %v9264_v12 = vmax.f32 %v2488_v1, %v2590_v23 }
 0x17a   : > { %v2609_v10 = vsel %vm384_vm0, %v2607_v3, %v2608_v51  ;;  %v2611_v31 = vsel %vm384_vm0, %v2608_v51, %v13441_v30  ;;  %v9272_v62 = vmax.f32 %v2491_v20, %v2595_v58  ;;  %v9274_v56 = vmax.f32 %v2492_v5, %v2597_v34  ;;  %v1341_v51 = vld [vmem:[#allocation2 + $0x2a8] sm:$0xff]  ;;  %7000 = vmatmul.msk.f32.gmra.mxu2 %vm1109_vm2, %v8820_v39 }
 0x17b   : > { %v2855_v35 = vmax.f32 %v2495_v28, %v2602_v38  ;;  %v2856_v54 = vmax.f32 %v2496_v7, %v2604_v59  ;;  %v9276_v33 = vmax.f32 %v2499_v29, %v2609_v10  ;;  %v9278_v41 = vmax.f32 %v2500_v53, %v2611_v31 }
 0x17c   : > { %v3461_v1 = vmax.f32 %v2843_v52, %v9262_v48  ;;  %v3462_v15 = vmax.f32 %v2844_v40, %v9264_v12  ;;  %v13842_v9 = vrot.slane %v8986_v50, 1  ;;  %v13843_v45 = vrot.slane %v9013_v14, 1 }
 0x17d   : > { %13841 = vst [vmem:[#allocation46_spill] sm:$0xff] %v9278_v41  ;;  %v2988_v5 = vrot.slane %v9276_v33, 6  ;;  %v13440_v28 = vrot.slane %v9278_v41, 6  ;;  %v9291_v7 = vmax.f32 %v9272_v62, %v2855_v35  ;;  %v9294_v29 = vmax.f32 %v9274_v56, %v2856_v54 }
 0x17e   : > { %v2029_v49 = vmax.f32 %v8986_v50, %v13842_v9  ;;  %v2033_v20 = vmax.f32 %v9013_v14, %v13843_v45  ;;  %v9297_v53 = vmax.f32 %v2855_v35, %v9276_v33  ;;  %v9300_v17 = vmax.f32 %v2856_v54, %v9278_v41 }
 0x17f   : > { %13844 = vst [vmem:[#allocation47_spill] sm:$0xff] %v9291_v7  ;;  %v13848_v8 = vrot.slane %v9064_v42, 1  ;;  %v13849_v23 = vrot.slane %v9076_v21, 1  ;;  %v2990_v22 = vsel %vm2987_vm10, %v2988_v5, %v13440_v28  ;;  %v3549_v58 = vmax.f32 %v3461_v1, %v9291_v7 }
 0x180   : > { %13845 = vst [vmem:[#allocation48_spill] sm:$0xff] %v9294_v29  ;;  %v3550_v34 = vmax.f32 %v3462_v15, %v9294_v29  ;;  %v13850_v3 = vrot.slane %v9088_v43, 1  ;;  %6952 = vmatmul.msk.f32.vlgmr.msrb.gmra.mxu1 %vm1109_vm2, %v2990_v22  ;;  %v2224_v52 = vrot.slane %v2029_v49, 2  ;;  %v2231_v59 = vrot.slane %v2033_v20, 2  ;;  %v13884_v29 = vld [vmem:[#allocation5_spill] sm:$0xff] }
 0x181   : > { %13846 = vst [vmem:[#allocation49_spill] sm:$0xff] %v9297_v53  ;;  %v2037_v24 = vmax.f32 %v9064_v42, %v13848_v8  ;;  %v2041_v32 = vmax.f32 %v9076_v21, %v13849_v23  ;;  %v9318_v31 = vmax.f32 %v3549_v58, %v9276_v33  ;;  %v2584_v1 = vrot.slane %v8986_v50, 4 }
 0x182   : > { %13847 = vst [vmem:[#allocation50_spill] sm:$0xff] %v9300_v17  ;;  %v2045_v38 = vmax.f32 %v9088_v43, %v13850_v3  ;;  %v9321_v35 = vmax.f32 %v3550_v34, %v9278_v41  ;;  %v13853_v15 = vrot.slane %v9141_v55, 2  ;;  %v13854_v45 = vrot.slane %v9153_v37, 2 }
 0x183   : > { %v2238_v40 = vrot.slane %v2037_v24, 2  ;;  %v2245_v10 = vrot.slane %v2041_v32, 2  ;;  %13851 = vst [vmem:[#allocation51_spill] sm:$0xff] %v9318_v31  ;;  %v13855_v8 = vrot.slane %v9162_v26, 2  ;;  %v9339_v50 = vmax.f32 %v8715_v44, %v1341_v51 }
 0x184   : > { %13852 = vst [vmem:[#allocation52_spill] sm:$0xff] %v9321_v35  ;;  %v2252_v54 = vrot.slane %v2045_v38, 2  ;;  %v2225_v9 = vsel %vm2218_vm15, %v13853_v15, %v2224_v52  ;;  %v2232_v5 = vsel %vm2218_vm15, %v13854_v45, %v2231_v59  ;;  %v9342_v46 = vmax.f32 %v1341_v51, %v8872_v57 }
 0x185   : > { %v2239_v23 = vsel %vm2218_vm15, %v13855_v8, %v2238_v40  ;;  %v2246_v22 = vsel %vm2218_vm15, %v2243_v13, %v2245_v10  ;;  %13856 = vst [vmem:[#allocation53_spill] sm:$0xff] %v9339_v50  ;;  %v2485_v34 = vmax.f32 %v9141_v55, %v2225_v9  ;;  %v2486_v3 = vmax.f32 %v2029_v49, %v2224_v52  ;;  %v13868_v9 = vld [vmem:[#allocation45_spill] sm:$0xff] }
 0x186   : > { %13857 = vst [vmem:[#allocation54_spill] sm:$0xff] %v9342_v46  ;;  %v2253_v58 = vsel %vm2218_vm15, %v2250_v4, %v2252_v54  ;;  %v2489_v15 = vmax.f32 %v9153_v37, %v2232_v5  ;;  %v2490_v45 = vmax.f32 %v2033_v20, %v2231_v59  ;;  %v2493_v8 = vmax.f32 %v9162_v26, %v2239_v23  ;;  %v13869_v5 = vld [vmem:[#allocation38_spill] sm:$0xff] }
 0x187   : > { %v2494_v28 = vmax.f32 %v2037_v24, %v2238_v40  ;;  %v2497_v13 = vmax.f32 %v9171_v63, %v2246_v22  ;;  %v2498_v44 = vmax.f32 %v2041_v32, %v2245_v10  ;;  %v2501_v30 = vmax.f32 %v9182_v11, %v2253_v58  ;;  %v13862_v32 = vld [vmem:[#allocation29_spill] sm:$0xff]  ;;  %v9405_v40 = vld [vmem:[#allocation2 + $0x120] sm:$0xff] }
 0x188   : > { %v2502_v51 = vmax.f32 %v2045_v38, %v2252_v54  ;;  %v2585_v16 = vsel %vm384_vm0, %v2582_v47, %v2584_v1  ;;  %v2591_v4 = vrot.slane %v9013_v14, 4  ;;  %v2598_v55 = vrot.slane %v9064_v42, 4  ;;  %13865 = vst [vmem:[#allocation58_spill] sm:$0xff] %v9405_v40  ;;  %v13870_v22 = vld [vmem:[#allocation31_spill] sm:$0xff] }
 0x189   : > { %v2605_v37 = vrot.slane %v9076_v21, 4  ;;  %v2612_v49 = vrot.slane %v9088_v43, 4  ;;  %v2845_v26 = vmax.f32 %v2485_v34, %v2585_v16  ;;  %v2846_v20 = vmax.f32 %v2486_v3, %v2584_v1  ;;  %v9412_v1 = vld [vmem:[#allocation2 + $0x128] sm:$0xff]  ;;  %v9420_v34 = vld [vmem:[#allocation2 + $0x130] sm:$0xff] }
 0x18a   : > { %v2592_v63 = vsel %vm384_vm0, %v2589_v0, %v2591_v4  ;;  %v2599_v27 = vsel %vm384_vm0, %v2596_v18, %v2598_v55  ;;  %v9365_v11 = vmax.f32 %v2490_v45, %v2591_v4  ;;  %v9367_v47 = vmax.f32 %v2494_v28, %v2598_v55  ;;  %13867 = vst [vmem:[#allocation59_spill] sm:$0xff] %v9412_v1  ;;  %v13873_v4 = vld [vmem:[#allocation26_spill] sm:$0xff]  ;;  %v13874_v55 = vld [vmem:[#allocation33_spill] sm:$0xff] }
 0x18b   : > { %v13858_v14 = vrot.slane %v9073_v2, 4  ;;  %v13859_v21 = vrot.slane %v9085_v61, 4  ;;  %v9375_v16 = vmax.f32 %v2489_v15, %v2592_v63  ;;  %v9377_v36 = vmax.f32 %v2493_v8, %v2599_v27  ;;  %v9437_v27 = vld [vmem:[#allocation2 + $0x230] sm:$0xff] }
 0x18c   : > { %v2858_v0 = vmax.f32 %v2498_v44, %v2605_v37  ;;  %v9383_v28 = vmax.f32 %v2502_v51, %v2612_v49  ;;  %v3464_v24 = vmax.f32 %v2846_v20, %v9365_v11  ;;  %v9389_v61 = vmax.f32 %v8947_v6, %v9041_v60  ;;  %v13866_v6 = vld [vmem:[#allocation17_spill] sm:$0xff]  ;;  %v13872_v44 = vld [vmem:[#allocation32_spill] sm:$0xff]  ;;  %13876 = vst [vmem:[#allocation45_spill] sm:$0xff] %v9437_v27 }
 0x18d   : > { %v2606_v42 = vsel %vm384_vm0, %v13858_v14, %v2605_v37  ;;  %v2613_v43 = vsel %vm384_vm0, %v13859_v21, %v2612_v49  ;;  %v3463_v2 = vmax.f32 %v2845_v26, %v9375_v16  ;;  %v9393_v38 = vmax.f32 %v13862_v32, %v9049_v19  ;;  %v13875_v49 = vld [vmem:[#allocation34_spill] sm:$0xff] }
 0x18e   : > { %v2857_v25 = vmax.f32 %v2497_v13, %v2606_v42  ;;  %v9381_v18 = vmax.f32 %v2501_v30, %v2613_v43  ;;  %13861 = vst [vmem:[#allocation56_spill] sm:$0xff] %v9389_v61  ;;  %v9400_v30 = vmax.f32 %v9367_v47, %v2858_v0  ;;  %v9410_v54 = vmax.f32 %v2858_v0, %v9383_v28  ;;  %v1295_v13 = vld [vmem:[#allocation2 + $0x138] sm:$0x3f] }
 0x18f   : > { %13863 = vst [vmem:[#allocation29_spill] sm:$0xff] %v9393_v38  ;;  %v9416_v23 = vmax.f32 %v13869_v5, %v13868_v9  ;;  %v1493_v58 = vmax.f32 %v13870_v22, %v9389_v61  ;;  %v13871_v3 = vrot.slane %v9278_v41, 6  ;;  %v1494_v51 = vmax.f32 %v13872_v44, %v9393_v38  ;;  %v1299_v32 = vld [vmem:[#allocation2 + $0x158] sm:$0x3f] }
 0x190   : > { %13860 = vst [vmem:[#allocation55_spill] sm:$0xff] %v9381_v18  ;;  %v2991_v39 = vrot.slane %v9381_v18, 6  ;;  %v9397_v52 = vmax.f32 %v9377_v36, %v2857_v25  ;;  %v9403_v59 = vmax.f32 %v2857_v25, %v9381_v18  ;;  %v3552_v8 = vmax.f32 %v3464_v24, %v9400_v30  ;;  %v9448_v25 = vld [vmem:[#allocation2 + $0x150] sm:$0xff]  ;;  %v1315_v22 = vld [vmem:[#allocation2 + $0x1d8] sm:$0x3f] }
 0x191   : > { %v1495_v37 = vmax.f32 %v13874_v55, %v13873_v4  ;;  %v1496_v26 = vmax.f32 %v13875_v49, %v9416_v23  ;;  %v1589_v20 = vmax.f32 %v1493_v58, %v9405_v40  ;;  %v3465_v63 = vmax.f32 %v9262_v48, %v9272_v62  ;;  %v1307_v55 = vld [vmem:[#allocation2 + $0x198] sm:$0x3f] }
 0x192   : > { %13864 = vst [vmem:[#allocation57_spill] sm:$0xff] %v9397_v52  ;;  %v2992_v15 = vsel %vm2987_vm10, %v13871_v3, %v2991_v39  ;;  %v3551_v45 = vmax.f32 %v3463_v2, %v9397_v52  ;;  %v9443_v42 = vmax.f32 %v3552_v8, %v9383_v28  ;;  %v1590_v21 = vmax.f32 %v1494_v51, %v9412_v1  ;;  %v13880_v39 = vld [vmem:[#allocation3_spill] sm:$0xff]  ;;  %v1303_v3 = vld [vmem:[#allocation2 + $0x178] sm:$0x3f] }
 0x193   : > { %6953 = vmatmul.msk.f32.gmra.mxu1 %vm1109_vm2, %v2992_v15  ;;  %v3466_v43 = vmax.f32 %v9264_v12, %v9274_v56  ;;  %v9453_v48 = vmax.f32 %v1495_v37, %v9420_v34  ;;  %v9455_v62 = vmax.f32 %v1496_v26, %v1295_v13  ;;  %v1797_v24 = vrot.slane %v1589_v20, 1  ;;  %7001 = vmatmul.msk.f32.gmra.mxu2 %vm1109_vm2, %v13880_v39  ;;  %v13882_v15 = vld [vmem:[#allocation16_spill] sm:$0xff]  ;;  %v1311_v37 = vld [vmem:[#allocation2 + $0x1b8] sm:$0x3f] }
 0x194   : > { %v9440_v14 = vmax.f32 %v3551_v45, %v9381_v18  ;;  %13878 = vst [vmem:[#allocation31_spill] sm:$0xff] %v9443_v42  ;;  %v9463_v12 = vmax.f32 %v9420_v34, %v9448_v25  ;;  %v1798_v56 = vrot.slane %v1590_v21, 1  ;;  %v3553_v58 = vmax.f32 %v3465_v63, %v9297_v53  ;;  %v9475_v63 = vld [vmem:[#allocation2 + $0x1f8] sm:$0x3f] }
 0x195   : > { %v9468_v45 = vmax.f32 %v9437_v27, %v13882_v15  ;;  %v1800_v8 = vrot.slane %v9453_v48, 1  ;;  %v13449_v44 = vrot.slane %v9455_v62, 1  ;;  %v3554_v51 = vmax.f32 %v3466_v43, %v9300_v17 }
 0x196   : > { %13877 = vst [vmem:[#allocation38_spill] sm:$0xff] %v9440_v14  ;;  %v1404_v49 = vmax.f32 %v13868_v9, %v1295_v13  ;;  %v1799_v26 = vsel %vm1761_vm14, %v1797_v24, %v1798_v56  ;;  %v2614_v39 = vrot.slane %v1589_v20, 4  ;;  %v1408_v2 = vmax.f32 %v1295_v13, %v1299_v32 }
 0x197   : > { %v1801_v15 = vsel %vm1761_vm14, %v1798_v56, %v1800_v8  ;;  %v1803_v10 = vsel %vm1761_vm14, %v1800_v8, %v13449_v44  ;;  %v2046_v5 = vmax.f32 %v1589_v20, %v1799_v26  ;;  %v1412_v46 = vmax.f32 %v1299_v32, %v1303_v3  ;;  %v13883_v20 = vld [vmem:[#allocation40_spill] sm:$0xff] }
 0x198   : > { %v2047_v43 = vmax.f32 %v1590_v21, %v1801_v15  ;;  %v9482_v17 = vmax.f32 %v9453_v48, %v1803_v10  ;;  %v1416_v9 = vmax.f32 %v1303_v3, %v1307_v55  ;;  %v1420_v53 = vmax.f32 %v1307_v55, %v1311_v37 }
 0x199   : > { %v2615_v24 = vrot.slane %v1590_v21, 4  ;;  %v9485_v38 = vmax.f32 %v1311_v37, %v1315_v22  ;;  %v9488_v13 = vmax.f32 %v1315_v22, %v9475_v63  ;;  %v2254_v56 = vrot.slane %v2046_v5, 2 }
 0x19a   : > { %v2255_v61 = vrot.slane %v2047_v43, 2  ;;  %v2257_v8 = vrot.slane %v9482_v17, 2  ;;  %v1500_v26 = vmax.f32 %v13883_v20, %v1404_v49  ;;  %v1504_v15 = vmax.f32 %v9416_v23, %v1408_v2 }
 0x19b   : > { %v1508_v10 = vmax.f32 %v1404_v49, %v1412_v46  ;;  %v1512_v44 = vmax.f32 %v1408_v2, %v1416_v9  ;;  %v1516_v42 = vmax.f32 %v1412_v46, %v1420_v53  ;;  %7002 = vmatmul.msk.f32.gmra.mxu2 %vm1109_vm2, %v13884_v29  ;;  %v1520_v7 = vmax.f32 %v1416_v9, %v9485_v38 }
 0x19c   : > { %v2256_v21 = vsel %vm2218_vm15, %v2254_v56, %v2255_v61  ;;  %v2258_v0 = vsel %vm2218_vm15, %v2255_v61, %v2257_v8  ;;  %v1524_v52 = vmax.f32 %v1420_v53, %v9488_v13  ;;  %v2616_v20 = vsel %vm384_vm0, %v2614_v39, %v2615_v24  ;;  %v9515_v53 = vld [vmem:[#allocation2 + $0x218] sm:$0x3f] }
 0x19d   : > { %v2503_v41 = vmax.f32 %v2046_v5, %v2256_v21  ;;  %v2504_v18 = vmax.f32 %v2047_v43, %v2258_v0  ;;  %v13885_v23 = vrot.slane %v9453_v48, 4  ;;  %v9503_v46 = vmax.f32 %v1500_v26, %v1299_v32 }
 0x19e   : > { %v9505_v49 = vmax.f32 %v1504_v15, %v1303_v3  ;;  %v9507_v29 = vmax.f32 %v1508_v10, %v1307_v55  ;;  %v9509_v56 = vmax.f32 %v1512_v44, %v1311_v37  ;;  %v9517_v0 = vmax.f32 %v1516_v42, %v1315_v22  ;;  %v13892_v44 = vld [vmem:[#allocation23_spill] sm:$0xff]  ;;  %v13901_v42 = vld [vmem:[#allocation30_spill] sm:$0xff] }
 0x19f   : > { %v2618_v2 = vsel %vm384_vm0, %v2615_v24, %v13885_v23  ;;  %v9511_v61 = vmax.f32 %v2503_v41, %v2616_v20  ;;  %v9520_v5 = vmax.f32 %v1520_v7, %v9475_v63  ;;  %v13890_v32 = vmax.f32 %v13866_v6, %v9339_v50  ;;  %v13894_v24 = vld [vmem:[#allocation27_spill] sm:$0xff] }
 0x1a0   : > { %v9513_v9 = vmax.f32 %v2504_v18, %v2618_v2  ;;  %13888 = vst [vmem:[#allocation33_spill] sm:$0xff] %v9517_v0  ;;  %v9530_v55 = vmax.f32 %v13892_v44, %v9437_v27  ;;  %v9533_v41 = vmax.f32 %v1524_v52, %v9515_v53  ;;  %v13456_v18 = vrot.slane %v9503_v46, 1 }
 0x1a1   : > { %13886 = vst [vmem:[#allocation32_spill] sm:$0xff] %v9511_v61  ;;  %v9526_v3 = vmax.f32 %v13890_v32, %v8872_v57  ;;  %v2993_v7 = vrot.slane %v9511_v61, 6  ;;  %v13457_v37 = vrot.slane %v9505_v49, 1  ;;  %v9542_v57 = vmax.f32 %v3553_v58, %v9511_v61  ;;  %v13895_v58 = vld [vmem:[#allocation6_spill] sm:$0xff] }
 0x1a2   : > { %13887 = vst [vmem:[#allocation26_spill] sm:$0xff] %v9513_v9  ;;  %v13459_v22 = vrot.slane %v9513_v9, 6  ;;  %v9545_v39 = vmax.f32 %v3554_v51, %v9513_v9  ;;  %v13458_v52 = vrot.slane %v9507_v29, 1  ;;  %v13460_v43 = vrot.slane %v9509_v56, 1  ;;  %v13896_v51 = vld [vmem:[#allocation18_spill] sm:$0xff] }
 0x1a3   : > { %13889 = vst [vmem:[#allocation34_spill] sm:$0xff] %v9520_v5  ;;  %v1535_v26 = vmax.f32 %v13894_v24, %v9468_v45  ;;  %v13462_v10 = vrot.slane %v9517_v0, 1  ;;  %v13464_v21 = vrot.slane %v9520_v5, 1  ;;  %7003 = vmatmul.msk.f32.gmra.mxu2 %vm1109_vm2, %v13895_v58  ;;  %v1539_v20 = vmax.f32 %v9530_v55, %v13896_v51 }
 0x1a4   : > { %13891 = vst [vmem:[#allocation3_spill] sm:$0xff] %v9526_v3  ;;  %v2995_v15 = vsel %vm2987_vm10, %v2993_v7, %v13459_v22  ;;  %v13897_v2 = vrot.slane %v9455_v62, 1  ;;  %v9568_v44 = vmax.f32 %v9503_v46, %v13456_v18  ;;  %v9573_v7 = vmax.f32 %v9505_v49, %v13457_v37  ;;  %v7374_v3 = vld [vmem:[#allocation2 + $0x270] sm:$0xff] }
 0x1a5   : > { %13893 = vst [vmem:[#allocation16_spill] sm:$0xff] %v9533_v41  ;;  %6954 = vmatmul.msk.f32.gmra.mxu1 %vm1109_vm2, %v2995_v15  ;;  %v9578_v15 = vmax.f32 %v9507_v29, %v13458_v52  ;;  %v9583_v58 = vmax.f32 %v9509_v56, %v13460_v43  ;;  %v1543_v18 = vmax.f32 %v9468_v45, %v13901_v42  ;;  %v13904_v45 = vld [vmem:[#allocation25_spill] sm:$0xff]  ;;  %v13906_v22 = vrot.slane %v9533_v41, 1 }
 0x1a6   : > { %v2049_v32 = vmax.f32 %v9455_v62, %v13897_v2  ;;  %13898 = vst [vmem:[#allocation40_spill] sm:$0xff] %v9573_v7  ;;  %v9588_v2 = vmax.f32 %v9517_v0, %v13462_v10  ;;  %v9595_v37 = vmax.f32 %v9520_v5, %v13464_v21  ;;  %v9602_v51 = vmax.f32 %v1535_v26, %v7374_v3 }
 0x1a7   : > { %13899 = vst [vmem:[#allocation5_spill] sm:$0xff] %v9583_v58  ;;  %v9605_v42 = vmax.f32 %v1539_v20, %v13904_v45  ;;  %v9612_v23 = vmax.f32 %v9533_v41, %v13906_v22  ;;  %v13908_v50 = vrot.slane %v9568_v44, 2  ;;  %v13909_v3 = vrot.slane %v9573_v7, 2 }
 0x1a8   : > { %13900 = vst [vmem:[#allocation23_spill] sm:$0xff] %v9588_v2  ;;  %v2259_v52 = vrot.slane %v2049_v32, 2  ;;  %v13911_v6 = vrot.slane %v9583_v58, 2  ;;  %v13916_v27 = vrot.slane %v9509_v56, 4 }
 0x1a9   : > { %13902 = vst [vmem:[#allocation6_spill] sm:$0xff] %v9595_v37  ;;  %v2510_v10 = vmax.f32 %v9568_v44, %v13908_v50  ;;  %v2514_v26 = vmax.f32 %v9573_v7, %v13909_v3  ;;  %v13913_v50 = vrot.slane %v9595_v37, 2  ;;  %v2619_v3 = vrot.slane %v9455_v62, 4 }
 0x1aa   : > { %13903 = vst [vmem:[#allocation60_spill] sm:$0xff] %v9602_v51  ;;  %v2260_v21 = vsel %vm2218_vm15, %v2257_v8, %v2259_v52  ;;  %v2506_v43 = vmax.f32 %v2049_v32, %v2259_v52  ;;  %v13910_v8 = vrot.slane %v9578_v15, 2  ;;  %v2522_v22 = vmax.f32 %v9583_v58, %v13911_v6  ;;  %v13914_v51 = vld [vmem:[#allocation9_spill] sm:$0xff] }
 0x1ab   : > { %13905 = vst [vmem:[#allocation25_spill] sm:$0xff] %v9605_v42  ;;  %v2505_v20 = vmax.f32 %v9482_v17, %v2260_v21  ;;  %v13912_v52 = vrot.slane %v9588_v2, 2  ;;  %v2530_v42 = vmax.f32 %v9595_v37, %v13913_v50  ;;  %v13475_v17 = vrot.slane %v9503_v46, 4  ;;  %7004 = vmatmul.msk.f32.gmra.mxu2 %vm1109_vm2, %v13914_v51 }
 0x1ac   : > { %13907 = vst [vmem:[#allocation61_spill] sm:$0xff] %v9612_v23  ;;  %v2518_v45 = vmax.f32 %v9578_v15, %v13910_v8  ;;  %v13473_v21 = vrot.slane %v9505_v49, 4  ;;  %v13474_v8 = vrot.slane %v9507_v29, 4  ;;  %v2866_v62 = vmax.f32 %v2506_v43, %v2619_v3 }
 0x1ad   : > { %v2526_v32 = vmax.f32 %v9588_v2, %v13912_v52  ;;  %v13915_v2 = vrot.slane %v9453_v48, 4  ;;  %v2870_v37 = vmax.f32 %v2510_v10, %v13475_v17  ;;  %v2882_v52 = vmax.f32 %v2522_v22, %v13916_v27 }
 0x1ae   : > { %v9649_v7 = vmax.f32 %v2514_v26, %v13473_v21  ;;  %v2878_v6 = vmax.f32 %v2518_v45, %v13474_v8  ;;  %v13917_v48 = vrot.slane %v9517_v0, 4  ;;  %v13920_v10 = vrot.slane %v9520_v5, 4  ;;  %v1327_v45 = vld [vmem:[#allocation2 + $0x238] sm:$0x3f] }
 0x1af   : > { %v2620_v50 = vsel %vm384_vm0, %v13915_v2, %v2619_v3  ;;  %v13918_v2 = vld [vmem:[#allocation39_spill] sm:$0xff]  ;;  %v3467_v26 = vmax.f32 %v9375_v16, %v9377_v36  ;;  %v3480_v22 = vmax.f32 %v9383_v28, %v2866_v62 }
 0x1b0   : > { %v9651_v51 = vmax.f32 %v2505_v20, %v2620_v50  ;;  %v2886_v58 = vmax.f32 %v2526_v32, %v13917_v48  ;;  %v9660_v43 = vmax.f32 %v1543_v18, %v13918_v2  ;;  %v9664_v3 = vmax.f32 %v2530_v42, %v13920_v10 }
 0x1b1   : > { %v3468_v20 = vmax.f32 %v9365_v11, %v9367_v47  ;;  %v13478_v50 = vrot.slane %v9612_v23, 2  ;;  %v9673_v32 = vmax.f32 %v2866_v62, %v2870_v37  ;;  %v3488_v18 = vmax.f32 %v2870_v37, %v9649_v7 }
 0x1b2   : > { %13919 = vst [vmem:[#allocation9_spill] sm:$0xff] %v9660_v43  ;;  %v2996_v27 = vrot.slane %v9651_v51, 6  ;;  %v9677_v42 = vmax.f32 %v9649_v7, %v2878_v6  ;;  %v9679_v48 = vmax.f32 %v2878_v6, %v2882_v52  ;;  %v9681_v16 = vmax.f32 %v2882_v52, %v2886_v58  ;;  %v9778_v43 = vld [vmem:[#allocation2 + $0x140] sm:$0xff] }
 0x1b3   : > { %v9685_v11 = vmax.f32 %v9475_v63, %v9515_v53  ;;  %v13924_v47 = vrot.slane %v9513_v9, 6  ;;  %v9691_v28 = vmax.f32 %v2886_v58, %v9664_v3  ;;  %v3555_v2 = vmax.f32 %v3467_v26, %v9403_v59 }
 0x1b4   : > { %13921 = vst [vmem:[#allocation39_spill] sm:$0xff] %v9679_v48  ;;  %v9695_v10 = vmax.f32 %v9515_v53, %v1327_v45  ;;  %v3556_v21 = vmax.f32 %v3468_v20, %v9410_v54  ;;  %v3560_v8 = vmax.f32 %v9400_v30, %v3480_v22  ;;  %v3568_v17 = vmax.f32 %v3480_v22, %v3488_v18  ;;  %v13927_v53 = vld [vmem:[#allocation11_spill] sm:$0xff] }
 0x1b5   : > { %13922 = vst [vmem:[#allocation62_spill] sm:$0xff] %v9681_v16  ;;  %v2997_v36 = vsel %vm2987_vm10, %v13924_v47, %v2996_v27  ;;  %v3572_v27 = vmax.f32 %v9673_v32, %v9677_v42  ;;  %v3576_v47 = vmax.f32 %v3488_v18, %v9679_v48  ;;  %7005 = vmatmul.msk.f32.gmra.mxu2 %vm1109_vm2, %v13927_v53  ;;  %v9727_v53 = vld [vmem:[#allocation2 + $0x170] sm:$0xff] }
 0x1b6   : > { %13923 = vst [vmem:[#allocation63_spill] sm:$0xff] %v9685_v11  ;;  %6955 = vmatmul.msk.f32.gmra.mxu1 %vm1109_vm2, %v2997_v36  ;;  %v2534_v20 = vmax.f32 %v9612_v23, %v13478_v50  ;;  %v9715_v22 = vmax.f32 %v3555_v2, %v9651_v51  ;;  %v9717_v36 = vmax.f32 %v3556_v21, %v2866_v62  ;;  %v13480_v50 = vrot.slane %v9533_v41, 4  ;;  %v1306_v2 = vld [vmem:[#allocation2 + $0x190] sm:$0xff] }
 0x1b7   : > { %13925 = vst [vmem:[#allocation64_spill] sm:$0xff] %v9691_v28  ;;  %v9719_v63 = vmax.f32 %v3560_v8, %v2870_v37  ;;  %v9721_v18 = vmax.f32 %v3568_v17, %v2878_v6  ;;  %v9723_v26 = vmax.f32 %v3572_v27, %v2882_v52  ;;  %v9725_v5 = vmax.f32 %v3576_v47, %v2886_v58  ;;  %v13931_v8 = vld [vmem:[#allocation21_spill] sm:$0xff]  ;;  %v13933_v37 = vld [vmem:[#allocation35_spill] sm:$0xff]  ;;  %v13934_v52 = vld [vmem:[#allocation36_spill] sm:$0xff] }
 0x1b8   : > { %13926 = vst [vmem:[#allocation65_spill] sm:$0xff] %v9695_v10  ;;  %v13482_v23 = vrot.slane %v9715_v22, 1  ;;  %v13481_v30 = vrot.slane %v9717_v36, 1  ;;  %v9734_v21 = vmax.f32 %v9041_v60, %v9405_v40  ;;  %v1528_v17 = vmax.f32 %v9485_v38, %v9685_v11  ;;  %v13939_v28 = vld [vmem:[#allocation13_spill] sm:$0xff] }
 0x1b9   : > { %13928 = vst [vmem:[#allocation11_spill] sm:$0xff] %v9725_v5  ;;  %v9741_v58 = vmax.f32 %v9049_v19, %v9412_v1  ;;  %v1403_v6 = vmax.f32 %v13931_v8, %v9420_v34  ;;  %v9749_v60 = vmax.f32 %v2534_v20, %v13480_v50  ;;  %v1310_v34 = vld [vmem:[#allocation2 + $0x1b0] sm:$0xff]  ;;  %v1411_v47 = vmax.f32 %v9448_v25, %v9727_v53 }
 0x1ba   : > { %13929 = vst [vmem:[#allocation66_spill] sm:$0xff] %v9734_v21  ;;  %v3802_v38 = vsel %vm1761_vm14, %v13482_v23, %v13481_v30  ;;  %v9763_v8 = vmax.f32 %v9727_v53, %v1306_v2  ;;  %v1497_v50 = vmax.f32 %v13933_v37, %v9734_v21  ;;  %v13935_v30 = vld [vmem:[#allocation37_spill] sm:$0xff]  ;;  %v9776_v23 = vmax.f32 %v1528_v17, %v1327_v45  ;;  %v13940_v37 = vld [vmem:[#allocation55_spill] sm:$0xff] }
 0x1bb   : > { %13930 = vst [vmem:[#allocation67_spill] sm:$0xff] %v9741_v58  ;;  %v9758_v27 = vmax.f32 %v9715_v22, %v3802_v38  ;;  %v1498_v62 = vmax.f32 %v13934_v52, %v9741_v58  ;;  %v1499_v19 = vmax.f32 %v13935_v30, %v1403_v6  ;;  %v9774_v38 = vmax.f32 %v9276_v33, %v9511_v61  ;;  %v9792_v33 = vld [vmem:[#allocation2 + $0x148] sm:$0xff]  ;;  %v1314_v45 = vld [vmem:[#allocation2 + $0x1d0] sm:$0xff] }
 0x1bc   : > { %13932 = vst [vmem:[#allocation21_spill] sm:$0xff] %v9749_v60  ;;  %v1507_v11 = vmax.f32 %v1403_v6, %v1411_v47  ;;  %v1511_v20 = vmax.f32 %v9463_v12, %v9763_v8  ;;  %v9786_v52 = vmax.f32 %v13940_v37, %v9651_v51  ;;  %v9790_v30 = vmax.f32 %v9664_v3, %v9749_v60  ;;  %v13943_v37 = vld [vmem:[#allocation46_spill] sm:$0xff] }
 0x1bd   : > { %13936 = vst [vmem:[#allocation35_spill] sm:$0xff] %v9774_v38  ;;  %7006 = vmatmul.msk.f32.gmra.mxu2 %vm1109_vm2, %v13939_v28  ;;  %v9794_v17 = vmax.f32 %v1306_v2, %v1310_v34  ;;  %v1593_v6 = vmax.f32 %v1497_v50, %v9778_v43  ;;  %v1594_v48 = vmax.f32 %v1498_v62, %v9792_v33  ;;  %v3796_v60 = vrot.slane %v9542_v57, 1 }
 0x1be   : > { %13937 = vst [vmem:[#allocation36_spill] sm:$0xff] %v9776_v23  ;;  %v1595_v5 = vmax.f32 %v1499_v19, %v9448_v25  ;;  %v9799_v28 = vmax.f32 %v1507_v11, %v1306_v2  ;;  %v9801_v31 = vmax.f32 %v1511_v20, %v1310_v34  ;;  %v9805_v35 = vmax.f32 %v13943_v37, %v9513_v9  ;;  %v13946_v11 = vld [vmem:[#allocation57_spill] sm:$0xff] }
 0x1bf   : > { %13938 = vst [vmem:[#allocation37_spill] sm:$0xff] %v9778_v43  ;;  %v9811_v21 = vmax.f32 %v1310_v34, %v1314_v45  ;;  %v1804_v62 = vrot.slane %v1593_v6, 1  ;;  %v1805_v25 = vrot.slane %v1594_v48, 1  ;;  %v3559_v2 = vmax.f32 %v13946_v11, %v9786_v52  ;;  %v7375_v19 = vld [vmem:[#allocation2 + $0x1f0] sm:$0xff] }
 0x1c0   : > { %13941 = vst [vmem:[#allocation13_spill] sm:$0xff] %v9790_v30  ;;  %v9815_v20 = vmax.f32 %v1314_v45, %v7375_v19  ;;  %v1807_v37 = vrot.slane %v1595_v5, 1  ;;  %v1515_v58 = vmax.f32 %v1411_v47, %v9794_v17  ;;  %v13949_v43 = vrot.slane %v9503_v46, 1 }
 0x1c1   : > { %13942 = vst [vmem:[#allocation55_spill] sm:$0xff] %v9792_v33  ;;  %v1806_v50 = vsel %vm1761_vm14, %v1804_v62, %v1805_v25  ;;  %v13947_v33 = vmax.f32 %v9677_v42, %v9681_v16  ;;  %v13950_v23 = vrot.slane %v9507_v29, 1  ;;  %v13951_v47 = vrot.slane %v9799_v28, 1 }
 0x1c2   : > { %13944 = vst [vmem:[#allocation46_spill] sm:$0xff] %v9805_v35  ;;  %v1808_v40 = vsel %vm1761_vm14, %v1805_v25, %v1807_v37  ;;  %v1810_v1 = vsel %vm1761_vm14, %v1807_v37, %v13949_v43  ;;  %v13952_v34 = vrot.slane %v9721_v18, 1  ;;  %v2050_v43 = vmax.f32 %v1593_v6, %v1806_v50  ;;  %v13955_v25 = vld [vmem:[#allocation15_spill] sm:$0xff] }
 0x1c3   : > { %13945 = vst [vmem:[#allocation68_spill] sm:$0xff] %v9811_v21  ;;  %v9827_v11 = vmax.f32 %v13947_v33, %v9664_v3  ;;  %v1824_v62 = vsel %vm1761_vm14, %v13951_v47, %v13950_v23  ;;  %v13953_v3 = vrot.slane %v9723_v26, 1  ;;  %v1519_v33 = vmax.f32 %v9763_v8, %v9811_v21 }
 0x1c4   : > { %v9841_v30 = vmax.f32 %v9721_v18, %v13952_v34  ;;  %v1523_v23 = vmax.f32 %v9794_v17, %v9815_v20  ;;  %v2051_v37 = vmax.f32 %v1594_v48, %v1808_v40  ;;  %v2052_v47 = vmax.f32 %v1595_v5, %v1810_v1 }
 0x1c5   : > { %13948 = vst [vmem:[#allocation57_spill] sm:$0xff] %v9827_v11  ;;  %v9846_v42 = vmax.f32 %v9723_v26, %v13953_v3  ;;  %7007 = vmatmul.msk.f32.gmra.mxu2 %vm1109_vm2, %v13955_v25  ;;  %v9855_v34 = vmax.f32 %v9799_v28, %v1824_v62  ;;  %v9861_v11 = vmax.f32 %v1515_v58, %v1314_v45  ;;  %v13956_v8 = vrot.slane %v9509_v56, 1 }
 0x1c6   : > { %v13957_v50 = vrot.slane %v9801_v31, 1  ;;  %v2261_v17 = vrot.slane %v2050_v43, 2  ;;  %v2262_v40 = vrot.slane %v2051_v37, 2  ;;  %v2264_v1 = vrot.slane %v2052_v47, 2 }
 0x1c7   : > { %13954 = vst [vmem:[#allocation69_spill] sm:$0xff] %v9846_v42  ;;  %v13513_v62 = vrot.slane %v9855_v34, 2  ;;  %v2621_v9 = vrot.slane %v1593_v6, 4  ;;  %v2622_v61 = vrot.slane %v1594_v48, 4  ;;  %v2624_v42 = vrot.slane %v1595_v5, 4 }
 0x1c8   : > { %v1831_v25 = vsel %vm1761_vm14, %v13957_v50, %v13956_v8  ;;  %v2263_v3 = vsel %vm2218_vm15, %v2261_v17, %v2262_v40  ;;  %v2265_v58 = vsel %vm2218_vm15, %v2262_v40, %v2264_v1  ;;  %v13958_v45 = vrot.slane %v9568_v44, 2 }
 0x1c9   : > { %v13959_v8 = vrot.slane %v9578_v15, 2  ;;  %v2507_v21 = vmax.f32 %v2050_v43, %v2263_v3  ;;  %v2508_v6 = vmax.f32 %v2051_v37, %v2265_v58  ;;  %v2623_v16 = vsel %vm384_vm0, %v2621_v9, %v2622_v61  ;;  %v13965_v9 = vld [vmem:[#allocation22_spill] sm:$0xff] }
 0x1ca   : > { %v2267_v24 = vsel %vm2218_vm15, %v2264_v1, %v13958_v45  ;;  %v2625_v17 = vsel %vm384_vm0, %v2622_v61, %v2624_v42  ;;  %v13960_v40 = vrot.slane %v9503_v46, 4  ;;  %v13961_v1 = vrot.slane %v9507_v29, 4  ;;  %v13967_v61 = vld [vmem:[#allocation47_spill] sm:$0xff] }
 0x1cb   : > { %v2281_v50 = vsel %vm2218_vm15, %v13513_v62, %v13959_v8  ;;  %v2509_v48 = vmax.f32 %v2052_v47, %v2267_v24  ;;  %v13962_v15 = vrot.slane %v9799_v28, 4  ;;  %v9891_v8 = vmax.f32 %v1519_v33, %v7375_v19 }
 0x1cc   : > { %v2517_v5 = vmax.f32 %v9855_v34, %v2281_v50  ;;  %v2627_v44 = vsel %vm384_vm0, %v2624_v42, %v13960_v40  ;;  %v9893_v43 = vmax.f32 %v2507_v21, %v2623_v16  ;;  %v9895_v24 = vmax.f32 %v2508_v6, %v2625_v17  ;;  %v13968_v42 = vld [vmem:[#allocation48_spill] sm:$0xff]  ;;  %v7376_v21 = vld [vmem:[#allocation2 + $0x210] sm:$0xff] }
 0x1cd   : > { %v2641_v45 = vsel %vm384_vm0, %v13962_v15, %v13961_v1  ;;  %v9897_v37 = vmax.f32 %v2509_v48, %v2627_v44  ;;  %7008 = vmatmul.msk.f32.gmra.mxu2 %vm1109_vm2, %v13965_v9  ;;  %v3557_v29 = vmax.f32 %v13967_v61, %v9774_v38  ;;  %v3558_v47 = vmax.f32 %v13968_v42, %v9805_v35  ;;  %v14043_v38 = vld [vmem:[#allocation56_spill] sm:$0xff] }
 0x1ce   : > { %13963 = vst [vmem:[#allocation15_spill] sm:$0xff] %v9893_v43  ;;  %v9901_v46 = vmax.f32 %v2517_v5, %v2641_v45  ;;  %v13969_v19 = vrot.slane %v9545_v39, 1  ;;  %v9910_v33 = vmax.f32 %v1523_v23, %v7376_v21  ;;  %v9913_v3 = vmax.f32 %v9801_v31, %v1831_v25 }
 0x1cf   : > { %13964 = vst [vmem:[#allocation70_spill] sm:$0xff] %v9895_v24  ;;  %v2998_v58 = vrot.slane %v9893_v43, 6  ;;  %v2999_v50 = vrot.slane %v9895_v24, 6  ;;  %v3637_v6 = vmax.f32 %v3557_v29, %v9893_v43  ;;  %v3638_v48 = vmax.f32 %v3558_v47, %v9895_v24 }
 0x1d0   : > { %13966 = vst [vmem:[#allocation22_spill] sm:$0xff] %v9901_v46  ;;  %v3798_v16 = vsel %vm1761_vm14, %v3796_v60, %v13969_v19  ;;  %v9920_v5 = vmax.f32 %v3559_v2, %v9897_v37  ;;  %v13970_v17 = vrot.slane %v9715_v22, 1  ;;  %v13971_v60 = vmov %v13969_v19 }
 0x1d1   : > { %v3000_v25 = vsel %vm2987_vm10, %v2998_v58, %v2999_v50  ;;  %v13514_v40 = vrot.slane %v9719_v63, 1  ;;  %v4013_v44 = vmax.f32 %v9542_v57, %v3798_v16  ;;  %v3803_v15 = vrot.slane %v3637_v6, 1 }
 0x1d2   : > { %v3800_v23 = vsel %vm1761_vm14, %v13971_v60, %v13970_v17  ;;  %6956 = vmatmul.msk.f32.gmra.mxu1 %vm1109_vm2, %v3000_v25  ;;  %v3804_v45 = vrot.slane %v3638_v48, 1  ;;  %v3806_v2 = vrot.slane %v9920_v5, 1  ;;  %v13517_v9 = vrot.slane %v9758_v27, 2 }
 0x1d3   : > { %v4014_v1 = vmax.f32 %v9545_v39, %v3800_v23  ;;  %v4176_v61 = vrot.slane %v4013_v44, 2  ;;  %v4436_v42 = vrot.slane %v9542_v57, 4  ;;  %v4437_v47 = vrot.slane %v9545_v39, 4 }
 0x1d4   : > { %v3805_v19 = vsel %vm1761_vm14, %v3803_v15, %v3804_v45  ;;  %v3807_v16 = vsel %vm1761_vm14, %v3804_v45, %v3806_v2  ;;  %v3809_v21 = vsel %vm1761_vm14, %v3806_v2, %v13514_v40  ;;  %v13516_v58 = vrot.slane %v9715_v22, 4 }
 0x1d5   : > { %v4177_v29 = vrot.slane %v4014_v1, 2  ;;  %v4017_v17 = vmax.f32 %v3637_v6, %v3805_v19  ;;  %v4018_v60 = vmax.f32 %v3638_v48, %v3807_v16  ;;  %v9943_v23 = vmax.f32 %v9920_v5, %v3809_v21 }
 0x1d6   : > { %v4438_v15 = vsel %vm384_vm0, %v4436_v42, %v4437_v47  ;;  %v4440_v45 = vsel %vm384_vm0, %v4437_v47, %v13516_v58  ;;  %v4443_v21 = vrot.slane %v3637_v6, 4  ;;  %v4444_v40 = vrot.slane %v3638_v48, 4  ;;  %v7377_v47 = vld [vmem:[#allocation2 + $0x250] sm:$0xff] }
 0x1d7   : > { %v4178_v25 = vsel %vm2218_vm15, %v4176_v61, %v4177_v29  ;;  %v4180_v57 = vsel %vm2218_vm15, %v4177_v29, %v13517_v9  ;;  %v4183_v2 = vrot.slane %v4017_v17, 2  ;;  %v4184_v62 = vrot.slane %v4018_v60, 2 }
 0x1d8   : > { %v4372_v39 = vmax.f32 %v4013_v44, %v4178_v25  ;;  %v4186_v19 = vrot.slane %v9943_v23, 2  ;;  %v4373_v16 = vmax.f32 %v4014_v1, %v4180_v57  ;;  %v4446_v61 = vrot.slane %v9920_v5, 4  ;;  %v1331_v57 = vld [vmem:[#allocation2 + $0x258] sm:$0x3f] }
 0x1d9   : > { %v4185_v29 = vsel %vm2218_vm15, %v4183_v2, %v4184_v62  ;;  %v3001_v25 = vrot.slane %v9897_v37, 6  ;;  %v13974_v58 = vmax.f32 %v9815_v20, %v9530_v55  ;;  %v13519_v6 = vrot.slane %v9913_v3, 2 }
 0x1da   : > { %v9955_v35 = vmax.f32 %v4372_v39, %v4438_v15  ;;  %v4187_v44 = vsel %vm2218_vm15, %v4184_v62, %v4186_v19  ;;  %v9959_v42 = vmax.f32 %v4373_v16, %v4440_v45  ;;  %v4375_v48 = vmax.f32 %v4017_v17, %v4185_v29 }
 0x1db   : > { %v9965_v9 = vmax.f32 %v13974_v58, %v7377_v47  ;;  %v4376_v1 = vmax.f32 %v4018_v60, %v4187_v44  ;;  %v4445_v39 = vsel %vm384_vm0, %v4443_v21, %v4444_v40  ;;  %v4447_v62 = vsel %vm384_vm0, %v4444_v40, %v4446_v61  ;;  %v13984_v47 = vld [vmem:[#allocation5_spill] sm:$0xff] }
 0x1dc   : > { %13972 = vst [vmem:[#allocation47_spill] sm:$0xff] %v9955_v35  ;;  %v3002_v15 = vsel %vm2987_vm10, %v2999_v50, %v3001_v25  ;;  %v13976_v45 = vmax.f32 %v13873_v4, %v9463_v12  ;;  %v13977_v20 = vmax.f32 %v9488_v13, %v9695_v10  ;;  %v9984_v17 = vmax.f32 %v4375_v48, %v4445_v39  ;;  %v1321_v35 = vld [vmem:[#allocation2 + $0x208] sm:$0xff] }
 0x1dd   : > { %13973 = vst [vmem:[#allocation48_spill] sm:$0xff] %v9959_v42  ;;  %v9986_v60 = vmax.f32 %v4376_v1, %v4447_v62  ;;  %6957 = vmatmul.msk.f32.gmra.mxu1 %vm1109_vm2, %v3002_v15  ;;  %v9991_v50 = vmax.f32 %v9651_v51, %v9897_v37  ;;  %v13981_v12 = vmax.f32 %v9410_v54, %v9673_v32  ;;  %v13535_v16 = vrot.slane %v9861_v11, 1 }
 0x1de   : > { %13975 = vst [vmem:[#allocation71_spill] sm:$0xff] %v9965_v9  ;;  %v9977_v55 = vmax.f32 %v13976_v45, %v9727_v53  ;;  %v9982_v58 = vmax.f32 %v13977_v20, %v1331_v57  ;;  %v13982_v53 = vld [vmem:[#allocation31_spill] sm:$0xff]  ;;  %v13534_v21 = vrot.slane %v9910_v33, 1  ;;  %v4737_v29 = vrot.slane %v9984_v17, 4 }
 0x1df   : > { %13979 = vst [vmem:[#allocation73_spill] sm:$0xff] %v9984_v17  ;;  %v9999_v13 = vmax.f32 %v13981_v12, %v9649_v7  ;;  %v3794_v2 = vrot.slane %v13982_v53, 1  ;;  %v13521_v51 = vrot.slane %v9986_v60, 4  ;;  %v13983_v44 = vrot.slane %v9505_v49, 1  ;;  %v14035_v17 = vld [vmem:[#allocation66_spill] sm:$0xff] }
 0x1e0   : > { %13978 = vst [vmem:[#allocation72_spill] sm:$0xff] %v9982_v58  ;;  %v13520_v40 = vrot.slane %v9977_v55, 1  ;;  %v13518_v4 = vrot.slane %v9977_v55, 4  ;;  %v13985_v54 = vrot.slane %v13984_v47, 2  ;;  %v13986_v32 = vrot.slane %v9505_v49, 4 }
 0x1e1   : > { %13980 = vst [vmem:[#allocation74_spill] sm:$0xff] %v9986_v60  ;;  %v3563_v1 = vmax.f32 %v9403_v59, %v9991_v50  ;;  %v4739_v39 = vsel %vm384_vm0, %v4737_v29, %v13521_v51  ;;  %v13987_v15 = vrot.slane %v9440_v14, 1  ;;  %v4012_v59 = vmax.f32 %v13982_v53, %v3794_v2 }
 0x1e2   : > { %v1817_v25 = vsel %vm1761_vm14, %v13520_v40, %v13983_v44  ;;  %v2288_v7 = vsel %vm2218_vm15, %v13519_v6, %v13985_v54  ;;  %v2634_v48 = vsel %vm384_vm0, %v13518_v4, %v13986_v32  ;;  %7018 = vmatmul.msk.f32.vlgmr.msrb.gmra.mxu3 %vm1109_vm2, %v4739_v39  ;;  %v13989_v20 = vrot.slane %v9717_v36, 1  ;;  %v13991_v4 = vld [vmem:[#allocation40_spill] sm:$0xff] }
 0x1e3   : > { %v10028_v62 = vmax.f32 %v9977_v55, %v1817_v25  ;;  %v3795_v49 = vsel %vm1761_vm14, %v13987_v15, %v3794_v2  ;;  %v13990_v29 = vrot.slane %v9719_v63, 1  ;;  %v13527_v25 = vrot.slane %v9982_v58, 1  ;;  %v1312_v58 = vld [vmem:[#allocation2 + $0x1c0] sm:$0xff] }
 0x1e4   : > { %v10035_v45 = vmax.f32 %v9440_v14, %v3795_v49  ;;  %v4016_v12 = vmax.f32 %v9717_v36, %v13989_v20  ;;  %v13533_v47 = vrot.slane %v9801_v31, 4  ;;  %v2521_v32 = vmax.f32 %v9913_v3, %v2288_v7 }
 0x1e5   : > { %v4020_v44 = vmax.f32 %v9719_v63, %v13990_v29  ;;  %v13522_v54 = vrot.slane %v10028_v62, 2  ;;  %v4174_v15 = vrot.slane %v4012_v59, 2  ;;  %v13992_v6 = vrot.slane %v13991_v4, 2 }
 0x1e6   : > { %13988 = vst [vmem:[#allocation31_spill] sm:$0xff] %v10035_v45  ;;  %v13523_v39 = vrot.slane %v10035_v45, 2  ;;  %v4181_v2 = vrot.slane %v4016_v12, 2  ;;  %v3815_v29 = vrot.slane %v9999_v13, 1  ;;  %v13526_v40 = vrot.slane %v9440_v14, 4 }
 0x1e7   : > { %v4188_v49 = vrot.slane %v4020_v44, 2  ;;  %v2274_v20 = vsel %vm2218_vm15, %v13522_v54, %v13992_v6  ;;  %v4434_v51 = vrot.slane %v13982_v53, 4  ;;  %v13993_v59 = vrot.slane %v9758_v27, 2 }
 0x1e8   : > { %v2513_v57 = vmax.f32 %v10028_v62, %v2274_v20  ;;  %v4175_v7 = vsel %vm2218_vm15, %v13523_v39, %v4174_v15  ;;  %v13994_v20 = vrot.slane %v9517_v0, 1 }
 0x1e9   : > { %v4182_v4 = vsel %vm2218_vm15, %v13993_v59, %v4181_v2  ;;  %v4189_v12 = vsel %vm2218_vm15, %v4186_v19, %v4188_v49  ;;  %v4371_v6 = vmax.f32 %v10035_v45, %v4175_v7  ;;  %v4435_v53 = vsel %vm384_vm0, %v13526_v40, %v4434_v51 }
 0x1ea   : > { %v4374_v44 = vmax.f32 %v9758_v27, %v4182_v4  ;;  %v4377_v54 = vmax.f32 %v9943_v23, %v4189_v12  ;;  %v1838_v15 = vsel %vm1761_vm14, %v13535_v16, %v13994_v20  ;;  %v10076_v39 = vmax.f32 %v2513_v57, %v2634_v48 }
 0x1eb   : > { %v4441_v19 = vrot.slane %v9717_v36, 4  ;;  %v4448_v2 = vrot.slane %v9719_v63, 4  ;;  %v13996_v27 = vrot.slane %v9533_v41, 1  ;;  %v13997_v51 = vrot.slane %v9509_v56, 4 }
 0x1ec   : > { %13995 = vst [vmem:[#allocation5_spill] sm:$0xff] %v10076_v39  ;;  %v4455_v7 = vrot.slane %v9999_v13, 4  ;;  %v10091_v48 = vmax.f32 %v4371_v6, %v4435_v53  ;;  %v10095_v36 = vmax.f32 %v9897_v37, %v10076_v39  ;;  %v10099_v63 = vmax.f32 %v10076_v39, %v9901_v46 }
 0x1ed   : > { %v1852_v23 = vsel %vm1761_vm14, %v13534_v21, %v13996_v27  ;;  %v2648_v49 = vsel %vm384_vm0, %v13533_v47, %v13997_v51  ;;  %v10102_v57 = vmax.f32 %v3563_v1, %v10076_v39  ;;  %v14001_v56 = vrot.slane %v9715_v22, 4  ;;  %v14026_v47 = vld [vmem:[#allocation37_spill] sm:$0xff] }
 0x1ee   : > { %13998 = vst [vmem:[#allocation40_spill] sm:$0xff] %v10095_v36  ;;  %v10107_v4 = vmax.f32 %v2521_v32, %v2648_v49  ;;  %v4024_v12 = vmax.f32 %v9999_v13, %v3815_v29  ;;  %v4449_v37 = vsel %vm384_vm0, %v4446_v61, %v4448_v2  ;;  %v3567_v53 = vmax.f32 %v9786_v52, %v10095_v36  ;;  %v1316_v36 = vld [vmem:[#allocation2 + $0x1e0] sm:$0xff] }
 0x1ef   : > { %13999 = vst [vmem:[#allocation75_spill] sm:$0xff] %v10099_v63  ;;  %v4442_v59 = vsel %vm384_vm0, %v14001_v56, %v4441_v19  ;;  %v3571_v1 = vmax.f32 %v9991_v50, %v10099_v63  ;;  %v13525_v22 = vrot.slane %v10102_v57, 1  ;;  %v13524_v20 = vrot.slane %v10102_v57, 4  ;;  %v1313_v63 = vld [vmem:[#allocation2 + $0x1c8] sm:$0xff] }
 0x1f0   : > { %14000 = vst [vmem:[#allocation76_spill] sm:$0xff] %v10102_v57  ;;  %v10113_v6 = vmax.f32 %v4374_v44, %v4442_v59  ;;  %v4462_v32 = vrot.slane %v9721_v18, 4  ;;  %v4469_v13 = vrot.slane %v9723_v26, 4  ;;  %v10123_v19 = vmax.f32 %v4377_v54, %v4449_v37 }
 0x1f1   : > { %14002 = vst [vmem:[#allocation77_spill] sm:$0xff] %v10107_v4  ;;  %v10128_v61 = vmax.f32 %v3567_v53, %v9901_v46  ;;  %v10131_v52 = vmax.f32 %v3571_v1, %v10107_v4  ;;  %v3816_v50 = vsel %vm1761_vm14, %v13525_v22, %v3815_v29  ;;  %v4456_v44 = vsel %vm384_vm0, %v13524_v20, %v4455_v7  ;;  %v1320_v46 = vld [vmem:[#allocation2 + $0x200] sm:$0xff] }
 0x1f2   : > { %v10140_v54 = vmax.f32 %v10102_v57, %v3816_v50  ;;  %v4195_v2 = vrot.slane %v4024_v12, 2  ;;  %v4740_v27 = vrot.slane %v10123_v19, 4  ;;  %v14006_v7 = vrot.slane %v9965_v9, 1 }
 0x1f3   : > { %14003 = vst [vmem:[#allocation78_spill] sm:$0xff] %v10128_v61  ;;  %v13532_v49 = vrot.slane %v10128_v61, 1  ;;  %v13528_v56 = vrot.slane %v10131_v52, 1  ;;  %v13529_v59 = vrot.slane %v10128_v61, 4  ;;  %v13530_v29 = vrot.slane %v10131_v52, 4 }
 0x1f4   : > { %14004 = vst [vmem:[#allocation79_spill] sm:$0xff] %v10131_v52  ;;  %v1866_v37 = vsel %vm1761_vm14, %v14006_v7, %v13527_v25  ;;  %v13531_v12 = vrot.slane %v10140_v54, 2  ;;  %v4202_v53 = vrot.slane %v9841_v30, 2  ;;  %v14007_v1 = vrot.slane %v9986_v60, 4  ;;  %v10186_v25 = vld [vmem:[#allocation2 + $0x160] sm:$0xff] }
 0x1f5   : > { %14005 = vst [vmem:[#allocation80_spill] sm:$0xff] %v10140_v54  ;;  %v14008_v20 = vrot.slane %v9721_v18, 1  ;;  %v14009_v40 = vrot.slane %v9723_v26, 1  ;;  %v4463_v30 = vsel %vm384_vm0, %v13529_v59, %v4462_v32  ;;  %v14013_v32 = vld [vmem:[#allocation45_spill] sm:$0xff]  ;;  %v14015_v59 = vld [vmem:[#allocation27_spill] sm:$0xff]  ;;  %v10228_v21 = vmax.f32 %v14026_v47, %v10186_v25 }
 0x1f6   : > { %v4741_v50 = vsel %vm384_vm0, %v14007_v1, %v4740_v27  ;;  %v4470_v27 = vsel %vm384_vm0, %v13530_v29, %v4469_v13  ;;  %v4196_v26 = vsel %vm2218_vm15, %v13531_v12, %v4195_v2  ;;  %v10202_v2 = vmax.f32 %v9965_v9, %v1866_v37  ;;  %v10220_v37 = vld [vmem:[#allocation2 + $0x180] sm:$0xff] }
 0x1f7   : > { %v3823_v22 = vsel %vm1761_vm14, %v13532_v49, %v14008_v20  ;;  %v3830_v7 = vsel %vm1761_vm14, %v13528_v56, %v14009_v40  ;;  %7019 = vmatmul.msk.f32.gmra.mxu3 %vm1109_vm2, %v4741_v50  ;;  %v14012_v40 = vld [vmem:[#allocation69_spill] sm:$0xff]  ;;  %v14014_v56 = vld [vmem:[#allocation68_spill] sm:$0xff]  ;;  %v10198_v50 = vmax.f32 %v9910_v33, %v1852_v23  ;;  %v14027_v23 = vld [vmem:[#allocation58_spill] sm:$0xff]  ;;  %v1505_v42 = vmax.f32 %v14035_v17, %v10228_v21 }
 0x1f8   : > { %v10177_v18 = vmax.f32 %v10128_v61, %v3823_v22  ;;  %v10180_v20 = vmax.f32 %v10131_v52, %v3830_v7  ;;  %v4209_v1 = vrot.slane %v14012_v40, 2  ;;  %v14016_v13 = vmax.f32 %v14014_v56, %v14015_v59  ;;  %14020 = vst [vmem:[#allocation27_spill] sm:$0xff] %v10202_v2  ;;  %v14021_v40 = vld [vmem:[#allocation32_spill] sm:$0xff]  ;;  %v1324_v60 = vld [vmem:[#allocation2 + $0x220] sm:$0xff] }
 0x1f9   : > { %v10195_v22 = vmax.f32 %v9861_v11, %v1838_v15  ;;  %14019 = vst [vmem:[#allocation68_spill] sm:$0xff] %v10198_v50  ;;  %v4380_v7 = vmax.f32 %v10140_v54, %v4196_v26  ;;  %v10206_v12 = vmax.f32 %v14021_v40, %v9893_v43  ;;  %v10210_v59 = vld [vmem:[#allocation2 + $0x168] sm:$0xff]  ;;  %v14023_v15 = vld [vmem:[#allocation26_spill] sm:$0xff]  ;;  %v10224_v40 = vld [vmem:[#allocation2 + $0x1a0] sm:$0xff]  ;;  %v10242_v51 = vmax.f32 %v14027_v23, %v14026_v47 }
 0x1fa   : > { %14010 = vst [vmem:[#allocation81_spill] sm:$0xff] %v10177_v18  ;;  %v10192_v29 = vmax.f32 %v14016_v13, %v14013_v32  ;;  %v13539_v49 = vrot.slane %v10177_v18, 2  ;;  %v13540_v56 = vrot.slane %v10180_v20, 2  ;;  %v10214_v32 = vmax.f32 %v14023_v15, %v9895_v24  ;;  %v10222_v13 = vld [vmem:[#allocation2 + $0x188] sm:$0xff]  ;;  %v10256_v47 = vld [vmem:[#allocation2 + $0x280] sm:$0xff]  ;;  %v14044_v43 = vld [vmem:[#allocation29_spill] sm:$0xff] }
 0x1fb   : > { %14011 = vst [vmem:[#allocation82_spill] sm:$0xff] %v10180_v20  ;;  %v10218_v26 = vmax.f32 %v4380_v7, %v4456_v44  ;;  %v10238_v7 = vld [vmem:[#allocation2 + $0x1a8] sm:$0xff]  ;;  %v1417_v0 = vmax.f32 %v10220_v37, %v10224_v40  ;;  %v1421_v39 = vmax.f32 %v10224_v40, %v1312_v58  ;;  %v10312_v61 = vld [vmem:[#allocation2 + $0x2a0] sm:$0xff]  ;;  %v10314_v14 = vmax.f32 %v1316_v36, %v1320_v46 }
 0x1fc   : > { %14017 = vst [vmem:[#allocation69_spill] sm:$0xff] %v10192_v29  ;;  %v4203_v15 = vsel %vm2218_vm15, %v13539_v49, %v4202_v53  ;;  %v4210_v44 = vsel %vm2218_vm15, %v13540_v56, %v4209_v1  ;;  %v10250_v53 = vld [vmem:[#allocation2 + $0x240] sm:$0xff]  ;;  %v1418_v54 = vmax.f32 %v10222_v13, %v10238_v7  ;;  %v1501_v24 = vmax.f32 %v14043_v38, %v10242_v51 }
 0x1fd   : > { %14018 = vst [vmem:[#allocation45_spill] sm:$0xff] %v10195_v22  ;;  %v4383_v5 = vmax.f32 %v10177_v18, %v4203_v15  ;;  %v4386_v10 = vmax.f32 %v10180_v20, %v4210_v44  ;;  %v10248_v16 = vmax.f32 %v10123_v19, %v10218_v26  ;;  %v10252_v49 = vld [vmem:[#allocation2 + $0x260] sm:$0xff]  ;;  %v1413_v15 = vmax.f32 %v10186_v25, %v10220_v37 }
 0x1fe   : > { %14022 = vst [vmem:[#allocation32_spill] sm:$0xff] %v10206_v12  ;;  %v14029_v1 = vld [vmem:[#allocation55_spill] sm:$0xff]  ;;  %v1414_v44 = vmax.f32 %v10210_v59, %v10222_v13  ;;  %v10296_v17 = vmax.f32 %v1324_v60, %v10250_v53  ;;  %v1422_v18 = vmax.f32 %v10238_v7, %v1313_v63 }
 0x1ff   : > { %14024 = vst [vmem:[#allocation26_spill] sm:$0xff] %v10214_v32  ;;  %v14030_v56 = vld [vmem:[#allocation59_spill] sm:$0xff]  ;;  %v1410_v23 = vmax.f32 %v14029_v1, %v10210_v59  ;;  %v10266_v4 = vmax.f32 %v4383_v5, %v4463_v30  ;;  %v10268_v20 = vmax.f32 %v4386_v10, %v4470_v27  ;;  %v10280_v5 = vmax.f32 %v1320_v46, %v1324_v60 }
 0x200   : > { %14025 = vst [vmem:[#allocation83_spill] sm:$0xff] %v10218_v26  ;;  %v1406_v41 = vmax.f32 %v14030_v56, %v14029_v1  ;;  %v14033_v56 = vmax.f32 %v10091_v48, %v10113_v6  ;;  %v1317_v1 = vld [vmem:[#allocation2 + $0x1e8] sm:$0xff]  ;;  %v10284_v10 = vmax.f32 %v10250_v53, %v10252_v49  ;;  %v14037_v30 = vld [vmem:[#allocation67_spill] sm:$0xff]  ;;  %v1518_v50 = vmax.f32 %v1414_v44, %v1422_v18 }
 0x201   : > { %14028 = vst [vmem:[#allocation37_spill] sm:$0xff] %v10248_v16  ;;  %v1506_v48 = vmax.f32 %v14037_v30, %v1410_v23  ;;  %v10289_v27 = vmax.f32 %v10218_v26, %v10266_v4  ;;  %v1425_v30 = vmax.f32 %v1312_v58, %v1316_v36  ;;  %v1426_v45 = vmax.f32 %v1313_v63, %v1317_v1 }
 0x202   : > { %14031 = vst [vmem:[#allocation58_spill] sm:$0xff] %v10266_v4  ;;  %v10274_v52 = vmax.f32 %v14033_v56, %v10248_v16  ;;  %v10293_v56 = vmax.f32 %v10266_v4, %v10268_v20  ;;  %v14041_v26 = vmax.f32 %v10113_v6, %v10123_v19  ;;  %v1325_v4 = vld [vmem:[#allocation2 + $0x228] sm:$0xff]  ;;  %v10316_v32 = vmax.f32 %v1317_v1, %v1321_v35 }
 0x203   : > { %14032 = vst [vmem:[#allocation55_spill] sm:$0xff] %v10268_v20  ;;  %v10318_v12 = vmax.f32 %v1321_v35, %v1325_v4  ;;  %v1502_v2 = vmax.f32 %v14044_v43, %v1406_v41  ;;  %v1537_v6 = vmax.f32 %v10280_v5, %v10284_v10  ;;  %v1509_v19 = vmax.f32 %v10242_v51, %v1413_v15 }
 0x204   : > { %14034 = vst [vmem:[#allocation59_spill] sm:$0xff] %v10274_v52  ;;  %v10300_v52 = vmax.f32 %v10252_v49, %v10256_v47  ;;  %v10308_v57 = vmax.f32 %v14041_v26, %v10289_v27  ;;  %v1510_v26 = vmax.f32 %v1406_v41, %v1414_v44  ;;  %v1513_v20 = vmax.f32 %v10228_v21, %v1417_v0 }
 0x205   : > { %14036 = vst [vmem:[#allocation66_spill] sm:$0xff] %v10284_v10  ;;  %v1514_v38 = vmax.f32 %v1410_v23, %v1418_v54  ;;  %v1517_v43 = vmax.f32 %v1413_v15, %v1421_v39  ;;  %v1521_v22 = vmax.f32 %v1417_v0, %v1425_v30  ;;  %v1522_v10 = vmax.f32 %v1418_v54, %v1426_v45 }
 0x206   : > { %14038 = vst [vmem:[#allocation67_spill] sm:$0xff] %v10289_v27  ;;  %v1525_v51 = vmax.f32 %v1421_v39, %v10314_v14  ;;  %v1526_v41 = vmax.f32 %v1422_v18, %v10316_v32  ;;  %v10338_v21 = vmax.f32 %v1501_v24, %v10186_v25  ;;  %v10341_v27 = vmax.f32 %v1502_v2, %v10210_v59 }
 0x207   : > { %14039 = vst [vmem:[#allocation84_spill] sm:$0xff] %v10293_v56  ;;  %v7378_v56 = vld [vmem:[#allocation2 + $0x248] sm:$0xff]  ;;  %v10350_v23 = vmax.f32 %v1509_v19, %v10224_v40  ;;  %v10353_v0 = vmax.f32 %v1510_v26, %v10238_v7  ;;  %v10355_v39 = vmax.f32 %v1513_v20, %v1312_v58  ;;  %v1529_v24 = vmax.f32 %v1425_v30, %v10280_v5  ;;  %v14050_v5 = vld [vmem:[#allocation17_spill] sm:$0xff] }
 0x208   : > { %14040 = vst [vmem:[#allocation85_spill] sm:$0xff] %v10300_v52  ;;  %v10329_v16 = vmax.f32 %v1325_v4, %v7378_v56  ;;  %v10344_v52 = vmax.f32 %v1505_v42, %v10220_v37  ;;  %v1530_v25 = vmax.f32 %v1426_v45, %v10318_v12  ;;  %v1533_v54 = vmax.f32 %v10314_v14, %v10296_v17 }
 0x209   : > { %14042 = vst [vmem:[#allocation86_spill] sm:$0xff] %v10308_v57  ;;  %v10333_v57 = vmax.f32 %v10256_v47, %v10312_v61  ;;  %v10361_v42 = vmax.f32 %v1514_v38, %v1313_v63  ;;  %v10363_v18 = vmax.f32 %v1517_v43, %v1316_v36  ;;  %v10365_v2 = vmax.f32 %v1518_v50, %v1317_v1 }
 0x20a   : > { %14045 = vst [vmem:[#allocation56_spill] sm:$0xff] %v10329_v16  ;;  %v10367_v59 = vmax.f32 %v1521_v22, %v1320_v46  ;;  %v10369_v37 = vmax.f32 %v1522_v10, %v1321_v35  ;;  %v1811_v58 = vrot.slane %v10338_v21, 1  ;;  %v1812_v20 = vrot.slane %v10341_v27, 1 }
 0x20b   : > { %14046 = vst [vmem:[#allocation29_spill] sm:$0xff] %v10333_v57  ;;  %v10347_v57 = vmax.f32 %v1506_v48, %v10222_v13  ;;  %v10371_v13 = vmax.f32 %v1525_v51, %v1324_v60  ;;  %v1818_v45 = vrot.slane %v10344_v52, 1  ;;  %v1825_v63 = vrot.slane %v10350_v23, 1 }
 0x20c   : > { %v1826_v36 = vrot.slane %v10353_v0, 1  ;;  %v1832_v50 = vrot.slane %v10355_v39, 1  ;;  %v10380_v46 = vmax.f32 %v1526_v41, %v1325_v4  ;;  %v1813_v35 = vsel %vm1761_vm14, %v1811_v58, %v1812_v20 }
 0x20d   : > { %v1819_v14 = vrot.slane %v10347_v57, 1  ;;  %v14048_v60 = vrot.slane %v9977_v55, 1  ;;  %v1833_v40 = vrot.slane %v10361_v42, 1  ;;  %v1534_v7 = vmax.f32 %v10316_v32, %v10329_v16 }
 0x20e   : > { %14047 = vst [vmem:[#allocation87_spill] sm:$0xff] %v10380_v46  ;;  %v14049_v44 = vrot.slane %v9799_v28, 1  ;;  %v1827_v4 = vsel %vm1761_vm14, %v1825_v63, %v1826_v36  ;;  %v1839_v30 = vrot.slane %v10363_v18, 1  ;;  %v1840_v19 = vrot.slane %v10365_v2, 1 }
 0x20f   : > { %v1815_v22 = vsel %vm1761_vm14, %v1812_v20, %v14048_v60  ;;  %v1820_v15 = vsel %vm1761_vm14, %v1818_v45, %v1819_v14  ;;  %v1834_v48 = vsel %vm1761_vm14, %v1832_v50, %v1833_v40  ;;  %v10400_v26 = vmax.f32 %v1529_v24, %v10250_v53 }
 0x210   : > { %v1822_v1 = vsel %vm1761_vm14, %v1819_v14, %v14049_v44  ;;  %v10402_v32 = vmax.f32 %v1530_v25, %v7378_v56  ;;  %v1842_v38 = vrot.slane %v9891_v8, 1  ;;  %v1846_v43 = vrot.slane %v10367_v59, 1  ;;  %v7379_v56 = vld [vmem:[#allocation2 + $0x268] sm:$0xff] }
 0x211   : > { %v1847_v51 = vrot.slane %v10369_v37, 1  ;;  %v1853_v41 = vrot.slane %v10371_v13, 1  ;;  %v1854_v58 = vrot.slane %v10380_v46, 1  ;;  %v1856_v20 = vrot.slane %v10192_v29, 1  ;;  %v14058_v14 = vld [vmem:[#allocation36_spill] sm:$0xff] }
 0x212   : > { %14051 = vst [vmem:[#allocation17_spill] sm:$0xff] %v10402_v32  ;;  %v10413_v53 = vmax.f32 %v1533_v54, %v10252_v49  ;;  %v10415_v24 = vmax.f32 %v1534_v7, %v7379_v56  ;;  %v10418_v25 = vmax.f32 %v1537_v6, %v10256_v47  ;;  %v14056_v63 = vrot.slane %v9801_v31, 1  ;;  %v14059_v54 = vld [vmem:[#allocation34_spill] sm:$0xff] }
 0x213   : > { %v14057_v60 = vrot.slane %v9861_v11, 1  ;;  %v1841_v10 = vsel %vm1761_vm14, %v1839_v30, %v1840_v19  ;;  %v1843_v49 = vsel %vm1761_vm14, %v1840_v19, %v1842_v38  ;;  %v14060_v7 = vrot.slane %v14059_v54, 1 }
 0x214   : > { %14053 = vst [vmem:[#allocation88_spill] sm:$0xff] %v10413_v53  ;;  %v1829_v50 = vsel %vm1761_vm14, %v1826_v36, %v14056_v63  ;;  %v1860_v47 = vrot.slane %v10400_v26, 1  ;;  %v1861_v6 = vrot.slane %v10402_v32, 1  ;;  %v1848_v36 = vsel %vm1761_vm14, %v1846_v43, %v1847_v51  ;;  %v14114_v53 = vld [vmem:[#allocation78_spill] sm:$0xff] }
 0x215   : > { %14054 = vst [vmem:[#allocation89_spill] sm:$0xff] %v10415_v24  ;;  %v1836_v44 = vsel %vm1761_vm14, %v1833_v40, %v14057_v60  ;;  %v1845_v56 = vsel %vm1761_vm14, %v1842_v38, %v14060_v7  ;;  %v14061_v63 = vrot.slane %v9910_v33, 1  ;;  %v1855_v30 = vsel %vm1761_vm14, %v1853_v41, %v1854_v58 }
 0x216   : > { %14055 = vst [vmem:[#allocation90_spill] sm:$0xff] %v10418_v25  ;;  %v1857_v60 = vsel %vm1761_vm14, %v1854_v58, %v1856_v20  ;;  %v10441_v19 = vmax.f32 %v10338_v21, %v1813_v35  ;;  %v10444_v45 = vmax.f32 %v10341_v27, %v1815_v22  ;;  %v10447_v38 = vmax.f32 %v10344_v52, %v1820_v15 }
 0x217   : > { %v1850_v40 = vsel %vm1761_vm14, %v1847_v51, %v14061_v63  ;;  %v10450_v7 = vmax.f32 %v10347_v57, %v1822_v1  ;;  %v14062_v43 = vrot.slane %v14058_v14, 1  ;;  %v10456_v41 = vmax.f32 %v10350_v23, %v1827_v4 }
 0x218   : > { %v10459_v58 = vmax.f32 %v10353_v0, %v1829_v50  ;;  %v10462_v35 = vmax.f32 %v10355_v39, %v1834_v48  ;;  %v1862_v22 = vsel %vm1761_vm14, %v1860_v47, %v1861_v6  ;;  %v14063_v15 = vrot.slane %v9965_v9, 1 }
 0x219   : > { %v1859_v51 = vsel %vm1761_vm14, %v1856_v20, %v14062_v43  ;;  %v10469_v63 = vmax.f32 %v10361_v42, %v1836_v44  ;;  %v10472_v20 = vmax.f32 %v10363_v18, %v1841_v10  ;;  %v10475_v4 = vmax.f32 %v10365_v2, %v1843_v49 }
 0x21a   : > { %v1864_v1 = vsel %vm1761_vm14, %v1861_v6, %v14063_v15  ;;  %v10478_v50 = vmax.f32 %v9891_v8, %v1845_v56  ;;  %v10481_v48 = vmax.f32 %v10367_v59, %v1848_v36  ;;  %v10484_v47 = vmax.f32 %v10369_v37, %v1850_v40 }
 0x21b   : > { %v10487_v6 = vmax.f32 %v10380_v46, %v1857_v60  ;;  %v10490_v44 = vmax.f32 %v10192_v29, %v1859_v51  ;;  %v2268_v10 = vrot.slane %v10441_v19, 2  ;;  %v2269_v49 = vrot.slane %v10444_v45, 2 }
 0x21c   : > { %v2275_v43 = vrot.slane %v10447_v38, 2  ;;  %v2276_v56 = vrot.slane %v10450_v7, 2  ;;  %v2282_v36 = vrot.slane %v10456_v41, 2  ;;  %v2283_v15 = vrot.slane %v10459_v58, 2 }
 0x21d   : > { %14064 = vst [vmem:[#allocation91_spill] sm:$0xff] %v10490_v44  ;;  %v10499_v40 = vsel %vm2218_vm15, %v2268_v10, %v2269_v49  ;;  %v14065_v60 = vrot.slane %v10028_v62, 2  ;;  %v2289_v25 = vrot.slane %v10462_v35, 2  ;;  %v2290_v16 = vrot.slane %v10469_v63, 2 }
 0x21e   : > { %v10509_v14 = vsel %vm2218_vm15, %v2275_v43, %v2276_v56  ;;  %v14066_v54 = vrot.slane %v9855_v34, 2  ;;  %v10517_v10 = vsel %vm2218_vm15, %v2282_v36, %v2283_v15  ;;  %v14067_v62 = vrot.slane %v9913_v3, 2  ;;  %v14068_v34 = vld [vmem:[#allocation45_spill] sm:$0xff] }
 0x21f   : > { %v10504_v51 = vsel %vm2218_vm15, %v2269_v49, %v14065_v60  ;;  %v10525_v60 = vmax.f32 %v10400_v26, %v1862_v22  ;;  %v10528_v29 = vmax.f32 %v10402_v32, %v1864_v1  ;;  %v10531_v43 = vsel %vm2218_vm15, %v2289_v25, %v2290_v16  ;;  %v14071_v3 = vld [vmem:[#allocation85_spill] sm:$0xff] }
 0x220   : > { %v10514_v9 = vsel %vm2218_vm15, %v2276_v56, %v14066_v54  ;;  %v10522_v49 = vsel %vm2218_vm15, %v2283_v15, %v14067_v62  ;;  %v13601_v54 = vrot.slane %v14068_v34, 2  ;;  %v7380_v56 = vld [vmem:[#allocation2 + $0x288] sm:$0xff]  ;;  %v14069_v36 = vmax.f32 %v10318_v12, %v14050_v5 }
 0x221   : > { %v14072_v15 = vmax.f32 %v10296_v17, %v14071_v3  ;;  %v10548_v25 = vmax.f32 %v10371_v13, %v1855_v30  ;;  %v2296_v12 = vrot.slane %v10472_v20, 2  ;;  %v2297_v5 = vrot.slane %v10475_v4, 2 }
 0x222   : > { %v10537_v46 = vmax.f32 %v14069_v36, %v7380_v56  ;;  %v10553_v32 = vsel %vm2218_vm15, %v2290_v16, %v13601_v54  ;;  %v2304_v56 = vrot.slane %v10484_v47, 2  ;;  %v14074_v36 = vld [vmem:[#allocation68_spill] sm:$0xff]  ;;  %v2311_v30 = vrot.slane %v10487_v6, 2  ;;  %v14075_v54 = vld [vmem:[#allocation27_spill] sm:$0xff] }
 0x223   : > { %v10543_v22 = vmax.f32 %v14072_v15, %v10312_v61  ;;  %v2303_v61 = vrot.slane %v10481_v48, 2  ;;  %v2317_v62 = vrot.slane %v10525_v60, 2  ;;  %v2318_v16 = vrot.slane %v10528_v29, 2 }
 0x224   : > { %14070 = vst [vmem:[#allocation92_spill] sm:$0xff] %v10537_v46  ;;  %v2512_v17 = vmax.f32 %v10444_v45, %v10504_v51  ;;  %v2515_v46 = vmax.f32 %v10447_v38, %v10509_v14  ;;  %v10573_v15 = vsel %vm2218_vm15, %v2296_v12, %v2297_v5  ;;  %v2310_v1 = vrot.slane %v10548_v25, 2 }
 0x225   : > { %14073 = vst [vmem:[#allocation93_spill] sm:$0xff] %v10543_v22  ;;  %v2511_v22 = vmax.f32 %v10441_v19, %v10499_v40  ;;  %v2516_v34 = vmax.f32 %v10450_v7, %v10514_v9  ;;  %v2519_v3 = vmax.f32 %v10456_v41, %v10517_v10  ;;  %v14076_v24 = vrot.slane %v10478_v50, 2 }
 0x226   : > { %v2520_v45 = vmax.f32 %v10459_v58, %v10522_v49  ;;  %v2523_v14 = vmax.f32 %v10462_v35, %v10531_v43  ;;  %v2524_v38 = vmax.f32 %v10469_v63, %v10553_v32  ;;  %v2305_v40 = vsel %vm2218_vm15, %v2303_v61, %v2304_v56 }
 0x227   : > { %v10583_v19 = vsel %vm2218_vm15, %v2297_v5, %v14076_v24  ;;  %v14077_v9 = vrot.slane %v14074_v36, 2  ;;  %v10598_v41 = vsel %vm2218_vm15, %v2310_v1, %v2311_v30  ;;  %v14078_v24 = vrot.slane %v10490_v44, 2 }
 0x228   : > { %v10606_v35 = vsel %vm2218_vm15, %v2317_v62, %v2318_v16  ;;  %v14079_v32 = vrot.slane %v14075_v54, 2  ;;  %v2527_v51 = vmax.f32 %v10472_v20, %v10573_v15  ;;  %v2628_v10 = vrot.slane %v10338_v21, 4 }
 0x229   : > { %v10595_v7 = vsel %vm2218_vm15, %v2304_v56, %v14077_v9  ;;  %v10603_v58 = vsel %vm2218_vm15, %v2311_v30, %v14078_v24  ;;  %v2629_v49 = vrot.slane %v10341_v27, 4  ;;  %v2635_v43 = vrot.slane %v10344_v52, 4 }
 0x22a   : > { %v10611_v63 = vsel %vm2218_vm15, %v2318_v16, %v14079_v32  ;;  %v2636_v1 = vrot.slane %v10347_v57, 4  ;;  %v2642_v12 = vrot.slane %v10350_v23, 4  ;;  %v2528_v62 = vmax.f32 %v10475_v4, %v10583_v19 }
 0x22b   : > { %v2643_v5 = vrot.slane %v10353_v0, 4  ;;  %v2649_v61 = vrot.slane %v10355_v39, 4  ;;  %v2650_v56 = vrot.slane %v10361_v42, 4  ;;  %v2630_v20 = vsel %vm384_vm0, %v2628_v10, %v2629_v49 }
 0x22c   : > { %v14080_v21 = vrot.slane %v9977_v55, 4  ;;  %v2637_v52 = vsel %vm384_vm0, %v2635_v43, %v2636_v1  ;;  %v14081_v57 = vrot.slane %v9799_v28, 4  ;;  %v2531_v4 = vmax.f32 %v10481_v48, %v2305_v40 }
 0x22d   : > { %v2644_v0 = vsel %vm384_vm0, %v2642_v12, %v2643_v5  ;;  %v2651_v39 = vsel %vm384_vm0, %v2649_v61, %v2650_v56  ;;  %v13611_v42 = vrot.slane %v9861_v11, 4  ;;  %v2656_v15 = vrot.slane %v10363_v18, 4 }
 0x22e   : > { %v2632_v27 = vsel %vm384_vm0, %v2629_v49, %v14080_v21  ;;  %v2639_v23 = vsel %vm384_vm0, %v2636_v1, %v14081_v57  ;;  %v2657_v55 = vrot.slane %v10365_v2, 4  ;;  %v13610_v30 = vrot.slane %v9891_v8, 4 }
 0x22f   : > { %v2663_v16 = vrot.slane %v10367_v59, 4  ;;  %v2532_v28 = vmax.f32 %v10484_v47, %v10595_v7  ;;  %v2535_v48 = vmax.f32 %v10548_v25, %v10598_v41  ;;  %v2536_v19 = vmax.f32 %v10487_v6, %v10603_v58  ;;  %v14083_v7 = vld [vmem:[#allocation87_spill] sm:$0xff]  ;;  %v14084_v41 = vld [vmem:[#allocation69_spill] sm:$0xff] }
 0x230   : > { %v2664_v40 = vrot.slane %v10369_v37, 4  ;;  %v2539_v18 = vmax.f32 %v10525_v60, %v10606_v35  ;;  %v2540_v2 = vmax.f32 %v10528_v29, %v10611_v63  ;;  %v14082_v9 = vrot.slane %v9801_v31, 4  ;;  %v14085_v35 = vld [vmem:[#allocation17_spill] sm:$0xff] }
 0x231   : > { %v13609_v47 = vrot.slane %v9910_v33, 4  ;;  %v2653_v25 = vsel %vm384_vm0, %v2650_v56, %v13611_v42  ;;  %v2670_v6 = vrot.slane %v10371_v13, 4  ;;  %v2671_v37 = vrot.slane %v14083_v7, 4  ;;  %v14095_v7 = vld [vmem:[#allocation35_spill] sm:$0xff] }
 0x232   : > { %v2646_v59 = vsel %vm384_vm0, %v2643_v5, %v14082_v9  ;;  %v13608_v24 = vrot.slane %v14084_v41, 4  ;;  %v2658_v60 = vsel %vm384_vm0, %v2656_v15, %v2657_v55  ;;  %v2660_v31 = vsel %vm384_vm0, %v2657_v55, %v13610_v30  ;;  %v14086_v5 = vld [vmem:[#allocation71_spill] sm:$0xff] }
 0x233   : > { %v2665_v29 = vsel %vm384_vm0, %v2663_v16, %v2664_v40  ;;  %v2677_v58 = vrot.slane %v10400_v26, 4  ;;  %v2678_v32 = vrot.slane %v14085_v35, 4  ;;  %v10669_v63 = vmax.f32 %v2511_v22, %v2630_v20  ;;  %v14098_v35 = vld [vmem:[#allocation26_spill] sm:$0xff]  ;;  %v14109_v42 = vld [vmem:[#allocation51_spill] sm:$0xff] }
 0x234   : > { %v10671_v10 = vmax.f32 %v2512_v17, %v2632_v27  ;;  %v10673_v13 = vmax.f32 %v2515_v46, %v2637_v52  ;;  %v2667_v49 = vsel %vm384_vm0, %v2664_v40, %v13609_v47  ;;  %v10678_v43 = vmax.f32 %v2516_v34, %v2639_v23  ;;  %v14089_v52 = vld [vmem:[#allocation70_spill] sm:$0xff]  ;;  %v14107_v47 = vld [vmem:[#allocation52_spill] sm:$0xff] }
 0x235   : > { %v10680_v1 = vmax.f32 %v2519_v3, %v2644_v0  ;;  %v10682_v12 = vmax.f32 %v2520_v45, %v2646_v59  ;;  %v2672_v26 = vsel %vm384_vm0, %v2670_v6, %v2671_v37  ;;  %v2674_v22 = vsel %vm384_vm0, %v2671_v37, %v13608_v24  ;;  %v14105_v24 = vld [vmem:[#allocation49_spill] sm:$0xff] }
 0x236   : > { %v10688_v17 = vmax.f32 %v2523_v14, %v2651_v39  ;;  %v10690_v46 = vmax.f32 %v2524_v38, %v2653_v25  ;;  %v13607_v61 = vrot.slane %v14086_v5, 4  ;;  %v10694_v34 = vmax.f32 %v2527_v51, %v2658_v60  ;;  %v14088_v14 = vld [vmem:[#allocation15_spill] sm:$0xff]  ;;  %v14096_v60 = vld [vmem:[#allocation46_spill] sm:$0xff] }
 0x237   : > { %v10696_v3 = vmax.f32 %v2528_v62, %v2660_v31  ;;  %v2679_v45 = vsel %vm384_vm0, %v2677_v58, %v2678_v32  ;;  %v10699_v20 = vmax.f32 %v2531_v4, %v2665_v29  ;;  %v3003_v21 = vrot.slane %v10669_v63, 6  ;;  %v14097_v29 = vld [vmem:[#allocation32_spill] sm:$0xff]  ;;  %v14119_v5 = vld [vmem:[#allocation31_spill] sm:$0xff] }
 0x238   : > { %v13612_v27 = vrot.slane %v10671_v10, 6  ;;  %v3485_v38 = vmax.f32 %v14088_v14, %v10669_v63  ;;  %v3486_v57 = vmax.f32 %v14089_v52, %v10671_v10  ;;  %v3489_v51 = vmax.f32 %v10669_v63, %v10673_v13 }
 0x239   : > { %14087 = vst [vmem:[#allocation68_spill] sm:$0xff] %v10699_v20  ;;  %v3490_v62 = vmax.f32 %v10671_v10, %v10678_v43  ;;  %v3493_v4 = vmax.f32 %v10673_v13, %v10680_v1  ;;  %v3494_v0 = vmax.f32 %v10678_v43, %v10682_v12  ;;  %v10720_v39 = vmax.f32 %v10680_v1, %v10688_v17 }
 0x23a   : > { %v3005_v23 = vsel %vm2987_vm10, %v3003_v21, %v13612_v27  ;;  %v10722_v15 = vmax.f32 %v2532_v28, %v2667_v49  ;;  %v10727_v55 = vmax.f32 %v10682_v12, %v10690_v46  ;;  %v10731_v16 = vmax.f32 %v10688_v17, %v10694_v34  ;;  %v14111_v27 = vld [vmem:[#allocation38_spill] sm:$0xff] }
 0x23b   : > { %6958 = vmatmul.msk.f32.gmra.mxu1 %vm1109_vm2, %v3005_v23  ;;  %v10735_v40 = vmax.f32 %v10690_v46, %v10696_v3  ;;  %v2681_v9 = vsel %vm384_vm0, %v2678_v32, %v13607_v61  ;;  %v10740_v28 = vmax.f32 %v2535_v48, %v2672_v26  ;;  %v10742_v59 = vmax.f32 %v2536_v19, %v2674_v22 }
 0x23c   : > { %14090 = vst [vmem:[#allocation87_spill] sm:$0xff] %v10722_v15  ;;  %v10744_v25 = vmax.f32 %v2539_v18, %v2679_v45  ;;  %v10748_v6 = vmax.f32 %v10694_v34, %v10699_v20  ;;  %v3565_v37 = vmax.f32 %v14095_v7, %v3485_v38  ;;  %v3566_v31 = vmax.f32 %v14096_v60, %v3486_v57  ;;  %v14106_v60 = vld [vmem:[#allocation50_spill] sm:$0xff] }
 0x23d   : > { %14091 = vst [vmem:[#allocation17_spill] sm:$0xff] %v10727_v55  ;;  %v3569_v58 = vmax.f32 %v14097_v29, %v3489_v51  ;;  %v3570_v49 = vmax.f32 %v14098_v35, %v3490_v62  ;;  %v3573_v21 = vmax.f32 %v3485_v38, %v3493_v4  ;;  %v3574_v32 = vmax.f32 %v3486_v57, %v3494_v0 }
 0x23e   : > { %14092 = vst [vmem:[#allocation15_spill] sm:$0xff] %v10731_v16  ;;  %v3577_v48 = vmax.f32 %v3489_v51, %v10720_v39  ;;  %v10757_v19 = vmax.f32 %v10696_v3, %v10722_v15  ;;  %v3578_v18 = vmax.f32 %v3490_v62, %v10727_v55  ;;  %v3581_v26 = vmax.f32 %v3493_v4, %v10731_v16 }
 0x23f   : > { %14093 = vst [vmem:[#allocation70_spill] sm:$0xff] %v10735_v40  ;;  %v3582_v22 = vmax.f32 %v3494_v0, %v10735_v40  ;;  %v10763_v52 = vmax.f32 %v2540_v2, %v2681_v9  ;;  %v10767_v38 = vmax.f32 %v10699_v20, %v10740_v28  ;;  %v10771_v57 = vmax.f32 %v10722_v15, %v10742_v59 }
 0x240   : > { %14094 = vst [vmem:[#allocation94_spill] sm:$0xff] %v10744_v25  ;;  %v10775_v51 = vmax.f32 %v10740_v28, %v10744_v25  ;;  %v10778_v62 = vmax.f32 %v3565_v37, %v10673_v13  ;;  %v10781_v23 = vmax.f32 %v3566_v31, %v10678_v43  ;;  %v10784_v2 = vmax.f32 %v3569_v58, %v10680_v1 }
 0x241   : > { %14099 = vst [vmem:[#allocation35_spill] sm:$0xff] %v10757_v19  ;;  %v10787_v4 = vmax.f32 %v3570_v49, %v10682_v12  ;;  %v10790_v0 = vmax.f32 %v3573_v21, %v10688_v17  ;;  %v10793_v9 = vmax.f32 %v3574_v32, %v10690_v46  ;;  %v10796_v7 = vmax.f32 %v3577_v48, %v10694_v34 }
 0x242   : > { %14101 = vst [vmem:[#allocation46_spill] sm:$0xff] %v10763_v52  ;;  %v10803_v31 = vmax.f32 %v3578_v18, %v10696_v3  ;;  %v10806_v58 = vmax.f32 %v3581_v26, %v10699_v20  ;;  %v10809_v49 = vmax.f32 %v3582_v22, %v10722_v15  ;;  %v3817_v21 = vrot.slane %v10778_v62, 1 }
 0x243   : > { %14102 = vst [vmem:[#allocation32_spill] sm:$0xff] %v10767_v38  ;;  %v3818_v32 = vrot.slane %v10781_v23, 1  ;;  %v3561_v22 = vmax.f32 %v14105_v24, %v14097_v29  ;;  %v3562_v37 = vmax.f32 %v14106_v60, %v14098_v35  ;;  %v14108_v30 = vrot.slane %v14107_v47, 1 }
 0x244   : > { %14103 = vst [vmem:[#allocation26_spill] sm:$0xff] %v10771_v57  ;;  %v14110_v48 = vrot.slane %v14109_v42, 1  ;;  %v14112_v14 = vrot.slane %v14111_v27, 1  ;;  %v14115_v45 = vrot.slane %v14114_v53, 1  ;;  %v14120_v40 = vrot.slane %v14119_v5, 2 }
 0x245   : > { %14104 = vst [vmem:[#allocation95_spill] sm:$0xff] %v10775_v51  ;;  %v14113_v61 = vmov %v14108_v30  ;;  %v3819_v26 = vsel %vm1761_vm14, %v3817_v21, %v3818_v32  ;;  %v3641_v35 = vmax.f32 %v3561_v22, %v10669_v63  ;;  %v3642_v60 = vmax.f32 %v3562_v37, %v10671_v10 }
 0x246   : > { %v3791_v56 = vsel %vm1761_vm14, %v14110_v48, %v14108_v30  ;;  %v3793_v18 = vsel %vm1761_vm14, %v14113_v61, %v14112_v14  ;;  %v3821_v24 = vsel %vm1761_vm14, %v3818_v32, %v14115_v45  ;;  %v4025_v48 = vmax.f32 %v10778_v62, %v3819_v26 }
 0x247   : > { %v4009_v29 = vmax.f32 %v14109_v42, %v3791_v56  ;;  %v4010_v30 = vmax.f32 %v14107_v47, %v3793_v18  ;;  %v4026_v51 = vmax.f32 %v10781_v23, %v3821_v24  ;;  %v4429_v61 = vrot.slane %v14109_v42, 4  ;;  %v14117_v24 = vld [vmem:[#allocation76_spill] sm:$0xff] }
 0x248   : > { %v4430_v14 = vrot.slane %v14107_v47, 4  ;;  %v3810_v21 = vrot.slane %v3641_v35, 1  ;;  %v3811_v25 = vrot.slane %v3642_v60, 1  ;;  %v4197_v32 = vrot.slane %v4025_v48, 2 }
 0x249   : > { %v4169_v52 = vrot.slane %v4009_v29, 2  ;;  %v4170_v45 = vrot.slane %v4010_v30, 2  ;;  %v4198_v56 = vrot.slane %v4026_v51, 2  ;;  %v14116_v37 = vrot.slane %v14111_v27, 4  ;;  %v14121_v27 = vld [vmem:[#allocation81_spill] sm:$0xff] }
 0x24a   : > { %v4431_v63 = vsel %vm384_vm0, %v4429_v61, %v4430_v14  ;;  %v4450_v22 = vrot.slane %v3641_v35, 4  ;;  %v3812_v26 = vsel %vm1761_vm14, %v3810_v21, %v3811_v25  ;;  %v14118_v54 = vrot.slane %v14117_v24, 1 }
 0x24b   : > { %v4433_v18 = vsel %vm384_vm0, %v4430_v14, %v14116_v37  ;;  %v4171_v47 = vsel %vm2218_vm15, %v4169_v52, %v4170_v45  ;;  %v4173_v57 = vsel %vm2218_vm15, %v4170_v45, %v14120_v40  ;;  %v4021_v16 = vmax.f32 %v3641_v35, %v3812_v26  ;;  %v14123_v45 = vld [vmem:[#allocation5_spill] sm:$0xff] }
 0x24c   : > { %v3814_v42 = vsel %vm1761_vm14, %v3811_v25, %v14118_v54  ;;  %v4199_v61 = vsel %vm2218_vm15, %v4197_v32, %v4198_v56  ;;  %v14122_v44 = vrot.slane %v14121_v27, 2  ;;  %v4369_v37 = vmax.f32 %v4009_v29, %v4171_v47  ;;  %v14129_v47 = vld [vmem:[#allocation48_spill] sm:$0xff] }
 0x24d   : > { %v4022_v38 = vmax.f32 %v3642_v60, %v3814_v42  ;;  %v4370_v21 = vmax.f32 %v4010_v30, %v4173_v57  ;;  %v4381_v41 = vmax.f32 %v4025_v48, %v4199_v61  ;;  %v4190_v20 = vrot.slane %v4021_v16, 2  ;;  %v14124_v42 = vld [vmem:[#allocation80_spill] sm:$0xff]  ;;  %v10882_v61 = vpop.f32.mrf.mxu2 }
 0x24e   : > { %v4201_v14 = vsel %vm2218_vm15, %v4198_v56, %v14122_v44  ;;  %v4451_v25 = vrot.slane %v3642_v60, 4  ;;  %v4457_v52 = vrot.slane %v10778_v62, 4  ;;  %v4458_v5 = vrot.slane %v10781_v23, 4  ;;  %14130 = vst [vmem:[#allocation49_spill] sm:$0xff] %v10882_v61 }
 0x24f   : > { %v4382_v15 = vmax.f32 %v4026_v51, %v4201_v14  ;;  %v4191_v54 = vrot.slane %v4022_v38, 2  ;;  %v4629_v40 = vmax.f32 %v4369_v37, %v4431_v63  ;;  %v4630_v35 = vmax.f32 %v4370_v21, %v4433_v18  ;;  %v14128_v63 = vld [vmem:[#allocation47_spill] sm:$0xff]  ;;  %v14133_v37 = vld [vmem:[#allocation58_spill] sm:$0xff] }
 0x250   : > { %v3006_v26 = vrot.slane %v14123_v45, 6  ;;  %v14125_v27 = vrot.slane %v14124_v42, 2  ;;  %v4452_v57 = vsel %vm384_vm0, %v4450_v22, %v4451_v25  ;;  %v14126_v51 = vrot.slane %v14117_v24, 4  ;;  %v14131_v24 = vld [vmem:[#allocation4_spill] sm:$0xff]  ;;  %v14136_v45 = vld [vmem:[#allocation73_spill] sm:$0xff] }
 0x251   : > { %v4192_v32 = vsel %vm2218_vm15, %v4190_v20, %v4191_v54  ;;  %v4459_v23 = vsel %vm384_vm0, %v4457_v52, %v4458_v5  ;;  %v14127_v30 = vrot.slane %v14114_v53, 4  ;;  %v5030_v18 = vmax.f32 %v4629_v40, %v14128_v63  ;;  %7009 = vmatmul.msk.f32.gmra.mxu2 %vm1109_vm2, %v14131_v24 }
 0x252   : > { %v4194_v44 = vsel %vm2218_vm15, %v4191_v54, %v14125_v27  ;;  %v4454_v29 = vsel %vm384_vm0, %v4451_v25, %v14126_v51  ;;  %v4378_v60 = vmax.f32 %v4021_v16, %v4192_v32  ;;  %v10876_v56 = vmax.f32 %v4381_v41, %v4459_v23  ;;  %v14134_v41 = vld [vmem:[#allocation59_spill] sm:$0xff] }
 0x253   : > { %v4379_v62 = vmax.f32 %v4022_v38, %v4194_v44  ;;  %v4461_v48 = vsel %vm384_vm0, %v4458_v5, %v14127_v30  ;;  %v5031_v22 = vmax.f32 %v4630_v35, %v14129_v47  ;;  %v14132_v14 = vrot.slane %v10671_v10, 6  ;;  %v14137_v10 = vld [vmem:[#allocation74_spill] sm:$0xff] }
 0x254   : > { %v10878_v20 = vmax.f32 %v4382_v15, %v4461_v48  ;;  %v4638_v16 = vmax.f32 %v4378_v60, %v4452_v57  ;;  %v5134_v21 = vmax.f32 %v14134_v41, %v14133_v37  ;;  %v14135_v15 = vld [vmem:[#allocation83_spill] sm:$0xff]  ;;  %v3008_v25 = vrot.slane %v10673_v13, 6  ;;  %v14138_v30 = vld [vmem:[#allocation22_spill] sm:$0xff] }
 0x255   : > { %v4639_v38 = vmax.f32 %v4379_v62, %v4454_v29  ;;  %v3007_v53 = vsel %vm2987_vm10, %v14132_v14, %v3006_v26  ;;  %v4745_v54 = vrot.slane %v14135_v15, 4  ;;  %v3009_v52 = vrot.slane %v10678_v43, 6  ;;  %v14141_v14 = vld [vmem:[#allocation79_spill] sm:$0xff] }
 0x256   : > { %6959 = vmatmul.msk.f32.gmra.mxu1 %vm1109_vm2, %v3007_v53  ;;  %v4747_v5 = vrot.slane %v10876_v56, 4  ;;  %v4742_v40 = vrot.slane %v4638_v16, 4  ;;  %v10897_v32 = vmax.f32 %v14136_v45, %v4638_v16  ;;  %v10903_v42 = vmax.f32 %v4638_v16, %v10876_v56 }
 0x257   : > { %v4743_v35 = vrot.slane %v4639_v38, 4  ;;  %v10900_v26 = vmax.f32 %v14137_v10, %v4639_v38  ;;  %v10906_v27 = vmax.f32 %v4639_v38, %v10878_v20  ;;  %v5231_v44 = vrot.slane %v5134_v21, 1 }
 0x258   : > { %v5631_v13 = vrot.slane %v5134_v21, 4  ;;  %v5084_v57 = vmax.f32 %v5030_v18, %v10897_v32  ;;  %v3010_v62 = vsel %vm2987_vm10, %v3008_v25, %v3009_v52  ;;  %v13630_v23 = vrot.slane %v10878_v20, 4 }
 0x259   : > { %v4744_v43 = vsel %vm384_vm0, %v4742_v40, %v4743_v35  ;;  %v5085_v51 = vmax.f32 %v5031_v22, %v10900_v26  ;;  %v4746_v29 = vsel %vm384_vm0, %v4743_v35, %v4745_v54  ;;  %v5358_v60 = vmax.f32 %v5134_v21, %v5231_v44  ;;  %v10933_v35 = vpop.f32.mrf.mxu2 }
 0x25a   : > { %7020 = vmatmul.msk.f32.gmra.mxu3 %vm1109_vm2, %v4744_v43  ;;  %v3011_v48 = vrot.slane %v14138_v30, 6  ;;  %v5132_v24 = vmax.f32 %v5084_v57, %v10876_v56  ;;  %v14139_v38 = vrot.slane %v10787_v4, 1  ;;  %v14140_v18 = vrot.slane %v10784_v2, 1  ;;  %14144 = vst [vmem:[#allocation50_spill] sm:$0xff] %v10933_v35  ;;  %v14145_v43 = vld [vmem:[#allocation7_spill] sm:$0xff] }
 0x25b   : > { %v5133_v16 = vmax.f32 %v5085_v51, %v10878_v20  ;;  %v14142_v53 = vrot.slane %v14141_v14, 1  ;;  %v5455_v15 = vrot.slane %v5358_v60, 2  ;;  %v4749_v54 = vsel %vm384_vm0, %v4747_v5, %v13630_v23  ;;  %7010 = vmatmul.msk.f32.gmra.mxu2 %vm1109_vm2, %v14145_v43 }
 0x25c   : > { %v3826_v22 = vsel %vm1761_vm14, %v14140_v18, %v14139_v38  ;;  %v14143_v41 = vmov %v14139_v38  ;;  %v3012_v25 = vsel %vm2987_vm10, %v3009_v52, %v3011_v48  ;;  %v5228_v57 = vrot.slane %v5132_v24, 1 }
 0x25d   : > { %v3828_v21 = vsel %vm1761_vm14, %v14143_v41, %v14142_v53  ;;  %v4029_v40 = vmax.f32 %v10784_v2, %v3826_v22  ;;  %v5229_v51 = vrot.slane %v5133_v16, 1  ;;  %v5628_v38 = vrot.slane %v5132_v24, 4 }
 0x25e   : > { %v5629_v18 = vrot.slane %v5133_v16, 4  ;;  %6960 = vmatmul.msk.f32.gmra.mxu1 %vm1109_vm2, %v3010_v62  ;;  %v5582_v53 = vmax.f32 %v5358_v60, %v5455_v15  ;;  %v4030_v41 = vmax.f32 %v10787_v4, %v3828_v21  ;;  %v4464_v5 = vrot.slane %v10784_v2, 4 }
 0x25f   : > { %v4204_v61 = vrot.slane %v4029_v40, 2  ;;  %v5230_v52 = vsel %vm1761_vm14, %v5228_v57, %v5229_v51  ;;  %v5232_v48 = vsel %vm1761_vm14, %v5229_v51, %v5231_v44  ;;  %v4465_v62 = vrot.slane %v10787_v4, 4  ;;  %v14148_v57 = vld [vmem:[#allocation55_spill] sm:$0xff]  ;;  %v14149_v51 = vld [vmem:[#allocation86_spill] sm:$0xff] }
 0x260   : > { %v5630_v22 = vsel %vm384_vm0, %v5628_v38, %v5629_v18  ;;  %v5632_v43 = vsel %vm384_vm0, %v5629_v18, %v5631_v13  ;;  %v5356_v23 = vmax.f32 %v5132_v24, %v5230_v52  ;;  %v5357_v35 = vmax.f32 %v5133_v16, %v5232_v48  ;;  %v14150_v16 = vld [vmem:[#allocation82_spill] sm:$0xff] }
 0x261   : > { %v5758_v19 = vmax.f32 %v5582_v53, %v5631_v13  ;;  %v4205_v55 = vrot.slane %v4030_v41, 2  ;;  %v14146_v60 = vmax.f32 %v14128_v63, %v14136_v45  ;;  %v14147_v2 = vmax.f32 %v14129_v47, %v14137_v10 }
 0x262   : > { %v5137_v38 = vmax.f32 %v14149_v51, %v14148_v57  ;;  %v5452_v18 = vrot.slane %v5356_v23, 2  ;;  %v5453_v24 = vrot.slane %v5357_v35, 2  ;;  %7021 = vmatmul.msk.f32.gmra.mxu3 %vm1109_vm2, %v4746_v29  ;;  %v14151_v53 = vrot.slane %v14150_v16, 2 }
 0x263   : > { %v5087_v21 = vmax.f32 %v14146_v60, %v10903_v42  ;;  %v5088_v44 = vmax.f32 %v14147_v2, %v10906_v27  ;;  %v5855_v13 = vrot.slane %v5758_v19, 2  ;;  %v4206_v4 = vsel %vm2218_vm15, %v4204_v61, %v4205_v55  ;;  %v10966_v19 = vpop.f32.mrf.mxu2  ;;  %v14153_v61 = vld [vmem:[#allocation8_spill] sm:$0xff] }
 0x264   : > { %v4208_v63 = vsel %vm2218_vm15, %v4205_v55, %v14151_v53  ;;  %v4384_v45 = vmax.f32 %v4029_v40, %v4206_v4  ;;  %v4466_v52 = vsel %vm384_vm0, %v4464_v5, %v4465_v62  ;;  %v14152_v47 = vrot.slane %v14141_v14, 4  ;;  %7011 = vmatmul.msk.f32.gmra.mxu2 %vm1109_vm2, %v14153_v61 }
 0x265   : > { %v5454_v48 = vsel %vm2218_vm15, %v5452_v18, %v5453_v24  ;;  %v5456_v60 = vsel %vm2218_vm15, %v5453_v24, %v5455_v15  ;;  %v4385_v2 = vmax.f32 %v4030_v41, %v4208_v63  ;;  %v5236_v29 = vrot.slane %v5137_v38, 1 }
 0x266   : > { %v4468_v10 = vsel %vm384_vm0, %v4465_v62, %v14152_v47  ;;  %v5580_v51 = vmax.f32 %v5356_v23, %v5454_v48  ;;  %v5581_v55 = vmax.f32 %v5357_v35, %v5456_v60  ;;  %v10970_v40 = vmax.f32 %v4384_v45, %v4466_v52  ;;  %6961 = vmatmul.msk.f32.gmra.mxu1 %vm1109_vm2, %v3012_v25 }
 0x267   : > { %v5636_v5 = vrot.slane %v5137_v38, 4  ;;  %v10973_v14 = vmax.f32 %v4385_v2, %v4468_v10  ;;  %v5361_v62 = vmax.f32 %v5137_v38, %v5236_v29  ;;  %v4750_v18 = vrot.slane %v14133_v37, 4  ;;  %v14155_v10 = vld [vmem:[#allocation77_spill] sm:$0xff] }
 0x268   : > { %v3013_v15 = vrot.slane %v10680_v1, 6  ;;  %v5756_v41 = vmax.f32 %v5580_v51, %v5630_v22  ;;  %v5757_v24 = vmax.f32 %v5581_v55, %v5632_v43  ;;  %v5135_v4 = vmax.f32 %v5087_v21, %v10970_v40 }
 0x269   : > { %v3014_v16 = vrot.slane %v10682_v12, 6  ;;  %v5136_v23 = vmax.f32 %v5088_v44, %v10973_v14  ;;  %v5460_v35 = vrot.slane %v5361_v62, 2  ;;  %v14154_v53 = vrot.slane %v10878_v20, 4 }
 0x26a   : > { %v4752_v63 = vrot.slane %v10970_v40, 4  ;;  %v5852_v38 = vrot.slane %v5756_v41, 2  ;;  %v5853_v45 = vrot.slane %v5757_v24, 2  ;;  %v5233_v37 = vrot.slane %v5135_v4, 1  ;;  %7022 = vmatmul.msk.f32.gmra.mxu3 %vm1109_vm2, %v4749_v54  ;;  %v14158_v24 = vld [vmem:[#allocation45_spill] sm:$0xff] }
 0x26b   : > { %v4751_v25 = vsel %vm384_vm0, %v14154_v53, %v4750_v18  ;;  %v5633_v52 = vrot.slane %v5135_v4, 4  ;;  %v5234_v1 = vrot.slane %v5136_v23, 1  ;;  %v5634_v22 = vrot.slane %v5136_v23, 4 }
 0x26c   : > { %v3015_v43 = vsel %vm2987_vm10, %v3013_v15, %v3014_v16  ;;  %v5585_v12 = vmax.f32 %v5361_v62, %v5460_v35  ;;  %v5854_v21 = vsel %vm2218_vm15, %v5852_v38, %v5853_v45  ;;  %v5856_v44 = vsel %vm2218_vm15, %v5853_v45, %v5855_v13  ;;  %v14156_v15 = vld [vmem:[#allocation23_spill] sm:$0xff]  ;;  %v14160_v38 = vld [vmem:[#allocation33_spill] sm:$0xff] }
 0x26d   : > { %v4753_v47 = vrot.slane %v10973_v14, 4  ;;  %v3016_v48 = vrot.slane %v14155_v10, 6  ;;  %7051 = vmatmul.msk.f32.vlgmr.msrb.gmra.mxu0 %vm1109_vm2, %v5854_v21  ;;  %v5235_v60 = vsel %vm1761_vm14, %v5233_v37, %v5234_v1  ;;  %v5237_v2 = vsel %vm1761_vm14, %v5234_v1, %v5236_v29  ;;  %v14163_v1 = vld [vmem:[#allocation40_spill] sm:$0xff]  ;;  %v14166_v21 = vld [vmem:[#allocation11_spill] sm:$0xff] }
 0x26e   : > { %v5635_v54 = vsel %vm384_vm0, %v5633_v52, %v5634_v22  ;;  %v5637_v61 = vsel %vm384_vm0, %v5634_v22, %v5636_v5  ;;  %v5359_v51 = vmax.f32 %v5135_v4, %v5235_v60  ;;  %v5360_v55 = vmax.f32 %v5136_v23, %v5237_v2  ;;  %6962 = vmatmul.msk.f32.gmra.mxu1 %vm1109_vm2, %v3015_v43 }
 0x26f   : > { %v5761_v62 = vmax.f32 %v5585_v12, %v5636_v5  ;;  %v4754_v13 = vsel %vm384_vm0, %v4752_v63, %v4753_v47  ;;  %v3017_v18 = vsel %vm2987_vm10, %v3014_v16, %v3016_v48  ;;  %v14157_v41 = vrot.slane %v14156_v15, 2 }
 0x270   : > { %v14159_v53 = vrot.slane %v14158_v24, 2  ;;  %v14161_v45 = vrot.slane %v14160_v38, 4  ;;  %v14162_v4 = vrot.slane %v9861_v11, 4  ;;  %v11012_v23 = vmax.f32 %v14138_v30, %v14155_v10  ;;  %v11034_v38 = vpop.f32.mrf.mxu2 }
 0x271   : > { %v5457_v63 = vrot.slane %v5359_v51, 2  ;;  %v5458_v37 = vrot.slane %v5360_v55, 2  ;;  %v5860_v52 = vrot.slane %v5761_v62, 2  ;;  %v14164_v43 = vrot.slane %v10793_v9, 1 }
 0x272   : > { %v2295_v29 = vsel %vm2218_vm15, %v14159_v53, %v14157_v41  ;;  %v2655_v5 = vsel %vm384_vm0, %v14162_v4, %v14161_v45  ;;  %v3575_v22 = vmax.f32 %v14163_v1, %v11012_v23  ;;  %v14165_v12 = vrot.slane %v10790_v0, 1  ;;  %7023 = vmatmul.msk.f32.gmra.mxu3 %vm1109_vm2, %v4751_v25  ;;  %v14167_v45 = vld [vmem:[#allocation10_spill] sm:$0xff] }
 0x273   : > { %v2525_v16 = vmax.f32 %v14158_v24, %v2295_v29  ;;  %v3836_v48 = vrot.slane %v14166_v21, 1  ;;  %v4471_v60 = vrot.slane %v10790_v0, 4  ;;  %v5459_v30 = vsel %vm2218_vm15, %v5457_v63, %v5458_v37  ;;  %7012 = vmatmul.msk.f32.gmra.mxu2 %vm1109_vm2, %v14167_v45 }
 0x274   : > { %v3833_v11 = vsel %vm1761_vm14, %v14165_v12, %v14164_v43  ;;  %v5461_v2 = vsel %vm2218_vm15, %v5458_v37, %v5460_v35  ;;  %v5583_v41 = vmax.f32 %v5359_v51, %v5459_v30  ;;  %v4472_v29 = vrot.slane %v10793_v9, 4 }
 0x275   : > { %v11026_v62 = vmax.f32 %v2525_v16, %v2655_v5  ;;  %v11029_v15 = vmax.f32 %v10790_v0, %v3833_v11  ;;  %v5584_v24 = vmax.f32 %v5360_v55, %v5461_v2  ;;  %v4036_v53 = vmax.f32 %v14166_v21, %v3836_v48  ;;  %7052 = vmatmul.msk.f32.gmra.mxu0 %vm1109_vm2, %v5856_v44 }
 0x276   : > { %v4476_v0 = vrot.slane %v14166_v21, 4  ;;  %v11043_v51 = vmax.f32 %v10876_v56, %v10970_v40  ;;  %v5759_v25 = vmax.f32 %v5583_v41, %v5635_v54  ;;  %v4473_v63 = vsel %vm384_vm0, %v4471_v60, %v4472_v29  ;;  %6963 = vmatmul.msk.f32.gmra.mxu1 %vm1109_vm2, %v3017_v18 }
 0x277   : > { %v3655_v35 = vmax.f32 %v3575_v22, %v11026_v62  ;;  %v4211_v4 = vrot.slane %v11029_v15, 2  ;;  %v5760_v55 = vmax.f32 %v5584_v24, %v5637_v61  ;;  %v4216_v5 = vrot.slane %v4036_v53, 2 }
 0x278   : > { %v11049_v1 = vmax.f32 %v10878_v20, %v10973_v14  ;;  %v5090_v22 = vmax.f32 %v10897_v32, %v11043_v51  ;;  %v5857_v43 = vrot.slane %v5759_v25, 2  ;;  %v4755_v56 = vrot.slane %v14148_v57, 4  ;;  %v14176_v25 = vld [vmem:[#allocation12_spill] sm:$0xff] }
 0x279   : > { %v3834_v37 = vrot.slane %v3655_v35, 1  ;;  %v4474_v16 = vrot.slane %v3655_v35, 4  ;;  %v5858_v12 = vrot.slane %v5760_v55, 2  ;;  %v3018_v44 = vrot.slane %v10688_v17, 6 }
 0x27a   : > { %v14168_v54 = vrot.slane %v10793_v9, 1  ;;  %v5091_v17 = vmax.f32 %v10900_v26, %v11049_v1  ;;  %v4756_v2 = vsel %vm384_vm0, %v4753_v47, %v4755_v56  ;;  %v3021_v41 = vrot.slane %v11026_v62, 6  ;;  %7024 = vmatmul.msk.f32.gmra.mxu3 %vm1109_vm2, %v4754_v13 }
 0x27b   : > { %v3837_v11 = vsel %vm1761_vm14, %v3834_v37, %v3836_v48  ;;  %v4475_v20 = vsel %vm384_vm0, %v4472_v29, %v4474_v16  ;;  %v4477_v21 = vsel %vm384_vm0, %v4474_v16, %v4476_v0  ;;  %v5859_v32 = vsel %vm2218_vm15, %v5857_v43, %v5858_v12  ;;  %v11073_v29 = vpop.f32.mrf.mxu2  ;;  %7013 = vmatmul.msk.f32.gmra.mxu2 %vm1109_vm2, %v14176_v25 }
 0x27c   : > { %v3835_v61 = vsel %vm1761_vm14, %v14168_v54, %v3834_v37  ;;  %v5861_v60 = vsel %vm2218_vm15, %v5858_v12, %v5860_v52  ;;  %v4035_v30 = vmax.f32 %v3655_v35, %v3837_v11  ;;  %v3019_v48 = vrot.slane %v10690_v46, 6  ;;  %14169 = vst [vmem:[#allocation52_spill] sm:$0xff] %v11073_v29  ;;  %v14170_v52 = vld [vmem:[#allocation6_spill] sm:$0xff] }
 0x27d   : > { %v4034_v18 = vmax.f32 %v10793_v9, %v3835_v61  ;;  %v14171_v9 = vrot.slane %v14170_v52, 2  ;;  %v14172_v45 = vrot.slane %v10478_v50, 2  ;;  %v14173_v35 = vld [vmem:[#allocation34_spill] sm:$0xff]  ;;  %v14175_v47 = vrot.slane %v9891_v8, 4  ;;  %7053 = vmatmul.msk.f32.gmra.mxu0 %vm1109_vm2, %v5859_v32 }
 0x27e   : > { %v4214_v53 = vrot.slane %v4035_v30, 2  ;;  %v14174_v0 = vrot.slane %v14173_v35, 4  ;;  %v3020_v13 = vsel %vm2987_vm10, %v3018_v44, %v3019_v48  ;;  %v3022_v55 = vsel %vm2987_vm10, %v3019_v48, %v3021_v41  ;;  %v14180_v48 = vld [vmem:[#allocation57_spill] sm:$0xff] }
 0x27f   : > { %v4212_v24 = vrot.slane %v4034_v18, 2  ;;  %v2302_v26 = vsel %vm2218_vm15, %v14172_v45, %v14171_v9  ;;  %v11092_v16 = vmax.f32 %v14155_v10, %v11026_v62  ;;  %v14177_v56 = vrot.slane %v10803_v31, 1  ;;  %6964 = vmatmul.msk.f32.gmra.mxu1 %vm1109_vm2, %v3020_v13 }
 0x280   : > { %v2662_v46 = vsel %vm384_vm0, %v14175_v47, %v14174_v0  ;;  %v2529_v37 = vmax.f32 %v10478_v50, %v2302_v26  ;;  %v4217_v12 = vsel %vm2218_vm15, %v4214_v53, %v4216_v5  ;;  %v14178_v44 = vrot.slane %v10796_v7, 1 }
 0x281   : > { %v4213_v43 = vsel %vm2218_vm15, %v4211_v4, %v4212_v24  ;;  %v4215_v8 = vsel %vm2218_vm15, %v4212_v24, %v4214_v53  ;;  %v4389_v11 = vmax.f32 %v4035_v30, %v4217_v12  ;;  %v14179_v4 = vld [vmem:[#allocation75_spill] sm:$0xff]  ;;  %v3843_v41 = vrot.slane %v14180_v48, 1 }
 0x282   : > { %v3840_v54 = vsel %vm1761_vm14, %v14178_v44, %v14177_v56  ;;  %v4387_v50 = vmax.f32 %v11029_v15, %v4213_v43  ;;  %v4388_v61 = vmax.f32 %v4034_v18, %v4215_v8  ;;  %v11104_v10 = vmax.f32 %v2529_v37, %v2662_v46  ;;  %7025 = vmatmul.msk.f32.gmra.mxu3 %vm1109_vm2, %v4756_v2  ;;  %v14185_v56 = vld [vmem:[#allocation14_spill] sm:$0xff] }
 0x283   : > { %v3579_v32 = vmax.f32 %v14179_v4, %v11092_v16  ;;  %v11111_v5 = vmax.f32 %v10796_v7, %v3840_v54  ;;  %v4478_v24 = vrot.slane %v10796_v7, 4  ;;  %v11118_v15 = vmax.f32 %v4389_v11, %v4477_v21 }
 0x284   : > { %v11114_v53 = vmax.f32 %v4387_v50, %v4473_v63  ;;  %v11116_v52 = vmax.f32 %v4388_v61, %v4475_v20  ;;  %v4479_v18 = vrot.slane %v10803_v31, 4  ;;  %v4040_v9 = vmax.f32 %v14180_v48, %v3843_v41  ;;  %v14181_v63 = vld [vmem:[#allocation37_spill] sm:$0xff]  ;;  %v14182_v20 = vld [vmem:[#allocation84_spill] sm:$0xff] }
 0x285   : > { %v3659_v30 = vmax.f32 %v3579_v32, %v11104_v10  ;;  %v4218_v45 = vrot.slane %v11111_v5, 2  ;;  %v4483_v26 = vrot.slane %v14180_v48, 4  ;;  %v14183_v0 = vmax.f32 %v14181_v63, %v14182_v20  ;;  %7054 = vmatmul.msk.f32.gmra.mxu0 %vm1109_vm2, %v5861_v60 }
 0x286   : > { %v5138_v35 = vmax.f32 %v5090_v22, %v11114_v53  ;;  %v5139_v7 = vmax.f32 %v5091_v17, %v11116_v52  ;;  %v4757_v47 = vrot.slane %v11114_v53, 4  ;;  %v13634_v46 = vrot.slane %v11116_v52, 4  ;;  %v11135_v17 = vpop.f32.mrf.mxu2  ;;  %7014 = vmatmul.msk.f32.gmra.mxu2 %vm1109_vm2, %v14185_v56 }
 0x287   : > { %v5140_v21 = vmax.f32 %v14183_v0, %v11118_v15  ;;  %v3841_v25 = vrot.slane %v3659_v30, 1  ;;  %v4223_v13 = vrot.slane %v4040_v9, 2  ;;  %v4480_v37 = vsel %vm384_vm0, %v4478_v24, %v4479_v18  ;;  %14184 = vst [vmem:[#allocation51_spill] sm:$0xff] %v11135_v17  ;;  %6965 = vmatmul.msk.f32.gmra.mxu1 %vm1109_vm2, %v3022_v55 }
 0x288   : > { %v5238_v43 = vrot.slane %v5138_v35, 1  ;;  %v5239_v8 = vrot.slane %v5139_v7, 1  ;;  %v5638_v12 = vrot.slane %v5138_v35, 4  ;;  %v5639_v44 = vrot.slane %v5139_v7, 4 }
 0x289   : > { %v5241_v22 = vrot.slane %v5140_v21, 1  ;;  %v5641_v54 = vrot.slane %v5140_v21, 4  ;;  %v4759_v2 = vsel %vm384_vm0, %v4757_v47, %v13634_v46  ;;  %v14186_v50 = vrot.slane %v10803_v31, 1 }
 0x28a   : > { %v5240_v11 = vsel %vm1761_vm14, %v5238_v43, %v5239_v8  ;;  %v3844_v48 = vsel %vm1761_vm14, %v3841_v25, %v3843_v41  ;;  %v5640_v60 = vsel %vm384_vm0, %v5638_v12, %v5639_v44  ;;  %v11159_v41 = vmax.f32 %v10973_v14, %v11116_v52  ;;  %7026 = vmatmul.msk.f32.gmra.mxu3 %vm1109_vm2, %v4759_v2 }
 0x28b   : > { %v3842_v61 = vsel %vm1761_vm14, %v14186_v50, %v3841_v25  ;;  %v5242_v4 = vsel %vm1761_vm14, %v5239_v8, %v5241_v22  ;;  %v5364_v32 = vmax.f32 %v5140_v21, %v5241_v22  ;;  %v5362_v24 = vmax.f32 %v5138_v35, %v5240_v11 }
 0x28c   : > { %v5363_v9 = vmax.f32 %v5139_v7, %v5242_v4  ;;  %v5642_v63 = vsel %vm384_vm0, %v5639_v44, %v5641_v54  ;;  %v4038_v47 = vmax.f32 %v10803_v31, %v3842_v61  ;;  %v4039_v56 = vmax.f32 %v3659_v30, %v3844_v48 }
 0x28d   : > { %v5465_v0 = vrot.slane %v5364_v32, 2  ;;  %v4481_v50 = vrot.slane %v3659_v30, 4  ;;  %v5462_v46 = vrot.slane %v5362_v24, 2  ;;  %v11155_v21 = vmax.f32 %v10970_v40, %v11114_v53 }
 0x28e   : > { %v5463_v43 = vrot.slane %v5363_v9, 2  ;;  %v4219_v7 = vrot.slane %v4038_v47, 2  ;;  %v4221_v25 = vrot.slane %v4039_v56, 2  ;;  %v11168_v40 = vmax.f32 %v14148_v57, %v11118_v15  ;;  %v11171_v61 = vpop.f32.mrf.mxu2 }
 0x28f   : > { %v5588_v35 = vmax.f32 %v5364_v32, %v5465_v0  ;;  %v4482_v55 = vsel %vm384_vm0, %v4479_v18, %v4481_v50  ;;  %v4484_v30 = vsel %vm384_vm0, %v4481_v50, %v4483_v26  ;;  %14187 = vst [vmem:[#allocation38_spill] sm:$0xff] %v11171_v61  ;;  %v14188_v18 = vld [vmem:[#allocation19_spill] sm:$0xff]  ;;  %v5093_v57 = vmax.f32 %v10903_v42, %v11155_v21 }
 0x290   : > { %v5464_v8 = vsel %vm2218_vm15, %v5462_v46, %v5463_v43  ;;  %v5466_v31 = vsel %vm2218_vm15, %v5463_v43, %v5465_v0  ;;  %v4220_v44 = vsel %vm2218_vm15, %v4218_v45, %v4219_v7  ;;  %7015 = vmatmul.msk.f32.gmra.mxu2 %vm1109_vm2, %v14188_v18  ;;  %v4222_v46 = vsel %vm2218_vm15, %v4219_v7, %v4221_v25  ;;  %v14191_v18 = vld [vmem:[#allocation61_spill] sm:$0xff] }
 0x291   : > { %v5586_v22 = vmax.f32 %v5362_v24, %v5464_v8  ;;  %v5587_v14 = vmax.f32 %v5363_v9, %v5466_v31  ;;  %v5764_v12 = vmax.f32 %v5588_v35, %v5641_v54  ;;  %v4224_v2 = vsel %vm2218_vm15, %v4221_v25, %v4223_v13  ;;  %v14189_v9 = vld [vmem:[#allocation67_spill] sm:$0xff] }
 0x292   : > { %v4390_v26 = vmax.f32 %v11111_v5, %v4220_v44  ;;  %v4391_v54 = vmax.f32 %v4038_v47, %v4222_v46  ;;  %v4392_v48 = vmax.f32 %v4039_v56, %v4224_v2  ;;  %v5094_v24 = vmax.f32 %v10906_v27, %v11159_v41 }
 0x293   : > { %v5762_v11 = vmax.f32 %v5586_v22, %v5640_v60  ;;  %v5763_v4 = vmax.f32 %v5587_v14, %v5642_v63  ;;  %v5865_v32 = vrot.slane %v5764_v12, 2  ;;  %v5095_v0 = vmax.f32 %v14189_v9, %v11168_v40 }
 0x294   : > { %v11180_v45 = vmax.f32 %v4390_v26, %v4480_v37  ;;  %v11186_v43 = vmax.f32 %v4391_v54, %v4482_v55  ;;  %v4760_v5 = vrot.slane %v11118_v15, 4  ;;  %v11189_v42 = vmax.f32 %v4392_v48, %v4484_v30 }
 0x295   : > { %v5862_v50 = vrot.slane %v5762_v11, 2  ;;  %v5863_v13 = vrot.slane %v5763_v4, 2  ;;  %v3023_v63 = vrot.slane %v10694_v34, 6  ;;  %v3024_v37 = vrot.slane %v10696_v3, 6 }
 0x296   : > { %v5141_v60 = vmax.f32 %v5093_v57, %v11180_v45  ;;  %v5142_v56 = vmax.f32 %v5094_v24, %v11186_v43  ;;  %v14190_v35 = vrot.slane %v11116_v52, 4  ;;  %v5143_v25 = vmax.f32 %v5095_v0, %v11189_v42 }
 0x297   : > { %v5864_v47 = vsel %vm2218_vm15, %v5862_v50, %v5863_v13  ;;  %v5866_v27 = vsel %vm2218_vm15, %v5863_v13, %v5865_v32  ;;  %v3025_v34 = vsel %vm2987_vm10, %v3023_v63, %v3024_v37  ;;  %v4762_v30 = vrot.slane %v11180_v45, 4  ;;  %v14194_v13 = vld [vmem:[#allocation16_spill] sm:$0xff] }
 0x298   : > { %v4761_v7 = vsel %vm384_vm0, %v14190_v35, %v4760_v5  ;;  %7055 = vmatmul.msk.f32.gmra.mxu0 %vm1109_vm2, %v5864_v47  ;;  %v5243_v55 = vrot.slane %v5141_v60, 1  ;;  %v5643_v8 = vrot.slane %v5141_v60, 4  ;;  %v5244_v3 = vrot.slane %v5142_v56, 1  ;;  %6966 = vmatmul.msk.f32.gmra.mxu1 %vm1109_vm2, %v3025_v34 }
 0x299   : > { %7027 = vmatmul.msk.f32.gmra.mxu3 %vm1109_vm2, %v4761_v7  ;;  %v5644_v31 = vrot.slane %v5142_v56, 4  ;;  %v4763_v22 = vrot.slane %v11186_v43, 4  ;;  %v5246_v14 = vrot.slane %v5143_v25, 1  ;;  %v5646_v12 = vrot.slane %v5143_v25, 4 }
 0x29a   : > { %v3026_v44 = vrot.slane %v11104_v10, 6  ;;  %v14192_v46 = vrot.slane %v14191_v18, 2  ;;  %v14193_v2 = vrot.slane %v14074_v36, 2  ;;  %v5245_v57 = vsel %vm1761_vm14, %v5243_v55, %v5244_v3 }
 0x29b   : > { %v5645_v11 = vsel %vm384_vm0, %v5643_v8, %v5644_v31  ;;  %v4764_v4 = vsel %vm384_vm0, %v4762_v30, %v4763_v22  ;;  %v5247_v54 = vsel %vm1761_vm14, %v5244_v3, %v5246_v14  ;;  %v5365_v48 = vmax.f32 %v5141_v60, %v5245_v57  ;;  %v14197_v60 = vld [vmem:[#allocation21_spill] sm:$0xff]  ;;  %v14199_v8 = vld [vmem:[#allocation64_spill] sm:$0xff] }
 0x29c   : > { %v2309_v26 = vsel %vm2218_vm15, %v14193_v2, %v14192_v46  ;;  %v5367_v24 = vmax.f32 %v5143_v25, %v5246_v14  ;;  %v5647_v9 = vsel %vm384_vm0, %v5644_v31, %v5646_v12  ;;  %v5366_v0 = vmax.f32 %v5142_v56, %v5247_v54  ;;  %v14198_v25 = vld [vmem:[#allocation39_spill] sm:$0xff]  ;;  %v14202_v54 = vld [vmem:[#allocation24_spill] sm:$0xff] }
 0x29d   : > { %v2533_v32 = vmax.f32 %v14074_v36, %v2309_v26  ;;  %v3027_v50 = vsel %vm2987_vm10, %v3024_v37, %v3026_v44  ;;  %v14195_v5 = vrot.slane %v14194_v13, 4  ;;  %v14196_v63 = vrot.slane %v9910_v33, 4 }
 0x29e   : > { %v11229_v35 = vmax.f32 %v11026_v62, %v11104_v10  ;;  %v5467_v36 = vrot.slane %v5365_v48, 2  ;;  %v5470_v7 = vrot.slane %v5367_v24, 2  ;;  %v14200_v56 = vmax.f32 %v14198_v25, %v14199_v8 }
 0x29f   : > { %v2669_v47 = vsel %vm384_vm0, %v14196_v63, %v14195_v5  ;;  %v5468_v37 = vrot.slane %v5366_v0, 2  ;;  %v3845_v33 = vrot.slane %v10806_v58, 1  ;;  %v3846_v31 = vrot.slane %v10809_v49, 1 }
 0x2a0   : > { %v11231_v55 = vmax.f32 %v2533_v32, %v2669_v47  ;;  %v3664_v34 = vmax.f32 %v14200_v56, %v14197_v60  ;;  %v3583_v3 = vmax.f32 %v11012_v23, %v11229_v35  ;;  %7056 = vmatmul.msk.f32.gmra.mxu0 %vm1109_vm2, %v5866_v27  ;;  %v5591_v62 = vmax.f32 %v5367_v24, %v5470_v7  ;;  %v11251_v32 = vpop.f32.mrf.mxu2 }
 0x2a1   : > { %7028 = vmatmul.msk.f32.gmra.mxu3 %vm1109_vm2, %v4764_v4  ;;  %v4485_v14 = vrot.slane %v10806_v58, 4  ;;  %v4486_v44 = vrot.slane %v10809_v49, 4  ;;  %v5469_v18 = vsel %vm2218_vm15, %v5467_v36, %v5468_v37  ;;  %v5471_v46 = vsel %vm2218_vm15, %v5468_v37, %v5470_v7  ;;  %6967 = vmatmul.msk.f32.gmra.mxu1 %vm1109_vm2, %v3027_v50  ;;  %14201 = vst [vmem:[#allocation78_spill] sm:$0xff] %v11251_v32 }
 0x2a2   : > { %v3850_v30 = vrot.slane %v3664_v34, 1  ;;  %v3663_v23 = vmax.f32 %v3583_v3, %v11231_v55  ;;  %v3847_v2 = vsel %vm1761_vm14, %v3845_v33, %v3846_v31  ;;  %v5589_v26 = vmax.f32 %v5365_v48, %v5469_v18  ;;  %7016 = vmatmul.msk.f32.gmra.mxu2 %vm1109_vm2, %v14202_v54 }
 0x2a3   : > { %v5590_v27 = vmax.f32 %v5366_v0, %v5471_v46  ;;  %v5767_v57 = vmax.f32 %v5591_v62, %v5646_v12  ;;  %v4041_v4 = vmax.f32 %v10806_v58, %v3847_v2  ;;  %v4487_v5 = vsel %vm384_vm0, %v4485_v14, %v4486_v44 }
 0x2a4   : > { %v3848_v24 = vrot.slane %v3663_v23, 1  ;;  %v4044_v13 = vmax.f32 %v3664_v34, %v3850_v30  ;;  %v4488_v63 = vrot.slane %v3663_v23, 4  ;;  %v5765_v50 = vmax.f32 %v5589_v26, %v5645_v11 }
 0x2a5   : > { %v5766_v47 = vmax.f32 %v5590_v27, %v5647_v9  ;;  %v5870_v36 = vrot.slane %v5767_v57, 2  ;;  %v4225_v7 = vrot.slane %v4041_v4, 2  ;;  %v4490_v33 = vrot.slane %v3664_v34, 4  ;;  %v14204_v57 = vld [vmem:[#allocation17_spill] sm:$0xff] }
 0x2a6   : > { %v3849_v48 = vsel %vm1761_vm14, %v3846_v31, %v3848_v24  ;;  %v3851_v12 = vsel %vm1761_vm14, %v3848_v24, %v3850_v30  ;;  %v4230_v0 = vrot.slane %v4044_v13, 2  ;;  %v4489_v58 = vsel %vm384_vm0, %v4486_v44, %v4488_v63 }
 0x2a7   : > { %v5867_v25 = vrot.slane %v5765_v50, 2  ;;  %v5868_v56 = vrot.slane %v5766_v47, 2  ;;  %v4042_v37 = vmax.f32 %v10809_v49, %v3849_v48  ;;  %v4043_v3 = vmax.f32 %v3663_v23, %v3851_v12  ;;  %v14208_v47 = vld [vmem:[#allocation87_spill] sm:$0xff] }
 0x2a8   : > { %v11262_v62 = vmax.f32 %v11114_v53, %v11180_v45  ;;  %v11266_v11 = vmax.f32 %v11116_v52, %v11186_v43  ;;  %v11270_v9 = vmax.f32 %v11118_v15, %v11189_v42  ;;  %v4491_v34 = vsel %vm384_vm0, %v4488_v63, %v4490_v33  ;;  %v14207_v63 = vld [vmem:[#allocation68_spill] sm:$0xff] }
 0x2a9   : > { %v5869_v31 = vsel %vm2218_vm15, %v5867_v25, %v5868_v56  ;;  %v5871_v30 = vsel %vm2218_vm15, %v5868_v56, %v5870_v36  ;;  %v4226_v14 = vrot.slane %v4042_v37, 2  ;;  %v4228_v49 = vrot.slane %v4043_v3, 2 }
 0x2aa   : > { %7057 = vmatmul.msk.f32.gmra.mxu0 %vm1109_vm2, %v5869_v31  ;;  %v5096_v53 = vmax.f32 %v11043_v51, %v11262_v62  ;;  %v5097_v52 = vmax.f32 %v11049_v1, %v11266_v11  ;;  %v5098_v15 = vmax.f32 %v14182_v20, %v11270_v9  ;;  %v4765_v23 = vrot.slane %v11189_v42, 4  ;;  %v14205_v20 = vld [vmem:[#allocation35_spill] sm:$0xff] }
 0x2ab   : > { %v4227_v44 = vsel %vm2218_vm15, %v4225_v7, %v4226_v14  ;;  %v4229_v18 = vsel %vm2218_vm15, %v4226_v14, %v4228_v49  ;;  %v4231_v46 = vsel %vm2218_vm15, %v4228_v49, %v4230_v0  ;;  %v14203_v2 = vmax.f32 %v10720_v39, %v10748_v6  ;;  %v14209_v0 = vld [vmem:[#allocation36_spill] sm:$0xff] }
 0x2ac   : > { %v4393_v51 = vmax.f32 %v4041_v4, %v4227_v44  ;;  %v4394_v27 = vmax.f32 %v4042_v37, %v4229_v18  ;;  %v4395_v1 = vmax.f32 %v4043_v3, %v4231_v46  ;;  %v14206_v54 = vmax.f32 %v14204_v57, %v14205_v20 }
 0x2ad   : > { %v11290_v26 = vmax.f32 %v14203_v2, %v10740_v28  ;;  %v4766_v13 = vsel %vm384_vm0, %v4763_v22, %v4765_v23  ;;  %v3028_v50 = vrot.slane %v14207_v63, 6  ;;  %v3029_v36 = vrot.slane %v14208_v47, 6 }
 0x2ae   : > { %v11296_v24 = vmax.f32 %v14206_v54, %v10742_v59  ;;  %v11303_v39 = vmax.f32 %v4393_v51, %v4487_v5  ;;  %v11305_v7 = vmax.f32 %v4394_v27, %v4489_v58  ;;  %v11307_v4 = vmax.f32 %v4395_v1, %v4491_v34  ;;  %7029 = vmatmul.msk.f32.gmra.mxu3 %vm1109_vm2, %v4766_v13  ;;  %v14211_v34 = vld [vmem:[#allocation69_spill] sm:$0xff]  ;;  %v14213_v51 = vld [vmem:[#allocation91_spill] sm:$0xff] }
 0x2af   : > { %v3031_v48 = vrot.slane %v11231_v55, 6  ;;  %v3030_v12 = vsel %vm2987_vm10, %v3028_v50, %v3029_v36  ;;  %v14210_v25 = vrot.slane %v14209_v0, 1  ;;  %v2675_v56 = vrot.slane %v14209_v0, 4 }
 0x2b0   : > { %v11318_v5 = vmax.f32 %v11104_v10, %v11231_v55  ;;  %v5144_v58 = vmax.f32 %v5096_v53, %v11303_v39  ;;  %v5145_v37 = vmax.f32 %v5097_v52, %v11305_v7  ;;  %v5146_v3 = vmax.f32 %v5098_v15, %v11307_v4  ;;  %6968 = vmatmul.msk.f32.gmra.mxu1 %vm1109_vm2, %v3030_v12 }
 0x2b1   : > { %v2081_v22 = vmax.f32 %v14209_v0, %v14210_v25  ;;  %v4767_v33 = vrot.slane %v11303_v39, 4  ;;  %v4768_v31 = vrot.slane %v11305_v7, 4  ;;  %v3032_v14 = vsel %vm2987_vm10, %v3029_v36, %v3031_v48 }
 0x2b2   : > { %v14212_v44 = vrot.slane %v14211_v34, 4  ;;  %7058 = vmatmul.msk.f32.gmra.mxu0 %vm1109_vm2, %v5871_v30  ;;  %v5248_v53 = vrot.slane %v5144_v58, 1  ;;  %v5249_v18 = vrot.slane %v5145_v37, 1  ;;  %v5251_v52 = vrot.slane %v5146_v3, 1 }
 0x2b3   : > { %v2315_v49 = vrot.slane %v2081_v22, 2  ;;  %v5648_v46 = vrot.slane %v5144_v58, 4  ;;  %v5649_v15 = vrot.slane %v5145_v37, 4  ;;  %v5651_v23 = vrot.slane %v5146_v3, 4 }
 0x2b4   : > { %v2676_v10 = vsel %vm384_vm0, %v14212_v44, %v2675_v56  ;;  %v4769_v2 = vsel %vm384_vm0, %v4767_v33, %v4768_v31  ;;  %v14214_v27 = vrot.slane %v14213_v51, 2  ;;  %v5250_v57 = vsel %vm1761_vm14, %v5248_v53, %v5249_v18 }
 0x2b5   : > { %v5252_v54 = vsel %vm1761_vm14, %v5249_v18, %v5251_v52  ;;  %v5370_v13 = vmax.f32 %v5146_v3, %v5251_v52  ;;  %v5368_v63 = vmax.f32 %v5144_v58, %v5250_v57  ;;  %v5650_v47 = vsel %vm384_vm0, %v5648_v46, %v5649_v15 }
 0x2b6   : > { %v2316_v1 = vsel %vm2218_vm15, %v14214_v27, %v2315_v49  ;;  %v5369_v50 = vmax.f32 %v5145_v37, %v5252_v54  ;;  %v5652_v36 = vsel %vm384_vm0, %v5649_v15, %v5651_v23  ;;  %7030 = vmatmul.msk.f32.gmra.mxu3 %vm1109_vm2, %v4769_v2  ;;  %v2538_v12 = vmax.f32 %v2081_v22, %v2315_v49  ;;  %v14215_v2 = vld [vmem:[#allocation62_spill] sm:$0xff] }
 0x2b7   : > { %v2537_v30 = vmax.f32 %v14213_v51, %v2316_v1  ;;  %v5475_v48 = vrot.slane %v5370_v13, 2  ;;  %v3587_v25 = vmax.f32 %v11092_v16, %v11318_v5  ;;  %v5472_v33 = vrot.slane %v5368_v63, 2 }
 0x2b8   : > { %v5473_v34 = vrot.slane %v5369_v50, 2  ;;  %v3852_v3 = vrot.slane %v11290_v26, 1  ;;  %v3853_v58 = vrot.slane %v11296_v24, 1  ;;  %6969 = vmatmul.msk.f32.gmra.mxu1 %vm1109_vm2, %v3032_v14  ;;  %v11350_v44 = vmax.f32 %v2538_v12, %v2675_v56  ;;  %v14216_v14 = vld [vmem:[#allocation13_spill] sm:$0xff] }
 0x2b9   : > { %v11343_v0 = vmax.f32 %v2537_v30, %v2676_v10  ;;  %v5594_v37 = vmax.f32 %v5370_v13, %v5475_v48  ;;  %v4492_v22 = vrot.slane %v11290_v26, 4  ;;  %v4493_v18 = vrot.slane %v11296_v24, 4 }
 0x2ba   : > { %v5474_v49 = vsel %vm2218_vm15, %v5472_v33, %v5473_v34  ;;  %v5476_v10 = vsel %vm2218_vm15, %v5473_v34, %v5475_v48  ;;  %v3854_v16 = vsel %vm1761_vm14, %v3852_v3, %v3853_v58  ;;  %v14217_v56 = vmax.f32 %v14215_v2, %v14216_v14 }
 0x2bb   : > { %v3667_v53 = vmax.f32 %v3587_v25, %v11343_v0  ;;  %v5592_v52 = vmax.f32 %v5368_v63, %v5474_v49  ;;  %v5593_v46 = vmax.f32 %v5369_v50, %v5476_v10  ;;  %v5770_v15 = vmax.f32 %v5594_v37, %v5651_v23 }
 0x2bc   : > { %v3668_v51 = vmax.f32 %v14217_v56, %v11350_v44  ;;  %v4045_v1 = vmax.f32 %v11290_v26, %v3854_v16  ;;  %v4494_v57 = vsel %vm384_vm0, %v4492_v22, %v4493_v18  ;;  %v11377_v16 = vmax.f32 %v11186_v43, %v11305_v7 }
 0x2bd   : > { %v3855_v27 = vrot.slane %v3667_v53, 1  ;;  %v4495_v54 = vrot.slane %v3667_v53, 4  ;;  %v5768_v13 = vmax.f32 %v5592_v52, %v5650_v47  ;;  %v5769_v30 = vmax.f32 %v5593_v46, %v5652_v36  ;;  %v14218_v52 = vld [vmem:[#allocation32_spill] sm:$0xff]  ;;  %v14219_v46 = vld [vmem:[#allocation15_spill] sm:$0xff] }
 0x2be   : > { %v5875_v48 = vrot.slane %v5770_v15, 2  ;;  %v3857_v12 = vrot.slane %v3668_v51, 1  ;;  %v4232_v63 = vrot.slane %v4045_v1, 2  ;;  %v4497_v50 = vrot.slane %v3668_v51, 4 }
 0x2bf   : > { %v3856_v25 = vsel %vm1761_vm14, %v3853_v58, %v3855_v27  ;;  %v4496_v23 = vsel %vm384_vm0, %v4493_v18, %v4495_v54  ;;  %v5872_v33 = vrot.slane %v5768_v13, 2  ;;  %v5873_v34 = vrot.slane %v5769_v30, 2 }
 0x2c0   : > { %v3858_v3 = vsel %vm1761_vm14, %v3855_v27, %v3857_v12  ;;  %v4046_v37 = vmax.f32 %v11296_v24, %v3856_v25  ;;  %v4048_v49 = vmax.f32 %v3668_v51, %v3857_v12  ;;  %v4498_v22 = vsel %vm384_vm0, %v4495_v54, %v4497_v50  ;;  %v14220_v12 = vld [vmem:[#allocation26_spill] sm:$0xff] }
 0x2c1   : > { %v4047_v26 = vmax.f32 %v3667_v53, %v3858_v3  ;;  %v11371_v47 = vmax.f32 %v11180_v45, %v11303_v39  ;;  %v5874_v36 = vsel %vm2218_vm15, %v5872_v33, %v5873_v34  ;;  %v5876_v58 = vsel %vm2218_vm15, %v5873_v34, %v5875_v48  ;;  %v14222_v34 = vld [vmem:[#allocation72_spill] sm:$0xff] }
 0x2c2   : > { %v4233_v10 = vrot.slane %v4046_v37, 2  ;;  %7059 = vmatmul.msk.f32.gmra.mxu0 %vm1109_vm2, %v5874_v36  ;;  %v4237_v53 = vrot.slane %v4048_v49, 2  ;;  %v11382_v18 = vmax.f32 %v11189_v42, %v11307_v4  ;;  %v3589_v15 = vmax.f32 %v14219_v46, %v14218_v52 }
 0x2c3   : > { %v4235_v24 = vrot.slane %v4047_v26, 2  ;;  %v5099_v45 = vmax.f32 %v11155_v21, %v11371_v47  ;;  %v5100_v43 = vmax.f32 %v11159_v41, %v11377_v16  ;;  %v4770_v56 = vrot.slane %v11307_v4, 4  ;;  %v14221_v41 = vld [vmem:[#allocation70_spill] sm:$0xff] }
 0x2c4   : > { %v4234_v2 = vsel %vm2218_vm15, %v4232_v63, %v4233_v10  ;;  %v5101_v42 = vmax.f32 %v11168_v40, %v11382_v18  ;;  %v3033_v48 = vrot.slane %v10740_v28, 6  ;;  %v3590_v25 = vmax.f32 %v14221_v41, %v14220_v12 }
 0x2c5   : > { %v4236_v51 = vsel %vm2218_vm15, %v4233_v10, %v4235_v24  ;;  %v4238_v27 = vsel %vm2218_vm15, %v4235_v24, %v4237_v53  ;;  %v4396_v54 = vmax.f32 %v4045_v1, %v4234_v2  ;;  %v4771_v30 = vsel %vm384_vm0, %v4768_v31, %v4770_v56 }
 0x2c6   : > { %v4397_v13 = vmax.f32 %v4046_v37, %v4236_v51  ;;  %v4398_v21 = vmax.f32 %v4047_v26, %v4238_v27  ;;  %7031 = vmatmul.msk.f32.gmra.mxu3 %vm1109_vm2, %v4771_v30  ;;  %v3034_v1 = vrot.slane %v10742_v59, 6  ;;  %v3036_v50 = vrot.slane %v11343_v0, 6 }
 0x2c7   : > { %v11402_v63 = vmax.f32 %v4396_v54, %v4494_v57  ;;  %v14223_v3 = vrot.slane %v14222_v34, 1  ;;  %v2682_v28 = vrot.slane %v14222_v34, 4  ;;  %v11429_v56 = vmax.f32 %v11231_v55, %v11343_v0 }
 0x2c8   : > { %v11407_v40 = vmax.f32 %v4397_v13, %v4496_v23  ;;  %v11409_v33 = vmax.f32 %v4398_v21, %v4498_v22  ;;  %v3035_v57 = vsel %vm2987_vm10, %v3033_v48, %v3034_v1  ;;  %v3037_v49 = vsel %vm2987_vm10, %v3034_v1, %v3036_v50  ;;  %v14226_v13 = vld [vmem:[#allocation27_spill] sm:$0xff] }
 0x2c9   : > { %v2085_v31 = vmax.f32 %v14222_v34, %v14223_v3  ;;  %v5147_v37 = vmax.f32 %v5099_v45, %v11402_v63  ;;  %v4772_v26 = vrot.slane %v11402_v63, 4  ;;  %6970 = vmatmul.msk.f32.gmra.mxu1 %vm1109_vm2, %v3035_v57  ;;  %v14224_v45 = vld [vmem:[#allocation71_spill] sm:$0xff]  ;;  %v11439_v48 = vmax.f32 %v14197_v60, %v11350_v44 }
 0x2ca   : > { %v5148_v36 = vmax.f32 %v5100_v43, %v11407_v40  ;;  %v5149_v23 = vmax.f32 %v5101_v42, %v11409_v33  ;;  %v13635_v22 = vrot.slane %v11407_v40, 4  ;;  %7060 = vmatmul.msk.f32.gmra.mxu0 %vm1109_vm2, %v5876_v58  ;;  %v14225_v46 = vrot.slane %v14224_v45, 4 }
 0x2cb   : > { %v2322_v10 = vrot.slane %v2085_v31, 2  ;;  %v5253_v24 = vrot.slane %v5147_v37, 1  ;;  %v5653_v53 = vrot.slane %v5147_v37, 4  ;;  %v14227_v58 = vrot.slane %v14226_v13, 2 }
 0x2cc   : > { %v2683_v2 = vsel %vm384_vm0, %v14225_v46, %v2682_v28  ;;  %v5254_v43 = vrot.slane %v5148_v36, 1  ;;  %v5256_v51 = vrot.slane %v5149_v23, 1  ;;  %v5654_v27 = vrot.slane %v5148_v36, 4 }
 0x2cd   : > { %v5656_v54 = vrot.slane %v5149_v23, 4  ;;  %v4774_v42 = vsel %vm384_vm0, %v4772_v26, %v13635_v22  ;;  %v2323_v21 = vsel %vm2218_vm15, %v14227_v58, %v2322_v10  ;;  %v2542_v30 = vmax.f32 %v2085_v31, %v2322_v10 }
 0x2ce   : > { %v5255_v55 = vsel %vm1761_vm14, %v5253_v24, %v5254_v43  ;;  %v5257_v41 = vsel %vm1761_vm14, %v5254_v43, %v5256_v51  ;;  %v5373_v1 = vmax.f32 %v5149_v23, %v5256_v51  ;;  %v5655_v50 = vsel %vm384_vm0, %v5653_v53, %v5654_v27  ;;  %7032 = vmatmul.msk.f32.gmra.mxu3 %vm1109_vm2, %v4774_v42  ;;  %v14229_v43 = vld [vmem:[#allocation46_spill] sm:$0xff] }
 0x2cf   : > { %v5371_v34 = vmax.f32 %v5147_v37, %v5255_v55  ;;  %v5372_v3 = vmax.f32 %v5148_v36, %v5257_v41  ;;  %v5657_v57 = vsel %vm384_vm0, %v5654_v27, %v5656_v54  ;;  %v2541_v26 = vmax.f32 %v14226_v13, %v2323_v21  ;;  %v14228_v37 = vld [vmem:[#allocation94_spill] sm:$0xff] }
 0x2d0   : > { %v5480_v31 = vrot.slane %v5373_v1, 2  ;;  %v11447_v10 = vmax.f32 %v2542_v30, %v2682_v28  ;;  %v3591_v60 = vmax.f32 %v11229_v35, %v11429_v56  ;;  %v3592_v24 = vmax.f32 %v14199_v8, %v11439_v48 }
 0x2d1   : > { %v5477_v23 = vrot.slane %v5371_v34, 2  ;;  %v5478_v45 = vrot.slane %v5372_v3, 2  ;;  %v11453_v53 = vmax.f32 %v2541_v26, %v2683_v2  ;;  %v3669_v36 = vmax.f32 %v3589_v15, %v14228_v37  ;;  %6971 = vmatmul.msk.f32.gmra.mxu1 %vm1109_vm2, %v3037_v49 }
 0x2d2   : > { %v5597_v46 = vmax.f32 %v5373_v1, %v5480_v31  ;;  %v3670_v51 = vmax.f32 %v3590_v25, %v14229_v43  ;;  %v3672_v28 = vmax.f32 %v3592_v24, %v11447_v10  ;;  %v11461_v27 = vmax.f32 %v11303_v39, %v11402_v63 }
 0x2d3   : > { %v5479_v35 = vsel %vm2218_vm15, %v5477_v23, %v5478_v45  ;;  %v5481_v8 = vsel %vm2218_vm15, %v5478_v45, %v5480_v31  ;;  %v3671_v2 = vmax.f32 %v3591_v60, %v11453_v53  ;;  %v3859_v42 = vrot.slane %v3669_v36, 1 }
 0x2d4   : > { %v5595_v13 = vmax.f32 %v5371_v34, %v5479_v35  ;;  %v5596_v15 = vmax.f32 %v5372_v3, %v5481_v8  ;;  %v5773_v58 = vmax.f32 %v5597_v46, %v5656_v54  ;;  %v3860_v21 = vrot.slane %v3670_v51, 1 }
 0x2d5   : > { %v3862_v49 = vrot.slane %v3671_v2, 1  ;;  %v3864_v30 = vrot.slane %v3672_v28, 1  ;;  %v4499_v25 = vrot.slane %v3669_v36, 4  ;;  %v4500_v55 = vrot.slane %v3670_v51, 4 }
 0x2d6   : > { %v5771_v41 = vmax.f32 %v5595_v13, %v5655_v50  ;;  %v5772_v1 = vmax.f32 %v5596_v15, %v5657_v57  ;;  %v5880_v26 = vrot.slane %v5773_v58, 2  ;;  %v3861_v39 = vsel %vm1761_vm14, %v3859_v42, %v3860_v21 }
 0x2d7   : > { %v3863_v24 = vsel %vm1761_vm14, %v3860_v21, %v3862_v49  ;;  %v3865_v31 = vsel %vm1761_vm14, %v3862_v49, %v3864_v30  ;;  %v4049_v23 = vmax.f32 %v3669_v36, %v3861_v39  ;;  %v4052_v60 = vmax.f32 %v3672_v28, %v3864_v30 }
 0x2d8   : > { %v5877_v45 = vrot.slane %v5771_v41, 2  ;;  %v5878_v34 = vrot.slane %v5772_v1, 2  ;;  %v4050_v3 = vmax.f32 %v3670_v51, %v3863_v24  ;;  %v4051_v54 = vmax.f32 %v3671_v2, %v3865_v31 }
 0x2d9   : > { %v4239_v46 = vrot.slane %v4049_v23, 2  ;;  %v4244_v35 = vrot.slane %v4052_v60, 2  ;;  %v4501_v8 = vsel %vm384_vm0, %v4499_v25, %v4500_v55  ;;  %v4502_v22 = vrot.slane %v3671_v2, 4 }
 0x2da   : > { %v5879_v50 = vsel %vm2218_vm15, %v5877_v45, %v5878_v34  ;;  %v5881_v57 = vsel %vm2218_vm15, %v5878_v34, %v5880_v26  ;;  %v4240_v42 = vrot.slane %v4050_v3, 2  ;;  %v4242_v13 = vrot.slane %v4051_v54, 2  ;;  %v3153_v45 = vpop.f32.mrf.mxu1 }
 0x2db   : > { %7061 = vmatmul.msk.f32.gmra.mxu0 %vm1109_vm2, %v5879_v50  ;;  %v4503_v36 = vsel %vm384_vm0, %v4500_v55, %v4502_v22  ;;  %v4504_v15 = vrot.slane %v3672_v28, 4  ;;  %v11476_v51 = vmax.f32 %v11305_v7, %v11407_v40  ;;  %v11480_v58 = vmax.f32 %v11307_v4, %v11409_v33 }
 0x2dc   : > { %v11484_v2 = vmax.f32 %v10742_v59, %v14229_v43  ;;  %v4241_v21 = vsel %vm2218_vm15, %v4239_v46, %v4240_v42  ;;  %v4243_v49 = vsel %vm2218_vm15, %v4240_v42, %v4242_v13  ;;  %v4245_v30 = vsel %vm2218_vm15, %v4242_v13, %v4244_v35  ;;  %v7381_v42 = vld [vmem:[#allocation2 + $0x238] sm:$0x3f] }
 0x2dd   : > { %v4399_v25 = vmax.f32 %v4049_v23, %v4241_v21  ;;  %v4400_v28 = vmax.f32 %v4050_v3, %v4243_v49  ;;  %v4401_v55 = vmax.f32 %v4051_v54, %v4245_v30  ;;  %v5102_v7 = vmax.f32 %v11262_v62, %v11461_v27  ;;  %v14231_v23 = vld [vmem:[#allocation95_spill] sm:$0xff]  ;;  %v11520_v13 = vld [vmem:[#allocation2 + $0x258] sm:$0x3f] }
 0x2de   : > { %14230 = vst [vmem:[#allocation76_spill] sm:$0xff] %v11484_v2  ;;  %v4505_v41 = vsel %vm384_vm0, %v4502_v22, %v4504_v15  ;;  %v5103_v4 = vmax.f32 %v11266_v11, %v11476_v51  ;;  %v5104_v59 = vmax.f32 %v11270_v9, %v11480_v58  ;;  %v4775_v1 = vrot.slane %v11409_v33, 4  ;;  %v14236_v22 = vld [vmem:[#allocation89_spill] sm:$0xff] }
 0x2df   : > { %v11497_v26 = vmax.f32 %v4399_v25, %v4501_v8  ;;  %v11499_v39 = vmax.f32 %v4400_v28, %v4503_v36  ;;  %v11501_v24 = vmax.f32 %v4401_v55, %v4505_v41  ;;  %v3038_v31 = vrot.slane %v14228_v37, 6  ;;  %v14234_v25 = vld [vmem:[#allocation49_spill] sm:$0xff] }
 0x2e0   : > { %v14232_v11 = vrot.slane %v11407_v40, 4  ;;  %v3039_v60 = vrot.slane %v14229_v43, 6  ;;  %v3041_v50 = vrot.slane %v11453_v53, 6  ;;  %v11523_v36 = vmax.f32 %v7381_v42, %v11520_v13  ;;  %v14235_v42 = vld [vmem:[#allocation63_spill] sm:$0xff] }
 0x2e1   : > { %v5150_v34 = vmax.f32 %v5102_v7, %v11497_v26  ;;  %v5151_v3 = vmax.f32 %v5103_v4, %v11499_v39  ;;  %v5152_v54 = vmax.f32 %v5104_v59, %v11501_v24  ;;  %v4777_v46 = vrot.slane %v11497_v26, 4 }
 0x2e2   : > { %v4776_v9 = vsel %vm384_vm0, %v14232_v11, %v4775_v1  ;;  %v3040_v35 = vsel %vm2987_vm10, %v3038_v31, %v3039_v60  ;;  %v13636_v8 = vrot.slane %v11499_v39, 4  ;;  %14233 = vst [vmem:[#allocation31_spill] sm:$0xff] %v11523_v36  ;;  %v11528_v28 = vadd.f32 %v14234_v25, %v3153_v45 }
 0x2e3   : > { %7033 = vmatmul.msk.f32.gmra.mxu3 %vm1109_vm2, %v4776_v9  ;;  %7062 = vmatmul.msk.f32.gmra.mxu0 %vm1109_vm2, %v5881_v57  ;;  %v5258_v15 = vrot.slane %v5150_v34, 1  ;;  %v5259_v21 = vrot.slane %v5151_v3, 1  ;;  %v5261_v49 = vrot.slane %v5152_v54, 1  ;;  %v5658_v30 = vrot.slane %v5150_v34, 4 }
 0x2e4   : > { %6972 = vmatmul.msk.f32.gmra.mxu1 %vm1109_vm2, %v3040_v35  ;;  %v5659_v55 = vrot.slane %v5151_v3, 4  ;;  %v5661_v7 = vrot.slane %v5152_v54, 4  ;;  %v4779_v41 = vsel %vm384_vm0, %v4777_v46, %v13636_v8  ;;  %v3042_v1 = vsel %vm2987_vm10, %v3039_v60, %v3041_v50  ;;  %v14238_v46 = vld [vmem:[#allocation88_spill] sm:$0xff] }
 0x2e5   : > { %v5260_v4 = vsel %vm1761_vm14, %v5258_v15, %v5259_v21  ;;  %v5262_v59 = vsel %vm1761_vm14, %v5259_v21, %v5261_v49  ;;  %v5376_v57 = vmax.f32 %v5152_v54, %v5261_v49  ;;  %v1536_v25 = vmax.f32 %v14235_v42, %v11523_v36  ;;  %v14240_v21 = vld [vmem:[#allocation60_spill] sm:$0xff] }
 0x2e6   : > { %v5374_v31 = vmax.f32 %v5150_v34, %v5260_v4  ;;  %v5375_v11 = vmax.f32 %v5151_v3, %v5262_v59  ;;  %v5660_v9 = vsel %vm384_vm0, %v5658_v30, %v5659_v55  ;;  %v5662_v45 = vsel %vm384_vm0, %v5659_v55, %v5661_v7  ;;  %v11546_v34 = vld [vmem:[#allocation2 + $0x278] sm:$0x3f] }
 0x2e7   : > { %v5485_v35 = vrot.slane %v5376_v57, 2  ;;  %v14237_v62 = vrot.slane %v14236_v22, 1  ;;  %v14239_v8 = vrot.slane %v14238_v46, 1  ;;  %v1870_v54 = vrot.slane %v14240_v21, 1 }
 0x2e8   : > { %v5482_v49 = vrot.slane %v5374_v31, 2  ;;  %v5483_v60 = vrot.slane %v5375_v11, 2  ;;  %v14241_v50 = vrot.slane %v14236_v22, 4  ;;  %v14242_v30 = vrot.slane %v14238_v46, 4 }
 0x2e9   : > { %v1869_v15 = vsel %vm1761_vm14, %v14239_v8, %v14237_v62  ;;  %v5600_v4 = vmax.f32 %v5376_v57, %v5485_v35  ;;  %v1632_v59 = vmax.f32 %v1536_v25, %v11546_v34  ;;  %v1871_v8 = vsel %vm1761_vm14, %v14237_v62, %v1870_v54 }
 0x2ea   : > { %v2086_v3 = vmax.f32 %v14238_v46, %v1869_v15  ;;  %v2686_v55 = vsel %vm384_vm0, %v14242_v30, %v14241_v50  ;;  %v2687_v42 = vrot.slane %v14240_v21, 4  ;;  %v5484_v32 = vsel %vm2218_vm15, %v5482_v49, %v5483_v60 }
 0x2eb   : > { %7034 = vmatmul.msk.f32.gmra.mxu3 %vm1109_vm2, %v4779_v41  ;;  %v5486_v15 = vsel %vm2218_vm15, %v5483_v60, %v5485_v35  ;;  %v2087_v61 = vmax.f32 %v14236_v22, %v1871_v8  ;;  %v5598_v17 = vmax.f32 %v5374_v31, %v5484_v32  ;;  %v5776_v57 = vmax.f32 %v5600_v4, %v5661_v7 }
 0x2ec   : > { %v2324_v46 = vrot.slane %v2086_v3, 2  ;;  %v5599_v50 = vmax.f32 %v5375_v11, %v5486_v15  ;;  %6973 = vmatmul.msk.f32.gmra.mxu1 %vm1109_vm2, %v3042_v1  ;;  %v1872_v41 = vrot.slane %v1632_v59, 1  ;;  %v14243_v30 = vrot.slane %v14236_v22, 4 }
 0x2ed   : > { %v2325_v25 = vrot.slane %v2087_v61, 2  ;;  %v2689_v29 = vrot.slane %v1632_v59, 4  ;;  %v11569_v49 = vmax.f32 %v11343_v0, %v11453_v53  ;;  %v5774_v35 = vmax.f32 %v5598_v17, %v5660_v9 }
 0x2ee   : > { %v2688_v62 = vsel %vm384_vm0, %v14243_v30, %v2687_v42  ;;  %v5775_v60 = vmax.f32 %v5599_v50, %v5662_v45  ;;  %v5885_v8 = vrot.slane %v5776_v57, 2  ;;  %v1873_v32 = vsel %vm1761_vm14, %v1870_v54, %v1872_v41 }
 0x2ef   : > { %14244 = vst [vmem:[#allocation81_spill] sm:$0xff] %v11569_v49  ;;  %v2088_v7 = vmax.f32 %v14240_v21, %v1873_v32  ;;  %v2089_v31 = vmax.f32 %v1632_v59, %v1872_v41  ;;  %v2326_v1 = vsel %vm2218_vm15, %v2324_v46, %v2325_v25  ;;  %v2690_v11 = vsel %vm384_vm0, %v2687_v42, %v2689_v29 }
 0x2f0   : > { %v5882_v22 = vrot.slane %v5774_v35, 2  ;;  %v5883_v4 = vrot.slane %v5775_v60, 2  ;;  %v2543_v15 = vmax.f32 %v2086_v3, %v2326_v1  ;;  %v11577_v30 = vmax.f32 %v11350_v44, %v11447_v10  ;;  %v4902_v44 = vpop.f32.mrf.mxu3  ;;  %v7383_v35 = vld [vmem:[#allocation2 + $0x2a8] sm:$0xff] }
 0x2f1   : > { %v2327_v0 = vrot.slane %v2088_v7, 2  ;;  %v2329_v17 = vrot.slane %v2089_v31, 2  ;;  %v3595_v9 = vmax.f32 %v11318_v5, %v11569_v49  ;;  %v11583_v45 = vmax.f32 %v11402_v63, %v11497_v26  ;;  %v14251_v60 = vld [vmem:[#allocation20_spill] sm:$0xff] }
 0x2f2   : > { %14245 = vst [vmem:[#allocation5_spill] sm:$0xff] %v11577_v30  ;;  %v5884_v21 = vsel %vm2218_vm15, %v5882_v22, %v5883_v4  ;;  %v5886_v54 = vsel %vm2218_vm15, %v5883_v4, %v5885_v8  ;;  %v11587_v59 = vmax.f32 %v2543_v15, %v2686_v55  ;;  %v3596_v3 = vmax.f32 %v14216_v14, %v11577_v30 }
 0x2f3   : > { %14246 = vst [vmem:[#allocation80_spill] sm:$0xff] %v11583_v45  ;;  %7063 = vmatmul.msk.f32.gmra.mxu0 %vm1109_vm2, %v5884_v21  ;;  %v2328_v42 = vsel %vm2218_vm15, %v2325_v25, %v2327_v0  ;;  %v2330_v5 = vsel %vm2218_vm15, %v2327_v0, %v2329_v17  ;;  %v2546_v46 = vmax.f32 %v2089_v31, %v2329_v17  ;;  %v14250_v25 = vld [vmem:[#allocation56_spill] sm:$0xff]  ;;  %v14253_v31 = vld [vmem:[#allocation90_spill] sm:$0xff]  ;;  %v14256_v17 = vrot.slane %v11499_v39, 4 }
 0x2f4   : > { %v11596_v63 = vmax.f32 %v11407_v40, %v11499_v39  ;;  %v2544_v50 = vmax.f32 %v2087_v61, %v2328_v42  ;;  %v2545_v57 = vmax.f32 %v2088_v7, %v2330_v5  ;;  %v14248_v55 = vmax.f32 %v10748_v6, %v14231_v23  ;;  %v14254_v7 = vld [vmem:[#allocation92_spill] sm:$0xff] }
 0x2f5   : > { %v11604_v14 = vmax.f32 %v11409_v33, %v11501_v24  ;;  %v14252_v8 = vmax.f32 %v14250_v25, %v14251_v60  ;;  %v1874_v40 = vrot.slane %v14253_v31, 1  ;;  %v11612_v1 = vmax.f32 %v2546_v46, %v2689_v29 }
 0x2f6   : > { %14247 = vst [vmem:[#allocation47_spill] sm:$0xff] %v11596_v63  ;;  %v3673_v41 = vmax.f32 %v14248_v55, %v11587_v59  ;;  %v4780_v61 = vrot.slane %v11501_v24, 4  ;;  %v1875_v22 = vrot.slane %v14254_v7, 1  ;;  %v4998_v6 = vadd.f32 %v4902_v44, %v11528_v28 }
 0x2f7   : > { %14249 = vst [vmem:[#allocation48_spill] sm:$0xff] %v11604_v14  ;;  %v11609_v32 = vmax.f32 %v14252_v8, %v7383_v35  ;;  %v11617_v4 = vmax.f32 %v2544_v50, %v2688_v62  ;;  %v11619_v33 = vmax.f32 %v2545_v57, %v2690_v11  ;;  %v11623_v15 = vmax.f32 %v11520_v13, %v11546_v34  ;;  %v14258_v8 = vld [vmem:[#allocation65_spill] sm:$0xff] }
 0x2f8   : > { %v3676_v0 = vmax.f32 %v3596_v3, %v11612_v1  ;;  %v4781_v29 = vsel %vm384_vm0, %v14256_v17, %v4780_v61  ;;  %v3043_v21 = vrot.slane %v11587_v59, 6  ;;  %v14257_v28 = vmax.f32 %v14205_v20, %v11484_v2 }
 0x2f9   : > { %14255 = vst [vmem:[#allocation4_spill] sm:$0xff] %v11623_v15  ;;  %v3675_v11 = vmax.f32 %v3595_v9, %v11619_v33  ;;  %v3866_v44 = vrot.slane %v3673_v41, 1  ;;  %7035 = vmatmul.msk.f32.gmra.mxu3 %vm1109_vm2, %v4781_v29  ;;  %v3044_v13 = vrot.slane %v11617_v4, 6  ;;  %v4506_v3 = vrot.slane %v3673_v41, 4 }
 0x2fa   : > { %v3674_v62 = vmax.f32 %v14257_v28, %v11617_v4  ;;  %v3871_v42 = vrot.slane %v3676_v0, 1  ;;  %v5105_v5 = vmax.f32 %v11371_v47, %v11583_v45  ;;  %v5106_v46 = vmax.f32 %v11377_v16, %v11596_v63 }
 0x2fb   : > { %v3869_v57 = vrot.slane %v3675_v11, 1  ;;  %v4511_v55 = vrot.slane %v3676_v0, 4  ;;  %v3046_v20 = vrot.slane %v11619_v33, 6  ;;  %7064 = vmatmul.msk.f32.gmra.mxu0 %vm1109_vm2, %v5886_v54  ;;  %v3045_v25 = vsel %vm2987_vm10, %v3043_v21, %v3044_v13 }
 0x2fc   : > { %v3867_v50 = vrot.slane %v3674_v62, 1  ;;  %v4056_v9 = vmax.f32 %v3676_v0, %v3871_v42  ;;  %v4507_v35 = vrot.slane %v3674_v62, 4  ;;  %v1540_v61 = vmax.f32 %v14258_v8, %v11623_v15  ;;  %6974 = vmatmul.msk.f32.gmra.mxu1 %vm1109_vm2, %v3045_v25  ;;  %v11650_v0 = vld [vmem:[#allocation2 + $0x298] sm:$0x3f]  ;;  %v14259_v25 = vld [vmem:[#allocation25_spill] sm:$0xff] }
 0x2fd   : > { %v3872_v16 = vsel %vm1761_vm14, %v3869_v57, %v3871_v42  ;;  %v4509_v29 = vrot.slane %v3675_v11, 4  ;;  %v5107_v21 = vmax.f32 %v11382_v18, %v11604_v14  ;;  %v3047_v8 = vsel %vm2987_vm10, %v3044_v13, %v3046_v20  ;;  %v11665_v18 = vld [vmem:[%s13380_s4] ss:$0 sm:$0xff] }
 0x2fe   : > { %v3868_v17 = vsel %vm1761_vm14, %v3866_v44, %v3867_v50  ;;  %v3870_v47 = vsel %vm1761_vm14, %v3867_v50, %v3869_v57  ;;  %v4055_v63 = vmax.f32 %v3675_v11, %v3872_v16  ;;  %v4251_v54 = vrot.slane %v4056_v9, 2  ;;  %v6017_v9 = vpop.f32.mrf.mxu0 }
 0x2ff   : > { %v4053_v28 = vmax.f32 %v3673_v41, %v3868_v17  ;;  %v4054_v60 = vmax.f32 %v3674_v62, %v3870_v47  ;;  %v11656_v44 = vmax.f32 %v1540_v61, %v11650_v0  ;;  %v1876_v50 = vsel %vm1761_vm14, %v1874_v40, %v1875_v22 }
 0x300   : > { %v4249_v15 = vrot.slane %v4055_v63, 2  ;;  %v1877_v41 = vrot.slane %v14259_v25, 1  ;;  %v4508_v62 = vsel %vm384_vm0, %v4506_v3, %v4507_v35  ;;  %v4510_v11 = vsel %vm384_vm0, %v4507_v35, %v4509_v29 }
 0x301   : > { %v4246_v42 = vrot.slane %v4053_v28, 2  ;;  %v4247_v57 = vrot.slane %v4054_v60, 2  ;;  %v1879_v13 = vrot.slane %v11656_v44, 1  ;;  %v11669_v20 = vmax.f32 %v14253_v31, %v1876_v50 }
 0x302   : > { %v4252_v17 = vsel %vm2218_vm15, %v4249_v15, %v4251_v54  ;;  %v4512_v3 = vsel %vm384_vm0, %v4509_v29, %v4511_v55  ;;  %v6113_v14 = vadd.f32 %v6017_v9, %v4998_v6  ;;  %v1878_v45 = vsel %vm1761_vm14, %v1875_v22, %v1877_v41 }
 0x303   : > { %v4248_v40 = vsel %vm2218_vm15, %v4246_v42, %v4247_v57  ;;  %v4250_v61 = vsel %vm2218_vm15, %v4247_v57, %v4249_v15  ;;  %v4404_v16 = vmax.f32 %v4055_v63, %v4252_v17  ;;  %v1880_v30 = vsel %vm1761_vm14, %v1877_v41, %v1879_v13 }
 0x304   : > { %v4402_v35 = vmax.f32 %v4053_v28, %v4248_v40  ;;  %v4403_v47 = vmax.f32 %v4054_v60, %v4250_v61  ;;  %v2093_v49 = vmax.f32 %v11656_v44, %v1879_v13  ;;  %v2691_v50 = vrot.slane %v14253_v31, 4  ;;  %6975 = vmatmul.msk.f32.gmra.mxu1 %vm1109_vm2, %v3047_v8  ;;  %v3156_v8 = vpop.f32.mrf.mxu1 }
 0x305   : > { %v11683_v57 = vmax.f32 %v4404_v16, %v4512_v3  ;;  %v11686_v15 = vadd.f32 %v11665_v18, %v6113_v14  ;;  %v11690_v63 = vmax.f32 %v14254_v7, %v1878_v45  ;;  %v11693_v60 = vmax.f32 %v14259_v25, %v1880_v30 }
 0x306   : > { %v11679_v2 = vmax.f32 %v4402_v35, %v4508_v62  ;;  %v11681_v42 = vmax.f32 %v4403_v47, %v4510_v11  ;;  %v2331_v22 = vrot.slane %v11669_v20, 2  ;;  %v2336_v31 = vrot.slane %v2093_v49, 2 }
 0x307   : > { %v5155_v29 = vmax.f32 %v5107_v21, %v11683_v57  ;;  %v6181_v54 = vsub.f32 0.0, %v11686_v15  ;;  %v2332_v45 = vrot.slane %v11690_v63, 2  ;;  %v2692_v30 = vrot.slane %v14254_v7, 4 }
 0x308   : > { %v5153_v6 = vmax.f32 %v5105_v5, %v11679_v2  ;;  %v5154_v55 = vmax.f32 %v5106_v46, %v11681_v42  ;;  %v4782_v14 = vrot.slane %v11679_v2, 4  ;;  %v13645_v28 = vrot.slane %v11681_v42, 4 }
 0x309   : > { %v5266_v11 = vrot.slane %v5155_v29, 1  ;;  %v5666_v13 = vrot.slane %v5155_v29, 4  ;;  %v6213_v21 = vmul.f32 1.442695, %v6181_v54  ;;  %v2333_v7 = vsel %vm2218_vm15, %v2331_v22, %v2332_v45 }
 0x30a   : > { %v5263_v41 = vrot.slane %v5153_v6, 1  ;;  %v5264_v62 = vrot.slane %v5154_v55, 1  ;;  %v5663_v9 = vrot.slane %v5153_v6, 4  ;;  %v5664_v5 = vrot.slane %v5154_v55, 4 }
 0x30b   : > { %v4784_v46 = vsel %vm384_vm0, %v4782_v14, %v13645_v28  ;;  %v5379_v17 = vmax.f32 %v5155_v29, %v5266_v11  ;;  %7245 = vpow2.f32 %v6213_v21  ;;  %v2334_v14 = vrot.slane %v11693_v60, 2 }
 0x30c   : > { %v5265_v40 = vsel %vm1761_vm14, %v5263_v41, %v5264_v62  ;;  %v5267_v61 = vsel %vm1761_vm14, %v5264_v62, %v5266_v11  ;;  %7036 = vmatmul.msk.f32.gmra.mxu3 %vm1109_vm2, %v4784_v46  ;;  %v5665_v47 = vsel %vm384_vm0, %v5663_v9, %v5664_v5  ;;  %v5667_v16 = vsel %vm384_vm0, %v5664_v5, %v5666_v13  ;;  %v14260_v41 = vld [vmem:[#allocation93_spill] sm:$0xff]  ;;  %v14261_v5 = vld [vmem:[#allocation50_spill] sm:$0xff] }
 0x30d   : > { %v5377_v3 = vmax.f32 %v5153_v6, %v5265_v40  ;;  %v5378_v35 = vmax.f32 %v5154_v55, %v5267_v61  ;;  %v5490_v23 = vrot.slane %v5379_v17, 2  ;;  %v2547_v54 = vmax.f32 %v11669_v20, %v2333_v7 }
 0x30e   : > { %v2693_v11 = vsel %vm384_vm0, %v2691_v50, %v2692_v30  ;;  %v2335_v55 = vsel %vm2218_vm15, %v2332_v45, %v2334_v14  ;;  %v2694_v9 = vrot.slane %v14259_v25, 4  ;;  %v3369_v46 = vadd.f32 %v14261_v5, %v3156_v8  ;;  %v3159_v8 = vpop.f32.mrf.mxu1 }
 0x30f   : > { %v5487_v62 = vrot.slane %v5377_v3, 2  ;;  %v5488_v29 = vrot.slane %v5378_v35, 2  ;;  %v5603_v6 = vmax.f32 %v5379_v17, %v5490_v23  ;;  %v2550_v20 = vmax.f32 %v2093_v49, %v2336_v31 }
 0x310   : > { %v2337_v36 = vsel %vm2218_vm15, %v2334_v14, %v2336_v31  ;;  %v2548_v50 = vmax.f32 %v11690_v63, %v2335_v55  ;;  %v2695_v17 = vsel %vm384_vm0, %v2692_v30, %v2694_v9  ;;  %v2696_v45 = vrot.slane %v11656_v44, 4 }
 0x311   : > { %v5489_v21 = vsel %vm2218_vm15, %v5487_v62, %v5488_v29  ;;  %v5491_v40 = vsel %vm2218_vm15, %v5488_v29, %v5490_v23  ;;  %v5779_v28 = vmax.f32 %v5603_v6, %v5666_v13  ;;  %v11727_v22 = vmax.f32 %v2547_v54, %v2693_v11  ;;  %v7246_v25 = vpop.eup %7245 }
 0x312   : > { %v5601_v61 = vmax.f32 %v5377_v3, %v5489_v21  ;;  %v5602_v7 = vmax.f32 %v5378_v35, %v5491_v40  ;;  %v11731_v23 = vmax.f32 %v14228_v37, %v11587_v59  ;;  %v11735_v49 = vmax.f32 %v14229_v43, %v11617_v4 }
 0x313   : > { %v5890_v31 = vrot.slane %v5779_v28, 2  ;;  %v11737_v63 = vadd.f32 1.0, %v7246_v25  ;;  %v2549_v30 = vmax.f32 %v11693_v60, %v2337_v36  ;;  %v11742_v44 = vmax.f32 %v11453_v53, %v11619_v33  ;;  %v4905_v28 = vpop.f32.mrf.mxu3 }
 0x314   : > { %v5777_v5 = vmax.f32 %v5601_v61, %v5665_v47  ;;  %v5778_v62 = vmax.f32 %v5602_v7, %v5667_v16  ;;  %v2697_v35 = vsel %vm384_vm0, %v2694_v9, %v2696_v45  ;;  %v11747_v37 = vmax.f32 %v11447_v10, %v11612_v1 }
 0x315   : > { %v11750_v43 = vadd.f32 %v10966_v19, %v3159_v8  ;;  %7247 = vrcp.f32 %v11737_v63  ;;  %v6320_v36 = vand.u32 2147483648, %v11737_v63  ;;  %v11754_v60 = vmax.f32 %v2548_v50, %v2695_v17 }
 0x316   : > { %v5887_v13 = vrot.slane %v5777_v5, 2  ;;  %v5888_v3 = vrot.slane %v5778_v62, 2  ;;  %v3597_v16 = vmax.f32 %v14218_v52, %v11731_v23  ;;  %v3598_v10 = vmax.f32 %v14220_v12, %v11735_v49 }
 0x317   : > { %v11763_v19 = vmax.f32 %v2549_v30, %v2697_v35  ;;  %v11765_v14 = vmax.f32 %v2550_v20, %v2696_v45  ;;  %v3599_v54 = vmax.f32 %v11429_v56, %v11742_v44  ;;  %v3600_v29 = vmax.f32 %v11439_v48, %v11747_v37 }
 0x318   : > { %v5889_v53 = vsel %vm2218_vm15, %v5887_v13, %v5888_v3  ;;  %v5891_v47 = vsel %vm2218_vm15, %v5888_v3, %v5890_v31  ;;  %v4999_v11 = vadd.f32 %v4905_v28, %v3369_v46  ;;  %v6318_v6 = vand.u32 2147483647, %v11737_v63 }
 0x319   : > { %7065 = vmatmul.msk.f32.gmra.mxu0 %vm1109_vm2, %v5889_v53  ;;  %v3677_v52 = vmax.f32 %v3597_v16, %v11727_v22  ;;  %v3678_v55 = vmax.f32 %v3598_v10, %v11754_v60  ;;  %v6321_v12 = vor.u32 1.1754944e-38, %v6320_v36  ;;  %v3679_v9 = vmax.f32 %v3599_v54, %v11763_v19 }
 0x31a   : > { %v3680_v21 = vmax.f32 %v3600_v29, %v11765_v14  ;;  %v11778_v40 = vmax.f32 %v11497_v26, %v11679_v2  ;;  %vm6314_vm4 = vweird.f32 %v11737_v63  ;;  %v11783_v46 = vmax.f32 %v11499_v39, %v11681_v42 }
 0x31b   : > { %v3873_v56 = vrot.slane %v3677_v52, 1  ;;  %v3874_v48 = vrot.slane %v3678_v55, 1  ;;  %v11787_v20 = vmax.f32 %v11501_v24, %v11683_v57  ;;  %v7248_v61 = vpop.eup %7247  ;;  %v3876_v7 = vrot.slane %v3679_v9, 1 }
 0x31c   : > { %v3878_v50 = vrot.slane %v3680_v21, 1  ;;  %v4513_v17 = vrot.slane %v3677_v52, 4  ;;  %v4514_v45 = vrot.slane %v3678_v55, 4  ;;  %v6310_v26 = vmul.f32 %v7248_v61, %v11737_v63 }
 0x31d   : > { %vm11790_vm1 = vcmp.eq.f32.partialorder %v6318_v6, 8.507059e+37  ;;  %v3875_v8 = vsel %vm1761_vm14, %v3873_v56, %v3874_v48  ;;  %v4516_v5 = vrot.slane %v3679_v9, 4  ;;  %v4785_v39 = vrot.slane %v11683_v57, 4  ;;  %v6020_v56 = vpop.f32.mrf.mxu0 }
 0x31e   : > { %v3877_v24 = vsel %vm1761_vm14, %v3874_v48, %v3876_v7  ;;  %v3879_v62 = vsel %vm1761_vm14, %v3876_v7, %v3878_v50  ;;  %v4057_v31 = vmax.f32 %v3677_v52, %v3875_v8  ;;  %v4060_v30 = vmax.f32 %v3680_v21, %v3878_v50 }
 0x31f   : > { %v6311_v13 = vsub.f32 1.0, %v6310_v26  ;;  %v4058_v3 = vmax.f32 %v3678_v55, %v3877_v24  ;;  %v4059_v35 = vmax.f32 %v3679_v9, %v3879_v62  ;;  %v4518_v28 = vrot.slane %v3680_v21, 4 }
 0x320   : > { %vm6315_vm7 = vweird.f32 %v7248_v61  ;;  %v4253_v36 = vrot.slane %v4057_v31, 2  ;;  %v4258_v53 = vrot.slane %v4060_v30, 2  ;;  %v4515_v16 = vsel %vm384_vm0, %v4513_v17, %v4514_v45 }
 0x321   : > { %7066 = vmatmul.msk.f32.gmra.mxu0 %vm1109_vm2, %v5891_v47  ;;  %v6312_v10 = vmul.f32 %v7248_v61, %v6311_v13  ;;  %v4254_v54 = vrot.slane %v4058_v3, 2  ;;  %v4256_v29 = vrot.slane %v4059_v35, 2  ;;  %v4517_v6 = vsel %vm384_vm0, %v4514_v45, %v4516_v5  ;;  %vm6316_vm5 = vmor %vm6314_vm4, %vm6315_vm7 }
 0x322   : > { %v5108_v52 = vmax.f32 %v11461_v27, %v11778_v40  ;;  %v5109_v55 = vmax.f32 %v11476_v51, %v11783_v46  ;;  %v5110_v47 = vmax.f32 %v11480_v58, %v11787_v20  ;;  %v14264_v9 = vrot.slane %v11681_v42, 4  ;;  %v3162_v27 = vpop.f32.mrf.mxu1 }
 0x323   : > { %v6313_v48 = vadd.f32 %v7248_v61, %v6312_v10  ;;  %v4255_v7 = vsel %vm2218_vm15, %v4253_v36, %v4254_v54  ;;  %v4257_v50 = vsel %vm2218_vm15, %v4254_v54, %v4256_v29  ;;  %v4259_v17 = vsel %vm2218_vm15, %v4256_v29, %v4258_v53  ;;  %v4908_v36 = vpop.f32.mrf.mxu3 }
 0x324   : > { %v4786_v21 = vsel %vm384_vm0, %v14264_v9, %v4785_v39  ;;  %v4405_v51 = vmax.f32 %v4057_v31, %v4255_v7  ;;  %v4406_v58 = vmax.f32 %v4058_v3, %v4257_v50  ;;  %v4407_v45 = vmax.f32 %v4059_v35, %v4259_v17 }
 0x325   : > { %7037 = vmatmul.msk.f32.gmra.mxu3 %vm1109_vm2, %v4786_v21  ;;  %v6114_v26 = vadd.f32 %v6020_v56, %v4999_v11  ;;  %v6317_v8 = vsel %vm6316_vm5, %v7248_v61, %v6313_v48  ;;  %v4519_v39 = vsel %vm384_vm0, %v4516_v5, %v4518_v28  ;;  %v3048_v24 = vrot.slane %v11727_v22, 6  ;;  %v6023_v21 = vpop.f32.mrf.mxu0 }
 0x326   : > { %v3049_v62 = vrot.slane %v11754_v60, 6  ;;  %v6322_v63 = vsel %vm11790_vm1, %v6321_v12, %v6317_v8  ;;  %v11829_v31 = vmax.f32 %v4405_v51, %v4515_v16  ;;  %v11831_v11 = vmax.f32 %v4406_v58, %v4517_v6 }
 0x327   : > { %v11833_v61 = vmax.f32 %v4407_v45, %v4519_v39  ;;  %v11836_v5 = vadd.f32 %v11034_v38, %v3162_v27  ;;  %v6757_v30 = vmul.f32 %v6322_v63, %v11686_v15  ;;  %v11840_v13 = vadd.f32 %v11665_v18, %v6114_v26 }
 0x328   : > { %v3050_v3 = vsel %vm2987_vm10, %v3048_v24, %v3049_v62  ;;  %v5156_v25 = vmax.f32 %v5108_v52, %v11829_v31  ;;  %v5157_v12 = vmax.f32 %v5109_v55, %v11831_v11  ;;  %v4787_v28 = vrot.slane %v11829_v31, 4 }
 0x329   : > { %v5158_v35 = vmax.f32 %v5110_v47, %v11833_v61  ;;  %6976 = vmatmul.msk.f32.gmra.mxu1 %vm1109_vm2, %v3050_v3  ;;  %6790 = vst.msk [vmem:[%s11825_s23] sm:$0xff] %vm6789_vm6, %v6757_v30  ;;  %v6182_v38 = vsub.f32 0.0, %v11840_v13  ;;  %v13647_v15 = vrot.slane %v11831_v11, 4  ;;  %v3051_v53 = vrot.slane %v11763_v19, 6  ;;  %v14269_v3 = vld [vmem:[#allocation9_spill] sm:$0xff] }
 0x32a   : > { %v14265_v16 = vrot.slane %v11609_v32, 1  ;;  %v14266_v10 = vrot.slane %v14260_v41, 1  ;;  %v5268_v29 = vrot.slane %v5156_v25, 1  ;;  %v5269_v6 = vrot.slane %v5157_v12, 1 }
 0x32b   : > { %v5271_v56 = vrot.slane %v5158_v35, 1  ;;  %v5668_v52 = vrot.slane %v5156_v25, 4  ;;  %v5669_v55 = vrot.slane %v5157_v12, 4  ;;  %v6215_v47 = vmul.f32 1.442695, %v6182_v38 }
 0x32c   : > { %v1883_v54 = vsel %vm1761_vm14, %v14266_v10, %v14265_v16  ;;  %v4789_v9 = vsel %vm384_vm0, %v4787_v28, %v13647_v15  ;;  %v11863_v48 = vmax.f32 %v11546_v34, %v11650_v0  ;;  %v5000_v7 = vadd.f32 %v4908_v36, %v11750_v43  ;;  %v14268_v43 = vld [vmem:[#allocation31_spill] sm:$0xff] }
 0x32d   : > { %v5270_v50 = vsel %vm1761_vm14, %v5268_v29, %v5269_v6  ;;  %v5272_v17 = vsel %vm1761_vm14, %v5269_v6, %v5271_v56  ;;  %v5382_v27 = vmax.f32 %v5158_v35, %v5271_v56  ;;  %7038 = vmatmul.msk.f32.gmra.mxu3 %vm1109_vm2, %v4789_v9  ;;  %v5671_v45 = vrot.slane %v5158_v35, 4 }
 0x32e   : > { %14267 = vst [vmem:[#allocation58_spill] sm:$0xff] %v11863_v48  ;;  %v5380_v51 = vmax.f32 %v5156_v25, %v5270_v50  ;;  %v5381_v58 = vmax.f32 %v5157_v12, %v5272_v17  ;;  %v3052_v26 = vsel %vm2987_vm10, %v3049_v62, %v3051_v53  ;;  %v5670_v39 = vsel %vm384_vm0, %v5668_v52, %v5669_v55  ;;  %v11882_v62 = vld [vmem:[#allocation2 + $0x2b8] sm:$0x3f] }
 0x32f   : > { %v5495_v8 = vrot.slane %v5382_v27, 2  ;;  %7249 = vpow2.f32 %v6215_v47  ;;  %v6115_v34 = vadd.f32 %v6023_v21, %v5000_v7  ;;  %v1544_v30 = vmax.f32 %v14268_v43, %v11863_v48 }
 0x330   : > { %v5492_v24 = vrot.slane %v5380_v51, 2  ;;  %v5493_v63 = vrot.slane %v5381_v58, 2  ;;  %v14270_v28 = vrot.slane %v14269_v3, 1  ;;  %v14271_v36 = vmov %v14265_v16 }
 0x331   : > { %v5606_v12 = vmax.f32 %v5382_v27, %v5495_v8  ;;  %v11879_v35 = vadd.f32 %v11665_v18, %v6115_v34  ;;  %6977 = vmatmul.msk.f32.gmra.mxu1 %vm1109_vm2, %v3052_v26  ;;  %v2094_v38 = vmax.f32 %v14260_v41, %v1883_v54  ;;  %v5672_v29 = vsel %vm384_vm0, %v5669_v55, %v5671_v45  ;;  %v11895_v27 = vld [vmem:[#allocation2 + $0x2c0] sm:$0xff] }
 0x332   : > { %v1885_v25 = vsel %vm1761_vm14, %v14271_v36, %v14270_v28  ;;  %v5494_v16 = vsel %vm2218_vm15, %v5492_v24, %v5493_v63  ;;  %v5496_v10 = vsel %vm2218_vm15, %v5493_v63, %v5495_v8  ;;  %v11890_v6 = vmax.f32 %v1544_v30, %v11882_v62  ;;  %v4911_v24 = vpop.f32.mrf.mxu3  ;;  %v14273_v36 = vld [vmem:[#allocation18_spill] sm:$0xff] }
 0x333   : > { %v2095_v53 = vmax.f32 %v11609_v32, %v1885_v25  ;;  %v5604_v56 = vmax.f32 %v5380_v51, %v5494_v16  ;;  %v5605_v52 = vmax.f32 %v5381_v58, %v5496_v10  ;;  %v6183_v47 = vsub.f32 0.0, %v11879_v35  ;;  %v14274_v25 = vld [vmem:[#allocation41_spill] sm:$0xff]  ;;  %v7385_v16 = vld [vmem:[#allocation2 + $0x2a0] sm:$0xff] }
 0x334   : > { %v2698_v9 = vrot.slane %v14260_v41, 4  ;;  %v5782_v21 = vmax.f32 %v5606_v12, %v5671_v45  ;;  %v1886_v54 = vrot.slane %v11890_v6, 1  ;;  %v2338_v7 = vrot.slane %v2094_v38, 2 }
 0x335   : > { %v2339_v50 = vrot.slane %v2095_v53, 2  ;;  %v7250_v17 = vpop.eup %7249  ;;  %v5780_v26 = vmax.f32 %v5604_v56, %v5670_v39  ;;  %v5781_v8 = vmax.f32 %v5605_v52, %v5672_v29  ;;  %v6217_v55 = vmul.f32 1.442695, %v6183_v47  ;;  %v14277_v29 = vld [vmem:[#allocation29_spill] sm:$0xff]  ;;  %v14278_v56 = vld [vmem:[#allocation66_spill] sm:$0xff] }
 0x336   : > { %v2699_v34 = vrot.slane %v11609_v32, 4  ;;  %v11898_v51 = vadd.f32 1.0, %v7250_v17  ;;  %v14272_v58 = vmov %v14270_v28  ;;  %v2097_v45 = vmax.f32 %v11890_v6, %v1886_v54  ;;  %v7384_v28 = vld [vmem:[#allocation2 + $0x2d0] sm:$0xff] }
 0x337   : > { %v1887_v41 = vsel %vm1761_vm14, %v14272_v58, %v1886_v54  ;;  %v2340_v63 = vsel %vm2218_vm15, %v2338_v7, %v2339_v50  ;;  %v5892_v43 = vrot.slane %v5780_v26, 2  ;;  %v5893_v30 = vrot.slane %v5781_v8, 2 }
 0x338   : > { %7251 = vpow2.f32 %v6217_v55  ;;  %v2096_v39 = vmax.f32 %v14269_v3, %v1887_v41  ;;  %v14275_v32 = vmax.f32 %v14273_v36, %v14274_v25  ;;  %v11912_v10 = vmax.f32 %v7385_v16, %v11895_v27  ;;  %v14291_v25 = vld [vmem:[#allocation80_spill] sm:$0xff] }
 0x339   : > { %7253 = vrcp.f32 %v11898_v51  ;;  %v5894_v47 = vsel %vm2218_vm15, %v5892_v43, %v5893_v30  ;;  %v11919_v54 = vadd.f32 %v4911_v24, %v11836_v5  ;;  %v2343_v17 = vrot.slane %v2097_v45, 2 }
 0x33a   : > { %v11909_v12 = vmax.f32 %v14275_v32, %v7384_v28  ;;  %14276 = vst [vmem:[#allocation59_spill] sm:$0xff] %v11912_v10  ;;  %v2341_v7 = vrot.slane %v2096_v39, 2  ;;  %7067 = vmatmul.msk.f32.gmra.mxu0 %vm1109_vm2, %v5894_v47  ;;  %v6332_v26 = vand.u32 2147483647, %v11898_v51  ;;  %v5895_v8 = vrot.slane %v5782_v21, 2 }
 0x33b   : > { %v2551_v55 = vmax.f32 %v2094_v38, %v2340_v63  ;;  %v2700_v58 = vsel %vm384_vm0, %v2698_v9, %v2699_v34  ;;  %v6334_v41 = vand.u32 2147483648, %v11898_v51  ;;  %v2701_v43 = vrot.slane %v14269_v3, 4 }
 0x33c   : > { %v2342_v28 = vsel %vm2218_vm15, %v2339_v50, %v2341_v7  ;;  %v2344_v36 = vsel %vm2218_vm15, %v2341_v7, %v2343_v17  ;;  %v2703_v32 = vrot.slane %v11890_v6, 4  ;;  %vm6328_vm3 = vweird.f32 %v11898_v51 }
 0x33d   : > { %v2552_v5 = vmax.f32 %v2095_v53, %v2342_v28  ;;  %v2553_v24 = vmax.f32 %v2096_v39, %v2344_v36  ;;  %v11929_v16 = vmax.f32 %v2551_v55, %v2700_v58  ;;  %v2702_v38 = vsel %vm384_vm0, %v2699_v34, %v2701_v43  ;;  %v14285_v58 = vld [vmem:[#allocation95_spill] sm:$0xff]  ;;  %v14286_v28 = vld [vmem:[#allocation76_spill] sm:$0xff] }
 0x33e   : > { %v7252_v47 = vpop.eup %7251  ;;  %v11935_v9 = vmax.f32 %v11587_v59, %v11727_v22  ;;  %v11939_v21 = vmax.f32 %v11617_v4, %v11754_v60  ;;  %v11943_v3 = vmax.f32 %v11619_v33, %v11763_v19  ;;  %v2554_v50 = vmax.f32 %v2097_v45, %v2343_v17 }
 0x33f   : > { %v7254_v53 = vpop.eup %7253  ;;  %v11945_v6 = vadd.f32 1.0, %v7252_v47  ;;  %v2704_v63 = vsel %vm384_vm0, %v2701_v43, %v2703_v32  ;;  %v11948_v39 = vmax.f32 %v2552_v5, %v2702_v38  ;;  %vm11951_vm8 = vcmp.eq.f32.partialorder %v6332_v26, 8.507059e+37  ;;  %v14288_v43 = vld [vmem:[#allocation5_spill] sm:$0xff] }
 0x340   : > { %14279 = vst [vmem:[#allocation83_spill] sm:$0xff] %v11935_v9  ;;  %v6324_v34 = vmul.f32 %v7254_v53, %v11898_v51  ;;  %v5896_v4 = vsel %vm2218_vm15, %v5893_v30, %v5895_v8  ;;  %v11958_v33 = vmax.f32 %v11612_v1, %v11765_v14  ;;  %v6335_v7 = vor.u32 1.1754944e-38, %v6334_v41  ;;  %v14287_v30 = vld [vmem:[#allocation81_spill] sm:$0xff] }
 0x341   : > { %14280 = vst [vmem:[#allocation73_spill] sm:$0xff] %v11939_v21  ;;  %7255 = vrcp.f32 %v11945_v6  ;;  %v6348_v45 = vand.u32 2147483648, %v11945_v6  ;;  %v11962_v17 = vmax.f32 %v2553_v24, %v2704_v63  ;;  %v3601_v26 = vmax.f32 %v14285_v58, %v11935_v9 }
 0x342   : > { %14281 = vst [vmem:[#allocation74_spill] sm:$0xff] %v11943_v3  ;;  %v6325_v55 = vsub.f32 1.0, %v6324_v34  ;;  %v3602_v36 = vmax.f32 %v14286_v28, %v11939_v21  ;;  %v3603_v8 = vmax.f32 %v14287_v30, %v11943_v3  ;;  %vm6329_vm11 = vweird.f32 %v7254_v53  ;;  %7068 = vmatmul.msk.f32.gmra.mxu0 %vm1109_vm2, %v5896_v4 }
 0x343   : > { %14284 = vst [vmem:[#allocation22_spill] sm:$0xff] %v11958_v33  ;;  %v6346_v1 = vand.u32 2147483647, %v11945_v6  ;;  %v11972_v41 = vmax.f32 %v2554_v50, %v2703_v32  ;;  %v3604_v5 = vmax.f32 %v14288_v43, %v11958_v33  ;;  %v3681_v47 = vmax.f32 %v3601_v26, %v11929_v16  ;;  %vm6330_vm12 = vmor %vm6328_vm3, %vm6329_vm11 }
 0x344   : > { %v6326_v24 = vmul.f32 %v7254_v53, %v6325_v55  ;;  %v3682_v38 = vmax.f32 %v3602_v36, %v11948_v39  ;;  %v3683_v63 = vmax.f32 %v3603_v8, %v11962_v17  ;;  %v6349_v34 = vor.u32 1.1754944e-38, %v6348_v45 }
 0x345   : > { %v3684_v58 = vmax.f32 %v3604_v5, %v11972_v41  ;;  %v11982_v4 = vmax.f32 %v11679_v2, %v11829_v31  ;;  %v11986_v32 = vmax.f32 %v11681_v42, %v11831_v11  ;;  %vm6342_vm9 = vweird.f32 %v11945_v6 }
 0x346   : > { %v6327_v50 = vadd.f32 %v7254_v53, %v6326_v24  ;;  %v3880_v55 = vrot.slane %v3681_v47, 1  ;;  %v3881_v26 = vrot.slane %v3682_v38, 1  ;;  %v3883_v28 = vrot.slane %v3683_v63, 1 }
 0x347   : > { %v7256_v36 = vpop.eup %7255  ;;  %v3885_v45 = vrot.slane %v3684_v58, 1  ;;  %v4520_v30 = vrot.slane %v3681_v47, 4  ;;  %v4521_v8 = vrot.slane %v3682_v38, 4  ;;  %v11994_v2 = vmax.f32 %v11683_v57, %v11833_v61 }
 0x348   : > { %v6331_v42 = vsel %vm6330_vm12, %v7254_v53, %v6327_v50  ;;  %v6338_v43 = vmul.f32 %v7256_v36, %v11945_v6  ;;  %vm11997_vm13 = vcmp.eq.f32.partialorder %v6346_v1, 8.507059e+37  ;;  %v3882_v24 = vsel %vm1761_vm14, %v3880_v55, %v3881_v26  ;;  %v3165_v6 = vpop.f32.mrf.mxu1 }
 0x349   : > { %v4523_v52 = vrot.slane %v3683_v63, 4  ;;  %v6336_v51 = vsel %vm11951_vm8, %v6335_v7, %v6331_v42  ;;  %v3884_v15 = vsel %vm1761_vm14, %v3881_v26, %v3883_v28  ;;  %v3886_v33 = vsel %vm1761_vm14, %v3883_v28, %v3885_v45 }
 0x34a   : > { %v4061_v57 = vmax.f32 %v3681_v47, %v3882_v24  ;;  %v6758_v53 = vmul.f32 %v6336_v51, %v11840_v13  ;;  %v6339_v50 = vsub.f32 1.0, %v6338_v43  ;;  %v4062_v3 = vmax.f32 %v3682_v38, %v3884_v15 }
 0x34b   : > { %v4063_v21 = vmax.f32 %v3683_v63, %v3886_v33  ;;  %vm6343_vm4 = vweird.f32 %v7256_v36  ;;  %v4064_v1 = vmax.f32 %v3684_v58, %v3885_v45  ;;  %v5111_v55 = vmax.f32 %v14291_v25, %v11982_v4  ;;  %v14292_v25 = vld [vmem:[#allocation47_spill] sm:$0xff]  ;;  %v6026_v45 = vpop.f32.mrf.mxu0 }
 0x34c   : > { %v4260_v9 = vrot.slane %v4061_v57, 2  ;;  %6791 = vst.msk [vmem:[%s11825_s23 + $0x8] sm:$0xff] %vm6789_vm6, %v6758_v53  ;;  %v6340_v59 = vmul.f32 %v7256_v36, %v6339_v50  ;;  %v4261_v7 = vrot.slane %v4062_v3, 2  ;;  %v4525_v26 = vrot.slane %v3684_v58, 4  ;;  %vm6344_vm1 = vmor %vm6342_vm9, %vm6343_vm4  ;;  %v14294_v50 = vld [vmem:[#allocation48_spill] sm:$0xff] }
 0x34d   : > { %v4263_v42 = vrot.slane %v4063_v21, 2  ;;  %v4265_v48 = vrot.slane %v4064_v1, 2  ;;  %v4522_v47 = vsel %vm384_vm0, %v4520_v30, %v4521_v8  ;;  %v4524_v13 = vsel %vm384_vm0, %v4521_v8, %v4523_v52 }
 0x34e   : > { %v4790_v15 = vrot.slane %v11833_v61, 4  ;;  %v6341_v33 = vadd.f32 %v7256_v36, %v6340_v59  ;;  %v4262_v38 = vsel %vm2218_vm15, %v4260_v9, %v4261_v7  ;;  %v5112_v28 = vmax.f32 %v14292_v25, %v11986_v32 }
 0x34f   : > { %v4264_v63 = vsel %vm2218_vm15, %v4261_v7, %v4263_v42  ;;  %v4266_v58 = vsel %vm2218_vm15, %v4263_v42, %v4265_v48  ;;  %v4408_v30 = vmax.f32 %v4061_v57, %v4262_v38  ;;  %v14293_v8 = vrot.slane %v11831_v11, 4 }
 0x350   : > { %v4409_v43 = vmax.f32 %v4062_v3, %v4264_v63  ;;  %v6345_v51 = vsel %vm6344_vm1, %v7256_v36, %v6341_v33  ;;  %v4410_v9 = vmax.f32 %v4063_v21, %v4266_v58  ;;  %v4526_v53 = vsel %vm384_vm0, %v4523_v52, %v4525_v26 }
 0x351   : > { %v4791_v24 = vsel %vm384_vm0, %v14293_v8, %v4790_v15  ;;  %v5113_v1 = vmax.f32 %v14294_v50, %v11994_v2  ;;  %v6350_v48 = vsel %vm11997_vm13, %v6349_v34, %v6345_v51  ;;  %v12031_v57 = vmax.f32 %v4408_v30, %v4522_v47  ;;  %v14295_v47 = vld [vmem:[#allocation52_spill] sm:$0xff] }
 0x352   : > { %7039 = vmatmul.msk.f32.gmra.mxu3 %vm1109_vm2, %v4791_v24  ;;  %v12033_v3 = vmax.f32 %v4409_v43, %v4524_v13  ;;  %v6116_v59 = vadd.f32 %v6026_v45, %v11919_v54  ;;  %v6759_v21 = vmul.f32 %v6350_v48, %v11879_v35  ;;  %v12037_v36 = vmax.f32 %v4410_v9, %v4526_v53  ;;  %v4914_v54 = vpop.f32.mrf.mxu3 }
 0x353   : > { %v3053_v52 = vrot.slane %v11929_v16, 6  ;;  %v3054_v7 = vrot.slane %v11948_v39, 6  ;;  %v5159_v42 = vmax.f32 %v5111_v55, %v12031_v57  ;;  %v4792_v5 = vrot.slane %v12031_v57, 4 }
 0x354   : > { %v5160_v26 = vmax.f32 %v5112_v28, %v12033_v3  ;;  %v12044_v34 = vadd.f32 %v11665_v18, %v6116_v59  ;;  %v3378_v13 = vadd.f32 %v14295_v47, %v3165_v6  ;;  %6792 = vst.msk [vmem:[%s11825_s23 + $0x10] sm:$0xff] %vm6789_vm6, %v6759_v21  ;;  %v12051_v35 = vmax.f32 %v5113_v1, %v12037_v36  ;;  %v14296_v28 = vld [vmem:[#allocation85_spill] sm:$0xff]  ;;  %v6029_v1 = vpop.f32.mrf.mxu0 }
 0x355   : > { %v3055_v15 = vsel %vm2987_vm10, %v3053_v52, %v3054_v7  ;;  %v13653_v33 = vrot.slane %v12033_v3, 4  ;;  %v5273_v55 = vrot.slane %v5159_v42, 1  ;;  %v5673_v63 = vrot.slane %v5159_v42, 4 }
 0x356   : > { %v5274_v38 = vrot.slane %v5160_v26, 1  ;;  %v5674_v25 = vrot.slane %v5160_v26, 4  ;;  %6978 = vmatmul.msk.f32.gmra.mxu1 %vm1109_vm2, %v3055_v15  ;;  %v1549_v45 = vmax.f32 %v14296_v28, %v11912_v10  ;;  %v14297_v58 = vmax.f32 %v14278_v56, %v14277_v29  ;;  %v12082_v15 = vld [vmem:[#allocation2 + $0x2d8] sm:$0x3f] }
 0x357   : > { %v5276_v43 = vrot.slane %v12051_v35, 1  ;;  %v6184_v8 = vsub.f32 0.0, %v12044_v34  ;;  %v5002_v24 = vadd.f32 %v4914_v54, %v3378_v13  ;;  %v4794_v9 = vsel %vm384_vm0, %v4792_v5, %v13653_v33  ;;  %v14298_v13 = vld [vmem:[#allocation4_spill] sm:$0xff] }
 0x358   : > { %v12062_v30 = vmax.f32 %v14297_v58, %v11895_v27  ;;  %v5275_v51 = vsel %vm1761_vm14, %v5273_v55, %v5274_v38  ;;  %v12072_v53 = vmax.f32 %v11650_v0, %v11882_v62  ;;  %v3056_v6 = vrot.slane %v11962_v17, 6 }
 0x359   : > { %v5277_v50 = vsel %vm1761_vm14, %v5274_v38, %v5276_v43  ;;  %v5383_v56 = vmax.f32 %v5159_v42, %v5275_v51  ;;  %v5385_v27 = vmax.f32 %v12051_v35, %v5276_v43  ;;  %v5675_v59 = vsel %vm384_vm0, %v5673_v63, %v5674_v25  ;;  %v14299_v38 = vld [vmem:[#allocation3_spill] sm:$0xff] }
 0x35a   : > { %7040 = vmatmul.msk.f32.gmra.mxu3 %vm1109_vm2, %v4794_v9  ;;  %v5384_v48 = vmax.f32 %v5160_v26, %v5277_v50  ;;  %v5676_v21 = vrot.slane %v12051_v35, 4  ;;  %v6219_v52 = vmul.f32 1.442695, %v6184_v8  ;;  %v6117_v0 = vadd.f32 %v6029_v1, %v5002_v24 }
 0x35b   : > { %v5497_v5 = vrot.slane %v5383_v56, 2  ;;  %v5500_v47 = vrot.slane %v5385_v27, 2  ;;  %v1548_v54 = vmax.f32 %v14298_v13, %v12072_v53  ;;  %v1888_v55 = vrot.slane %v12062_v30, 1 }
 0x35c   : > { %v5498_v42 = vrot.slane %v5384_v48, 2  ;;  %7257 = vpow2.f32 %v6219_v52  ;;  %v1889_v58 = vrot.slane %v14299_v38, 1  ;;  %v12087_v26 = vadd.f32 %v11665_v18, %v6117_v0 }
 0x35d   : > { %v3057_v35 = vsel %vm2987_vm10, %v3054_v7, %v3056_v6  ;;  %v12091_v63 = vmax.f32 %v1548_v54, %v12082_v15  ;;  %v1891_v43 = vrot.slane %v11909_v12, 1  ;;  %v5677_v51 = vsel %vm384_vm0, %v5674_v25, %v5676_v21 }
 0x35e   : > { %v5499_v8 = vsel %vm2218_vm15, %v5497_v5, %v5498_v42  ;;  %v5501_v24 = vsel %vm2218_vm15, %v5498_v42, %v5500_v47  ;;  %6979 = vmatmul.msk.f32.gmra.mxu1 %vm1109_vm2, %v3057_v35  ;;  %v1890_v9 = vsel %vm1761_vm14, %v1888_v55, %v1889_v58  ;;  %v5609_v1 = vmax.f32 %v5385_v27, %v5500_v47  ;;  %v3168_v55 = vpop.f32.mrf.mxu1 }
 0x35f   : > { %v5607_v50 = vmax.f32 %v5383_v56, %v5499_v8  ;;  %v5608_v18 = vmax.f32 %v5384_v48, %v5501_v24  ;;  %v6185_v7 = vsub.f32 0.0, %v12087_v26  ;;  %v1892_v6 = vsel %vm1761_vm14, %v1889_v58, %v1891_v43 }
 0x360   : > { %v1893_v52 = vrot.slane %v12091_v63, 1  ;;  %v2098_v0 = vmax.f32 %v12062_v30, %v1890_v9  ;;  %v2705_v5 = vrot.slane %v12062_v30, 4  ;;  %v2706_v42 = vrot.slane %v14299_v38, 4  ;;  %v12110_v30 = vld [vmem:[#allocation2 + $0x2e8] sm:$0xff] }
 0x361   : > { %v5783_v13 = vmax.f32 %v5607_v50, %v5675_v59  ;;  %v5784_v54 = vmax.f32 %v5608_v18, %v5677_v51  ;;  %v6221_v25 = vmul.f32 1.442695, %v6185_v7  ;;  %v2099_v27 = vmax.f32 %v14299_v38, %v1892_v6  ;;  %14300 = vst [vmem:[#allocation79_spill] sm:$0xff] %v12110_v30  ;;  %v14301_v59 = vld [vmem:[#allocation20_spill] sm:$0xff]  ;;  %v14302_v51 = vld [vmem:[#allocation54_spill] sm:$0xff] }
 0x362   : > { %v7258_v35 = vpop.eup %7257  ;;  %v1894_v56 = vsel %vm1761_vm14, %v1891_v43, %v1893_v52  ;;  %v2101_v48 = vmax.f32 %v12091_v63, %v1893_v52  ;;  %v2345_v47 = vrot.slane %v2098_v0, 2  ;;  %v14303_v9 = vmax.f32 %v14301_v59, %v14302_v51  ;;  %v12118_v43 = vld [vmem:[#allocation2 + $0x2e0] sm:$0xff] }
 0x363   : > { %v5897_v58 = vrot.slane %v5783_v13, 2  ;;  %v5898_v8 = vrot.slane %v5784_v54, 2  ;;  %v12108_v24 = vadd.f32 1.0, %v7258_v35  ;;  %7259 = vpow2.f32 %v6221_v25  ;;  %v14304_v54 = vld [vmem:[#allocation51_spill] sm:$0xff]  ;;  %v4917_v35 = vpop.f32.mrf.mxu3 }
 0x364   : > { %v12116_v50 = vmax.f32 %v14303_v9, %v12110_v30  ;;  %v2100_v38 = vmax.f32 %v11909_v12, %v1894_v56  ;;  %v2346_v18 = vrot.slane %v2099_v27, 2  ;;  %v2350_v7 = vrot.slane %v2101_v48, 2 }
 0x365   : > { %v12125_v6 = vmax.f32 %v1549_v45, %v12118_v43  ;;  %v5899_v52 = vsel %vm2218_vm15, %v5897_v58, %v5898_v8  ;;  %7261 = vrcp.f32 %v12108_v24  ;;  %v5785_v13 = vmax.f32 %v5609_v1, %v5676_v21 }
 0x366   : > { %v3381_v25 = vadd.f32 %v14304_v54, %v3168_v55  ;;  %7069 = vmatmul.msk.f32.gmra.mxu0 %vm1109_vm2, %v5899_v52  ;;  %v2347_v56 = vsel %vm2218_vm15, %v2345_v47, %v2346_v18  ;;  %v2348_v59 = vrot.slane %v2100_v38, 2  ;;  %v2707_v9 = vsel %vm384_vm0, %v2705_v5, %v2706_v42 }
 0x367   : > { %v6360_v33 = vand.u32 2147483647, %v12108_v24  ;;  %v6362_v28 = vand.u32 2147483648, %v12108_v24  ;;  %v2555_v45 = vmax.f32 %v2098_v0, %v2347_v56  ;;  %v2708_v58 = vrot.slane %v11909_v12, 4 }
 0x368   : > { %v2349_v10 = vsel %vm2218_vm15, %v2346_v18, %v2348_v59  ;;  %v2351_v21 = vsel %vm2218_vm15, %v2348_v59, %v2350_v7  ;;  %v2558_v1 = vmax.f32 %v2101_v48, %v2350_v7  ;;  %v2710_v55 = vrot.slane %v12091_v63, 4 }
 0x369   : > { %v7260_v52 = vpop.eup %7259  ;;  %v12139_v54 = vadd.f32 %v4917_v35, %v3381_v25  ;;  %v5900_v47 = vrot.slane %v5785_v13, 2  ;;  %v2556_v51 = vmax.f32 %v2099_v27, %v2349_v10  ;;  %v12141_v5 = vmax.f32 %v2555_v45, %v2707_v9 }
 0x36a   : > { %vm6356_vm7 = vweird.f32 %v12108_v24  ;;  %v12144_v30 = vadd.f32 1.0, %v7260_v52  ;;  %v2557_v0 = vmax.f32 %v2100_v38, %v2351_v21  ;;  %v2709_v12 = vsel %vm384_vm0, %v2706_v42, %v2708_v58 }
 0x36b   : > { %v12149_v18 = vmax.f32 %v11727_v22, %v11929_v16  ;;  %v7262_v48 = vpop.eup %7261  ;;  %v5901_v63 = vsel %vm2218_vm15, %v5898_v8, %v5900_v47  ;;  %v2711_v7 = vsel %vm384_vm0, %v2708_v58, %v2710_v55  ;;  %v12155_v10 = vmax.f32 %v11754_v60, %v11948_v39 }
 0x36c   : > { %v12159_v27 = vmax.f32 %v11763_v19, %v11962_v17  ;;  %v6352_v38 = vmul.f32 %v7262_v48, %v12108_v24  ;;  %vm12162_vm5 = vcmp.eq.f32.partialorder %v6360_v33, 8.507059e+37  ;;  %v6363_v22 = vor.u32 1.1754944e-38, %v6362_v28 }
 0x36d   : > { %14305 = vst [vmem:[#allocation7_spill] sm:$0xff] %v12149_v18  ;;  %7263 = vrcp.f32 %v12144_v30  ;;  %v12167_v8 = vmax.f32 %v2558_v1, %v2710_v55  ;;  %v6376_v13 = vand.u32 2147483648, %v12144_v30  ;;  %v12170_v25 = vmax.f32 %v2556_v51, %v2709_v12  ;;  %v3171_v55 = vpop.f32.mrf.mxu1 }
 0x36e   : > { %14306 = vst [vmem:[#allocation55_spill] sm:$0xff] %v12155_v10  ;;  %v12174_v60 = vmax.f32 %v11765_v14, %v11972_v41  ;;  %v3605_v19 = vmax.f32 %v11731_v23, %v12149_v18  ;;  %v6353_v33 = vsub.f32 1.0, %v6352_v38  ;;  %7070 = vmatmul.msk.f32.gmra.mxu0 %vm1109_vm2, %v5901_v63  ;;  %v12179_v35 = vmax.f32 %v2557_v0, %v2711_v7  ;;  %v14318_v63 = vld [vmem:[#allocation30_spill] sm:$0xff] }
 0x36f   : > { %14307 = vst [vmem:[#allocation86_spill] sm:$0xff] %v12159_v27  ;;  %v3606_v56 = vmax.f32 %v11735_v49, %v12155_v10  ;;  %v3607_v59 = vmax.f32 %v11742_v44, %v12159_v27  ;;  %vm6357_vm3 = vweird.f32 %v7262_v48  ;;  %v6374_v51 = vand.u32 2147483647, %v12144_v30 }
 0x370   : > { %14310 = vst [vmem:[#allocation82_spill] sm:$0xff] %v12174_v60  ;;  %v3608_v14 = vmax.f32 %v11747_v37, %v12174_v60  ;;  %v3685_v9 = vmax.f32 %v3605_v19, %v12141_v5  ;;  %v6354_v23 = vmul.f32 %v7262_v48, %v6353_v33  ;;  %v12193_v58 = vmax.f32 %v11829_v31, %v12031_v57  ;;  %vm6358_vm11 = vmor %vm6356_vm7, %vm6357_vm3 }
 0x371   : > { %v3686_v28 = vmax.f32 %v3606_v56, %v12170_v25  ;;  %v3687_v45 = vmax.f32 %v3607_v59, %v12179_v35  ;;  %vm6370_vm8 = vweird.f32 %v12144_v30  ;;  %v6377_v49 = vor.u32 1.1754944e-38, %v6376_v13 }
 0x372   : > { %14311 = vst [vmem:[#allocation8_spill] sm:$0xff] %v12193_v58  ;;  %v3688_v44 = vmax.f32 %v3608_v14, %v12167_v8  ;;  %v3887_v21 = vrot.slane %v3685_v9, 1  ;;  %v12199_v37 = vmax.f32 %v11831_v11, %v12033_v3  ;;  %v6355_v52 = vadd.f32 %v7262_v48, %v6354_v23 }
 0x373   : > { %v7264_v1 = vpop.eup %7263  ;;  %v3888_v47 = vrot.slane %v3686_v28, 1  ;;  %v3890_v0 = vrot.slane %v3687_v45, 1  ;;  %v4527_v12 = vrot.slane %v3685_v9, 4  ;;  %vm12205_vm9 = vcmp.eq.f32.partialorder %v6374_v51, 8.507059e+37 }
 0x374   : > { %14312 = vst [vmem:[#allocation77_spill] sm:$0xff] %v12199_v37  ;;  %v6366_v31 = vmul.f32 %v7264_v1, %v12144_v30  ;;  %v3892_v7 = vrot.slane %v3688_v44, 1  ;;  %v4528_v38 = vrot.slane %v3686_v28, 4  ;;  %v12211_v11 = vmax.f32 %v11833_v61, %v12037_v36 }
 0x375   : > { %v6359_v13 = vsel %vm6358_vm11, %v7262_v48, %v6355_v52  ;;  %vm6371_vm12 = vweird.f32 %v7264_v1  ;;  %v3889_v19 = vsel %vm1761_vm14, %v3887_v21, %v3888_v47  ;;  %v3891_v24 = vsel %vm1761_vm14, %v3888_v47, %v3890_v0 }
 0x376   : > { %14315 = vst [vmem:[#allocation23_spill] sm:$0xff] %v12211_v11  ;;  %v6364_v33 = vsel %vm12162_vm5, %v6363_v22, %v6359_v13  ;;  %v6367_v56 = vsub.f32 1.0, %v6366_v31  ;;  %v3893_v59 = vsel %vm1761_vm14, %v3890_v0, %v3892_v7  ;;  %v4065_v51 = vmax.f32 %v3685_v9, %v3889_v19  ;;  %vm6372_vm13 = vmor %vm6370_vm8, %vm6371_vm12  ;;  %v3174_v19 = vpop.f32.mrf.mxu1 }
 0x377   : > { %v6760_v14 = vmul.f32 %v6364_v33, %v12044_v34  ;;  %v4066_v23 = vmax.f32 %v3686_v28, %v3891_v24  ;;  %v4067_v60 = vmax.f32 %v3687_v45, %v3893_v59  ;;  %v4068_v61 = vmax.f32 %v3688_v44, %v3892_v7  ;;  %v4920_v59 = vpop.f32.mrf.mxu3 }
 0x378   : > { %v6368_v27 = vmul.f32 %v7264_v1, %v6367_v56  ;;  %v4267_v48 = vrot.slane %v4065_v51, 2  ;;  %v4529_v52 = vsel %vm384_vm0, %v4527_v12, %v4528_v38  ;;  %v4530_v10 = vrot.slane %v3687_v45, 4  ;;  %v6032_v12 = vpop.f32.mrf.mxu0 }
 0x379   : > { %6793 = vst.msk [vmem:[%s11825_s23 + $0x18] sm:$0xff] %vm6789_vm6, %v6760_v14  ;;  %v4268_v21 = vrot.slane %v4066_v23, 2  ;;  %v4270_v47 = vrot.slane %v4067_v60, 2  ;;  %v4272_v42 = vrot.slane %v4068_v61, 2  ;;  %v4532_v22 = vrot.slane %v3688_v44, 4  ;;  %v14321_v61 = vld [vmem:[#allocation38_spill] sm:$0xff] }
 0x37a   : > { %v6369_v31 = vadd.f32 %v7264_v1, %v6368_v27  ;;  %v5114_v9 = vmax.f32 %v11778_v40, %v12193_v58  ;;  %v5115_v34 = vmax.f32 %v11783_v46, %v12199_v37  ;;  %v5116_v28 = vmax.f32 %v11787_v20, %v12211_v11 }
 0x37b   : > { %v4269_v45 = vsel %vm2218_vm15, %v4267_v48, %v4268_v21  ;;  %v4271_v0 = vsel %vm2218_vm15, %v4268_v21, %v4270_v47  ;;  %v4273_v44 = vsel %vm2218_vm15, %v4270_v47, %v4272_v42  ;;  %v4795_v27 = vrot.slane %v12037_v36, 4 }
 0x37c   : > { %v6373_v40 = vsel %vm6372_vm13, %v7264_v1, %v6369_v31  ;;  %v4411_v7 = vmax.f32 %v4065_v51, %v4269_v45  ;;  %v4412_v13 = vmax.f32 %v4066_v23, %v4271_v0  ;;  %v4413_v46 = vmax.f32 %v4067_v60, %v4273_v44 }
 0x37d   : > { %v6378_v20 = vsel %vm12205_vm9, %v6377_v49, %v6373_v40  ;;  %v4531_v30 = vsel %vm384_vm0, %v4528_v38, %v4530_v10  ;;  %v4533_v24 = vsel %vm384_vm0, %v4530_v10, %v4532_v22  ;;  %v14316_v33 = vrot.slane %v12033_v3, 4  ;;  %v7387_v49 = vld [vmem:[#allocation2 + $0x2f0] sm:$0xff]  ;;  %v14319_v38 = vld [vmem:[#allocation42_spill] sm:$0xff] }
 0x37e   : > { %v6761_v14 = vmul.f32 %v6378_v20, %v12087_v26  ;;  %v12243_v1 = vmax.f32 %v4411_v7, %v4529_v52  ;;  %v12245_v51 = vmax.f32 %v4412_v13, %v4531_v30  ;;  %v12247_v60 = vmax.f32 %v4413_v46, %v4533_v24  ;;  %v14323_v52 = vld [vmem:[#allocation78_spill] sm:$0xff] }
 0x37f   : > { %v4796_v56 = vsel %vm384_vm0, %v14316_v33, %v4795_v27  ;;  %v14320_v23 = vmax.f32 %v14318_v63, %v14319_v38  ;;  %v3384_v48 = vadd.f32 %v14321_v61, %v3171_v55  ;;  %v6118_v21 = vadd.f32 %v6032_v12, %v12139_v54  ;;  %v12272_v54 = vld [vmem:[%s13380_s4] ss:$0 sm:$0xff]  ;;  %v14324_v40 = vld [vmem:[#allocation58_spill] sm:$0xff] }
 0x380   : > { %14317 = vst [vmem:[#allocation45_spill] sm:$0xff] %v12243_v1  ;;  %7041 = vmatmul.msk.f32.gmra.mxu3 %vm1109_vm2, %v4796_v56  ;;  %v12259_v26 = vmax.f32 %v11882_v62, %v12082_v15  ;;  %v12262_v47 = vadd.f32 %v14323_v52, %v3174_v19  ;;  %v5162_v42 = vmax.f32 %v5114_v9, %v12243_v1  ;;  %v4797_v55 = vrot.slane %v12243_v1, 4 }
 0x381   : > { %v12253_v10 = vmax.f32 %v14320_v23, %v7387_v49  ;;  %6794 = vst.msk [vmem:[%s11825_s23 + $0x20] sm:$0xff] %vm6789_vm6, %v6761_v14  ;;  %v5163_v22 = vmax.f32 %v5115_v34, %v12245_v51  ;;  %v5164_v31 = vmax.f32 %v5116_v28, %v12247_v60  ;;  %v5004_v45 = vadd.f32 %v4920_v59, %v3384_v48  ;;  %v6035_v14 = vpop.f32.mrf.mxu0 }
 0x382   : > { %14322 = vst [vmem:[#allocation33_spill] sm:$0xff] %v12259_v26  ;;  %v12275_v62 = vadd.f32 %v12272_v54, %v6118_v21  ;;  %v13659_v0 = vrot.slane %v12245_v51, 4  ;;  %v5278_v44 = vrot.slane %v5162_v42, 1  ;;  %v1895_v34 = vrot.slane %v12125_v6, 1 }
 0x383   : > { %v5279_v27 = vrot.slane %v5163_v22, 1  ;;  %v5281_v9 = vrot.slane %v5164_v31, 1  ;;  %v5678_v12 = vrot.slane %v5162_v42, 4  ;;  %v1552_v7 = vmax.f32 %v14324_v40, %v12259_v26 }
 0x384   : > { %v6186_v28 = vsub.f32 0.0, %v12275_v62  ;;  %v1896_v13 = vrot.slane %v12116_v50, 1  ;;  %v3058_v30 = vrot.slane %v12141_v5, 6  ;;  %v5679_v56 = vrot.slane %v5163_v22, 4 }
 0x385   : > { %v5280_v46 = vsel %vm1761_vm14, %v5278_v44, %v5279_v27  ;;  %v5282_v19 = vsel %vm1761_vm14, %v5279_v27, %v5281_v9  ;;  %v5388_v20 = vmax.f32 %v5164_v31, %v5281_v9  ;;  %v4799_v59 = vsel %vm384_vm0, %v4797_v55, %v13659_v0  ;;  %v12292_v44 = vld [vmem:[#allocation2 + $0x2f8] sm:$0x3f] }
 0x386   : > { %v5386_v24 = vmax.f32 %v5162_v42, %v5280_v46  ;;  %v5387_v33 = vmax.f32 %v5163_v22, %v5282_v19  ;;  %v5681_v63 = vrot.slane %v5164_v31, 4  ;;  %v6223_v23 = vmul.f32 1.442695, %v6186_v28 }
 0x387   : > { %v5505_v49 = vrot.slane %v5388_v20, 2  ;;  %v3059_v61 = vrot.slane %v12170_v25, 6  ;;  %v6119_v52 = vadd.f32 %v6035_v14, %v5004_v45  ;;  %v1897_v42 = vsel %vm1761_vm14, %v1895_v34, %v1896_v13 }
 0x388   : > { %7042 = vmatmul.msk.f32.gmra.mxu3 %vm1109_vm2, %v4799_v59  ;;  %v5502_v48 = vrot.slane %v5386_v24, 2  ;;  %v5503_v21 = vrot.slane %v5387_v33, 2  ;;  %7265 = vpow2.f32 %v6223_v23  ;;  %v12297_v55 = vmax.f32 %v1552_v7, %v12292_v44 }
 0x389   : > { %v3060_v22 = vsel %vm2987_vm10, %v3058_v30, %v3059_v61  ;;  %v5612_v27 = vmax.f32 %v5388_v20, %v5505_v49  ;;  %v12303_v28 = vadd.f32 %v12272_v54, %v6119_v52  ;;  %v1898_v45 = vrot.slane %v12253_v10, 1 }
 0x38a   : > { %v5504_v31 = vsel %vm2218_vm15, %v5502_v48, %v5503_v21  ;;  %v5506_v9 = vsel %vm2218_vm15, %v5503_v21, %v5505_v49  ;;  %6980 = vmatmul.msk.f32.gmra.mxu1 %vm1109_vm2, %v3060_v22  ;;  %v5680_v46 = vsel %vm384_vm0, %v5678_v12, %v5679_v56  ;;  %v5682_v19 = vsel %vm384_vm0, %v5679_v56, %v5681_v63 }
 0x38b   : > { %v5610_v40 = vmax.f32 %v5386_v24, %v5504_v31  ;;  %v5611_v34 = vmax.f32 %v5387_v33, %v5506_v9  ;;  %v6187_v7 = vsub.f32 0.0, %v12303_v28  ;;  %v1899_v20 = vsel %vm1761_vm14, %v1896_v13, %v1898_v45  ;;  %v4923_v13 = vpop.f32.mrf.mxu3 }
 0x38c   : > { %v1900_v30 = vrot.slane %v12297_v55, 1  ;;  %v2102_v59 = vmax.f32 %v12125_v6, %v1897_v42  ;;  %v5788_v23 = vmax.f32 %v5612_v27, %v5681_v63  ;;  %v3061_v48 = vrot.slane %v12179_v35, 6 }
 0x38d   : > { %v5786_v14 = vmax.f32 %v5610_v40, %v5680_v46  ;;  %v5787_v49 = vmax.f32 %v5611_v34, %v5682_v19  ;;  %v6225_v21 = vmul.f32 1.442695, %v6187_v7  ;;  %v2103_v12 = vmax.f32 %v12116_v50, %v1899_v20  ;;  %v14325_v40 = vld [vmem:[#allocation43_spill] sm:$0xff]  ;;  %v14326_v34 = vld [vmem:[#allocation41_spill] sm:$0xff] }
 0x38e   : > { %v1901_v24 = vsel %vm1761_vm14, %v1898_v45, %v1900_v30  ;;  %v2105_v33 = vmax.f32 %v12297_v55, %v1900_v30  ;;  %v7266_v56 = vpop.eup %7265  ;;  %v2352_v9 = vrot.slane %v2102_v59, 2  ;;  %v3062_v19 = vsel %vm2987_vm10, %v3059_v61, %v3061_v48 }
 0x38f   : > { %v5902_v52 = vrot.slane %v5786_v14, 2  ;;  %v5903_v22 = vrot.slane %v5787_v49, 2  ;;  %v2104_v31 = vmax.f32 %v12253_v10, %v1901_v24  ;;  %v12317_v42 = vadd.f32 1.0, %v7266_v56 }
 0x390   : > { %7267 = vpow2.f32 %v6225_v21  ;;  %v2353_v63 = vrot.slane %v2103_v12, 2  ;;  %v2357_v27 = vrot.slane %v2105_v33, 2  ;;  %v12325_v20 = vadd.f32 %v4923_v13, %v12262_v47 }
 0x391   : > { %v5904_v45 = vsel %vm2218_vm15, %v5902_v52, %v5903_v22  ;;  %v2355_v7 = vrot.slane %v2104_v31, 2  ;;  %7269 = vrcp.f32 %v12317_v42  ;;  %v5905_v30 = vrot.slane %v5788_v23, 2 }
 0x392   : > { %7071 = vmatmul.msk.f32.gmra.mxu0 %vm1109_vm2, %v5904_v45  ;;  %6981 = vmatmul.msk.f32.gmra.mxu1 %vm1109_vm2, %v3062_v19  ;;  %v2712_v14 = vrot.slane %v12125_v6, 4  ;;  %v6388_v49 = vand.u32 2147483647, %v12317_v42  ;;  %v2354_v21 = vsel %vm2218_vm15, %v2352_v9, %v2353_v63  ;;  %v6390_v48 = vand.u32 2147483648, %v12317_v42 }
 0x393   : > { %v2356_v24 = vsel %vm2218_vm15, %v2353_v63, %v2355_v7  ;;  %v2358_v61 = vsel %vm2218_vm15, %v2355_v7, %v2357_v27  ;;  %v2559_v56 = vmax.f32 %v2102_v59, %v2354_v21  ;;  %v2562_v52 = vmax.f32 %v2105_v33, %v2357_v27 }
 0x394   : > { %v2560_v47 = vmax.f32 %v2103_v12, %v2356_v24  ;;  %v2561_v13 = vmax.f32 %v2104_v31, %v2358_v61  ;;  %v2713_v23 = vrot.slane %v12116_v50, 4  ;;  %v2715_v45 = vrot.slane %v12253_v10, 4 }
 0x395   : > { %v2717_v6 = vrot.slane %v12297_v55, 4  ;;  %v12340_v9 = vmax.f32 %v11929_v16, %v12141_v5  ;;  %v12344_v63 = vmax.f32 %v11948_v39, %v12170_v25  ;;  %v12348_v59 = vmax.f32 %v11962_v17, %v12179_v35 }
 0x396   : > { %v7268_v19 = vpop.eup %7267  ;;  %v12352_v50 = vmax.f32 %v11972_v41, %v12167_v8  ;;  %v2714_v55 = vsel %vm384_vm0, %v2712_v14, %v2713_v23  ;;  %v2716_v12 = vsel %vm384_vm0, %v2713_v23, %v2715_v45  ;;  %vm6384_vm4 = vweird.f32 %v12317_v42  ;;  %v6038_v41 = vpop.f32.mrf.mxu0 }
 0x397   : > { %14327 = vst [vmem:[#allocation40_spill] sm:$0xff] %v12340_v9  ;;  %v12354_v10 = vadd.f32 1.0, %v7268_v19  ;;  %v2718_v16 = vsel %vm384_vm0, %v2715_v45, %v2717_v6  ;;  %v7270_v33 = vpop.eup %7269  ;;  %v6391_v39 = vor.u32 1.1754944e-38, %v6390_v48  ;;  %v5906_v31 = vsel %vm2218_vm15, %v5903_v22, %v5905_v30  ;;  %v14333_v22 = vld [vmem:[#allocation83_spill] sm:$0xff] }
 0x398   : > { %14328 = vst [vmem:[#allocation11_spill] sm:$0xff] %v12344_v63  ;;  %v12361_v17 = vmax.f32 %v2559_v56, %v2714_v55  ;;  %v6380_v27 = vmul.f32 %v7270_v33, %v12317_v42  ;;  %vm12364_vm1 = vcmp.eq.f32.partialorder %v6388_v49, 8.507059e+37  ;;  %v12369_v7 = vmax.f32 %v2560_v47, %v2716_v12  ;;  %v14334_v49 = vld [vmem:[#allocation73_spill] sm:$0xff]  ;;  %v14335_v56 = vld [vmem:[#allocation74_spill] sm:$0xff] }
 0x399   : > { %14329 = vst [vmem:[#allocation10_spill] sm:$0xff] %v12348_v59  ;;  %7271 = vrcp.f32 %v12354_v10  ;;  %v12371_v14 = vmax.f32 %v2561_v13, %v2718_v16  ;;  %v6404_v21 = vand.u32 2147483648, %v12354_v10  ;;  %v12375_v24 = vmax.f32 %v2562_v52, %v2717_v6  ;;  %v14336_v13 = vld [vmem:[#allocation22_spill] sm:$0xff] }
 0x39a   : > { %14330 = vst [vmem:[#allocation6_spill] sm:$0xff] %v12352_v50  ;;  %7072 = vmatmul.msk.f32.gmra.mxu0 %vm1109_vm2, %v5906_v31  ;;  %v3609_v30 = vmax.f32 %v14333_v22, %v12340_v9  ;;  %v3610_v61 = vmax.f32 %v14334_v49, %v12344_v63  ;;  %v6381_v48 = vsub.f32 1.0, %v6380_v27  ;;  %vm6385_vm7 = vweird.f32 %v7270_v33  ;;  %v3177_v27 = vpop.f32.mrf.mxu1 }
 0x39b   : > { %v3611_v47 = vmax.f32 %v14335_v56, %v12348_v59  ;;  %v3612_v23 = vmax.f32 %v14336_v13, %v12352_v50  ;;  %v6402_v45 = vand.u32 2147483647, %v12354_v10  ;;  %v12390_v6 = vmax.f32 %v12031_v57, %v12243_v1  ;;  %vm6386_vm3 = vmor %vm6384_vm4, %vm6385_vm7 }
 0x39c   : > { %v3689_v19 = vmax.f32 %v3609_v30, %v12361_v17  ;;  %v3690_v52 = vmax.f32 %v3610_v61, %v12369_v7  ;;  %v6382_v55 = vmul.f32 %v7270_v33, %v6381_v48  ;;  %v6405_v12 = vor.u32 1.1754944e-38, %v6404_v21  ;;  %v3389_v21 = vpop.f32.mrf.mxu2 }
 0x39d   : > { %v3691_v16 = vmax.f32 %v3611_v47, %v12371_v14  ;;  %v3692_v31 = vmax.f32 %v3612_v23, %v12375_v24  ;;  %vm6398_vm5 = vweird.f32 %v12354_v10  ;;  %v12397_v30 = vmax.f32 %v12033_v3, %v12245_v51 }
 0x39e   : > { %v3894_v22 = vrot.slane %v3689_v19, 1  ;;  %v3895_v49 = vrot.slane %v3690_v52, 1  ;;  %v4534_v56 = vrot.slane %v3689_v19, 4  ;;  %v6383_v13 = vadd.f32 %v7270_v33, %v6382_v55 }
 0x39f   : > { %v7272_v61 = vpop.eup %7271  ;;  %v3897_v57 = vrot.slane %v3691_v16, 1  ;;  %v3899_v46 = vrot.slane %v3692_v31, 1  ;;  %v4535_v48 = vrot.slane %v3690_v52, 4  ;;  %vm12403_vm11 = vcmp.eq.f32.partialorder %v6402_v45, 8.507059e+37 }
 0x3a0   : > { %v6394_v47 = vmul.f32 %v7272_v61, %v12354_v10  ;;  %vm6399_vm8 = vweird.f32 %v7272_v61  ;;  %v3896_v3 = vsel %vm1761_vm14, %v3894_v22, %v3895_v49  ;;  %v4537_v0 = vrot.slane %v3691_v16, 4 }
 0x3a1   : > { %v6387_v50 = vsel %vm6386_vm3, %v7270_v33, %v6383_v13  ;;  %v3898_v55 = vsel %vm1761_vm14, %v3895_v49, %v3897_v57  ;;  %v3900_v59 = vsel %vm1761_vm14, %v3897_v57, %v3899_v46  ;;  %v4069_v63 = vmax.f32 %v3689_v19, %v3896_v3  ;;  %vm6400_vm9 = vmor %vm6398_vm5, %vm6399_vm8  ;;  %v4926_v57 = vpop.f32.mrf.mxu3 }
 0x3a2   : > { %v6392_v42 = vsel %vm12364_vm1, %v6391_v39, %v6387_v50  ;;  %v6395_v9 = vsub.f32 1.0, %v6394_v47  ;;  %v4070_v26 = vmax.f32 %v3690_v52, %v3898_v55  ;;  %v4071_v11 = vmax.f32 %v3691_v16, %v3900_v59 }
 0x3a3   : > { %v6762_v45 = vmul.f32 %v6392_v42, %v12275_v62  ;;  %v4072_v37 = vmax.f32 %v3692_v31, %v3899_v46  ;;  %v4274_v58 = vrot.slane %v4069_v63, 2  ;;  %v4536_v22 = vsel %vm384_vm0, %v4534_v56, %v4535_v48 }
 0x3a4   : > { %v6396_v1 = vmul.f32 %v7272_v61, %v6395_v9  ;;  %v4275_v33 = vrot.slane %v4070_v26, 2  ;;  %v4277_v13 = vrot.slane %v4071_v11, 2  ;;  %v4539_v18 = vrot.slane %v3692_v31, 4 }
 0x3a5   : > { %6795 = vst.msk [vmem:[%s11825_s23 + $0x28] sm:$0xff] %vm6789_vm6, %v6762_v45  ;;  %v4279_v49 = vrot.slane %v4072_v37, 2  ;;  %v4538_v19 = vsel %vm384_vm0, %v4535_v48, %v4537_v0  ;;  %v12419_v50 = vmax.f32 %v12037_v36, %v12247_v60  ;;  %v5117_v62 = vmax.f32 %v11982_v4, %v12390_v6  ;;  %v3180_v4 = vpop.f32.mrf.mxu1 }
 0x3a6   : > { %v6397_v46 = vadd.f32 %v7272_v61, %v6396_v1  ;;  %v4276_v59 = vsel %vm2218_vm15, %v4274_v58, %v4275_v33  ;;  %v4278_v9 = vsel %vm2218_vm15, %v4275_v33, %v4277_v13  ;;  %v5118_v39 = vmax.f32 %v11986_v32, %v12397_v30  ;;  %v7390_v33 = vld [vmem:[#allocation2 + $0x2c0] sm:$0xff] }
 0x3a7   : > { %v4280_v37 = vsel %vm2218_vm15, %v4277_v13, %v4279_v49  ;;  %v4414_v36 = vmax.f32 %v4069_v63, %v4276_v59  ;;  %v4415_v52 = vmax.f32 %v4070_v26, %v4278_v9  ;;  %v4540_v16 = vsel %vm384_vm0, %v4537_v0, %v4539_v18  ;;  %v3392_v26 = vpop.f32.mrf.mxu2 }
 0x3a8   : > { %v6401_v1 = vsel %vm6400_vm9, %v7272_v61, %v6397_v46  ;;  %v4416_v31 = vmax.f32 %v4071_v11, %v4280_v37  ;;  %v5119_v58 = vmax.f32 %v11994_v2, %v12419_v50  ;;  %v4800_v56 = vrot.slane %v12247_v60, 4  ;;  %v12448_v61 = vld [vmem:[#allocation2 + $0x310] sm:$0xff] }
 0x3a9   : > { %v3390_v32 = vadd.f32 %v3389_v21, %v3177_v27  ;;  %v6406_v10 = vsel %vm12403_vm11, %v6405_v12, %v6401_v1  ;;  %v12437_v48 = vmax.f32 %v4414_v36, %v4536_v22  ;;  %v12439_v63 = vmax.f32 %v4415_v52, %v4538_v19 }
 0x3aa   : > { %v6763_v18 = vmul.f32 %v6406_v10, %v12303_v28  ;;  %v12442_v0 = vmax.f32 %v4416_v31, %v4540_v16  ;;  %v14339_v11 = vrot.slane %v12245_v51, 4  ;;  %v6120_v27 = vadd.f32 %v6038_v41, %v12325_v20  ;;  %v6041_v16 = vpop.f32.mrf.mxu0  ;;  %v12487_v10 = vld [vmem:[#allocation2 + $0x308] sm:$0xff] }
 0x3ab   : > { %v14340_v12 = vmax.f32 %v14326_v34, %v14325_v40  ;;  %v12456_v47 = vadd.f32 %v3392_v26, %v3180_v4  ;;  %v5165_v28 = vmax.f32 %v5117_v62, %v12437_v48  ;;  %v5166_v23 = vmax.f32 %v5118_v39, %v12439_v63 }
 0x3ac   : > { %v4801_v2 = vsel %vm384_vm0, %v14339_v11, %v4800_v56  ;;  %v5006_v3 = vadd.f32 %v4926_v57, %v3390_v32  ;;  %6796 = vst.msk [vmem:[%s11825_s23 + $0x30] sm:$0xff] %vm6789_vm6, %v6763_v18  ;;  %v5167_v20 = vmax.f32 %v5119_v58, %v12442_v0  ;;  %v12465_v55 = vadd.f32 %v12272_v54, %v6120_v27 }
 0x3ad   : > { %v12454_v21 = vmax.f32 %v14340_v12, %v12448_v61  ;;  %7043 = vmatmul.msk.f32.gmra.mxu3 %vm1109_vm2, %v4801_v2  ;;  %v4802_v34 = vrot.slane %v12437_v48, 4  ;;  %v5283_v42 = vrot.slane %v5165_v28, 1  ;;  %v5284_v45 = vrot.slane %v5166_v23, 1  ;;  %v12497_v12 = vld [vmem:[#allocation2 + $0x300] sm:$0xff] }
 0x3ae   : > { %v13671_v22 = vrot.slane %v12439_v63, 4  ;;  %v12470_v13 = vmax.f32 %v7390_v33, %v12118_v43  ;;  %v5286_v49 = vrot.slane %v5167_v20, 1  ;;  %v5683_v19 = vrot.slane %v5165_v28, 4 }
 0x3af   : > { %v5684_v62 = vrot.slane %v5166_v23, 4  ;;  %v6188_v46 = vsub.f32 0.0, %v12465_v55  ;;  %v5285_v59 = vsel %vm1761_vm14, %v5283_v42, %v5284_v45  ;;  %v3063_v9 = vrot.slane %v12361_v17, 6 }
 0x3b0   : > { %v3064_v39 = vrot.slane %v12369_v7, 6  ;;  %v12478_v41 = vmax.f32 %v12082_v15, %v12292_v44  ;;  %v5287_v37 = vsel %vm1761_vm14, %v5284_v45, %v5286_v49  ;;  %v5389_v36 = vmax.f32 %v5165_v28, %v5285_v59  ;;  %v12499_v28 = vld [vmem:[#allocation2 + $0x318] sm:$0x3f] }
 0x3b1   : > { %v5391_v43 = vmax.f32 %v5167_v20, %v5286_v49  ;;  %v5686_v52 = vrot.slane %v5167_v20, 4  ;;  %v5390_v4 = vmax.f32 %v5166_v23, %v5287_v37  ;;  %v6227_v1 = vmul.f32 1.442695, %v6188_v46  ;;  %v14342_v23 = vld [vmem:[#allocation53_spill] sm:$0xff] }
 0x3b2   : > { %14341 = vst [vmem:[#allocation34_spill] sm:$0xff] %v12478_v41  ;;  %v3065_v31 = vsel %vm2987_vm10, %v3063_v9, %v3064_v39  ;;  %v4804_v58 = vsel %vm384_vm0, %v4802_v34, %v13671_v22  ;;  %v5507_v56 = vrot.slane %v5389_v36, 2  ;;  %v5685_v57 = vsel %vm384_vm0, %v5683_v19, %v5684_v62 }
 0x3b3   : > { %v5510_v32 = vrot.slane %v5391_v43, 2  ;;  %6982 = vmatmul.msk.f32.gmra.mxu1 %vm1109_vm2, %v3065_v31  ;;  %v6121_v15 = vadd.f32 %v6041_v16, %v5006_v3  ;;  %v5508_v26 = vrot.slane %v5390_v4, 2  ;;  %7273 = vpow2.f32 %v6227_v1  ;;  %v14343_v3 = vld [vmem:[#allocation28_spill] sm:$0xff] }
 0x3b4   : > { %v1553_v18 = vmax.f32 %v14277_v29, %v12470_v13  ;;  %v1556_v11 = vmax.f32 %v12072_v53, %v12478_v41  ;;  %v14344_v20 = vmax.f32 %v14342_v23, %v14343_v3  ;;  %v1905_v42 = vrot.slane %v12454_v21, 1 }
 0x3b5   : > { %7044 = vmatmul.msk.f32.gmra.mxu3 %vm1109_vm2, %v4804_v58  ;;  %v5615_v2 = vmax.f32 %v5391_v43, %v5510_v32  ;;  %v12495_v27 = vadd.f32 %v12272_v54, %v6121_v15  ;;  %v5509_v29 = vsel %vm2218_vm15, %v5507_v56, %v5508_v26  ;;  %v5511_v53 = vsel %vm2218_vm15, %v5508_v26, %v5510_v32 }
 0x3b6   : > { %v12505_v34 = vmax.f32 %v14344_v20, %v12487_v10  ;;  %v1649_v45 = vmax.f32 %v1553_v18, %v12497_v12  ;;  %v12512_v33 = vmax.f32 %v1556_v11, %v12499_v28  ;;  %v5613_v49 = vmax.f32 %v5389_v36, %v5509_v29  ;;  %v4929_v11 = vpop.f32.mrf.mxu3  ;;  %v14345_v20 = vld [vmem:[#allocation79_spill] sm:$0xff] }
 0x3b7   : > { %v5614_v19 = vmax.f32 %v5390_v4, %v5511_v53  ;;  %v5687_v46 = vsel %vm384_vm0, %v5684_v62, %v5686_v52  ;;  %v6189_v59 = vsub.f32 0.0, %v12495_v27  ;;  %v3066_v9 = vrot.slane %v12371_v14, 6 }
 0x3b8   : > { %v1902_v37 = vrot.slane %v1649_v45, 1  ;;  %v1903_v43 = vrot.slane %v12505_v34, 1  ;;  %v1907_v16 = vrot.slane %v12512_v33, 1  ;;  %v5789_v1 = vmax.f32 %v5613_v49, %v5685_v57 }
 0x3b9   : > { %v5790_v31 = vmax.f32 %v5614_v19, %v5687_v46  ;;  %v5791_v58 = vmax.f32 %v5615_v2, %v5686_v52  ;;  %v6229_v56 = vmul.f32 1.442695, %v6189_v59  ;;  %v7274_v32 = vpop.eup %7273  ;;  %v3067_v15 = vsel %vm2987_vm10, %v3064_v39, %v3066_v9 }
 0x3ba   : > { %v1904_v36 = vsel %vm1761_vm14, %v1902_v37, %v1903_v43  ;;  %v1906_v62 = vsel %vm1761_vm14, %v1903_v43, %v1905_v42  ;;  %v1908_v4 = vsel %vm1761_vm14, %v1905_v42, %v1907_v16  ;;  %v5907_v26 = vrot.slane %v5789_v1, 2  ;;  %v14347_v42 = vld [vmem:[#allocation44_spill] sm:$0xff] }
 0x3bb   : > { %v5908_v18 = vrot.slane %v5790_v31, 2  ;;  %v12523_v23 = vadd.f32 1.0, %v7274_v32  ;;  %7275 = vpow2.f32 %v6229_v56  ;;  %6983 = vmatmul.msk.f32.gmra.mxu1 %vm1109_vm2, %v3067_v15  ;;  %v2106_v57 = vmax.f32 %v1649_v45, %v1904_v36 }
 0x3bc   : > { %v2107_v52 = vmax.f32 %v12505_v34, %v1906_v62  ;;  %v2108_v2 = vmax.f32 %v12454_v21, %v1908_v4  ;;  %v2109_v39 = vmax.f32 %v12512_v33, %v1907_v16  ;;  %v12531_v29 = vmax.f32 %v14345_v20, %v12487_v10 }
 0x3bd   : > { %v5909_v49 = vsel %vm2218_vm15, %v5907_v26, %v5908_v18  ;;  %7277 = vrcp.f32 %v12523_v23  ;;  %v12539_v19 = vadd.f32 %v4929_v11, %v12456_v47  ;;  %v5910_v46 = vrot.slane %v5791_v58, 2 }
 0x3be   : > { %14346 = vst [vmem:[#allocation12_spill] sm:$0xff] %v12531_v29  ;;  %7073 = vmatmul.msk.f32.gmra.mxu0 %vm1109_vm2, %v5909_v49  ;;  %v2359_v59 = vrot.slane %v2106_v57, 2  ;;  %v2360_v9 = vrot.slane %v2107_v52, 2  ;;  %v6416_v37 = vand.u32 2147483647, %v12523_v23  ;;  %v2362_v43 = vrot.slane %v2108_v2, 2 }
 0x3bf   : > { %v2364_v16 = vrot.slane %v2109_v39, 2  ;;  %v2719_v1 = vrot.slane %v1649_v45, 4  ;;  %v6418_v31 = vand.u32 2147483648, %v12523_v23  ;;  %v2720_v32 = vrot.slane %v12505_v34, 4 }
 0x3c0   : > { %v2361_v56 = vsel %vm2218_vm15, %v2359_v59, %v2360_v9  ;;  %v2722_v15 = vrot.slane %v12454_v21, 4  ;;  %v5911_v47 = vsel %vm2218_vm15, %v5908_v18, %v5910_v46  ;;  %v2363_v58 = vsel %vm2218_vm15, %v2360_v9, %v2362_v43 }
 0x3c1   : > { %v7276_v36 = vpop.eup %7275  ;;  %v2365_v62 = vsel %vm2218_vm15, %v2362_v43, %v2364_v16  ;;  %v2563_v4 = vmax.f32 %v2106_v57, %v2361_v56  ;;  %vm6412_vm10 = vweird.f32 %v12523_v23  ;;  %v2564_v45 = vmax.f32 %v2107_v52, %v2363_v58  ;;  %v14355_v58 = vld [vmem:[#allocation55_spill] sm:$0xff] }
 0x3c2   : > { %v12550_v26 = vadd.f32 1.0, %v7276_v36  ;;  %v2565_v11 = vmax.f32 %v2108_v2, %v2365_v62  ;;  %v2721_v20 = vsel %vm384_vm0, %v2719_v1, %v2720_v32  ;;  %v2566_v34 = vmax.f32 %v2109_v39, %v2364_v16  ;;  %v14354_v36 = vld [vmem:[#allocation7_spill] sm:$0xff]  ;;  %v14356_v62 = vld [vmem:[#allocation45_spill] sm:$0xff] }
 0x3c3   : > { %v7278_v49 = vpop.eup %7277  ;;  %v2723_v21 = vsel %vm384_vm0, %v2720_v32, %v2722_v15  ;;  %v2724_v59 = vrot.slane %v12512_v33, 4  ;;  %v12555_v18 = vmax.f32 %v2563_v4, %v2721_v20  ;;  %vm12558_vm12 = vcmp.eq.f32.partialorder %v6416_v37, 8.507059e+37 }
 0x3c4   : > { %v6408_v46 = vmul.f32 %v7278_v49, %v12523_v23  ;;  %v6419_v9 = vor.u32 1.1754944e-38, %v6418_v31  ;;  %7279 = vrcp.f32 %v12550_v26  ;;  %v12565_v52 = vmax.f32 %v12141_v5, %v12361_v17 }
 0x3c5   : > { %vm6413_vm13 = vweird.f32 %v7278_v49  ;;  %v6432_v2 = vand.u32 2147483648, %v12550_v26  ;;  %v2725_v33 = vsel %vm384_vm0, %v2722_v15, %v2724_v59  ;;  %v12569_v39 = vmax.f32 %v2564_v45, %v2723_v21 }
 0x3c6   : > { %14350 = vst [vmem:[#allocation75_spill] sm:$0xff] %v12565_v52  ;;  %v6409_v43 = vsub.f32 1.0, %v6408_v46  ;;  %7074 = vmatmul.msk.f32.gmra.mxu0 %vm1109_vm2, %v5911_v47  ;;  %v6430_v37 = vand.u32 2147483647, %v12550_v26  ;;  %v12573_v16 = vmax.f32 %v2565_v11, %v2725_v33  ;;  %v12577_v1 = vmax.f32 %v12170_v25, %v12369_v7  ;;  %v14358_v11 = vld [vmem:[#allocation82_spill] sm:$0xff]  ;;  %v14360_v33 = vld [vmem:[#allocation8_spill] sm:$0xff]  ;;  %vm6414_vm1 = vmor %vm6412_vm10, %vm6413_vm13 }
 0x3c7   : > { %v12579_v5 = vor.u32 1.1754944e-38, %v6432_v2  ;;  %v12581_v31 = vmax.f32 %v2566_v34, %v2724_v59  ;;  %v12585_v56 = vmax.f32 %v12179_v35, %v12371_v14  ;;  %v12589_v32 = vmax.f32 %v12167_v8, %v12375_v24  ;;  %v14357_v35 = vld [vmem:[#allocation86_spill] sm:$0xff] }
 0x3c8   : > { %14351 = vst [vmem:[#allocation57_spill] sm:$0xff] %v12577_v1  ;;  %v6410_v15 = vmul.f32 %v7278_v49, %v6409_v43  ;;  %v3613_v47 = vmax.f32 %v14354_v36, %v12565_v52  ;;  %v3614_v25 = vmax.f32 %v14355_v58, %v12577_v1  ;;  %v12597_v4 = vmax.f32 %v14356_v62, %v12437_v48 }
 0x3c9   : > { %14352 = vst [vmem:[#allocation37_spill] sm:$0xff] %v12585_v56  ;;  %vm6426_vm4 = vweird.f32 %v12550_v26  ;;  %v3615_v45 = vmax.f32 %v14357_v35, %v12585_v56  ;;  %v3616_v8 = vmax.f32 %v14358_v11, %v12589_v32  ;;  %v12606_v20 = vmax.f32 %v12245_v51, %v12439_v63 }
 0x3ca   : > { %14353 = vst [vmem:[#allocation84_spill] sm:$0xff] %v12589_v32  ;;  %v12610_v34 = vmax.f32 %v12247_v60, %v12442_v0  ;;  %v7280_v21 = vpop.eup %7279  ;;  %v6411_v59 = vadd.f32 %v7278_v49, %v6410_v15  ;;  %v3693_v46 = vmax.f32 %v3613_v47, %v12555_v18  ;;  %v3694_v2 = vmax.f32 %v3614_v25, %v12569_v39  ;;  %v3183_v47 = vpop.f32.mrf.mxu1 }
 0x3cb   : > { %v6422_v51 = vmul.f32 %v7280_v21, %v12550_v26  ;;  %vm6427_vm7 = vweird.f32 %v7280_v21  ;;  %vm12620_vm5 = vcmp.eq.f32.partialorder %v6430_v37, 8.507059e+37  ;;  %v3695_v60 = vmax.f32 %v3615_v45, %v12573_v16  ;;  %v3395_v37 = vpop.f32.mrf.mxu2 }
 0x3cc   : > { %14359 = vst [vmem:[#allocation14_spill] sm:$0xff] %v12610_v34  ;;  %v3696_v15 = vmax.f32 %v3616_v8, %v12581_v31  ;;  %v6415_v58 = vsel %vm6414_vm1, %v7278_v49, %v6411_v59  ;;  %v3901_v25 = vrot.slane %v3693_v46, 1  ;;  %v3902_v62 = vrot.slane %v3694_v2, 1  ;;  %vm6428_vm3 = vmor %vm6426_vm4, %vm6427_vm7 }
 0x3cd   : > { %v4541_v35 = vrot.slane %v3693_v46, 4  ;;  %v6420_v23 = vsel %vm12558_vm12, %v6419_v9, %v6415_v58  ;;  %v6423_v11 = vsub.f32 1.0, %v6422_v51  ;;  %v3904_v43 = vrot.slane %v3695_v60, 1 }
 0x3ce   : > { %v3906_v22 = vrot.slane %v3696_v15, 1  ;;  %v6764_v53 = vmul.f32 %v6420_v23, %v12465_v55  ;;  %v3903_v32 = vsel %vm1761_vm14, %v3901_v25, %v3902_v62  ;;  %v4542_v45 = vrot.slane %v3694_v2, 4 }
 0x3cf   : > { %v4544_v56 = vrot.slane %v3695_v60, 4  ;;  %v6424_v8 = vmul.f32 %v7280_v21, %v6423_v11  ;;  %v3905_v49 = vsel %vm1761_vm14, %v3902_v62, %v3904_v43  ;;  %v4073_v1 = vmax.f32 %v3693_v46, %v3903_v32  ;;  %v14363_v32 = vld [vmem:[#allocation77_spill] sm:$0xff]  ;;  %v6044_v46 = vpop.f32.mrf.mxu0 }
 0x3d0   : > { %v3907_v59 = vsel %vm1761_vm14, %v3904_v43, %v3906_v22  ;;  %6797 = vst.msk [vmem:[%s11825_s23 + $0x38] sm:$0xff] %vm6789_vm6, %v6764_v53  ;;  %v4074_v57 = vmax.f32 %v3694_v2, %v3905_v49  ;;  %v4076_v51 = vmax.f32 %v3696_v15, %v3906_v22  ;;  %v4543_v58 = vsel %vm384_vm0, %v4541_v35, %v4542_v45  ;;  %v12641_v2 = vld [vmem:[#allocation2 + $0x330] sm:$0xff]  ;;  %v14364_v35 = vld [vmem:[#allocation23_spill] sm:$0xff] }
 0x3d1   : > { %v4075_v9 = vmax.f32 %v3695_v60, %v3907_v59  ;;  %v6425_v52 = vadd.f32 %v7280_v21, %v6424_v8  ;;  %v4281_v41 = vrot.slane %v4073_v1, 2  ;;  %v4545_v55 = vsel %vm384_vm0, %v4542_v45, %v4544_v56 }
 0x3d2   : > { %v4546_v25 = vrot.slane %v3696_v15, 4  ;;  %v4282_v62 = vrot.slane %v4074_v57, 2  ;;  %v4286_v43 = vrot.slane %v4076_v51, 2  ;;  %v5121_v53 = vmax.f32 %v14363_v32, %v12606_v20  ;;  %v14365_v51 = vld [vmem:[#allocation54_spill] sm:$0xff] }
 0x3d3   : > { %v4284_v23 = vrot.slane %v4075_v9, 2  ;;  %v6429_v22 = vsel %vm6428_vm3, %v7280_v21, %v6425_v52  ;;  %v5122_v11 = vmax.f32 %v14364_v35, %v12610_v34  ;;  %v4805_v15 = vrot.slane %v12442_v0, 4  ;;  %v12678_v35 = vld [vmem:[#allocation2 + $0x328] sm:$0xff] }
 0x3d4   : > { %v4547_v60 = vsel %vm384_vm0, %v4544_v56, %v4546_v25  ;;  %v6434_v26 = vsel %vm12620_vm5, %v12579_v5, %v6429_v22  ;;  %v4283_v45 = vsel %vm2218_vm15, %v4281_v41, %v4282_v62  ;;  %v1558_v25 = vmax.f32 %v14365_v51, %v12531_v29  ;;  %v3186_v5 = vpop.f32.mrf.mxu1 }
 0x3d5   : > { %v4285_v8 = vsel %vm2218_vm15, %v4282_v62, %v4284_v23  ;;  %v4287_v49 = vsel %vm2218_vm15, %v4284_v23, %v4286_v43  ;;  %v6765_v52 = vmul.f32 %v6434_v26, %v12495_v27  ;;  %v4417_v21 = vmax.f32 %v4073_v1, %v4283_v45  ;;  %v4932_v27 = vpop.f32.mrf.mxu3 }
 0x3d6   : > { %v4418_v56 = vmax.f32 %v4074_v57, %v4285_v8  ;;  %v4419_v59 = vmax.f32 %v4075_v9, %v4287_v49  ;;  %v14366_v32 = vmax.f32 %v14319_v38, %v14347_v42  ;;  %v14367_v41 = vrot.slane %v12439_v63, 4  ;;  %v3398_v38 = vpop.f32.mrf.mxu2 }
 0x3d7   : > { %v6122_v23 = vadd.f32 %v6044_v46, %v12539_v19  ;;  %6798 = vst.msk [vmem:[%s11825_s23 + $0x40] sm:$0xff] %vm6789_vm6, %v6765_v52  ;;  %v12668_v1 = vmax.f32 %v4417_v21, %v4543_v58  ;;  %v3396_v43 = vadd.f32 %v3395_v37, %v3183_v47  ;;  %v12685_v58 = vmax.f32 %v12292_v44, %v12499_v28  ;;  %v6047_v51 = vpop.f32.mrf.mxu0 }
 0x3d8   : > { %v12660_v36 = vmax.f32 %v14366_v32, %v12641_v2  ;;  %v4806_v62 = vsel %vm384_vm0, %v14367_v41, %v4805_v15  ;;  %v12670_v57 = vmax.f32 %v4418_v56, %v4545_v55  ;;  %v12672_v9 = vmax.f32 %v4419_v59, %v4547_v60  ;;  %v7391_v15 = vld [vmem:[#allocation2 + $0x2e0] sm:$0xff] }
 0x3d9   : > { %7045 = vmatmul.msk.f32.gmra.mxu3 %vm1109_vm2, %v4806_v62  ;;  %v12676_v22 = vadd.f32 %v12272_v54, %v6122_v23  ;;  %v12681_v19 = vmax.f32 %v7391_v15, %v12497_v12  ;;  %14369 = vst [vmem:[#allocation67_spill] sm:$0xff] %v12685_v58  ;;  %v12687_v55 = vadd.f32 %v3398_v38, %v3186_v5  ;;  %v4807_v8 = vrot.slane %v12668_v1, 4  ;;  %v12707_v38 = vld [vmem:[#allocation2 + $0x320] sm:$0xff] }
 0x3da   : > { %v14370_v46 = vmax.f32 %v14360_v33, %v12597_v4  ;;  %v5169_v37 = vmax.f32 %v5121_v53, %v12670_v57  ;;  %v5170_v60 = vmax.f32 %v5122_v11, %v12672_v9  ;;  %v5008_v26 = vadd.f32 %v4932_v27, %v3396_v43  ;;  %v14371_v53 = vld [vmem:[#allocation59_spill] sm:$0xff]  ;;  %v14372_v11 = vld [vmem:[#allocation33_spill] sm:$0xff]  ;;  %v12709_v43 = vld [vmem:[#allocation2 + $0x338] sm:$0x3f] }
 0x3db   : > { %14368 = vst [vmem:[#allocation19_spill] sm:$0xff] %v12681_v19  ;;  %v6190_v45 = vsub.f32 0.0, %v12676_v22  ;;  %v13679_v49 = vrot.slane %v12670_v57, 4  ;;  %v12699_v56 = vmax.f32 %v1558_v25, %v12678_v35  ;;  %v1557_v32 = vmax.f32 %v14371_v53, %v12681_v19 }
 0x3dc   : > { %v5168_v47 = vmax.f32 %v14370_v46, %v12668_v1  ;;  %v5289_v52 = vrot.slane %v5169_v37, 1  ;;  %v5291_v21 = vrot.slane %v5170_v60, 1  ;;  %v1560_v5 = vmax.f32 %v14372_v11, %v12685_v58 }
 0x3dd   : > { %v6231_v33 = vmul.f32 1.442695, %v6190_v45  ;;  %v5689_v27 = vrot.slane %v5169_v37, 4  ;;  %v4809_v46 = vsel %vm384_vm0, %v4807_v8, %v13679_v49  ;;  %v1912_v45 = vrot.slane %v12660_v36, 1 }
 0x3de   : > { %v5288_v44 = vrot.slane %v5168_v47, 1  ;;  %v5688_v59 = vrot.slane %v5168_v47, 4  ;;  %v5292_v62 = vsel %vm1761_vm14, %v5289_v52, %v5291_v21  ;;  %v5394_v23 = vmax.f32 %v5170_v60, %v5291_v21 }
 0x3df   : > { %v5393_v15 = vmax.f32 %v5169_v37, %v5292_v62  ;;  %v5691_v11 = vrot.slane %v5170_v60, 4  ;;  %7281 = vpow2.f32 %v6231_v33  ;;  %v1653_v58 = vmax.f32 %v1557_v32, %v12707_v38 }
 0x3e0   : > { %v5290_v41 = vsel %vm1761_vm14, %v5288_v44, %v5289_v52  ;;  %v5515_v53 = vrot.slane %v5394_v23, 2  ;;  %v6123_v44 = vadd.f32 %v6047_v51, %v5008_v26  ;;  %v12718_v42 = vmax.f32 %v1560_v5, %v12709_v43 }
 0x3e1   : > { %v5392_v25 = vmax.f32 %v5168_v47, %v5290_v41  ;;  %7046 = vmatmul.msk.f32.gmra.mxu3 %vm1109_vm2, %v4809_v46  ;;  %v5513_v21 = vrot.slane %v5393_v15, 2  ;;  %v5690_v47 = vsel %vm384_vm0, %v5688_v59, %v5689_v27  ;;  %v1910_v41 = vrot.slane %v12699_v56, 1 }
 0x3e2   : > { %v5618_v37 = vmax.f32 %v5394_v23, %v5515_v53  ;;  %v12722_v8 = vadd.f32 %v12272_v54, %v6123_v44  ;;  %v1909_v26 = vrot.slane %v1653_v58, 1  ;;  %v1914_v51 = vrot.slane %v12718_v42, 1 }
 0x3e3   : > { %v5512_v52 = vrot.slane %v5392_v25, 2  ;;  %v5516_v33 = vsel %vm2218_vm15, %v5513_v21, %v5515_v53  ;;  %v5692_v5 = vsel %vm384_vm0, %v5689_v27, %v5691_v11  ;;  %v1913_v54 = vsel %vm1761_vm14, %v1910_v41, %v1912_v45 }
 0x3e4   : > { %v5617_v32 = vmax.f32 %v5393_v15, %v5516_v33  ;;  %v6191_v46 = vsub.f32 0.0, %v12722_v8  ;;  %v1911_v59 = vsel %vm1761_vm14, %v1909_v26, %v1910_v41  ;;  %v1915_v23 = vsel %vm1761_vm14, %v1912_v45, %v1914_v51 }
 0x3e5   : > { %v5514_v60 = vsel %vm2218_vm15, %v5512_v52, %v5513_v21  ;;  %v2113_v44 = vmax.f32 %v12718_v42, %v1914_v51  ;;  %v7282_v52 = vpop.eup %7281  ;;  %v4935_v21 = vpop.f32.mrf.mxu3  ;;  %v5794_v29 = vmax.f32 %v5618_v37, %v5691_v11  ;;  %v2110_v15 = vmax.f32 %v1653_v58, %v1911_v59 }
 0x3e6   : > { %v5616_v62 = vmax.f32 %v5392_v25, %v5514_v60  ;;  %v5793_v53 = vmax.f32 %v5617_v32, %v5692_v5  ;;  %v6233_v19 = vmul.f32 1.442695, %v6191_v46  ;;  %v12734_v25 = vadd.f32 1.0, %v7282_v52 }
 0x3e7   : > { %v2111_v27 = vmax.f32 %v12699_v56, %v1913_v54  ;;  %v2112_v60 = vmax.f32 %v12660_v36, %v1915_v23  ;;  %v12739_v45 = vadd.f32 %v4935_v21, %v12687_v55  ;;  %v2366_v11 = vrot.slane %v2110_v15, 2 }
 0x3e8   : > { %v5792_v49 = vmax.f32 %v5616_v62, %v5690_v47  ;;  %v5913_v26 = vrot.slane %v5793_v53, 2  ;;  %7283 = vpow2.f32 %v6233_v19  ;;  %v2371_v47 = vrot.slane %v2113_v44, 2 }
 0x3e9   : > { %7285 = vrcp.f32 %v12734_v25  ;;  %v2367_v37 = vrot.slane %v2111_v27, 2  ;;  %v2727_v51 = vrot.slane %v12699_v56, 4  ;;  %v6444_v62 = vand.u32 2147483647, %v12734_v25 }
 0x3ea   : > { %v5912_v33 = vrot.slane %v5792_v49, 2  ;;  %v6446_v49 = vand.u32 2147483648, %v12734_v25  ;;  %v5915_v32 = vrot.slane %v5794_v29, 2  ;;  %v2369_v19 = vrot.slane %v2112_v60, 2 }
 0x3eb   : > { %v2368_v55 = vsel %vm2218_vm15, %v2366_v11, %v2367_v37  ;;  %v2726_v5 = vrot.slane %v1653_v58, 4  ;;  %v2729_v46 = vrot.slane %v12660_v36, 4  ;;  %v2731_v59 = vrot.slane %v12718_v42, 4 }
 0x3ec   : > { %v5914_v41 = vsel %vm2218_vm15, %v5912_v33, %v5913_v26  ;;  %v2370_v54 = vsel %vm2218_vm15, %v2367_v37, %v2369_v19  ;;  %v2372_v23 = vsel %vm2218_vm15, %v2369_v19, %v2371_v47  ;;  %v2567_v56 = vmax.f32 %v2110_v15, %v2368_v55 }
 0x3ed   : > { %7075 = vmatmul.msk.f32.gmra.mxu0 %vm1109_vm2, %v5914_v41  ;;  %v2570_v52 = vmax.f32 %v2113_v44, %v2371_v47  ;;  %vm6440_vm8 = vweird.f32 %v12734_v25  ;;  %v5916_v21 = vsel %vm2218_vm15, %v5913_v26, %v5915_v32  ;;  %v2568_v29 = vmax.f32 %v2111_v27, %v2370_v54  ;;  %v14381_v54 = vld [vmem:[#allocation11_spill] sm:$0xff] }
 0x3ee   : > { %v7284_v53 = vpop.eup %7283  ;;  %v2728_v33 = vsel %vm384_vm0, %v2726_v5, %v2727_v51  ;;  %v2730_v58 = vsel %vm384_vm0, %v2727_v51, %v2729_v46  ;;  %v2569_v42 = vmax.f32 %v2112_v60, %v2372_v23  ;;  %v12762_v15 = vmax.f32 %v12361_v17, %v12555_v18  ;;  %v14379_v5 = vld [vmem:[#allocation40_spill] sm:$0xff]  ;;  %v14382_v23 = vld [vmem:[#allocation10_spill] sm:$0xff] }
 0x3ef   : > { %v7286_v41 = vpop.eup %7285  ;;  %v12756_v36 = vadd.f32 1.0, %v7284_v53  ;;  %v12758_v11 = vmax.f32 %v2567_v56, %v2728_v33  ;;  %vm12765_vm11 = vcmp.eq.f32.partialorder %v6444_v62, 8.507059e+37  ;;  %v2732_v27 = vsel %vm384_vm0, %v2729_v46, %v2731_v59 }
 0x3f0   : > { %14373 = vst [vmem:[#allocation61_spill] sm:$0xff] %v12762_v15  ;;  %v6436_v44 = vmul.f32 %v7286_v41, %v12734_v25  ;;  %v12770_v26 = vmax.f32 %v2568_v29, %v2730_v58  ;;  %vm6441_vm9 = vweird.f32 %v7286_v41  ;;  %v12774_v37 = vmax.f32 %v2570_v52, %v2731_v59  ;;  %v12798_v59 = vpop.f32.mrf.mxu1  ;;  %v14383_v52 = vld [vmem:[#allocation6_spill] sm:$0xff]  ;;  %v3401_v58 = vpop.f32.mrf.mxu2 }
 0x3f1   : > { %7287 = vrcp.f32 %v12756_v36  ;;  %v6460_v60 = vand.u32 2147483648, %v12756_v36  ;;  %v12778_v17 = vmax.f32 %v12369_v7, %v12569_v39  ;;  %v12782_v62 = vmax.f32 %v12371_v14, %v12573_v16  ;;  %vm6442_vm12 = vmor %vm6440_vm8, %vm6441_vm9 }
 0x3f2   : > { %v6437_v51 = vsub.f32 1.0, %v6436_v44  ;;  %v12786_v32 = vmax.f32 %v12375_v24, %v12581_v31  ;;  %v6458_v19 = vand.u32 2147483647, %v12756_v36  ;;  %v12790_v55 = vmax.f32 %v2569_v42, %v2732_v27 }
 0x3f3   : > { %14376 = vst [vmem:[#allocation16_spill] sm:$0xff] %v12778_v17  ;;  %v3617_v46 = vmax.f32 %v14379_v5, %v12762_v15  ;;  %v12796_v7 = vmax.f32 %v12437_v48, %v12668_v1  ;;  %v3618_v24 = vmax.f32 %v14381_v54, %v12778_v17  ;;  %v3619_v56 = vmax.f32 %v14382_v23, %v12782_v62 }
 0x3f4   : > { %14377 = vst [vmem:[#allocation21_spill] sm:$0xff] %v12782_v62  ;;  %v6438_v14 = vmul.f32 %v7286_v41, %v6437_v51  ;;  %v3620_v53 = vmax.f32 %v14383_v52, %v12786_v32  ;;  %v6461_v29 = vor.u32 1.1754944e-38, %v6460_v60  ;;  %v12809_v48 = vmax.f32 %v12439_v63, %v12670_v57 }
 0x3f5   : > { %14378 = vst [vmem:[#allocation39_spill] sm:$0xff] %v12786_v32  ;;  %7076 = vmatmul.msk.f32.gmra.mxu0 %vm1109_vm2, %v5916_v21  ;;  %v6447_v21 = vor.u32 1.1754944e-38, %v6446_v49  ;;  %v3697_v33 = vmax.f32 %v3617_v46, %v12758_v11  ;;  %vm6454_vm10 = vweird.f32 %v12756_v36  ;;  %v3698_v44 = vmax.f32 %v3618_v24, %v12770_v26 }
 0x3f6   : > { %14380 = vst [vmem:[#allocation64_spill] sm:$0xff] %v12796_v7  ;;  %v6439_v42 = vadd.f32 %v7286_v41, %v6438_v14  ;;  %v3699_v27 = vmax.f32 %v3619_v56, %v12790_v55  ;;  %v3700_v51 = vmax.f32 %v3620_v53, %v12774_v37  ;;  %v12820_v63 = vmax.f32 %v12442_v0, %v12672_v9 }
 0x3f7   : > { %14384 = vst [vmem:[#allocation24_spill] sm:$0xff] %v12809_v48  ;;  %v7288_v5 = vpop.eup %7287  ;;  %v3908_v49 = vrot.slane %v3697_v33, 1  ;;  %v4548_v60 = vrot.slane %v3697_v33, 4  ;;  %v5123_v46 = vmax.f32 %v12390_v6, %v12796_v7  ;;  %vm12825_vm13 = vcmp.eq.f32.partialorder %v6458_v19, 8.507059e+37 }
 0x3f8   : > { %v6443_v14 = vsel %vm6442_vm12, %v7286_v41, %v6439_v42  ;;  %v6450_v54 = vmul.f32 %v7288_v5, %v12756_v36  ;;  %v3909_v23 = vrot.slane %v3698_v44, 1  ;;  %v5124_v25 = vmax.f32 %v12397_v30, %v12809_v48 }
 0x3f9   : > { %v6448_v56 = vsel %vm12765_vm11, %v6447_v21, %v6443_v14  ;;  %v3911_v0 = vrot.slane %v3699_v27, 1  ;;  %v3913_v52 = vrot.slane %v3700_v51, 1  ;;  %v4549_v53 = vrot.slane %v3698_v44, 4  ;;  %v6050_v14 = vpop.f32.mrf.mxu0 }
 0x3fa   : > { %v6766_v6 = vmul.f32 %v6448_v56, %v12676_v22  ;;  %v6451_v41 = vsub.f32 1.0, %v6450_v54  ;;  %v3910_v42 = vsel %vm1761_vm14, %v3908_v49, %v3909_v23  ;;  %v4551_v7 = vrot.slane %v3699_v27, 4  ;;  %v3192_v54 = vpop.f32.mrf.mxu1  ;;  %v4938_v56 = vpop.f32.mrf.mxu3 }
 0x3fb   : > { %v3912_v19 = vsel %vm1761_vm14, %v3909_v23, %v3911_v0  ;;  %v3914_v32 = vsel %vm1761_vm14, %v3911_v0, %v3913_v52  ;;  %v4077_v62 = vmax.f32 %v3697_v33, %v3910_v42  ;;  %v4080_v17 = vmax.f32 %v3700_v51, %v3913_v52 }
 0x3fc   : > { %6799 = vst.msk [vmem:[%s11825_s23 + $0x48] sm:$0xff] %vm6789_vm6, %v6766_v6  ;;  %v6452_v30 = vmul.f32 %v7288_v5, %v6451_v41  ;;  %vm6455_vm4 = vweird.f32 %v7288_v5  ;;  %v4078_v47 = vmax.f32 %v3698_v44, %v3912_v19  ;;  %v4079_v21 = vmax.f32 %v3699_v27, %v3914_v32 }
 0x3fd   : > { %v4288_v48 = vrot.slane %v4077_v62, 2  ;;  %v4293_v15 = vrot.slane %v4080_v17, 2  ;;  %v4553_v22 = vrot.slane %v3700_v51, 4  ;;  %v5125_v49 = vmax.f32 %v12419_v50, %v12820_v63  ;;  %vm6456_vm1 = vmor %vm6454_vm10, %vm6455_vm4  ;;  %v3404_v51 = vpop.f32.mrf.mxu2 }
 0x3fe   : > { %v6453_v23 = vadd.f32 %v7288_v5, %v6452_v30  ;;  %v4289_v34 = vrot.slane %v4078_v47, 2  ;;  %v4291_v0 = vrot.slane %v4079_v21, 2  ;;  %v4810_v33 = vrot.slane %v12672_v9, 4 }
 0x3ff   : > { %v4550_v44 = vsel %vm384_vm0, %v4548_v60, %v4549_v53  ;;  %v4552_v32 = vsel %vm384_vm0, %v4549_v53, %v4551_v7  ;;  %v4554_v17 = vsel %vm384_vm0, %v4551_v7, %v4553_v22  ;;  %v6124_v27 = vadd.f32 %v6050_v14, %v12739_v45 }
 0x400   : > { %v6457_v50 = vsel %vm6456_vm1, %v7288_v5, %v6453_v23  ;;  %v4290_v52 = vsel %vm2218_vm15, %v4288_v48, %v4289_v34  ;;  %v4292_v6 = vsel %vm2218_vm15, %v4289_v34, %v4291_v0  ;;  %v4294_v41 = vsel %vm2218_vm15, %v4291_v0, %v4293_v15  ;;  %v12861_v34 = vld [vmem:[%s13380_s4] ss:$0 sm:$0xff] }
 0x401   : > { %v6462_v36 = vsel %vm12825_vm13, %v6461_v29, %v6457_v50  ;;  %v4420_v42 = vmax.f32 %v4077_v62, %v4290_v52  ;;  %v4421_v60 = vmax.f32 %v4078_v47, %v4292_v6  ;;  %v4422_v19 = vmax.f32 %v4079_v21, %v4294_v41 }
 0x402   : > { %v3402_v53 = vadd.f32 %v3401_v58, %v12798_v59  ;;  %v6767_v7 = vmul.f32 %v6462_v36, %v12722_v8  ;;  %v14387_v45 = vrot.slane %v12670_v57, 4  ;;  %v12864_v15 = vadd.f32 %v12861_v34, %v6124_v27 }
 0x403   : > { %v12866_v29 = vmax.f32 %v4420_v42, %v4550_v44  ;;  %v12868_v62 = vmax.f32 %v4421_v60, %v4552_v32  ;;  %v12870_v48 = vmax.f32 %v4422_v19, %v4554_v17  ;;  %v3405_v8 = vadd.f32 %v3404_v51, %v3192_v54  ;;  %v4941_v17 = vpop.f32.mrf.mxu3 }
 0x404   : > { %v4811_v5 = vsel %vm384_vm0, %v14387_v45, %v4810_v33  ;;  %v5010_v59 = vadd.f32 %v4938_v56, %v3402_v53  ;;  %6800 = vst.msk [vmem:[%s11825_s23 + $0x50] sm:$0xff] %vm6789_vm6, %v6767_v7  ;;  %v6192_v58 = vsub.f32 0.0, %v12864_v15  ;;  %v1465_v21 = vmax.f32 %v12497_v12, %v12707_v38  ;;  %v6053_v56 = vpop.f32.mrf.mxu0 }
 0x405   : > { %7047 = vmatmul.msk.f32.gmra.mxu3 %vm1109_vm2, %v4811_v5  ;;  %v5171_v24 = vmax.f32 %v5123_v46, %v12866_v29  ;;  %v5172_v30 = vmax.f32 %v5124_v25, %v12868_v62  ;;  %v12879_v47 = vmax.f32 %v5125_v49, %v12870_v48  ;;  %v4812_v22 = vrot.slane %v12866_v29, 4  ;;  %v3195_v49 = vpop.f32.mrf.mxu1  ;;  %v3407_v52 = vpop.f32.mrf.mxu2 }
 0x406   : > { %v6235_v14 = vmul.f32 1.442695, %v6192_v58  ;;  %v4813_v54 = vrot.slane %v12868_v62, 4  ;;  %v1466_v23 = vmax.f32 %v12487_v10, %v12678_v35  ;;  %v1467_v25 = vmax.f32 %v12448_v61, %v12641_v2 }
 0x407   : > { %v5293_v0 = vrot.slane %v5171_v24, 1  ;;  %v5294_v33 = vrot.slane %v5172_v30, 1  ;;  %v5296_v46 = vrot.slane %v12879_v47, 1  ;;  %v5693_v44 = vrot.slane %v5171_v24, 4 }
 0x408   : > { %v5694_v32 = vrot.slane %v5172_v30, 4  ;;  %v5696_v12 = vrot.slane %v12879_v47, 4  ;;  %7289 = vpow2.f32 %v6235_v14  ;;  %v6125_v50 = vadd.f32 %v6053_v56, %v5010_v59  ;;  %v12908_v59 = vld [vmem:[#allocation2 + $0x340] sm:$0xff] }
 0x409   : > { %v5295_v27 = vsel %vm1761_vm14, %v5293_v0, %v5294_v33  ;;  %v5297_v51 = vsel %vm1761_vm14, %v5294_v33, %v5296_v46  ;;  %v5397_v10 = vmax.f32 %v12879_v47, %v5296_v46  ;;  %v4814_v61 = vsel %vm384_vm0, %v4812_v22, %v4813_v54  ;;  %v12917_v47 = vld [vmem:[#allocation2 + $0x358] sm:$0x3f] }
 0x40a   : > { %v5395_v6 = vmax.f32 %v5171_v24, %v5295_v27  ;;  %v5396_v41 = vmax.f32 %v5172_v30, %v5297_v51  ;;  %v1468_v36 = vmax.f32 %v12499_v28, %v12709_v43  ;;  %v12899_v42 = vadd.f32 %v3407_v52, %v3195_v49  ;;  %v12913_v30 = vld [vmem:[#allocation2 + $0x348] sm:$0xff] }
 0x40b   : > { %v5520_v60 = vrot.slane %v5397_v10, 2  ;;  %v12901_v19 = vadd.f32 %v4941_v17, %v3405_v8  ;;  %v12905_v53 = vadd.f32 %v12861_v34, %v6125_v50  ;;  %v5695_v5 = vsel %vm384_vm0, %v5693_v44, %v5694_v32  ;;  %v12915_v8 = vld [vmem:[#allocation2 + $0x350] sm:$0xff] }
 0x40c   : > { %v5517_v7 = vrot.slane %v5395_v6, 2  ;;  %v5518_v45 = vrot.slane %v5396_v41, 2  ;;  %v1561_v58 = vmax.f32 %v12470_v13, %v1465_v21  ;;  %v5697_v28 = vsel %vm384_vm0, %v5694_v32, %v5696_v12  ;;  %v14388_v21 = vld [vmem:[#allocation34_spill] sm:$0xff] }
 0x40d   : > { %7048 = vmatmul.msk.f32.gmra.mxu3 %vm1109_vm2, %v4814_v61  ;;  %v6193_v24 = vsub.f32 0.0, %v12905_v53  ;;  %v1562_v14 = vmax.f32 %v14343_v3, %v1466_v23  ;;  %v1563_v22 = vmax.f32 %v14325_v40, %v1467_v25  ;;  %v5621_v13 = vmax.f32 %v5397_v10, %v5520_v60 }
 0x40e   : > { %v7290_v56 = vpop.eup %7289  ;;  %v5519_v0 = vsel %vm2218_vm15, %v5517_v7, %v5518_v45  ;;  %v5521_v33 = vsel %vm2218_vm15, %v5518_v45, %v5520_v60  ;;  %v1564_v46 = vmax.f32 %v14388_v21, %v1468_v36  ;;  %v1657_v17 = vmax.f32 %v1561_v58, %v12908_v59 }
 0x40f   : > { %v5619_v49 = vmax.f32 %v5395_v6, %v5519_v0  ;;  %v5620_v44 = vmax.f32 %v5396_v41, %v5521_v33  ;;  %v12924_v32 = vadd.f32 1.0, %v7290_v56  ;;  %v6237_v27 = vmul.f32 1.442695, %v6193_v24 }
 0x410   : > { %v1658_v51 = vmax.f32 %v1562_v14, %v12913_v30  ;;  %v12929_v3 = vmax.f32 %v1563_v22, %v12915_v8  ;;  %v12932_v40 = vmax.f32 %v1564_v46, %v12917_v47  ;;  %v1469_v10 = vmax.f32 %v12707_v38, %v12908_v59  ;;  %v1365_v59 = vld [vmem:[#allocation2 + $0x368] sm:$0xff] }
 0x411   : > { %v5795_v23 = vmax.f32 %v5619_v49, %v5695_v5  ;;  %v5796_v25 = vmax.f32 %v5620_v44, %v5697_v28  ;;  %7291 = vrcp.f32 %v12924_v32  ;;  %v1470_v50 = vmax.f32 %v12678_v35, %v12913_v30 }
 0x412   : > { %7293 = vpow2.f32 %v6237_v27  ;;  %v1916_v36 = vrot.slane %v1657_v17, 1  ;;  %v1917_v60 = vrot.slane %v1658_v51, 1  ;;  %v6472_v7 = vand.u32 2147483647, %v12924_v32 }
 0x413   : > { %v5917_v41 = vrot.slane %v5795_v23, 2  ;;  %v5918_v61 = vrot.slane %v5796_v25, 2  ;;  %v5797_v45 = vmax.f32 %v5621_v13, %v5696_v12  ;;  %v1919_v5 = vrot.slane %v12929_v3, 1 }
 0x414   : > { %v1921_v58 = vrot.slane %v12932_v40, 1  ;;  %v6474_v24 = vand.u32 2147483648, %v12924_v32  ;;  %v1918_v14 = vsel %vm1761_vm14, %v1916_v36, %v1917_v60  ;;  %v2733_v22 = vrot.slane %v1657_v17, 4 }
 0x415   : > { %v5919_v28 = vsel %vm2218_vm15, %v5917_v41, %v5918_v61  ;;  %vm6468_vm7 = vweird.f32 %v12924_v32  ;;  %v1920_v56 = vsel %vm1761_vm14, %v1917_v60, %v1919_v5  ;;  %v2114_v12 = vmax.f32 %v1657_v17, %v1918_v14 }
 0x416   : > { %7077 = vmatmul.msk.f32.gmra.mxu0 %vm1109_vm2, %v5919_v28  ;;  %v1922_v0 = vsel %vm1761_vm14, %v1919_v5, %v1921_v58  ;;  %v2117_v33 = vmax.f32 %v12932_v40, %v1921_v58  ;;  %v2115_v21 = vmax.f32 %v1658_v51, %v1920_v56  ;;  %v2734_v49 = vrot.slane %v1658_v51, 4 }
 0x417   : > { %v7292_v13 = vpop.eup %7291  ;;  %v2116_v46 = vmax.f32 %v12929_v3, %v1922_v0  ;;  %v2736_v44 = vrot.slane %v12929_v3, 4  ;;  %v5920_v25 = vrot.slane %v5797_v45, 2  ;;  %v2373_v41 = vrot.slane %v2114_v12, 2 }
 0x418   : > { %v7294_v27 = vpop.eup %7293  ;;  %v6464_v23 = vmul.f32 %v7292_v13, %v12924_v32  ;;  %v2378_v36 = vrot.slane %v2117_v33, 2  ;;  %vm12957_vm5 = vcmp.eq.f32.partialorder %v6472_v7, 8.507059e+37  ;;  %v2374_v5 = vrot.slane %v2115_v21, 2 }
 0x419   : > { %v12961_v17 = vadd.f32 1.0, %v7294_v27  ;;  %v2376_v58 = vrot.slane %v2116_v46, 2  ;;  %v6475_v14 = vor.u32 1.1754944e-38, %v6474_v24  ;;  %v5921_v51 = vsel %vm2218_vm15, %v5918_v61, %v5920_v25 }
 0x41a   : > { %v6465_v28 = vsub.f32 1.0, %v6464_v23  ;;  %v2738_v3 = vrot.slane %v12932_v40, 4  ;;  %vm6469_vm3 = vweird.f32 %v7292_v13  ;;  %v2735_v45 = vsel %vm384_vm0, %v2733_v22, %v2734_v49 }
 0x41b   : > { %7295 = vrcp.f32 %v12961_v17  ;;  %v2737_v7 = vsel %vm384_vm0, %v2734_v49, %v2736_v44  ;;  %v2375_v0 = vsel %vm2218_vm15, %v2373_v41, %v2374_v5  ;;  %v2377_v27 = vsel %vm2218_vm15, %v2374_v5, %v2376_v58  ;;  %vm6470_vm8 = vmor %vm6468_vm7, %vm6469_vm3 }
 0x41c   : > { %v6466_v56 = vmul.f32 %v7292_v13, %v6465_v28  ;;  %v2379_v6 = vsel %vm2218_vm15, %v2376_v58, %v2378_v36  ;;  %v6486_v24 = vand.u32 2147483647, %v12961_v17  ;;  %v2571_v23 = vmax.f32 %v2114_v12, %v2375_v0  ;;  %v14391_v58 = vld [vmem:[#allocation75_spill] sm:$0xff]  ;;  %v14396_v0 = vld [vmem:[#allocation84_spill] sm:$0xff] }
 0x41d   : > { %v2572_v61 = vmax.f32 %v2115_v21, %v2377_v27  ;;  %v2574_v25 = vmax.f32 %v2117_v33, %v2378_v36  ;;  %v6488_v52 = vand.u32 2147483648, %v12961_v17  ;;  %v2573_v22 = vmax.f32 %v2116_v46, %v2379_v6 }
 0x41e   : > { %v6467_v40 = vadd.f32 %v7292_v13, %v6466_v56  ;;  %7078 = vmatmul.msk.f32.gmra.mxu0 %vm1109_vm2, %v5921_v51  ;;  %v2739_v49 = vsel %vm384_vm0, %v2736_v44, %v2738_v3  ;;  %v12978_v41 = vmax.f32 %v2571_v23, %v2735_v45  ;;  %v3541_v12 = vmax.f32 %v12555_v18, %v12758_v11 }
 0x41f   : > { %v12980_v5 = vmax.f32 %v2572_v61, %v2737_v7  ;;  %v3542_v33 = vmax.f32 %v12569_v39, %v12770_v26  ;;  %vm6482_vm11 = vweird.f32 %v12961_v17  ;;  %v12987_v6 = vmax.f32 %v2573_v22, %v2739_v49 }
 0x420   : > { %v6471_v21 = vsel %vm6470_vm8, %v7292_v13, %v6467_v40  ;;  %v3543_v46 = vmax.f32 %v12573_v16, %v12790_v55  ;;  %v3544_v32 = vmax.f32 %v12581_v31, %v12774_v37  ;;  %v12995_v18 = vmax.f32 %v2574_v25, %v2738_v3  ;;  %v14392_v13 = vld [vmem:[#allocation57_spill] sm:$0xff]  ;;  %v14398_v16 = vld [vmem:[#allocation19_spill] sm:$0xff] }
 0x421   : > { %v7296_v44 = vpop.eup %7295  ;;  %v6476_v36 = vsel %vm12957_vm5, %v6475_v14, %v6471_v21  ;;  %v3621_v39 = vmax.f32 %v14391_v58, %v3541_v12  ;;  %v3622_v28 = vmax.f32 %v14392_v13, %v3542_v33  ;;  %vm13001_vm9 = vcmp.eq.f32.partialorder %v6486_v24, 8.507059e+37  ;;  %v14395_v31 = vld [vmem:[#allocation37_spill] sm:$0xff] }
 0x422   : > { %v6768_v51 = vmul.f32 %v6476_v36, %v12864_v15  ;;  %v6478_v45 = vmul.f32 %v7296_v44, %v12961_v17  ;;  %v6489_v7 = vor.u32 1.1754944e-38, %v6488_v52  ;;  %v3623_v56 = vmax.f32 %v14395_v31, %v3543_v46 }
 0x423   : > { %v3624_v60 = vmax.f32 %v14396_v0, %v3544_v32  ;;  %v3701_v14 = vmax.f32 %v3621_v39, %v12978_v41  ;;  %v3702_v3 = vmax.f32 %v3622_v28, %v12980_v5  ;;  %v5078_v27 = vmax.f32 %v12668_v1, %v12866_v29 }
 0x424   : > { %6801 = vst.msk [vmem:[%s11825_s23 + $0x58] sm:$0xff] %vm6789_vm6, %v6768_v51  ;;  %v6479_v15 = vsub.f32 1.0, %v6478_v45  ;;  %vm6483_vm10 = vweird.f32 %v7296_v44  ;;  %v3703_v24 = vmax.f32 %v3623_v56, %v12987_v6  ;;  %v5079_v52 = vmax.f32 %v12670_v57, %v12868_v62  ;;  %v6056_v45 = vpop.f32.mrf.mxu0 }
 0x425   : > { %v3704_v23 = vmax.f32 %v3624_v60, %v12995_v18  ;;  %v3915_v61 = vrot.slane %v3701_v14, 1  ;;  %v3916_v25 = vrot.slane %v3702_v3, 1  ;;  %v5080_v40 = vmax.f32 %v12672_v9, %v12870_v48  ;;  %vm6484_vm12 = vmor %vm6482_vm11, %vm6483_vm10 }
 0x426   : > { %v6480_v22 = vmul.f32 %v7296_v44, %v6479_v15  ;;  %v3918_v49 = vrot.slane %v3703_v24, 1  ;;  %v4555_v12 = vrot.slane %v3701_v14, 4  ;;  %v4556_v1 = vrot.slane %v3702_v3, 4 }
 0x427   : > { %v3917_v33 = vsel %vm1761_vm14, %v3915_v61, %v3916_v25  ;;  %v3920_v21 = vrot.slane %v3704_v23, 1  ;;  %v4558_v46 = vrot.slane %v3703_v24, 4  ;;  %v5126_v32 = vmax.f32 %v12597_v4, %v5078_v27 }
 0x428   : > { %v6481_v36 = vadd.f32 %v7296_v44, %v6480_v22  ;;  %v3919_v57 = vsel %vm1761_vm14, %v3916_v25, %v3918_v49  ;;  %v4081_v58 = vmax.f32 %v3701_v14, %v3917_v33  ;;  %v4560_v39 = vrot.slane %v3704_v23, 4  ;;  %v1364_v25 = vld [vmem:[#allocation2 + $0x360] sm:$0xff]  ;;  %v14399_v33 = vld [vmem:[#allocation12_spill] sm:$0xff] }
 0x429   : > { %v3921_v9 = vsel %vm1761_vm14, %v3918_v49, %v3920_v21  ;;  %v4082_v13 = vmax.f32 %v3702_v3, %v3919_v57  ;;  %v4084_v28 = vmax.f32 %v3704_v23, %v3920_v21  ;;  %v5127_v51 = vmax.f32 %v12606_v20, %v5079_v52  ;;  %v14401_v57 = vld [vmem:[#allocation44_spill] sm:$0xff] }
 0x42a   : > { %v6485_v31 = vsel %vm6484_vm12, %v7296_v44, %v6481_v36  ;;  %v4083_v56 = vmax.f32 %v3703_v24, %v3921_v9  ;;  %v4295_v4 = vrot.slane %v4081_v58, 2  ;;  %v4557_v0 = vsel %vm384_vm0, %v4555_v12, %v4556_v1  ;;  %v14397_v24 = vld [vmem:[#allocation14_spill] sm:$0xff]  ;;  %v14403_v9 = vld [vmem:[#allocation67_spill] sm:$0xff] }
 0x42b   : > { %v6490_v60 = vsel %vm13001_vm9, %v6489_v7, %v6485_v31  ;;  %v4296_v14 = vrot.slane %v4082_v13, 2  ;;  %v4300_v27 = vrot.slane %v4084_v28, 2  ;;  %v4559_v17 = vsel %vm384_vm0, %v4556_v1, %v4558_v46  ;;  %v1367_v36 = vld [vmem:[#allocation2 + $0x378] sm:$0x3f] }
 0x42c   : > { %v6769_v15 = vmul.f32 %v6490_v60, %v12905_v53  ;;  %v4298_v3 = vrot.slane %v4083_v56, 2  ;;  %v4561_v23 = vsel %vm384_vm0, %v4558_v46, %v4560_v39  ;;  %v4815_v20 = vrot.slane %v12870_v48, 4 }
 0x42d   : > { %v4297_v44 = vsel %vm2218_vm15, %v4295_v4, %v4296_v14  ;;  %v5128_v52 = vmax.f32 %v14397_v24, %v5080_v40  ;;  %v6126_v61 = vadd.f32 %v6056_v45, %v12901_v19  ;;  %v1565_v7 = vmax.f32 %v14398_v16, %v1469_v10  ;;  %v4944_v40 = vpop.f32.mrf.mxu3  ;;  %v1366_v10 = vld [vmem:[#allocation2 + $0x370] sm:$0xff]  ;;  %v6059_v4 = vpop.f32.mrf.mxu0 }
 0x42e   : > { %6802 = vst.msk [vmem:[%s11825_s23 + $0x60] sm:$0xff] %vm6789_vm6, %v6769_v15  ;;  %v4299_v53 = vsel %vm2218_vm15, %v4296_v14, %v4298_v3  ;;  %v4301_v22 = vsel %vm2218_vm15, %v4298_v3, %v4300_v27  ;;  %v4423_v49 = vmax.f32 %v4081_v58, %v4297_v44  ;;  %v4816_v12 = vsel %vm384_vm0, %v4813_v54, %v4815_v20  ;;  %v3198_v44 = vpop.f32.mrf.mxu1 }
 0x42f   : > { %v4424_v1 = vmax.f32 %v4082_v13, %v4299_v53  ;;  %v4425_v19 = vmax.f32 %v4083_v56, %v4301_v22  ;;  %7049 = vmatmul.msk.f32.gmra.mxu3 %vm1109_vm2, %v4816_v12  ;;  %v13050_v38 = vadd.f32 %v12861_v34, %v6126_v61  ;;  %v1566_v21 = vmax.f32 %v14399_v33, %v1470_v50 }
 0x430   : > { %v13056_v46 = vmax.f32 %v4423_v49, %v4557_v0  ;;  %v14400_v54 = vmax.f32 %v12641_v2, %v12915_v8  ;;  %v14402_v39 = vmax.f32 %v12709_v43, %v12917_v47  ;;  %v13066_v28 = vmax.f32 %v1565_v7, %v1364_v25  ;;  %v3410_v49 = vpop.f32.mrf.mxu2 }
 0x431   : > { %v13068_v45 = vmax.f32 %v4424_v1, %v4559_v17  ;;  %v13070_v35 = vmax.f32 %v4425_v19, %v4561_v23  ;;  %v6194_v30 = vsub.f32 0.0, %v13050_v38  ;;  %v5012_v50 = vadd.f32 %v4944_v40, %v12899_v42 }
 0x432   : > { %v1567_v58 = vmax.f32 %v14401_v57, %v14400_v54  ;;  %v1568_v13 = vmax.f32 %v14403_v9, %v14402_v39  ;;  %v5174_v31 = vmax.f32 %v5126_v32, %v13056_v46  ;;  %v13075_v2 = vmax.f32 %v1566_v21, %v1365_v59 }
 0x433   : > { %v5175_v43 = vmax.f32 %v5127_v51, %v13068_v45  ;;  %v5176_v47 = vmax.f32 %v5128_v52, %v13070_v35  ;;  %v6239_v56 = vmul.f32 1.442695, %v6194_v30  ;;  %v6127_v27 = vadd.f32 %v6059_v4, %v5012_v50 }
 0x434   : > { %v13077_v8 = vmax.f32 %v1567_v58, %v1366_v10  ;;  %v13081_v0 = vmax.f32 %v1568_v13, %v1367_v36  ;;  %v5298_v60 = vrot.slane %v5174_v31, 1  ;;  %v5698_v14 = vrot.slane %v5174_v31, 4 }
 0x435   : > { %v1923_v17 = vrot.slane %v13066_v28, 1  ;;  %v5299_v42 = vrot.slane %v5175_v43, 1  ;;  %v5301_v15 = vrot.slane %v5176_v47, 1  ;;  %v5699_v32 = vrot.slane %v5175_v43, 4 }
 0x436   : > { %v5701_v3 = vrot.slane %v5176_v47, 4  ;;  %7297 = vpow2.f32 %v6239_v56  ;;  %v13085_v23 = vadd.f32 %v12861_v34, %v6127_v27  ;;  %v1924_v51 = vrot.slane %v13075_v2, 1 }
 0x437   : > { %v1926_v20 = vrot.slane %v13077_v8, 1  ;;  %v5300_v24 = vsel %vm1761_vm14, %v5298_v60, %v5299_v42  ;;  %v5302_v52 = vsel %vm1761_vm14, %v5299_v42, %v5301_v15  ;;  %v5400_v61 = vmax.f32 %v5176_v47, %v5301_v15  ;;  %v4947_v15 = vpop.f32.mrf.mxu3 }
 0x438   : > { %v5700_v25 = vsel %vm384_vm0, %v5698_v14, %v5699_v32  ;;  %v5398_v16 = vmax.f32 %v5174_v31, %v5300_v24  ;;  %v5399_v7 = vmax.f32 %v5175_v43, %v5302_v52  ;;  %v5702_v53 = vsel %vm384_vm0, %v5699_v32, %v5701_v3 }
 0x439   : > { %v6195_v22 = vsub.f32 0.0, %v13085_v23  ;;  %v5525_v12 = vrot.slane %v5400_v61, 2  ;;  %v1925_v40 = vsel %vm1761_vm14, %v1923_v17, %v1924_v51  ;;  %v1927_v1 = vsel %vm1761_vm14, %v1924_v51, %v1926_v20 }
 0x43a   : > { %v1928_v19 = vrot.slane %v13081_v0, 1  ;;  %v5522_v59 = vrot.slane %v5398_v16, 2  ;;  %v5523_v10 = vrot.slane %v5399_v7, 2  ;;  %v2118_v21 = vmax.f32 %v13066_v28, %v1925_v40 }
 0x43b   : > { %v6241_v33 = vmul.f32 1.442695, %v6195_v22  ;;  %v5624_v36 = vmax.f32 %v5400_v61, %v5525_v12  ;;  %v2119_v57 = vmax.f32 %v13075_v2, %v1927_v1  ;;  %v3411_v42 = vadd.f32 %v3410_v49, %v3198_v44  ;;  %v13117_v44 = vpop.f32.mrf.mxu2 }
 0x43c   : > { %v1929_v54 = vsel %vm1761_vm14, %v1926_v20, %v1928_v19  ;;  %v2121_v58 = vmax.f32 %v13081_v0, %v1928_v19  ;;  %v7298_v39 = vpop.eup %7297  ;;  %v5524_v9 = vsel %vm2218_vm15, %v5522_v59, %v5523_v10  ;;  %v5526_v13 = vsel %vm2218_vm15, %v5523_v10, %v5525_v12  ;;  %v13112_v20 = vpop.f32.mrf.mxu1 }
 0x43d   : > { %7299 = vpow2.f32 %v6241_v33  ;;  %v13104_v30 = vmax.f32 %v13077_v8, %v1929_v54  ;;  %v5622_v50 = vmax.f32 %v5398_v16, %v5524_v9  ;;  %v5623_v31 = vmax.f32 %v5399_v7, %v5526_v13 }
 0x43e   : > { %v13106_v43 = vadd.f32 1.0, %v7298_v39  ;;  %v5800_v47 = vmax.f32 %v5624_v36, %v5701_v3  ;;  %v2380_v56 = vrot.slane %v2118_v21, 2  ;;  %v2381_v4 = vrot.slane %v2119_v57, 2 }
 0x43f   : > { %v2383_v60 = vrot.slane %v13104_v30, 2  ;;  %v2385_v14 = vrot.slane %v2121_v58, 2  ;;  %v5798_v27 = vmax.f32 %v5622_v50, %v5700_v25  ;;  %v5799_v17 = vmax.f32 %v5623_v31, %v5702_v53 }
 0x440   : > { %7301 = vrcp.f32 %v13106_v43  ;;  %v6502_v32 = vand.u32 2147483648, %v13106_v43  ;;  %v2382_v51 = vsel %vm2218_vm15, %v2380_v56, %v2381_v4  ;;  %v6500_v3 = vand.u32 2147483647, %v13106_v43 }
 0x441   : > { %v5922_v24 = vrot.slane %v5798_v27, 2  ;;  %v5923_v52 = vrot.slane %v5799_v17, 2  ;;  %v2384_v61 = vsel %vm2218_vm15, %v2381_v4, %v2383_v60  ;;  %v5925_v7 = vrot.slane %v5800_v47, 2 }
 0x442   : > { %v2386_v25 = vsel %vm2218_vm15, %v2383_v60, %v2385_v14  ;;  %v2575_v53 = vmax.f32 %v2118_v21, %v2382_v51  ;;  %v2576_v22 = vmax.f32 %v2119_v57, %v2384_v61  ;;  %v13120_v12 = vadd.f32 %v4947_v15, %v3411_v42  ;;  %v14406_v15 = vld [vmem:[#allocation61_spill] sm:$0xff] }
 0x443   : > { %v7300_v16 = vpop.eup %7299  ;;  %v5924_v49 = vsel %vm2218_vm15, %v5922_v24, %v5923_v52  ;;  %v6503_v40 = vor.u32 1.1754944e-38, %v6502_v32  ;;  %vm6496_vm13 = vweird.f32 %v13106_v43  ;;  %v5926_v19 = vsel %vm2218_vm15, %v5923_v52, %v5925_v7  ;;  %v14408_v51 = vld [vmem:[#allocation21_spill] sm:$0xff]  ;;  %v14409_v52 = vld [vmem:[#allocation39_spill] sm:$0xff]  ;;  %v13172_v7 = vpop.f32.mrf.mxu2 }
 0x444   : > { %v13122_v1 = vadd.f32 1.0, %v7300_v16  ;;  %7079 = vmatmul.msk.f32.gmra.mxu0 %vm1109_vm2, %v5924_v49  ;;  %v2740_v59 = vrot.slane %v13066_v28, 4  ;;  %v2741_v10 = vrot.slane %v13075_v2, 4  ;;  %v2743_v33 = vrot.slane %v13077_v8, 4 }
 0x445   : > { %v2577_v54 = vmax.f32 %v13104_v30, %v2386_v25  ;;  %v2578_v57 = vmax.f32 %v2121_v58, %v2385_v14  ;;  %vm13134_vm4 = vcmp.eq.f32.partialorder %v6500_v3, 8.507059e+37  ;;  %v2745_v50 = vrot.slane %v13081_v0, 4  ;;  %v13153_v0 = vpop.f32.mrf.mxu3 }
 0x446   : > { %v7302_v21 = vpop.eup %7301  ;;  %7303 = vrcp.f32 %v13122_v1  ;;  %v6516_v36 = vand.u32 2147483648, %v13122_v1  ;;  %v6514_v28 = vand.u32 2147483647, %v13122_v1  ;;  %v2742_v2 = vsel %vm384_vm0, %v2740_v59, %v2741_v10 }
 0x447   : > { %v6492_v39 = vmul.f32 %v7302_v21, %v13106_v43  ;;  %v2744_v8 = vsel %vm384_vm0, %v2741_v10, %v2743_v33  ;;  %vm6497_vm1 = vweird.f32 %v7302_v21  ;;  %v2935_v31 = vmax.f32 %v2575_v53, %v2742_v2 }
 0x448   : > { %v13141_v13 = vor.u32 1.1754944e-38, %v6516_v36  ;;  %v2936_v58 = vmax.f32 %v2576_v22, %v2744_v8  ;;  %v3545_v47 = vmax.f32 %v12758_v11, %v12978_v41  ;;  %v3546_v56 = vmax.f32 %v12770_v26, %v12980_v5  ;;  %v14407_v41 = vld [vmem:[#allocation16_spill] sm:$0xff]  ;;  %v13158_v5 = vpop.f32.mrf.mxu1  ;;  %vm6498_vm8 = vmor %vm6496_vm13, %vm6497_vm1 }
 0x449   : > { %v6493_v30 = vsub.f32 1.0, %v6492_v39  ;;  %v2746_v4 = vsel %vm384_vm0, %v2743_v33, %v2745_v50  ;;  %v2938_v60 = vmax.f32 %v2578_v57, %v2745_v50  ;;  %v3547_v14 = vmax.f32 %v12790_v55, %v12987_v6 }
 0x44a   : > { %v3548_v27 = vmax.f32 %v12774_v37, %v12995_v18  ;;  %vm6510_vm7 = vweird.f32 %v13122_v1  ;;  %v2937_v42 = vmax.f32 %v2577_v54, %v2746_v4  ;;  %v3625_v11 = vmax.f32 %v14406_v15, %v3545_v47  ;;  %v14413_v15 = vld [vmem:[#allocation24_spill] sm:$0xff] }
 0x44b   : > { %v6494_v17 = vmul.f32 %v7302_v21, %v6493_v30  ;;  %v3626_v32 = vmax.f32 %v14407_v41, %v3546_v56  ;;  %v3627_v24 = vmax.f32 %v14408_v51, %v3547_v14  ;;  %v5081_v37 = vmax.f32 %v12866_v29, %v13056_v46 }
 0x44c   : > { %v7304_v26 = vpop.eup %7303  ;;  %v3628_v55 = vmax.f32 %v14409_v52, %v3548_v27  ;;  %v5082_v6 = vmax.f32 %v12868_v62, %v13068_v45  ;;  %7080 = vmatmul.msk.f32.gmra.mxu0 %vm1109_vm2, %v5926_v19  ;;  %vm13168_vm3 = vcmp.eq.f32.partialorder %v6514_v28, 8.507059e+37  ;;  %v3705_v16 = vmax.f32 %v3625_v11, %v2935_v31 }
 0x44d   : > { %v6495_v18 = vadd.f32 %v7302_v21, %v6494_v17  ;;  %v6506_v3 = vmul.f32 %v7304_v26, %v13122_v1  ;;  %vm6511_vm5 = vweird.f32 %v7304_v26  ;;  %v3706_v29 = vmax.f32 %v3626_v32, %v2936_v58  ;;  %v4953_v4 = vpop.f32.mrf.mxu3  ;;  %v14412_v17 = vld [vmem:[#allocation64_spill] sm:$0xff] }
 0x44e   : > { %v3707_v46 = vmax.f32 %v3627_v24, %v2937_v42  ;;  %v3708_v62 = vmax.f32 %v3628_v55, %v2938_v60  ;;  %v5083_v45 = vmax.f32 %v12870_v48, %v13070_v35  ;;  %v3922_v22 = vrot.slane %v3705_v16, 1  ;;  %vm6512_vm11 = vmor %vm6510_vm7, %vm6511_vm5  ;;  %v6062_v60 = vpop.f32.mrf.mxu0  ;;  %v13204_v24 = vpop.f32.mrf.mxu2 }
 0x44f   : > { %v6499_v25 = vsel %vm6498_vm8, %v7302_v21, %v6495_v18  ;;  %v6507_v53 = vsub.f32 1.0, %v6506_v3  ;;  %v4562_v49 = vrot.slane %v3705_v16, 4  ;;  %v3923_v59 = vrot.slane %v3706_v29, 1 }
 0x450   : > { %v6504_v19 = vsel %vm13134_vm4, %v6503_v40, %v6499_v25  ;;  %v3925_v10 = vrot.slane %v3707_v46, 1  ;;  %v3927_v33 = vrot.slane %v3708_v62, 1  ;;  %v4563_v54 = vrot.slane %v3706_v29, 4  ;;  %v13192_v14 = vpop.f32.mrf.mxu1 }
 0x451   : > { %v6770_v43 = vmul.f32 %v6504_v19, %v13050_v38  ;;  %v6508_v36 = vmul.f32 %v7304_v26, %v6507_v53  ;;  %v4565_v57 = vrot.slane %v3707_v46, 4  ;;  %v3924_v39 = vsel %vm1761_vm14, %v3922_v22, %v3923_v59 }
 0x452   : > { %v3926_v48 = vsel %vm1761_vm14, %v3923_v59, %v3925_v10  ;;  %v3928_v35 = vsel %vm1761_vm14, %v3925_v10, %v3927_v33  ;;  %v4088_v21 = vmax.f32 %v3708_v62, %v3927_v33  ;;  %v4085_v9 = vmax.f32 %v3705_v16, %v3924_v39 }
 0x453   : > { %6803 = vst.msk [vmem:[%s11825_s23 + $0x68] sm:$0xff] %vm6789_vm6, %v6770_v43  ;;  %v6509_v28 = vadd.f32 %v7304_v26, %v6508_v36  ;;  %v4086_v40 = vmax.f32 %v3706_v29, %v3926_v48  ;;  %v4087_v2 = vmax.f32 %v3707_v46, %v3928_v35  ;;  %v4564_v8 = vsel %vm384_vm0, %v4562_v49, %v4563_v54 }
 0x454   : > { %v4307_v38 = vrot.slane %v4088_v21, 2  ;;  %v4566_v50 = vsel %vm384_vm0, %v4563_v54, %v4565_v57  ;;  %v4567_v31 = vrot.slane %v3708_v62, 4  ;;  %v4302_v58 = vrot.slane %v4085_v9, 2 }
 0x455   : > { %v6513_v30 = vsel %vm6512_vm11, %v7304_v26, %v6509_v28  ;;  %v4303_v47 = vrot.slane %v4086_v40, 2  ;;  %v4305_v56 = vrot.slane %v4087_v2, 2  ;;  %v5129_v42 = vmax.f32 %v14412_v17, %v5081_v37  ;;  %v4956_v59 = vpop.f32.mrf.mxu3 }
 0x456   : > { %v6518_v1 = vsel %vm13168_vm3, %v13141_v13, %v6513_v30  ;;  %v4568_v27 = vsel %vm384_vm0, %v4565_v57, %v4567_v31  ;;  %v5130_v11 = vmax.f32 %v14413_v15, %v5082_v6  ;;  %v5131_v13 = vmax.f32 %v12820_v63, %v5083_v45  ;;  %v6065_v10 = vpop.f32.mrf.mxu0  ;;  %v3422_v35 = vpop.f32.mrf.mxu2 }
 0x457   : > { %v6771_v41 = vmul.f32 %v6518_v1, %v13085_v23  ;;  %v4304_v32 = vsel %vm2218_vm15, %v4302_v58, %v4303_v47  ;;  %v4306_v26 = vsel %vm2218_vm15, %v4303_v47, %v4305_v56  ;;  %v4308_v51 = vsel %vm2218_vm15, %v4305_v56, %v4307_v38 }
 0x458   : > { %v4426_v52 = vmax.f32 %v4085_v9, %v4304_v32  ;;  %v4427_v55 = vmax.f32 %v4086_v40, %v4306_v26  ;;  %v4428_v18 = vmax.f32 %v4087_v2, %v4308_v51  ;;  %v6128_v37 = vadd.f32 %v6062_v60, %v13120_v12  ;;  %v3210_v33 = vpop.f32.mrf.mxu1 }
 0x459   : > { %6804 = vst.msk [vmem:[%s11825_s23 + $0x70] sm:$0xff] %vm6789_vm6, %v6771_v41  ;;  %v3414_v62 = vadd.f32 %v13117_v44, %v13112_v20  ;;  %v3417_v38 = vadd.f32 %v13172_v7, %v13158_v5 }
 0x45a   : > { %v4686_v6 = vmax.f32 %v4426_v52, %v4564_v8  ;;  %v4687_v3 = vmax.f32 %v4427_v55, %v4566_v50  ;;  %v4688_v23 = vmax.f32 %v4428_v18, %v4568_v27  ;;  %v13211_v61 = vadd.f32 %v12861_v34, %v6128_v37 }
 0x45b   : > { %v5014_v43 = vadd.f32 %v13153_v0, %v3414_v62  ;;  %v5015_v56 = vadd.f32 %v4953_v4, %v3417_v38  ;;  %v3420_v52 = vadd.f32 %v13204_v24, %v13192_v14 }
 0x45c   : > { %v5177_v16 = vmax.f32 %v5129_v42, %v4686_v6  ;;  %v5178_v29 = vmax.f32 %v5130_v11, %v4687_v3  ;;  %v5179_v46 = vmax.f32 %v5131_v13, %v4688_v23  ;;  %v6196_v25 = vsub.f32 0.0, %v13211_v61 }
 0x45d   : > { %v6129_v28 = vadd.f32 %v6065_v10, %v5014_v43  ;;  %v4959_v60 = vpop.f32.mrf.mxu3  ;;  %v5016_v13 = vadd.f32 %v4956_v59, %v3420_v52 }
 0x45e   : > { %v5303_v53 = vrot.slane %v5177_v16, 1  ;;  %v5304_v63 = vrot.slane %v5178_v29, 1  ;;  %v5306_v45 = vrot.slane %v5179_v46, 1  ;;  %v5703_v22 = vrot.slane %v5177_v16, 4  ;;  %v6068_v1 = vpop.f32.mrf.mxu0  ;;  %v3425_v51 = vpop.f32.mrf.mxu2 }
 0x45f   : > { %v5704_v49 = vrot.slane %v5178_v29, 4  ;;  %v5706_v12 = vrot.slane %v5179_v46, 4  ;;  %v6243_v19 = vmul.f32 1.442695, %v6196_v25  ;;  %v13222_v0 = vadd.f32 %v12861_v34, %v6129_v28 }
 0x460   : > { %v5305_v36 = vsel %vm1761_vm14, %v5303_v53, %v5304_v63  ;;  %v5307_v54 = vsel %vm1761_vm14, %v5304_v63, %v5306_v45  ;;  %v5403_v57 = vmax.f32 %v5179_v46, %v5306_v45  ;;  %v6130_v32 = vadd.f32 %v6068_v1, %v5015_v56  ;;  %v3213_v5 = vpop.f32.mrf.mxu1 }
 0x461   : > { %v5401_v20 = vmax.f32 %v5177_v16, %v5305_v36  ;;  %v5402_v44 = vmax.f32 %v5178_v29, %v5307_v54  ;;  %v5705_v39 = vsel %vm384_vm0, %v5703_v22, %v5704_v49  ;;  %v5707_v48 = vsel %vm384_vm0, %v5704_v49, %v5706_v12 }
 0x462   : > { %v5530_v21 = vrot.slane %v5403_v57, 2  ;;  %7305 = vpow2.f32 %v6243_v19  ;;  %v6197_v47 = vsub.f32 0.0, %v13222_v0  ;;  %v13234_v18 = vadd.f32 %v12861_v34, %v6130_v32 }
 0x463   : > { %v5527_v9 = vrot.slane %v5401_v20, 2  ;;  %v5528_v40 = vrot.slane %v5402_v44, 2  ;;  %v3423_v25 = vadd.f32 %v3422_v35, %v3210_v33  ;;  %v3426_v28 = vadd.f32 %v3425_v51, %v3213_v5 }
 0x464   : > { %v5627_v2 = vmax.f32 %v5403_v57, %v5530_v21  ;;  %v6245_v11 = vmul.f32 1.442695, %v6197_v47  ;;  %v6198_v37 = vsub.f32 0.0, %v13234_v18 }
 0x465   : > { %v5529_v8 = vsel %vm2218_vm15, %v5527_v9, %v5528_v40  ;;  %v5531_v50 = vsel %vm2218_vm15, %v5528_v40, %v5530_v21  ;;  %v4962_v6 = vpop.f32.mrf.mxu3  ;;  %v5017_v49 = vadd.f32 %v4959_v60, %v3423_v25 }
 0x466   : > { %v5625_v31 = vmax.f32 %v5401_v20, %v5529_v8  ;;  %v5626_v30 = vmax.f32 %v5402_v44, %v5531_v50  ;;  %v5803_v58 = vmax.f32 %v5627_v2, %v5706_v12  ;;  %7307 = vpow2.f32 %v6245_v11  ;;  %v6071_v3 = vpop.f32.mrf.mxu0  ;;  %v3428_v12 = vpop.f32.mrf.mxu2 }
 0x467   : > { %v6247_v16 = vmul.f32 1.442695, %v6198_v37  ;;  %v6131_v29 = vadd.f32 %v6071_v3, %v5016_v13  ;;  %v5018_v50 = vadd.f32 %v4962_v6, %v3426_v28 }
 0x468   : > { %v7306_v27 = vpop.eup %7305  ;;  %v5801_v17 = vmax.f32 %v5625_v31, %v5705_v39  ;;  %v5802_v42 = vmax.f32 %v5626_v30, %v5707_v48  ;;  %v5930_v15 = vrot.slane %v5803_v58, 2  ;;  %v3216_v53 = vpop.f32.mrf.mxu1 }
 0x469   : > { %v6292_v41 = vadd.f32 1.0, %v7306_v27  ;;  %v13239_v24 = vadd.f32 %v12861_v34, %v6131_v29 }
 0x46a   : > { %v5927_v7 = vrot.slane %v5801_v17, 2  ;;  %v5928_v26 = vrot.slane %v5802_v42, 2 }
 0x46b   : > { %7309 = vrcp.f32 %v6292_v41  ;;  %v6199_v45 = vsub.f32 0.0, %v13239_v24  ;;  %v6530_v22 = vand.u32 2147483648, %v6292_v41  ;;  %v6528_v59 = vand.u32 2147483647, %v6292_v41 }
 0x46c   : > { %v5929_v4 = vsel %vm2218_vm15, %v5927_v7, %v5928_v26  ;;  %v5931_v55 = vsel %vm2218_vm15, %v5928_v26, %v5930_v15  ;;  %v7308_v23 = vpop.eup %7307  ;;  %7311 = vpow2.f32 %v6247_v16  ;;  %vm6524_vm14 = vweird.f32 %v6292_v41 }
 0x46d   : > { %7081 = vmatmul.msk.f32.gmra.mxu0 %vm1109_vm2, %v5929_v4  ;;  %v6293_v62 = vadd.f32 1.0, %v7308_v23  ;;  %v6249_v10 = vmul.f32 1.442695, %v6199_v45  ;;  %v6531_v20 = vor.u32 1.1754944e-38, %v6530_v22  ;;  %v4965_v39 = vpop.f32.mrf.mxu3  ;;  %v3429_v4 = vadd.f32 %v3428_v12, %v3216_v53 }
 0x46e   : > { %v6074_v43 = vpop.f32.mrf.mxu0  ;;  %v3431_v1 = vpop.f32.mrf.mxu2 }
 0x46f   : > { %7313 = vrcp.f32 %v6293_v62  ;;  %v6132_v33 = vadd.f32 %v6074_v43, %v5017_v49  ;;  %v6544_v8 = vand.u32 2147483648, %v6293_v62  ;;  %vm6538_vm10 = vweird.f32 %v6293_v62 }
 0x470   : > { %7315 = vpow2.f32 %v6249_v10  ;;  %v13251_v30 = vpop.f32.mrf.mxu1  ;;  %v5019_v16 = vadd.f32 %v4965_v39, %v3429_v4 }
 0x471   : > { %v7310_v46 = vpop.eup %7309  ;;  %v13246_v21 = vadd.f32 %v12861_v34, %v6132_v33  ;;  %v6542_v34 = vand.u32 2147483647, %v6293_v62  ;;  %v6545_v42 = vor.u32 1.1754944e-38, %v6544_v8 }
 0x472   : > { %v6520_v14 = vmul.f32 %v7310_v46, %v6292_v41  ;;  %vm6525_vm0 = vweird.f32 %v7310_v46  ;;  %v7312_v36 = vpop.eup %7311  ;;  %v13262_v41 = vld [vmem:[%s13380_s4] ss:$0 sm:$0xff] }
 0x473   : > { %vm6526_vm15 = vmor %vm6524_vm14, %vm6525_vm0  ;;  %v13243_v44 = vadd.f32 1.0, %v7312_v36  ;;  %v6200_v38 = vsub.f32 0.0, %v13246_v21  ;;  %vm6543_vm13 = vcmp.eq.f32.partialorder %v6542_v34, 8.507059e+37 }
 0x474   : > { %v6521_v63 = vsub.f32 1.0, %v6520_v14 }
 0x475   : > { %7082 = vmatmul.msk.f32.gmra.mxu0 %vm1109_vm2, %v5931_v55  ;;  %v7314_v57 = vpop.eup %7313  ;;  %vm6529_vm2 = vcmp.eq.f32.partialorder %v6528_v59, 8.507059e+37  ;;  %7317 = vrcp.f32 %v13243_v44  ;;  %v6251_v47 = vmul.f32 1.442695, %v6200_v38  ;;  %v4968_v7 = vpop.f32.mrf.mxu3  ;;  %v6558_v55 = vand.u32 2147483648, %v13243_v44 }
 0x476   : > { %v6522_v19 = vmul.f32 %v7310_v46, %v6521_v63  ;;  %v6534_v35 = vmul.f32 %v7314_v57, %v6293_v62  ;;  %v7316_v31 = vpop.eup %7315  ;;  %vm6539_vm9 = vweird.f32 %v7314_v57  ;;  %v6077_v60 = vpop.f32.mrf.mxu0  ;;  %v6556_v6 = vand.u32 2147483647, %v13243_v44 }
 0x477   : > { %v13255_v56 = vadd.f32 1.0, %v7316_v31  ;;  %7319 = vpow2.f32 %v6251_v47  ;;  %vm6540_vm12 = vmor %vm6538_vm10, %vm6539_vm9  ;;  %vm6552_vm1 = vweird.f32 %v13243_v44  ;;  %v6559_v25 = vor.u32 1.1754944e-38, %v6558_v55  ;;  %v3434_v53 = vpop.f32.mrf.mxu2 }
 0x478   : > { %v6523_v54 = vadd.f32 %v7310_v46, %v6522_v19  ;;  %v6535_v2 = vsub.f32 1.0, %v6534_v35  ;;  %vm6557_vm5 = vcmp.eq.f32.partialorder %v6556_v6, 8.507059e+37 }
 0x479   : > { %7321 = vrcp.f32 %v13255_v56  ;;  %v6570_v12 = vand.u32 2147483647, %v13255_v56  ;;  %v6572_v19 = vand.u32 2147483648, %v13255_v56  ;;  %vm6566_vm8 = vweird.f32 %v13255_v56 }
 0x47a   : > { %v6527_v48 = vsel %vm6526_vm15, %v7310_v46, %v6523_v54  ;;  %v6536_v58 = vmul.f32 %v7314_v57, %v6535_v2 }
 0x47b   : > { %v6532_v9 = vsel %vm6529_vm2, %v6531_v20, %v6527_v48  ;;  %v7318_v17 = vpop.eup %7317  ;;  %v6573_v39 = vor.u32 1.1754944e-38, %v6572_v19  ;;  %vm6571_vm0 = vcmp.eq.f32.partialorder %v6570_v12, 8.507059e+37 }
 0x47c   : > { %v6772_v40 = vmul.f32 %v6532_v9, %v13211_v61  ;;  %v6537_v27 = vadd.f32 %v7314_v57, %v6536_v58  ;;  %v6133_v61 = vadd.f32 %v6077_v60, %v5018_v50  ;;  %v6548_v11 = vmul.f32 %v7318_v17, %v13243_v44 }
 0x47d   : > { %v7320_v13 = vpop.eup %7319  ;;  %vm6553_vm4 = vweird.f32 %v7318_v17  ;;  %v4971_v36 = vpop.f32.mrf.mxu3  ;;  %v3432_v44 = vadd.f32 %v3431_v1, %v13251_v30 }
 0x47e   : > { %6805 = vst.msk [vmem:[%s11825_s23 + $0x78] sm:$0xff] %vm6789_vm6, %v6772_v40  ;;  %v6541_v15 = vsel %vm6540_vm12, %v7314_v57, %v6537_v27  ;;  %v13265_v32 = vadd.f32 %v13262_v41, %v6133_v61  ;;  %v6549_v51 = vsub.f32 1.0, %v6548_v11  ;;  %v13273_v29 = vadd.f32 1.0, %v7320_v13  ;;  %v6080_v46 = vpop.f32.mrf.mxu0  ;;  %vm6554_vm7 = vmor %vm6552_vm1, %vm6553_vm4 }
 0x47f   : > { %v6546_v5 = vsel %vm6543_vm13, %v6545_v42, %v6541_v15  ;;  %v7322_v23 = vpop.eup %7321  ;;  %v6134_v22 = vadd.f32 %v6080_v46, %v5019_v16  ;;  %v5020_v2 = vadd.f32 %v4968_v7, %v3432_v44  ;;  %v3437_v58 = vpop.f32.mrf.mxu2 }
 0x480   : > { %v6773_v26 = vmul.f32 %v6546_v5, %v13222_v0  ;;  %v6201_v52 = vsub.f32 0.0, %v13265_v32  ;;  %v6550_v37 = vmul.f32 %v7318_v17, %v6549_v51  ;;  %v3222_v0 = vpop.f32.mrf.mxu1  ;;  %v6562_v14 = vmul.f32 %v7322_v23, %v13255_v56 }
 0x481   : > { %vm6567_vm3 = vweird.f32 %v7322_v23  ;;  %v13282_v43 = vadd.f32 %v13262_v41, %v6134_v22  ;;  %v6586_v31 = vand.u32 2147483648, %v13273_v29  ;;  %v6584_v47 = vand.u32 2147483647, %v13273_v29 }
 0x482   : > { %6806 = vst.msk [vmem:[%s11825_s23 + $0x80] sm:$0xff] %vm6789_vm6, %v6773_v26  ;;  %v6253_v3 = vmul.f32 1.442695, %v6201_v52  ;;  %v6551_v62 = vadd.f32 %v7318_v17, %v6550_v37  ;;  %v6563_v45 = vsub.f32 1.0, %v6562_v14  ;;  %vm6568_vm11 = vmor %vm6566_vm8, %vm6567_vm3  ;;  %v3435_v60 = vadd.f32 %v3434_v53, %v3222_v0 }
 0x483   : > { %v6202_v57 = vsub.f32 0.0, %v13282_v43  ;;  %vm6580_vm15 = vweird.f32 %v13273_v29  ;;  %v6587_v27 = vor.u32 1.1754944e-38, %v6586_v31  ;;  %vm6585_vm9 = vcmp.eq.f32.partialorder %v6584_v47, 8.507059e+37 }
 0x484   : > { %7323 = vpow2.f32 %v6253_v3  ;;  %v6555_v63 = vsel %vm6554_vm7, %v7318_v17, %v6551_v62  ;;  %v6564_v10 = vmul.f32 %v7322_v23, %v6563_v45  ;;  %v5021_v5 = vadd.f32 %v4971_v36, %v3435_v60 }
 0x485   : > { %7325 = vrcp.f32 %v13273_v29  ;;  %v6560_v49 = vsel %vm6557_vm5, %v6559_v25, %v6555_v63  ;;  %v6255_v9 = vmul.f32 1.442695, %v6202_v57  ;;  %v4974_v61 = vpop.f32.mrf.mxu3 }
 0x486   : > { %v6774_v59 = vmul.f32 %v6560_v49, %v13234_v18  ;;  %v6565_v33 = vadd.f32 %v7322_v23, %v6564_v10  ;;  %v6083_v48 = vpop.f32.mrf.mxu0 }
 0x487   : > { %v6135_v30 = vadd.f32 %v6083_v48, %v5020_v2 }
 0x488   : > { %6807 = vst.msk [vmem:[%s11825_s23 + $0x88] sm:$0xff] %vm6789_vm6, %v6774_v59  ;;  %v6569_v35 = vsel %vm6568_vm11, %v7322_v23, %v6565_v33  ;;  %v3225_v38 = vpop.f32.mrf.mxu1 }
 0x489   : > { %v6574_v40 = vsel %vm6571_vm0, %v6573_v39, %v6569_v35  ;;  %v13296_v56 = vadd.f32 %v13262_v41, %v6135_v30 }
 0x48a   : > { %v7324_v54 = vpop.eup %7323  ;;  %v6775_v8 = vmul.f32 %v6574_v40, %v13239_v24 }
 0x48b   : > { %v7326_v20 = vpop.eup %7325  ;;  %v6297_v18 = vadd.f32 1.0, %v7324_v54  ;;  %v6203_v17 = vsub.f32 0.0, %v13296_v56 }
 0x48c   : > { %v6576_v28 = vmul.f32 %v7326_v20, %v13273_v29  ;;  %6808 = vst.msk [vmem:[%s11825_s23 + $0x90] sm:$0xff] %vm6789_vm6, %v6775_v8  ;;  %vm6581_vm14 = vweird.f32 %v7326_v20  ;;  %v3440_v29 = vpop.f32.mrf.mxu2 }
 0x48d   : > { %7327 = vrcp.f32 %v6297_v18  ;;  %vm6582_vm2 = vmor %vm6580_vm15, %vm6581_vm14  ;;  %v6257_v51 = vmul.f32 1.442695, %v6203_v17  ;;  %v6598_v37 = vand.u32 2147483647, %v6297_v18  ;;  %v6600_v6 = vand.u32 2147483648, %v6297_v18  ;;  %v4977_v22 = vpop.f32.mrf.mxu3 }
 0x48e   : > { %v6577_v50 = vsub.f32 1.0, %v6576_v28  ;;  %7329 = vpow2.f32 %v6255_v9  ;;  %v6086_v52 = vpop.f32.mrf.mxu0  ;;  %vm6594_vm12 = vweird.f32 %v6297_v18 }
 0x48f   : > { %v6136_v13 = vadd.f32 %v6086_v52, %v5021_v5  ;;  %v6601_v62 = vor.u32 1.1754944e-38, %v6600_v6  ;;  %vm6599_vm4 = vcmp.eq.f32.partialorder %v6598_v37, 8.507059e+37 }
 0x490   : > { %v6578_v34 = vmul.f32 %v7326_v20, %v6577_v50  ;;  %v3228_v3 = vpop.f32.mrf.mxu1 }
 0x491   : > { %v13304_v16 = vadd.f32 %v13262_v41, %v6136_v13  ;;  %v3441_v33 = vadd.f32 %v3440_v29, %v3228_v3 }
 0x492   : > { %v6579_v1 = vadd.f32 %v7326_v20, %v6578_v34 }
 0x493   : > { %v7328_v24 = vpop.eup %7327  ;;  %v6204_v0 = vsub.f32 0.0, %v13304_v16  ;;  %v5023_v28 = vadd.f32 %v4977_v22, %v3441_v33 }
 0x494   : > { %v7330_v42 = vpop.eup %7329  ;;  %v6583_v15 = vsel %vm6582_vm2, %v7326_v20, %v6579_v1  ;;  %v6590_v11 = vmul.f32 %v7328_v24, %v6297_v18  ;;  %vm6595_vm10 = vweird.f32 %v7328_v24  ;;  %v3443_v35 = vpop.f32.mrf.mxu2 }
 0x495   : > { %v6588_v7 = vsel %vm6585_vm9, %v6587_v27, %v6583_v15  ;;  %v6298_v26 = vadd.f32 1.0, %v7330_v42  ;;  %vm6596_vm13 = vmor %vm6594_vm12, %vm6595_vm10  ;;  %v6259_v25 = vmul.f32 1.442695, %v6204_v0  ;;  %v4980_v34 = vpop.f32.mrf.mxu3 }
 0x496   : > { %v6776_v4 = vmul.f32 %v6588_v7, %v13246_v21  ;;  %v6591_v55 = vsub.f32 1.0, %v6590_v11  ;;  %v3438_v21 = vadd.f32 %v3437_v58, %v3225_v38  ;;  %v6089_v49 = vpop.f32.mrf.mxu0 }
 0x497   : > { %7331 = vrcp.f32 %v6298_v26  ;;  %v6614_v57 = vand.u32 2147483648, %v6298_v26  ;;  %v6612_v39 = vand.u32 2147483647, %v6298_v26  ;;  %vm6608_vm7 = vweird.f32 %v6298_v26 }
 0x498   : > { %6809 = vst.msk [vmem:[%s11825_s23 + $0x98] sm:$0xff] %vm6789_vm6, %v6776_v4  ;;  %v6592_v23 = vmul.f32 %v7328_v24, %v6591_v55  ;;  %7333 = vpow2.f32 %v6257_v51  ;;  %v5022_v45 = vadd.f32 %v4974_v61, %v3438_v21  ;;  %v3231_v20 = vpop.f32.mrf.mxu1 }
 0x499   : > { %7335 = vpow2.f32 %v6259_v25  ;;  %v6615_v40 = vor.u32 1.1754944e-38, %v6614_v57  ;;  %vm6613_vm3 = vcmp.eq.f32.partialorder %v6612_v39, 8.507059e+37  ;;  %v3444_v27 = vadd.f32 %v3443_v35, %v3231_v20 }
 0x49a   : > { %v6593_v46 = vadd.f32 %v7328_v24, %v6592_v23  ;;  %v6137_v36 = vadd.f32 %v6089_v49, %v5022_v45 }
 0x49b   : > { %v5024_v7 = vadd.f32 %v4980_v34, %v3444_v27 }
 0x49c   : > { %v6597_v14 = vsel %vm6596_vm13, %v7328_v24, %v6593_v46  ;;  %v13311_v18 = vadd.f32 %v13262_v41, %v6137_v36  ;;  %v3446_v51 = vpop.f32.mrf.mxu2 }
 0x49d   : > { %v7332_v53 = vpop.eup %7331  ;;  %v6602_v63 = vsel %vm6599_vm4, %v6601_v62, %v6597_v14  ;;  %v4983_v62 = vpop.f32.mrf.mxu3 }
 0x49e   : > { %v7334_v12 = vpop.eup %7333  ;;  %v6777_v19 = vmul.f32 %v6602_v63, %v13265_v32  ;;  %v6604_v59 = vmul.f32 %v7332_v53, %v6298_v26  ;;  %vm6609_vm1 = vweird.f32 %v7332_v53  ;;  %v6205_v9 = vsub.f32 0.0, %v13311_v18  ;;  %v6092_v38 = vpop.f32.mrf.mxu0 }
 0x49f   : > { %v6299_v10 = vadd.f32 1.0, %v7334_v12  ;;  %v7336_v48 = vpop.eup %7335  ;;  %vm6610_vm5 = vmor %vm6608_vm7, %vm6609_vm1  ;;  %v6138_v31 = vadd.f32 %v6092_v38, %v5023_v28 }
 0x4a0   : > { %6810 = vst.msk [vmem:[%s11825_s23 + $0xa0] sm:$0xff] %vm6789_vm6, %v6777_v19  ;;  %v6605_v54 = vsub.f32 1.0, %v6604_v59  ;;  %v6300_v2 = vadd.f32 1.0, %v7336_v48  ;;  %v6261_v50 = vmul.f32 1.442695, %v6205_v9  ;;  %v3234_v42 = vpop.f32.mrf.mxu1 }
 0x4a1   : > { %7337 = vrcp.f32 %v6299_v10  ;;  %v13316_v1 = vadd.f32 %v13262_v41, %v6138_v31  ;;  %v6628_v61 = vand.u32 2147483648, %v6299_v10  ;;  %v6626_v11 = vand.u32 2147483647, %v6299_v10 }
 0x4a2   : > { %v6606_v44 = vmul.f32 %v7332_v53, %v6605_v54  ;;  %7339 = vrcp.f32 %v6300_v2  ;;  %vm6622_vm11 = vweird.f32 %v6299_v10  ;;  %v3447_v13 = vadd.f32 %v3446_v51, %v3234_v42 }
 0x4a3   : > { %7341 = vpow2.f32 %v6261_v50  ;;  %v6206_v17 = vsub.f32 0.0, %v13316_v1  ;;  %v6629_v37 = vor.u32 1.1754944e-38, %v6628_v61  ;;  %vm6627_vm14 = vcmp.eq.f32.partialorder %v6626_v11, 8.507059e+37 }
 0x4a4   : > { %v6607_v32 = vadd.f32 %v7332_v53, %v6606_v44  ;;  %v6640_v0 = vand.u32 2147483647, %v6300_v2  ;;  %v6642_v21 = vand.u32 2147483648, %v6300_v2  ;;  %vm6636_vm2 = vweird.f32 %v6300_v2  ;;  %v3449_v48 = vpop.f32.mrf.mxu2 }
 0x4a5   : > { %v6263_v26 = vmul.f32 1.442695, %v6206_v17  ;;  %v5025_v22 = vadd.f32 %v4983_v62, %v3447_v13 }
 0x4a6   : > { %v6611_v8 = vsel %vm6610_vm5, %v7332_v53, %v6607_v32  ;;  %v6643_v12 = vor.u32 1.1754944e-38, %v6642_v21  ;;  %vm6641_vm10 = vcmp.eq.f32.partialorder %v6640_v0, 8.507059e+37  ;;  %v4986_v32 = vpop.f32.mrf.mxu3 }
 0x4a7   : > { %v7338_v30 = vpop.eup %7337  ;;  %v6616_v58 = vsel %vm6613_vm3, %v6615_v40, %v6611_v8  ;;  %7343 = vpow2.f32 %v6263_v26 }
 0x4a8   : > { %v6778_v47 = vmul.f32 %v6616_v58, %v13282_v43  ;;  %v6618_v60 = vmul.f32 %v7338_v30, %v6299_v10  ;;  %vm6623_vm8 = vweird.f32 %v7338_v30  ;;  %v7340_v5 = vpop.eup %7339  ;;  %v6095_v43 = vpop.f32.mrf.mxu0 }
 0x4a9   : > { %v6632_v4 = vmul.f32 %v7340_v5, %v6300_v2  ;;  %v7342_v55 = vpop.eup %7341  ;;  %vm6624_vm0 = vmor %vm6622_vm11, %vm6623_vm8  ;;  %v6139_v6 = vadd.f32 %v6095_v43, %v5024_v7  ;;  %vm6637_vm15 = vweird.f32 %v7340_v5  ;;  %v3237_v20 = vpop.f32.mrf.mxu1 }
 0x4aa   : > { %6811 = vst.msk [vmem:[%s11825_s23 + $0xa8] sm:$0xff] %vm6789_vm6, %v6778_v47  ;;  %v6619_v24 = vsub.f32 1.0, %v6618_v60  ;;  %v6301_v29 = vadd.f32 1.0, %v7342_v55  ;;  %vm6638_vm9 = vmor %vm6636_vm2, %vm6637_vm15  ;;  %v3450_v9 = vadd.f32 %v3449_v48, %v3237_v20 }
 0x4ab   : > { %v6633_v23 = vsub.f32 1.0, %v6632_v4  ;;  %v13322_v14 = vadd.f32 %v13262_v41, %v6139_v6 }
 0x4ac   : > { %v6620_v15 = vmul.f32 %v7338_v30, %v6619_v24  ;;  %7345 = vrcp.f32 %v6301_v29  ;;  %v6656_v40 = vand.u32 2147483648, %v6301_v29  ;;  %v6654_v8 = vand.u32 2147483647, %v6301_v29  ;;  %v3452_v51 = vpop.f32.mrf.mxu2 }
 0x4ad   : > { %v6634_v53 = vmul.f32 %v7340_v5, %v6633_v23  ;;  %v6207_v63 = vsub.f32 0.0, %v13322_v14  ;;  %v7344_v49 = vpop.eup %7343  ;;  %v5026_v31 = vadd.f32 %v4986_v32, %v3450_v9  ;;  %vm6650_vm13 = vweird.f32 %v6301_v29 }
 0x4ae   : > { %v6621_v52 = vadd.f32 %v7338_v30, %v6620_v15  ;;  %v6302_v36 = vadd.f32 1.0, %v7344_v49  ;;  %v6657_v60 = vor.u32 1.1754944e-38, %v6656_v40  ;;  %vm6655_vm1 = vcmp.eq.f32.partialorder %v6654_v8, 8.507059e+37  ;;  %v4989_v4 = vpop.f32.mrf.mxu3 }
 0x4af   : > { %v6635_v45 = vadd.f32 %v7340_v5, %v6634_v53  ;;  %v6265_v19 = vmul.f32 1.442695, %v6207_v63 }
 0x4b0   : > { %v6625_v3 = vsel %vm6624_vm0, %v7338_v30, %v6621_v52  ;;  %v6098_v59 = vpop.f32.mrf.mxu0  ;;  %v6668_v42 = vand.u32 2147483647, %v6302_v36  ;;  %v6670_v15 = vand.u32 2147483648, %v6302_v36  ;;  %vm6664_vm5 = vweird.f32 %v6302_v36 }
 0x4b1   : > { %v6630_v46 = vsel %vm6627_vm14, %v6629_v37, %v6625_v3  ;;  %v6639_v10 = vsel %vm6638_vm9, %v7340_v5, %v6635_v45  ;;  %7347 = vpow2.f32 %v6265_v19  ;;  %v3240_v11 = vpop.f32.mrf.mxu1 }
 0x4b2   : > { %v6779_v25 = vmul.f32 %v6630_v46, %v13296_v56  ;;  %v6140_v56 = vadd.f32 %v6098_v59, %v5025_v22  ;;  %v6644_v54 = vsel %vm6641_vm10, %v6643_v12, %v6639_v10  ;;  %v7346_v33 = vpop.eup %7345  ;;  %7349 = vrcp.f32 %v6302_v36 }
 0x4b3   : > { %v6780_v57 = vmul.f32 %v6644_v54, %v13304_v16  ;;  %v6646_v44 = vmul.f32 %v7346_v33, %v6301_v29  ;;  %vm6651_vm12 = vweird.f32 %v7346_v33  ;;  %v3453_v37 = vadd.f32 %v3452_v51, %v3240_v11 }
 0x4b4   : > { %6812 = vst.msk [vmem:[%s11825_s23 + $0xb0] sm:$0xff] %vm6789_vm6, %v6779_v25  ;;  %v13330_v39 = vadd.f32 %v13262_v41, %v6140_v56  ;;  %vm6652_vm4 = vmor %vm6650_vm13, %vm6651_vm12  ;;  %v6671_v6 = vor.u32 1.1754944e-38, %v6670_v15  ;;  %vm6669_vm8 = vcmp.eq.f32.partialorder %v6668_v42, 8.507059e+37 }
 0x4b5   : > { %6813 = vst.msk [vmem:[%s11825_s23 + $0xb8] sm:$0xff] %vm6789_vm6, %v6780_v57  ;;  %v6647_v35 = vsub.f32 1.0, %v6646_v44  ;;  %v5027_v21 = vadd.f32 %v4989_v4, %v3453_v37 }
 0x4b6   : > { %v6208_v28 = vsub.f32 0.0, %v13330_v39 }
 0x4b7   : > { %v7348_v2 = vpop.eup %7347  ;;  %v6648_v38 = vmul.f32 %v7346_v33, %v6647_v35 }
 0x4b8   : > { %v6267_v16 = vmul.f32 1.442695, %v6208_v28  ;;  %v7350_v50 = vpop.eup %7349  ;;  %v6303_v30 = vadd.f32 1.0, %v7348_v2 }
 0x4b9   : > { %v6649_v34 = vadd.f32 %v7346_v33, %v6648_v38  ;;  %v6660_v47 = vmul.f32 %v7350_v50, %v6302_v36  ;;  %vm6665_vm7 = vweird.f32 %v7350_v50 }
 0x4ba   : > { %7351 = vpow2.f32 %v6267_v16  ;;  %vm6666_vm3 = vmor %vm6664_vm5, %vm6665_vm7  ;;  %v6684_v53 = vand.u32 2147483648, %v6303_v30  ;;  %v6682_v22 = vand.u32 2147483647, %v6303_v30  ;;  %vm6678_vm0 = vweird.f32 %v6303_v30 }
 0x4bb   : > { %7353 = vrcp.f32 %v6303_v30  ;;  %v6653_v24 = vsel %vm6652_vm4, %v7346_v33, %v6649_v34  ;;  %v6661_v27 = vsub.f32 1.0, %v6660_v47  ;;  %v3243_v47 = vpop.f32.mrf.mxu1 }
 0x4bc   : > { %v6658_v17 = vsel %vm6655_vm1, %v6657_v60, %v6653_v24  ;;  %v6685_v59 = vor.u32 1.1754944e-38, %v6684_v53  ;;  %vm6683_vm15 = vcmp.eq.f32.partialorder %v6682_v22, 8.507059e+37  ;;  %v3455_v24 = vpop.f32.mrf.mxu2 }
 0x4bd   : > { %v6781_v5 = vmul.f32 %v6658_v17, %v13311_v18  ;;  %v6662_v7 = vmul.f32 %v7350_v50, %v6661_v27  ;;  %v4992_v27 = vpop.f32.mrf.mxu3  ;;  %v3456_v15 = vadd.f32 %v3455_v24, %v3243_v47 }
 0x4bf   : > { %6814 = vst.msk [vmem:[%s11825_s23 + $0xc0] sm:$0xff] %vm6789_vm6, %v6781_v5  ;;  %v6663_v52 = vadd.f32 %v7350_v50, %v6662_v7  ;;  %v5028_v7 = vadd.f32 %v4992_v27, %v3456_v15 }
 0x4c0   : > { %v7352_v43 = vpop.eup %7351 }
 0x4c1   : > { %v6101_v58 = vpop.f32.mrf.mxu0  ;;  %v7354_v13 = vpop.eup %7353  ;;  %v6304_v18 = vadd.f32 1.0, %v7352_v43  ;;  %v6667_v3 = vsel %vm6666_vm3, %v7350_v50, %v6663_v52 }
 0x4c2   : > { %v6141_v61 = vadd.f32 %v6101_v58, %v5026_v31  ;;  %v6674_v23 = vmul.f32 %v7354_v13, %v6303_v30  ;;  %v6672_v0 = vsel %vm6669_vm8, %v6671_v6, %v6667_v3  ;;  %vm6679_vm11 = vweird.f32 %v7354_v13 }
 0x4c3   : > { %7355 = vrcp.f32 %v6304_v18  ;;  %v6782_v62 = vmul.f32 %v6672_v0, %v13316_v1  ;;  %vm6680_vm14 = vmor %vm6678_vm0, %vm6679_vm11  ;;  %v6698_v48 = vand.u32 2147483648, %v6304_v18  ;;  %v6696_v32 = vand.u32 2147483647, %v6304_v18  ;;  %v3246_v37 = vpop.f32.mrf.mxu1 }
 0x4c4   : > { %v13337_v26 = vadd.f32 %v13262_v41, %v6141_v61  ;;  %v6675_v25 = vsub.f32 1.0, %v6674_v23  ;;  %vm6692_vm9 = vweird.f32 %v6304_v18  ;;  %v3458_v3 = vpop.f32.mrf.mxu2 }
 0x4c5   : > { %6815 = vst.msk [vmem:[%s11825_s23 + $0xc8] sm:$0xff] %vm6789_vm6, %v6782_v62  ;;  %v6699_v9 = vor.u32 1.1754944e-38, %v6698_v48  ;;  %vm6697_vm12 = vcmp.eq.f32.partialorder %v6696_v32, 8.507059e+37  ;;  %v4995_v23 = vpop.f32.mrf.mxu3 }
 0x4c6   : > { %v6209_v55 = vsub.f32 0.0, %v13337_v26  ;;  %v6676_v45 = vmul.f32 %v7354_v13, %v6675_v25 }
 0x4c8   : > { %v6269_v29 = vmul.f32 1.442695, %v6209_v55  ;;  %v6677_v12 = vadd.f32 %v7354_v13, %v6676_v45 }
 0x4c9   : > { %v6104_v46 = vpop.f32.mrf.mxu0  ;;  %v7356_v19 = vpop.eup %7355 }
 0x4ca   : > { %7357 = vpow2.f32 %v6269_v29  ;;  %v6142_v63 = vadd.f32 %v6104_v46, %v5027_v21  ;;  %v6681_v36 = vsel %vm6680_vm14, %v7354_v13, %v6677_v12  ;;  %v6688_v56 = vmul.f32 %v7356_v19, %v6304_v18 }
 0x4cb   : > { %v6686_v54 = vsel %vm6683_vm15, %v6685_v59, %v6681_v36  ;;  %vm6693_vm2 = vweird.f32 %v7356_v19  ;;  %v3459_v29 = vadd.f32 %v3458_v3, %v3246_v37 }
 0x4cc   : > { %v13346_v49 = vadd.f32 %v13262_v41, %v6142_v63  ;;  %v6783_v20 = vmul.f32 %v6686_v54, %v13322_v14  ;;  %v6689_v44 = vsub.f32 1.0, %v6688_v56  ;;  %vm6694_vm10 = vmor %vm6692_vm9, %vm6693_vm2 }
 0x4cd   : > { %v5029_v62 = vadd.f32 %v4995_v23, %v3459_v29 }
 0x4ce   : > { %v6210_v1 = vsub.f32 0.0, %v13346_v49  ;;  %6816 = vst.msk [vmem:[%s11825_s23 + $0xd0] sm:$0xff] %vm6789_vm6, %v6783_v20  ;;  %v6690_v35 = vmul.f32 %v7356_v19, %v6689_v44 }
 0x4d0   : > { %v7358_v10 = vpop.eup %7357  ;;  %v6271_v57 = vmul.f32 1.442695, %v6210_v1  ;;  %v6691_v28 = vadd.f32 %v7356_v19, %v6690_v35 }
 0x4d1   : > { %v6305_v33 = vadd.f32 1.0, %v7358_v10 }
 0x4d2   : > { %v6695_v40 = vsel %vm6694_vm10, %v7356_v19, %v6691_v28 }
 0x4d3   : > { %7359 = vrcp.f32 %v6305_v33  ;;  %v6700_v38 = vsel %vm6697_vm12, %v6699_v9, %v6695_v40  ;;  %v6712_v30 = vand.u32 2147483648, %v6305_v33  ;;  %v6710_v34 = vand.u32 2147483647, %v6305_v33 }
 0x4d4   : > { %7361 = vpow2.f32 %v6271_v57  ;;  %v6784_v14 = vmul.f32 %v6700_v38, %v13330_v39  ;;  %vm6706_vm4 = vweird.f32 %v6305_v33 }
 0x4d5   : > { %v6713_v61 = vor.u32 1.1754944e-38, %v6712_v30  ;;  %vm6711_vm7 = vcmp.eq.f32.partialorder %v6710_v34, 8.507059e+37 }
 0x4d6   : > { %6817 = vst.msk [vmem:[%s11825_s23 + $0xd8] sm:$0xff] %vm6789_vm6, %v6784_v14 }
 0x4d9   : > { %v7360_v2 = vpop.eup %7359 }
 0x4da   : > { %v7362_v8 = vpop.eup %7361  ;;  %v6702_v16 = vmul.f32 %v7360_v2, %v6305_v33  ;;  %vm6707_vm13 = vweird.f32 %v7360_v2 }
 0x4db   : > { %v6306_v50 = vadd.f32 1.0, %v7362_v8  ;;  %vm6708_vm1 = vmor %vm6706_vm4, %vm6707_vm13 }
 0x4dc   : > { %v6703_v31 = vsub.f32 1.0, %v6702_v16 }
 0x4dd   : > { %7363 = vrcp.f32 %v6306_v50  ;;  %v6726_v51 = vand.u32 2147483648, %v6306_v50  ;;  %v6724_v55 = vand.u32 2147483647, %v6306_v50  ;;  %vm6720_vm3 = vweird.f32 %v6306_v50 }
 0x4de   : > { %v6704_v58 = vmul.f32 %v7360_v2, %v6703_v31 }
 0x4df   : > { %vm6725_vm11 = vcmp.eq.f32.partialorder %v6724_v55, 8.507059e+37 }
 0x4e0   : > { %v6705_v60 = vadd.f32 %v7360_v2, %v6704_v58 }
 0x4e2   : > { %v6709_v17 = vsel %vm6708_vm1, %v7360_v2, %v6705_v60 }
 0x4e3   : > { %v7364_v39 = vpop.eup %7363  ;;  %v6714_v42 = vsel %vm6711_vm7, %v6713_v61, %v6709_v17 }
 0x4e4   : > { %v6785_v11 = vmul.f32 %v6714_v42, %v13337_v26  ;;  %v6716_v5 = vmul.f32 %v7364_v39, %v6306_v50  ;;  %vm6721_vm5 = vweird.f32 %v7364_v39  ;;  %v6727_v26 = vor.u32 1.1754944e-38, %v6726_v51 }
 0x4e5   : > { %vm6722_vm8 = vmor %vm6720_vm3, %vm6721_vm5 }
 0x4e6   : > { %6818 = vst.msk [vmem:[%s11825_s23 + $0xe0] sm:$0xff] %vm6789_vm6, %v6785_v11  ;;  %v6717_v43 = vsub.f32 1.0, %v6716_v5 }
 0x4e8   : > { %v6718_v4 = vmul.f32 %v7364_v39, %v6717_v43 }
 0x4ea   : > { %v6107_v52 = vpop.f32.mrf.mxu0  ;;  %v6719_v6 = vadd.f32 %v7364_v39, %v6718_v4 }
 0x4eb   : > { %v6143_v13 = vadd.f32 %v6107_v52, %v5028_v7 }
 0x4ec   : > { %v6723_v46 = vsel %vm6722_vm8, %v7364_v39, %v6719_v6 }
 0x4ed   : > { %v6179_v18 = vadd.f32 %v13262_v41, %v6143_v13  ;;  %v6728_v21 = vsel %vm6725_vm11, %v6727_v26, %v6723_v46 }
 0x4ee   : > { %v6786_v25 = vmul.f32 %v6728_v21, %v13346_v49 }
 0x4ef   : > { %v6211_v0 = vsub.f32 0.0, %v6179_v18 }
 0x4f0   : > { %6819 = vst.msk [vmem:[%s11825_s23 + $0xe8] sm:$0xff] %vm6789_vm6, %v6786_v25 }
 0x4f1   : > { %v6273_v53 = vmul.f32 1.442695, %v6211_v0 }
 0x4f2   : > { %v6110_v63 = vpop.f32.mrf.mxu0 }
 0x4f3   : > { %7365 = vpow2.f32 %v6273_v53  ;;  %v6144_v45 = vadd.f32 %v6110_v63, %v5029_v62 }
 0x4f5   : > { %v6180_v22 = vadd.f32 %v13262_v41, %v6144_v45 }
 0x4f7   : > { %v6212_v12 = vsub.f32 0.0, %v6180_v22 }
 0x4f9   : > { %v7366_v19 = vpop.eup %7365  ;;  %v6275_v59 = vmul.f32 1.442695, %v6212_v12 }
 0x4fa   : > { %v6307_v1 = vadd.f32 1.0, %v7366_v19 }
 0x4fb   : > { %7367 = vpow2.f32 %v6275_v59 }
 0x4fc   : > { %7369 = vrcp.f32 %v6307_v1  ;;  %v6740_v33 = vand.u32 2147483648, %v6307_v1  ;;  %v6738_v20 = vand.u32 2147483647, %v6307_v1  ;;  %vm6734_vm14 = vweird.f32 %v6307_v1 }
 0x4fe   : > { %v6741_v48 = vor.u32 1.1754944e-38, %v6740_v33  ;;  %vm6739_vm2 = vcmp.eq.f32.partialorder %v6738_v20, 8.507059e+37 }
 0x501   : > { %v7368_v10 = vpop.eup %7367 }
 0x502   : > { %v7370_v36 = vpop.eup %7369  ;;  %v6308_v56 = vadd.f32 1.0, %v7368_v10 }
 0x503   : > { %v6730_v54 = vmul.f32 %v7370_v36, %v6307_v1  ;;  %vm6735_vm0 = vweird.f32 %v7370_v36 }
 0x504   : > { %7371 = vrcp.f32 %v6308_v56  ;;  %vm6736_vm15 = vmor %vm6734_vm14, %vm6735_vm0  ;;  %v6754_v2 = vand.u32 2147483648, %v6308_v56  ;;  %v6752_v8 = vand.u32 2147483647, %v6308_v56  ;;  %vm6748_vm10 = vweird.f32 %v6308_v56 }
 0x505   : > { %v6731_v49 = vsub.f32 1.0, %v6730_v54 }
 0x506   : > { %v6755_v16 = vor.u32 1.1754944e-38, %v6754_v2  ;;  %vm6753_vm13 = vcmp.eq.f32.partialorder %v6752_v8, 8.507059e+37 }
 0x507   : > { %v6732_v57 = vmul.f32 %v7370_v36, %v6731_v49 }
 0x509   : > { %v6733_v44 = vadd.f32 %v7370_v36, %v6732_v57 }
 0x50a   : > { %v7372_v41 = vpop.eup %7371 }
 0x50b   : > { %v6737_v35 = vsel %vm6736_vm15, %v7370_v36, %v6733_v44  ;;  %v6744_v32 = vmul.f32 %v7372_v41, %v6308_v56  ;;  %vm6749_vm9 = vweird.f32 %v7372_v41 }
 0x50c   : > { %v6742_v28 = vsel %vm6739_vm2, %v6741_v48, %v6737_v35  ;;  %vm6750_vm12 = vmor %vm6748_vm10, %vm6749_vm9 }
 0x50d   : > { %v6787_v9 = vmul.f32 %v6742_v28, %v6179_v18  ;;  %v6745_v40 = vsub.f32 1.0, %v6744_v32 }
 0x50f   : > { %6820 = vst.msk [vmem:[%s11825_s23 + $0xf0] sm:$0xff] %vm6789_vm6, %v6787_v9  ;;  %v6746_v38 = vmul.f32 %v7372_v41, %v6745_v40 }
 0x511   : > { %v6747_v14 = vadd.f32 %v7372_v41, %v6746_v38 }
 0x513   : > { %v6751_v50 = vsel %vm6750_vm12, %v7372_v41, %v6747_v14 }
 0x514   : > { %v6756_v31 = vsel %vm6753_vm13, %v6755_v16, %v6751_v50 }
 0x515   : > { %v6788_v30 = vmul.f32 %v6756_v31, %v6180_v22 }
 0x517   : > { %6821 = vst.msk [vmem:[%s11825_s23 + $0xf8] sm:$0xff] %vm6789_vm6, %v6788_v30 }
 0x518 PF: > { %s15_s20 = sadd.s32 1, %s7416_s20   ;;  %s14414_s18 = smov %s7412_s19 }
 0x519   : > { %p12_p5 = scmp.ge.s32.totalorder %s15_s20, 4   ;;  %s14415_s19 = smov %s14417_s21 }
 0x51b   :  { %14 = sbr.rel (!%p12_p5) target bundleno = 2 (0x2), region = 71 }

</bundles_post_ra>
